<compile_context>
chip_gen: v5e
topology: v5e:2x2
jax: 0.10.0
libtpu: 0.0.40
codegen_flags: <defaults>
</compile_context>

<pallas_src>
import functools
import math

import jax
import jax.numpy as jnp
from jax.experimental import pallas as pl
from jax.experimental.pallas import tpu as pltpu


VMEM_LIMIT_BYTES = 48 * 1024 * 1024   # safe on v7x (64 MiB physical), above v6e default


# ----------------------------------------------------------------------------
# small helpers
# ----------------------------------------------------------------------------
def _round_up(x, m):
    return (x + m - 1) // m * m


def _pick_tile(dim, max_tile):
    """Return (tile, padded_dim). Full dim if small (exempt from 8/128 rule),
    otherwise an aligned tile (max_tile is a multiple of 8 and 128)."""
    if dim <= max_tile:
        return dim, dim
    return max_tile, _round_up(dim, max_tile)


# ----------------------------------------------------------------------------
# Pallas kernels
# ----------------------------------------------------------------------------
def _linear_kernel(x_ref, w_ref, b_ref, o_ref, acc_ref, *, activation):
    """Tiled matmul: bf16 operands, f32 VMEM accumulator, fused bias (+ReLU)."""
    k = pl.program_id(2)

    @pl.when(k == 0)
    def _():
        acc_ref[...] = jnp.zeros_like(acc_ref)

    acc_ref[...] += jnp.dot(
        x_ref[...], w_ref[...], preferred_element_type=jnp.float32)

    @pl.when(k == pl.num_programs(2) - 1)
    def _():
        y = acc_ref[...] + b_ref[...]          # f32 epilogue (v5e-friendly)
        if activation == "relu":
            y = jnp.maximum(y, 0.0)
        o_ref[...] = y.astype(o_ref.dtype)


def _linear_ln_kernel(x_ref, w_ref, b_ref, r_ref, g_ref, beta_ref, o_ref, acc_ref):
    """Tiled matmul with fused bias + residual-add + LayerNorm epilogue.
    Requires the full output row (tn == N) in one tile."""
    k = pl.program_id(1)

    @pl.when(k == 0)
    def _():
        acc_ref[...] = jnp.zeros_like(acc_ref)

    acc_ref[...] += jnp.dot(
        x_ref[...], w_ref[...], preferred_element_type=jnp.float32)

    @pl.when(k == pl.num_programs(1) - 1)
    def _():
        y = acc_ref[...] + b_ref[...] + r_ref[...].astype(jnp.float32)
        mean = jnp.mean(y, axis=-1, keepdims=True)
        c = y - mean
        var = jnp.mean(c * c, axis=-1, keepdims=True)
        o_ref[...] = (c * jax.lax.rsqrt(var + 1e-5) * g_ref[...]
                      + beta_ref[...]).astype(o_ref.dtype)


def _flash_attn_kernel(q_ref, kv_ref, kp_ref, o_ref, m_ref, l_ref, acc_ref, *,
                       n_heads, q_off, k_off, v_off, causal):
    """Flash-style attention.  grid = (B, Tq tiles, Tk tiles).
    q_ref : (1, tq, Lq) bf16 slab (Q lives at lanes [q_off, q_off+H))
    kv_ref: (1, tk, Lkv) bf16 slab (K at k_off, V at v_off)
    kp_ref: (1, 1, tk) f32 key-pad mask (>0 means valid key)
    scratch: m/l (n_heads, tq, 1) f32, acc (n_heads, tq, d) f32."""
    ki = pl.program_id(2)
    tq = q_ref.shape[1]
    tk = kv_ref.shape[1]
    d = acc_ref.shape[-1]

    @pl.when(ki == 0)
    def _():
        m_ref[...] = jnp.full_like(m_ref, -jnp.inf)
        l_ref[...] = jnp.zeros_like(l_ref)
        acc_ref[...] = jnp.zeros_like(acc_ref)

    q = q_ref[0]                               # (tq, Lq) bf16
    kv = kv_ref[0]                             # (tk, Lkv) bf16
    valid = kp_ref[0] > 0.0                    # (1, tk) bool
    if causal:
        row = (pl.program_id(1) * tq
               + jax.lax.broadcasted_iota(jnp.int32, (tq, tk), 0))
        col = ki * tk + jax.lax.broadcasted_iota(jnp.int32, (tq, tk), 1)
        mask = jnp.logical_and(jnp.broadcast_to(valid, (tq, tk)), row >= col)
    else:
        mask = jnp.broadcast_to(valid, (tq, tk))

    for h in range(n_heads):                   # static unroll over heads
        qh = q[:, q_off + h * d:q_off + (h + 1) * d]
        kh = kv[:, k_off + h * d:k_off + (h + 1) * d]
        vh = kv[:, v_off + h * d:v_off + (h + 1) * d]
        # Q @ K^T without materializing a transpose (1/sqrt(d) folded into Q).
        s = jax.lax.dot_general(qh, kh, (((1,), (1,)), ((), ())),
                                preferred_element_type=jnp.float32)
        s = jnp.where(mask, s, jnp.float32(-1e10))
        m_prev = m_ref[h]                      # (tq, 1)
        m_new = jnp.maximum(m_prev, jnp.max(s, axis=-1, keepdims=True))
        alpha = jnp.exp(m_prev - m_new)
        p = jnp.exp(s - m_new)
        l_ref[h] = alpha * l_ref[h] + jnp.sum(p, axis=-1, keepdims=True)
        acc_ref[h] = alpha * acc_ref[h] + jnp.dot(
            p.astype(kv.dtype), vh, preferred_element_type=jnp.float32)
        m_ref[h] = m_new

    @pl.when(ki == pl.num_programs(2) - 1)
    def _():
        outs = []
        for h in range(n_heads):
            inv = pl.reciprocal(l_ref[h], approx=True)   # (tq, 1)
            outs.append(acc_ref[h] * inv)
        # single lane-dense (tq, H) store (head-merge only once per q block)
        o_ref[0] = jnp.concatenate(outs, axis=-1).astype(o_ref.dtype)


def _attn_probs_kernel(q_ref, kv_ref, kp_ref, o_ref, a_ref, *,
                       n_heads, q_off, k_off, v_off):
    """Attention that also emits probabilities (last decoder cross-attention
    only).  grid = (B, Tq tiles), full Tk per block, exact softmax divide."""
    q = q_ref[0]                               # (tq, Lq)
    kv = kv_ref[0]                             # (Tk, Lkv)
    tq = q.shape[0]
    Tk = kv.shape[0]
    H = o_ref.shape[-1]
    d = H // n_heads
    valid = kp_ref[0] > 0.0                    # (1, Tk)
    mask = jnp.broadcast_to(valid, (tq, Tk))

    outs = []
    for h in range(n_heads):
        qh = q[:, q_off + h * d:q_off + (h + 1) * d]
        kh = kv[:, k_off + h * d:k_off + (h + 1) * d]
        vh = kv[:, v_off + h * d:v_off + (h + 1) * d]
        s = jax.lax.dot_general(qh, kh, (((1,), (1,)), ((), ())),
                                preferred_element_type=jnp.float32)
        s = jnp.where(mask, s, jnp.float32(-1e10))
        mx = jnp.max(s, axis=-1, keepdims=True)
        p = jnp.exp(s - mx)
        denom = jnp.sum(p, axis=-1, keepdims=True)
        attn = p / denom                       # exact divide on the prob path
        a_ref[0, h] = attn.astype(a_ref.dtype)
        outs.append(jnp.dot(attn.astype(kv.dtype), vh,
                            preferred_element_type=jnp.float32))
    o_ref[0] = jnp.concatenate(outs, axis=-1).astype(o_ref.dtype)


# ----------------------------------------------------------------------------
# Pallas wrappers
# ----------------------------------------------------------------------------
def linear(x, w, b, activation=None, residual=None, ln_g=None, ln_b=None,
           out_dtype=jnp.bfloat16):
    """x: (..., K) @ w: (K, N) + b.  bf16 MXU operands, f32 accumulation.
    If `residual` is given, fuses (y + residual) -> LayerNorm(ln_g, ln_b) into
    the epilogue (requires N == residual feature dim; output row in one tile)."""
    lead = x.shape[:-1]
    K = x.shape[-1]
    N = w.shape[1]
    x2 = x.reshape(-1, K)
    M = x2.shape[0]
    xb = x2.astype(jnp.bfloat16)
    wb = w.astype(jnp.bfloat16)
    bb = b.reshape(1, N).astype(jnp.float32)

    if residual is not None:
        assert residual.shape[-1] == N
        tm, Mp = _pick_tile(M, 256)
        tk, Kp = _pick_tile(K, 512)
        r2 = residual.reshape(-1, N).astype(jnp.bfloat16)
        if Mp != M or Kp != K:
            xb = jnp.pad(xb, ((0, Mp - M), (0, Kp - K)))
        if Kp != K:
            wb = jnp.pad(wb, ((0, Kp - K), (0, 0)))
        if Mp != M:
            r2 = jnp.pad(r2, ((0, Mp - M), (0, 0)))
        gg = ln_g.reshape(1, N).astype(jnp.float32)
        bg = ln_b.reshape(1, N).astype(jnp.float32)
        out = pl.pallas_call(
            _linear_ln_kernel,
            grid_spec=pltpu.PrefetchScalarGridSpec(
                num_scalar_prefetch=0,
                grid=(Mp // tm, Kp // tk),
                in_specs=[
                    pl.BlockSpec((tm, tk), lambda i, k: (i, k)),
                    pl.BlockSpec((tk, N), lambda i, k: (k, 0)),
                    pl.BlockSpec((1, N), lambda i, k: (0, 0)),
                    pl.BlockSpec((tm, N), lambda i, k: (i, 0)),
                    pl.BlockSpec((1, N), lambda i, k: (0, 0)),
                    pl.BlockSpec((1, N), lambda i, k: (0, 0)),
                ],
                out_specs=pl.BlockSpec((tm, N), lambda i, k: (i, 0)),
                scratch_shapes=[pltpu.VMEM((tm, N), jnp.float32)],
            ),
            out_shape=jax.ShapeDtypeStruct((Mp, N), jnp.bfloat16),
            compiler_params=pltpu.CompilerParams(
                dimension_semantics=("parallel", "arbitrary"),
                vmem_limit_bytes=VMEM_LIMIT_BYTES),
        )(xb, wb, bb, r2, gg, bg)
        if Mp != M:
            out = out[:M]
        return out.reshape(*lead, N)

    # Plain path: large tiles (review: ~85% HBM roofline at 512-wide tiles).
    tm, Mp = _pick_tile(M, 512)
    tn, Np = _pick_tile(N, 512)
    tk, Kp = _pick_tile(K, 1024)
    if Mp != M or Kp != K:
        xb = jnp.pad(xb, ((0, Mp - M), (0, Kp - K)))
    if Kp != K or Np != N:
        wb = jnp.pad(wb, ((0, Kp - K), (0, Np - N)))
    if Np != N:
        bb = jnp.pad(bb, ((0, 0), (0, Np - N)))

    out = pl.pallas_call(
        functools.partial(_linear_kernel, activation=activation),
        grid_spec=pltpu.PrefetchScalarGridSpec(
            num_scalar_prefetch=0,
            grid=(Mp // tm, Np // tn, Kp // tk),
            in_specs=[
                pl.BlockSpec((tm, tk), lambda i, j, k: (i, k)),
                pl.BlockSpec((tk, tn), lambda i, j, k: (k, j)),
                pl.BlockSpec((1, tn), lambda i, j, k: (0, j)),
            ],
            out_specs=pl.BlockSpec((tm, tn), lambda i, j, k: (i, j)),
            scratch_shapes=[pltpu.VMEM((tm, tn), jnp.float32)],
        ),
        out_shape=jax.ShapeDtypeStruct((Mp, Np), out_dtype),
        compiler_params=pltpu.CompilerParams(
            dimension_semantics=("parallel", "parallel", "arbitrary"),
            vmem_limit_bytes=VMEM_LIMIT_BYTES),
    )(xb, wb, bb)
    if (Mp, Np) != (M, N):
        out = out[:M, :N]
    return out.reshape(*lead, N)


def scaled_dot_product_attention(q_slab, kv_slab, key_pad, n_heads, H,
                                 q_off, k_off, v_off, causal=False,
                                 return_attn=False):
    """q_slab: (B,Tq,Lq) bf16 (Q at lanes [q_off,q_off+H)); kv_slab: (B,Tk,Lkv)
    bf16 (K at k_off, V at v_off); key_pad: (B,1,Tk) f32 (>0 => valid key).
    Returns (ctx (B,Tq,H) bf16, attn (B,n_heads,Tq,Tk) bf16 or None)."""
    B, Tq, Lq = q_slab.shape
    _, Tk, Lkv = kv_slab.shape
    d = H // n_heads

    if return_attn:
        tq, Tqp = _pick_tile(Tq, 128)
        qp = q_slab if Tqp == Tq else jnp.pad(
            q_slab, ((0, 0), (0, Tqp - Tq), (0, 0)))
        ctx, attn = pl.pallas_call(
            functools.partial(_attn_probs_kernel, n_heads=n_heads,
                              q_off=q_off, k_off=k_off, v_off=v_off),
            grid=(B, Tqp // tq),
            in_specs=[
                pl.BlockSpec((1, tq, Lq), lambda b, qi: (b, qi, 0)),
                pl.BlockSpec((1, Tk, Lkv), lambda b, qi: (b, 0, 0)),
                pl.BlockSpec((1, 1, Tk), lambda b, qi: (b, 0, 0)),
            ],
            out_specs=[
                pl.BlockSpec((1, tq, H), lambda b, qi: (b, qi, 0)),
                pl.BlockSpec((1, n_heads, tq, Tk), lambda b, qi: (b, 0, qi, 0)),
            ],
            out_shape=[
                jax.ShapeDtypeStruct((B, Tqp, H), jnp.bfloat16),
                jax.ShapeDtypeStruct((B, n_heads, Tqp, Tk), jnp.bfloat16),
            ],
            compiler_params=pltpu.CompilerParams(
                dimension_semantics=("parallel", "parallel"),
                vmem_limit_bytes=VMEM_LIMIT_BYTES),
        )(qp, kv_slab, key_pad)
        if Tqp != Tq:
            ctx = ctx[:, :Tq]
            attn = attn[:, :, :Tq]
        return ctx, attn

    tq, Tqp = _pick_tile(Tq, 256)
    tk, Tkp = _pick_tile(Tk, 512)
    qp = q_slab if Tqp == Tq else jnp.pad(
        q_slab, ((0, 0), (0, Tqp - Tq), (0, 0)))
    if (q_slab is kv_slab) and Tqp == Tkp:
        kvp = qp
    else:
        kvp = kv_slab if Tkp == Tk else jnp.pad(
            kv_slab, ((0, 0), (0, Tkp - Tk), (0, 0)))
    kp = key_pad if Tkp == Tk else jnp.pad(
        key_pad, ((0, 0), (0, 0), (0, Tkp - Tk)))   # padded keys -> invalid

    ctx = pl.pallas_call(
        functools.partial(_flash_attn_kernel, n_heads=n_heads, q_off=q_off,
                          k_off=k_off, v_off=v_off, causal=causal),
        grid_spec=pltpu.PrefetchScalarGridSpec(
            num_scalar_prefetch=0,
            grid=(B, Tqp // tq, Tkp // tk),
            in_specs=[
                pl.BlockSpec((1, tq, Lq), lambda b, qi, ki: (b, qi, 0)),
                pl.BlockSpec((1, tk, Lkv), lambda b, qi, ki: (b, ki, 0)),
                pl.BlockSpec((1, 1, tk), lambda b, qi, ki: (b, 0, ki)),
            ],
            out_specs=pl.BlockSpec((1, tq, H), lambda b, qi, ki: (b, qi, 0)),
            scratch_shapes=[
                pltpu.VMEM((n_heads, tq, 1), jnp.float32),   # running max
                pltpu.VMEM((n_heads, tq, 1), jnp.float32),   # running sum
                pltpu.VMEM((n_heads, tq, d), jnp.float32),   # running context
            ],
        ),
        out_shape=jax.ShapeDtypeStruct((B, Tqp, H), jnp.bfloat16),
        compiler_params=pltpu.CompilerParams(
            dimension_semantics=("parallel", "parallel", "arbitrary"),
            vmem_limit_bytes=VMEM_LIMIT_BYTES),
    )(qp, kvp, kp)
    if Tqp != Tq:
        ctx = ctx[:, :Tq]
    return ctx, None


# ----------------------------------------------------------------------------
# Transformer building blocks (parameters as nested dicts)
# ----------------------------------------------------------------------------
def encoder_layer(p, src, src_key_pad, n_heads):
    H = src.shape[-1]
    sa = p["self_attn"]
    qkv = linear(src, sa["w_qkv"], sa["b_qkv"])                  # (B,S,3H) bf16
    ctx, _ = scaled_dot_product_attention(
        qkv, qkv, src_key_pad, n_heads, H, q_off=0, k_off=H, v_off=2 * H,
        causal=False, return_attn=False)
    src = linear(ctx, sa["wo"], sa["bo"],
                 residual=src, ln_g=p["ln1_g"], ln_b=p["ln1_b"])
    h = linear(src, p["ffn"]["w1"], p["ffn"]["b1"], activation="relu")
    src = linear(h, p["ffn"]["w2"], p["ffn"]["b2"],
                 residual=src, ln_g=p["ln2_g"], ln_b=p["ln2_b"])
    return src


def decoder_layer(p, trg, enc_src, trg_key_pad, src_key_pad, n_heads, need_attn):
    H = trg.shape[-1]
    sa = p["self_attn"]
    qkv = linear(trg, sa["w_qkv"], sa["b_qkv"])                  # (B,T,3H) bf16
    ctx, _ = scaled_dot_product_attention(
        qkv, qkv, trg_key_pad, n_heads, H, q_off=0, k_off=H, v_off=2 * H,
        causal=True, return_attn=False)
    trg = linear(ctx, sa["wo"], sa["bo"],
                 residual=trg, ln_g=p["ln1_g"], ln_b=p["ln1_b"])

    ca = p["cross_attn"]
    qs = linear(trg, ca["w_q"], ca["b_q"])                       # (B,T,H)
    kv = linear(enc_src, ca["w_kv"], ca["b_kv"])                 # (B,S,2H)
    ctx2, attn = scaled_dot_product_attention(
        qs, kv, src_key_pad, n_heads, H, q_off=0, k_off=0, v_off=H,
        causal=False, return_attn=need_attn)
    trg = linear(ctx2, ca["wo"], ca["bo"],
                 residual=trg, ln_g=p["ln2_g"], ln_b=p["ln2_b"])

    h = linear(trg, p["ffn"]["w1"], p["ffn"]["b1"], activation="relu")
    trg = linear(h, p["ffn"]["w2"], p["ffn"]["b2"],
                 residual=trg, ln_g=p["ln3_g"], ln_b=p["ln3_b"])
    return trg, attn


def encoder_forward(p, src, src_key_pad, n_heads, hid_dim):
    B, S = src.shape
    scale = jnp.sqrt(jnp.float32(hid_dim))
    pos = jnp.broadcast_to(jnp.arange(S)[None, :], (B, S))
    x = (jnp.take(p["tok_emb"], src, axis=0) * scale
         + jnp.take(p["pos_emb"], pos, axis=0)).astype(jnp.bfloat16)
    for layer_p in p["layers"]:
        x = encoder_layer(layer_p, x, src_key_pad, n_heads)
    return x


def decoder_forward(p, trg, enc_src, trg_key_pad, src_key_pad, n_heads, hid_dim):
    B, T = trg.shape
    scale = jnp.sqrt(jnp.float32(hid_dim))
    pos = jnp.broadcast_to(jnp.arange(T)[None, :], (B, T))
    x = (jnp.take(p["tok_emb"], trg, axis=0) * scale
         + jnp.take(p["pos_emb"], pos, axis=0)).astype(jnp.bfloat16)
    n_layers = len(p["layers"])
    attention = None
    for li, layer_p in enumerate(p["layers"]):
        need_attn = (li == n_layers - 1)   # only the returned attention is kept
        x, attn = decoder_layer(layer_p, x, enc_src, trg_key_pad, src_key_pad,
                                n_heads, need_attn)
        if attn is not None:
            attention = attn
    output = linear(x, p["fc_out_w"], p["fc_out_b"], out_dtype=jnp.float32)
    return output, attention


# ----- masks (exact semantics of the PyTorch module) -------------------------
def make_key_pad(tokens, pad_idx):
    # (B, T) -> (B, 1, T) f32: 1.0 where the *key* token is not padding.
    # The causal component of the target mask is built inside the kernel.
    return (tokens != pad_idx).astype(jnp.float32)[:, None, :]


def transformer_forward(params, source, target, source_pad_idx, target_pad_idx,
                        n_heads, hid_dim):
    src_key_pad = make_key_pad(source, source_pad_idx)   # (B,1,S)
    trg_key_pad = make_key_pad(target, target_pad_idx)   # (B,1,T)
    encoded_source = encoder_forward(
        params["encoder"], source, src_key_pad, n_heads, hid_dim)
    output, attention = decoder_forward(
        params["decoder"], target, encoded_source, trg_key_pad, src_key_pad,
        n_heads, hid_dim)
    return output, attention


# ----------------------------------------------------------------------------
# Deterministic parameter init (matmul weights stored bf16; 1/sqrt(d) folded
# into the Q projection so the kernel never rescales Q at runtime)
# ----------------------------------------------------------------------------
def _w(key, shape, scale=0.02):
    return jax.random.normal(key, shape, jnp.float32) * scale


def init_self_attn(key, hid, n_heads):
    d = hid // n_heads
    qscale = 1.0 / math.sqrt(float(d))
    ks = jax.random.split(key, 4)
    wq = _w(ks[0], (hid, hid)) * qscale
    wk = _w(ks[1], (hid, hid))
    wv = _w(ks[2], (hid, hid))
    return {
        "w_qkv": jnp.concatenate([wq, wk, wv], axis=1).astype(jnp.bfloat16),
        "b_qkv": jnp.zeros((3 * hid,), jnp.float32),
        "wo": _w(ks[3], (hid, hid)).astype(jnp.bfloat16),
        "bo": jnp.zeros((hid,), jnp.float32),
    }


def init_cross_attn(key, hid, n_heads):
    d = hid // n_heads
    qscale = 1.0 / math.sqrt(float(d))
    ks = jax.random.split(key, 4)
    return {
        "w_q": (_w(ks[0], (hid, hid)) * qscale).astype(jnp.bfloat16),
        "b_q": jnp.zeros((hid,), jnp.float32),
        "w_kv": jnp.concatenate([_w(ks[1], (hid, hid)), _w(ks[2], (hid, hid))],
                                axis=1).astype(jnp.bfloat16),
        "b_kv": jnp.zeros((2 * hid,), jnp.float32),
        "wo": _w(ks[3], (hid, hid)).astype(jnp.bfloat16),
        "bo": jnp.zeros((hid,), jnp.float32),
    }


def init_ffn(key, hid, pf):
    k1, k2 = jax.random.split(key)
    return {
        "w1": _w(k1, (hid, pf)).astype(jnp.bfloat16),
        "b1": jnp.zeros((pf,), jnp.float32),
        "w2": _w(k2, (pf, hid)).astype(jnp.bfloat16),
        "b2": jnp.zeros((hid,), jnp.float32),
    }


def init_encoder_layer(key, hid, pf, n_heads):
    k1, k2 = jax.random.split(key)
    return {
        "self_attn": init_self_attn(k1, hid, n_heads),
        "ffn": init_ffn(k2, hid, pf),
        "ln1_g": jnp.ones((hid,), jnp.float32), "ln1_b": jnp.zeros((hid,), jnp.float32),
        "ln2_g": jnp.ones((hid,), jnp.float32), "ln2_b": jnp.zeros((hid,), jnp.float32),
    }


def init_decoder_layer(key, hid, pf, n_heads):
    k1, k2, k3 = jax.random.split(key, 3)
    return {
        "self_attn": init_self_attn(k1, hid, n_heads),
        "cross_attn": init_cross_attn(k2, hid, n_heads),
        "ffn": init_ffn(k3, hid, pf),
        "ln1_g": jnp.ones((hid,), jnp.float32), "ln1_b": jnp.zeros((hid,), jnp.float32),
        "ln2_g": jnp.ones((hid,), jnp.float32), "ln2_b": jnp.zeros((hid,), jnp.float32),
        "ln3_g": jnp.ones((hid,), jnp.float32), "ln3_b": jnp.zeros((hid,), jnp.float32),
    }


def init_transformer(key, src_vocab, trg_vocab, hid, pf, n_layers, n_heads, max_len):
    ks = jax.random.split(key, 6 + 2 * n_layers)
    enc_layers = [init_encoder_layer(ks[6 + i], hid, pf, n_heads)
                  for i in range(n_layers)]
    dec_layers = [init_decoder_layer(ks[6 + n_layers + i], hid, pf, n_heads)
                  for i in range(n_layers)]
    return {
        "encoder": {
            "tok_emb": _w(ks[0], (src_vocab, hid), 1.0),
            "pos_emb": _w(ks[1], (max_len, hid), 1.0),
            "layers": enc_layers,
        },
        "decoder": {
            "tok_emb": _w(ks[2], (trg_vocab, hid), 1.0),
            "pos_emb": _w(ks[3], (max_len, hid), 1.0),
            "layers": dec_layers,
            "fc_out_w": _w(ks[4], (hid, trg_vocab)).astype(jnp.bfloat16),
            "fc_out_b": jnp.zeros((trg_vocab,), jnp.float32),
        },
    }


# ----------------------------------------------------------------------------
if __name__ == "__main__":
    B, S, T = 2, 8, 8
    hid_dim = 32
    n_heads = 4
    pf_dim = 64
    n_layers = 2
    src_vocab = 16
    trg_vocab = 16
    max_len = 16
    source_pad_idx = 0
    target_pad_idx = 0

    key = jax.random.PRNGKey(0)
    k_src, k_trg, k_params = jax.random.split(key, 3)

    source = jax.random.randint(k_src, (B, S), 1, src_vocab, dtype=jnp.int32)
    source = source.at[0, -2:].set(source_pad_idx)   # some padding
    target = jax.random.randint(k_trg, (B, T), 1, trg_vocab, dtype=jnp.int32)
    target = target.at[1, -3:].set(target_pad_idx)   # some padding

    params = init_transformer(
        k_params, src_vocab, trg_vocab, hid_dim, pf_dim, n_layers, n_heads,
        max_len)

    fwd = jax.jit(
        functools.partial(
            transformer_forward,
            source_pad_idx=source_pad_idx,
            target_pad_idx=target_pad_idx,
            n_heads=n_heads,
            hid_dim=hid_dim,
        )
    )
    output, attention = fwd(params, source, target)
    jax.block_until_ready((output, attention))

    assert output.shape == (B, T, trg_vocab), output.shape
    assert attention.shape == (B, n_heads, T, S), attention.shape
    assert jnp.all(jnp.isfinite(output)) and jnp.all(jnp.isfinite(attention))
    print("KERNEL_OK")
</pallas_src>

<mosaic_0001>
module attributes {stable_mosaic.version = 11 : i64} {
  func.func @_linear_kernel(%arg0: i32, %arg1: i32, %arg2: i32, %arg3: memref<16x32xbf16, #tpu.memory_space<vmem>>, %arg4: memref<32x96xbf16, #tpu.memory_space<vmem>>, %arg5: memref<1x96xf32, #tpu.memory_space<vmem>>, %arg6: memref<16x96xbf16, #tpu.memory_space<vmem>>, %arg7: memref<16x96xf32, #tpu.memory_space<vmem>>) attributes {dimension_semantics = [#tpu.dimension_semantics<parallel>, #tpu.dimension_semantics<parallel>, #tpu.dimension_semantics<arbitrary>], iteration_bounds = array<i64: 1, 1, 1>, scalar_prefetch = 0 : i64, scratch_operands = 1 : i64, tpu.core_type = #tpu.core_type<tc>, window_params = [{transform_indices = @transform_0, window_bounds = array<i64: 16, 32>}, {transform_indices = @transform_1, window_bounds = array<i64: 32, 96>}, {transform_indices = @transform_2, window_bounds = array<i64: 1, 96>}, {transform_indices = @transform_3, window_bounds = array<i64: 16, 96>}]} {
    %c0_i32 = arith.constant 0 : i32
    %0 = arith.cmpi eq, %arg2, %c0_i32 : i32
    %1 = arith.extui %0 : i1 to i32
    %c0_i32_0 = arith.constant 0 : i32
    %2 = arith.cmpi ne, %1, %c0_i32_0 : i32
    scf.if %2 {
      %cst_10 = arith.constant 0.000000e+00 : f32
      %12 = vector.broadcast %cst_10 : f32 to vector<16x96xf32>
      %c0_11 = arith.constant 0 : index
      %c0_12 = arith.constant 0 : index
      %13 = vector.load %arg7[%c0_11, %c0_12] : memref<16x96xf32, #tpu.memory_space<vmem>>, vector<16x96xf32>
      tpu.vector_store %arg7[%c0_11, %c0_12], %12 {strides = array<i32>} : memref<16x96xf32, #tpu.memory_space<vmem>>, vector<16x96xf32>,
    } else {
    }
    %c0 = arith.constant 0 : index
    %c0_1 = arith.constant 0 : index
    %3 = vector.load %arg7[%c0, %c0_1] : memref<16x96xf32, #tpu.memory_space<vmem>>, vector<16x96xf32>
    %c0_2 = arith.constant 0 : index
    %c0_3 = arith.constant 0 : index
    %4 = vector.load %arg3[%c0_2, %c0_3] : memref<16x32xbf16, #tpu.memory_space<vmem>>, vector<16x32xbf16>
    %c0_4 = arith.constant 0 : index
    %c0_5 = arith.constant 0 : index
    %5 = vector.load %arg4[%c0_4, %c0_5] : memref<32x96xbf16, #tpu.memory_space<vmem>>, vector<32x96xbf16>
    %cst = arith.constant dense<0.000000e+00> : vector<16x96xf32>
    %6 = tpu.matmul %4, %5, %cst {dimension_numbers = #tpu.dot_dimension_numbers<[1], [0], [0], [1], [0, 0, 1, 1], [], []>} : vector<16x32xbf16>, vector<32x96xbf16>, vector<16x96xf32> -> vector<16x96xf32>
    %7 = arith.addf %3, %6 : vector<16x96xf32>
    %c0_6 = arith.constant 0 : index
    %c0_7 = arith.constant 0 : index
    %8 = vector.load %arg7[%c0_6, %c0_7] : memref<16x96xf32, #tpu.memory_space<vmem>>, vector<16x96xf32>
    tpu.vector_store %arg7[%c0_6, %c0_7], %7 {strides = array<i32>} : memref<16x96xf32, #tpu.memory_space<vmem>>, vector<16x96xf32>,
    %c0_i32_8 = arith.constant 0 : i32
    %9 = arith.cmpi eq, %arg2, %c0_i32_8 : i32
    %10 = arith.extui %9 : i1 to i32
    %c0_i32_9 = arith.constant 0 : i32
    %11 = arith.cmpi ne, %10, %c0_i32_9 : i32
    scf.if %11 {
      %c0_10 = arith.constant 0 : index
      %c0_11 = arith.constant 0 : index
      %12 = vector.load %arg7[%c0_10, %c0_11] : memref<16x96xf32, #tpu.memory_space<vmem>>, vector<16x96xf32>
      %c0_12 = arith.constant 0 : index
      %c0_13 = arith.constant 0 : index
      %13 = vector.load %arg5[%c0_12, %c0_13] : memref<1x96xf32, #tpu.memory_space<vmem>>, vector<1x96xf32>
      %14 = vector.broadcast %13 : vector<1x96xf32> to vector<16x96xf32>
      %15 = arith.addf %12, %14 : vector<16x96xf32>
      %16 = arith.truncf %15 : vector<16x96xf32> to vector<16x96xbf16>
      %c0_14 = arith.constant 0 : index
      %c0_15 = arith.constant 0 : index
      %17 = vector.load %arg6[%c0_14, %c0_15] : memref<16x96xbf16, #tpu.memory_space<vmem>>, vector<16x96xbf16>
      tpu.vector_store %arg6[%c0_14, %c0_15], %16 {strides = array<i32>} : memref<16x96xbf16, #tpu.memory_space<vmem>>, vector<16x96xbf16>,
    } else {
    }
    return
  }
  func.func @transform_0(%arg0: i32, %arg1: i32, %arg2: i32) -> (i32, i32) {
    %c0_i32 = arith.constant 0 : i32
    return %arg0, %arg2 : i32, i32
  }
  func.func @transform_1(%arg0: i32, %arg1: i32, %arg2: i32) -> (i32, i32) {
    %c0_i32 = arith.constant 0 : i32
    return %arg2, %arg1 : i32, i32
  }
  func.func @transform_2(%arg0: i32, %arg1: i32, %arg2: i32) -> (i32, i32) {
    %c0_i32 = arith.constant 0 : i32
    %c0_i32_0 = arith.constant 0 : i32
    return %c0_i32, %arg1 : i32, i32
  }
  func.func @transform_3(%arg0: i32, %arg1: i32, %arg2: i32) -> (i32, i32) {
    %c0_i32 = arith.constant 0 : i32
    return %arg0, %arg1 : i32, i32
  }
}

module attributes {stable_mosaic.version = 11 : i64} {
  func.func @_linear_ln_kernel(%arg0: i32, %arg1: i32, %arg2: memref<16x32xbf16, #tpu.memory_space<vmem>>, %arg3: memref<32x32xbf16, #tpu.memory_space<vmem>>, %arg4: memref<1x32xf32, #tpu.memory_space<vmem>>, %arg5: memref<16x32xbf16, #tpu.memory_space<vmem>>, %arg6: memref<1x32xf32, #tpu.memory_space<vmem>>, %arg7: memref<1x32xf32, #tpu.memory_space<vmem>>, %arg8: memref<16x32xbf16, #tpu.memory_space<vmem>>, %arg9: memref<16x32xf32, #tpu.memory_space<vmem>>) attributes {dimension_semantics = [#tpu.dimension_semantics<parallel>, #tpu.dimension_semantics<arbitrary>], iteration_bounds = array<i64: 1, 1>, scalar_prefetch = 0 : i64, scratch_operands = 1 : i64, tpu.core_type = #tpu.core_type<tc>, window_params = [{transform_indices = @transform_0, window_bounds = array<i64: 16, 32>}, {transform_indices = @transform_1, window_bounds = array<i64: 32, 32>}, {pipeline_mode = #tpu.pipeline_mode<synchronous>, transform_indices = @transform_2, window_bounds = array<i64: 1, 32>}, {transform_indices = @transform_3, window_bounds = array<i64: 16, 32>}, {pipeline_mode = #tpu.pipeline_mode<synchronous>, transform_indices = @transform_4, window_bounds = array<i64: 1, 32>}, {pipeline_mode = #tpu.pipeline_mode<synchronous>, transform_indices = @transform_5, window_bounds = array<i64: 1, 32>}, {transform_indices = @transform_6, window_bounds = array<i64: 16, 32>}]} {
    %c0_i32 = arith.constant 0 : i32
    %0 = arith.cmpi eq, %arg1, %c0_i32 : i32
    %1 = arith.extui %0 : i1 to i32
    %c0_i32_0 = arith.constant 0 : i32
    %2 = arith.cmpi ne, %1, %c0_i32_0 : i32
    scf.if %2 {
      %cst_10 = arith.constant 0.000000e+00 : f32
      %12 = vector.broadcast %cst_10 : f32 to vector<16x32xf32>
      %c0_11 = arith.constant 0 : index
      %c0_12 = arith.constant 0 : index
      %13 = vector.load %arg9[%c0_11, %c0_12] : memref<16x32xf32, #tpu.memory_space<vmem>>, vector<16x32xf32>
      tpu.vector_store %arg9[%c0_11, %c0_12], %12 {strides = array<i32>} : memref<16x32xf32, #tpu.memory_space<vmem>>, vector<16x32xf32>,
    } else {
    }
    %c0 = arith.constant 0 : index
    %c0_1 = arith.constant 0 : index
    %3 = vector.load %arg9[%c0, %c0_1] : memref<16x32xf32, #tpu.memory_space<vmem>>, vector<16x32xf32>
    %c0_2 = arith.constant 0 : index
    %c0_3 = arith.constant 0 : index
    %4 = vector.load %arg2[%c0_2, %c0_3] : memref<16x32xbf16, #tpu.memory_space<vmem>>, vector<16x32xbf16>
    %c0_4 = arith.constant 0 : index
    %c0_5 = arith.constant 0 : index
    %5 = vector.load %arg3[%c0_4, %c0_5] : memref<32x32xbf16, #tpu.memory_space<vmem>>, vector<32x32xbf16>
    %cst = arith.constant dense<0.000000e+00> : vector<16x32xf32>
    %6 = tpu.matmul %4, %5, %cst {dimension_numbers = #tpu.dot_dimension_numbers<[1], [0], [0], [1], [0, 0, 1, 1], [], []>} : vector<16x32xbf16>, vector<32x32xbf16>, vector<16x32xf32> -> vector<16x32xf32>
    %7 = arith.addf %3, %6 : vector<16x32xf32>
    %c0_6 = arith.constant 0 : index
    %c0_7 = arith.constant 0 : index
    %8 = vector.load %arg9[%c0_6, %c0_7] : memref<16x32xf32, #tpu.memory_space<vmem>>, vector<16x32xf32>
    tpu.vector_store %arg9[%c0_6, %c0_7], %7 {strides = array<i32>} : memref<16x32xf32, #tpu.memory_space<vmem>>, vector<16x32xf32>,
    %c0_i32_8 = arith.constant 0 : i32
    %9 = arith.cmpi eq, %arg1, %c0_i32_8 : i32
    %10 = arith.extui %9 : i1 to i32
    %c0_i32_9 = arith.constant 0 : i32
    %11 = arith.cmpi ne, %10, %c0_i32_9 : i32
    scf.if %11 {
      %c0_10 = arith.constant 0 : index
      %c0_11 = arith.constant 0 : index
      %12 = vector.load %arg9[%c0_10, %c0_11] : memref<16x32xf32, #tpu.memory_space<vmem>>, vector<16x32xf32>
      %c0_12 = arith.constant 0 : index
      %c0_13 = arith.constant 0 : index
      %13 = vector.load %arg4[%c0_12, %c0_13] : memref<1x32xf32, #tpu.memory_space<vmem>>, vector<1x32xf32>
      %14 = vector.broadcast %13 : vector<1x32xf32> to vector<16x32xf32>
      %15 = arith.addf %12, %14 : vector<16x32xf32>
      %c0_14 = arith.constant 0 : index
      %c0_15 = arith.constant 0 : index
      %16 = vector.load %arg5[%c0_14, %c0_15] : memref<16x32xbf16, #tpu.memory_space<vmem>>, vector<16x32xbf16>
      %17 = arith.extf %16 : vector<16x32xbf16> to vector<16x32xf32>
      %18 = arith.addf %15, %17 : vector<16x32xf32>
      %cst_16 = arith.constant dense<0.000000e+00> : vector<16xf32>
      %19 = vector.multi_reduction <add>, %18, %cst_16 [1] : vector<16x32xf32> to vector<16xf32>
      %20 = vector.shape_cast %19 : vector<16xf32> to vector<16x1xf32>
      %cst_17 = arith.constant 3.200000e+01 : f32
      %21 = vector.broadcast %cst_17 : f32 to vector<16x1xf32>
      %22 = arith.divf %20, %21 : vector<16x1xf32>
      %23 = vector.broadcast %22 : vector<16x1xf32> to vector<16x32xf32>
      %24 = arith.subf %18, %23 : vector<16x32xf32>
      %25 = arith.mulf %24, %24 : vector<16x32xf32>
      %cst_18 = arith.constant dense<0.000000e+00> : vector<16xf32>
      %26 = vector.multi_reduction <add>, %25, %cst_18 [1] : vector<16x32xf32> to vector<16xf32>
      %27 = vector.shape_cast %26 : vector<16xf32> to vector<16x1xf32>
      %cst_19 = arith.constant 3.200000e+01 : f32
      %28 = vector.broadcast %cst_19 : f32 to vector<16x1xf32>
      %29 = arith.divf %27, %28 : vector<16x1xf32>
      %cst_20 = arith.constant 9.99999974E-6 : f32
      %30 = vector.broadcast %cst_20 : f32 to vector<16x1xf32>
      %31 = arith.addf %29, %30 : vector<16x1xf32>
      %32 = math.rsqrt %31 : vector<16x1xf32>
      %33 = vector.broadcast %32 : vector<16x1xf32> to vector<16x32xf32>
      %34 = arith.mulf %24, %33 : vector<16x32xf32>
      %c0_21 = arith.constant 0 : index
      %c0_22 = arith.constant 0 : index
      %35 = vector.load %arg6[%c0_21, %c0_22] : memref<1x32xf32, #tpu.memory_space<vmem>>, vector<1x32xf32>
      %36 = vector.broadcast %35 : vector<1x32xf32> to vector<16x32xf32>
      %37 = arith.mulf %34, %36 : vector<16x32xf32>
      %c0_23 = arith.constant 0 : index
      %c0_24 = arith.constant 0 : index
      %38 = vector.load %arg7[%c0_23, %c0_24] : memref<1x32xf32, #tpu.memory_space<vmem>>, vector<1x32xf32>
      %39 = vector.broadcast %38 : vector<1x32xf32> to vector<16x32xf32>
      %40 = arith.addf %37, %39 : vector<16x32xf32>
      %41 = arith.truncf %40 : vector<16x32xf32> to vector<16x32xbf16>
      %c0_25 = arith.constant 0 : index
      %c0_26 = arith.constant 0 : index
      %42 = vector.load %arg8[%c0_25, %c0_26] : memref<16x32xbf16, #tpu.memory_space<vmem>>, vector<16x32xbf16>
      tpu.vector_store %arg8[%c0_25, %c0_26], %41 {strides = array<i32>} : memref<16x32xbf16, #tpu.memory_space<vmem>>, vector<16x32xbf16>,
    } else {
    }
    return
  }
  func.func @transform_0(%arg0: i32, %arg1: i32) -> (i32, i32) {
    %c0_i32 = arith.constant 0 : i32
    return %arg0, %arg1 : i32, i32
  }
  func.func @transform_1(%arg0: i32, %arg1: i32) -> (i32, i32) {
    %c0_i32 = arith.constant 0 : i32
    %c0_i32_0 = arith.constant 0 : i32
    return %arg1, %c0_i32 : i32, i32
  }
  func.func @transform_2(%arg0: i32, %arg1: i32) -> (i32, i32) {
    %c0_i32 = arith.constant 0 : i32
    %c0_i32_0 = arith.constant 0 : i32
    %c0_i32_1 = arith.constant 0 : i32
    return %c0_i32, %c0_i32_0 : i32, i32
  }
  func.func @transform_3(%arg0: i32, %arg1: i32) -> (i32, i32) {
    %c0_i32 = arith.constant 0 : i32
    %c0_i32_0 = arith.constant 0 : i32
    return %arg0, %c0_i32 : i32, i32
  }
  func.func @transform_4(%arg0: i32, %arg1: i32) -> (i32, i32) {
    %c0_i32 = arith.constant 0 : i32
    %c0_i32_0 = arith.constant 0 : i32
    %c0_i32_1 = arith.constant 0 : i32
    return %c0_i32, %c0_i32_0 : i32, i32
  }
  func.func @transform_5(%arg0: i32, %arg1: i32) -> (i32, i32) {
    %c0_i32 = arith.constant 0 : i32
    %c0_i32_0 = arith.constant 0 : i32
    %c0_i32_1 = arith.constant 0 : i32
    return %c0_i32, %c0_i32_0 : i32, i32
  }
  func.func @transform_6(%arg0: i32, %arg1: i32) -> (i32, i32) {
    %c0_i32 = arith.constant 0 : i32
    %c0_i32_0 = arith.constant 0 : i32
    return %arg0, %c0_i32 : i32, i32
  }
}

module attributes {stable_mosaic.version = 11 : i64} {
  func.func @_flash_attn_kernel(%arg0: i32, %arg1: i32, %arg2: i32, %arg3: memref<1x8x96xbf16, #tpu.memory_space<vmem>>, %arg4: memref<1x8x96xbf16, #tpu.memory_space<vmem>>, %arg5: memref<1x1x8xf32, #tpu.memory_space<vmem>>, %arg6: memref<1x8x32xbf16, #tpu.memory_space<vmem>>, %arg7: memref<4x8x1xf32, #tpu.memory_space<vmem>>, %arg8: memref<4x8x1xf32, #tpu.memory_space<vmem>>, %arg9: memref<4x8x8xf32, #tpu.memory_space<vmem>>) attributes {dimension_semantics = [#tpu.dimension_semantics<parallel>, #tpu.dimension_semantics<parallel>, #tpu.dimension_semantics<arbitrary>], iteration_bounds = array<i64: 2, 1, 1>, scalar_prefetch = 0 : i64, scratch_operands = 3 : i64, tpu.core_type = #tpu.core_type<tc>, window_params = [{transform_indices = @transform_0, window_bounds = array<i64: 1, 8, 96>}, {transform_indices = @transform_1, window_bounds = array<i64: 1, 8, 96>}, {transform_indices = @transform_2, window_bounds = array<i64: 1, 1, 8>}, {transform_indices = @transform_3, window_bounds = array<i64: 1, 8, 32>}]} {
    %c0_i32 = arith.constant 0 : i32
    %0 = arith.cmpi eq, %arg2, %c0_i32 : i32
    %1 = arith.extui %0 : i1 to i32
    %c0_i32_0 = arith.constant 0 : i32
    %2 = arith.cmpi ne, %1, %c0_i32_0 : i32
    scf.if %2 {
      %cst_100 = arith.constant 0xFF800000 : f32
      %168 = vector.broadcast %cst_100 : f32 to vector<4x8x1xf32>
      %c0_101 = arith.constant 0 : index
      %c0_102 = arith.constant 0 : index
      %c0_103 = arith.constant 0 : index
      %169 = vector.load %arg7[%c0_101, %c0_102, %c0_103] : memref<4x8x1xf32, #tpu.memory_space<vmem>>, vector<4x8x1xf32>
      tpu.vector_store %arg7[%c0_101, %c0_102, %c0_103], %168 {strides = array<i32>} : memref<4x8x1xf32, #tpu.memory_space<vmem>>, vector<4x8x1xf32>,
      %cst_104 = arith.constant 0.000000e+00 : f32
      %170 = vector.broadcast %cst_104 : f32 to vector<4x8x1xf32>
      %c0_105 = arith.constant 0 : index
      %c0_106 = arith.constant 0 : index
      %c0_107 = arith.constant 0 : index
      %171 = vector.load %arg8[%c0_105, %c0_106, %c0_107] : memref<4x8x1xf32, #tpu.memory_space<vmem>>, vector<4x8x1xf32>
      tpu.vector_store %arg8[%c0_105, %c0_106, %c0_107], %170 {strides = array<i32>} : memref<4x8x1xf32, #tpu.memory_space<vmem>>, vector<4x8x1xf32>,
      %cst_108 = arith.constant 0.000000e+00 : f32
      %172 = vector.broadcast %cst_108 : f32 to vector<4x8x8xf32>
      %c0_109 = arith.constant 0 : index
      %c0_110 = arith.constant 0 : index
      %c0_111 = arith.constant 0 : index
      %173 = vector.load %arg9[%c0_109, %c0_110, %c0_111] : memref<4x8x8xf32, #tpu.memory_space<vmem>>, vector<4x8x8xf32>
      tpu.vector_store %arg9[%c0_109, %c0_110, %c0_111], %172 {strides = array<i32>} : memref<4x8x8xf32, #tpu.memory_space<vmem>>, vector<4x8x8xf32>,
    } else {
    }
    %c0 = arith.constant 0 : index
    %c0_1 = arith.constant 0 : index
    %c0_2 = arith.constant 0 : index
    %3 = vector.load %arg3[%c0, %c0_1, %c0_2] : memref<1x8x96xbf16, #tpu.memory_space<vmem>>, vector<1x8x96xbf16>
    %4 = vector.shape_cast %3 : vector<1x8x96xbf16> to vector<8x96xbf16>
    %c0_3 = arith.constant 0 : index
    %c0_4 = arith.constant 0 : index
    %c0_5 = arith.constant 0 : index
    %5 = vector.load %arg4[%c0_3, %c0_4, %c0_5] : memref<1x8x96xbf16, #tpu.memory_space<vmem>>, vector<1x8x96xbf16>
    %6 = vector.shape_cast %5 : vector<1x8x96xbf16> to vector<8x96xbf16>
    %c0_6 = arith.constant 0 : index
    %c0_7 = arith.constant 0 : index
    %c0_8 = arith.constant 0 : index
    %7 = vector.load %arg5[%c0_6, %c0_7, %c0_8] : memref<1x1x8xf32, #tpu.memory_space<vmem>>, vector<1x1x8xf32>
    %8 = vector.shape_cast %7 : vector<1x1x8xf32> to vector<1x8xf32>
    %cst = arith.constant 0.000000e+00 : f32
    %9 = vector.broadcast %cst : f32 to vector<1x8xf32>
    %10 = arith.cmpf ogt, %8, %9 : vector<1x8xf32>
    %11 = vector.shape_cast %10 : vector<1x8xi1> to vector<1x8xi1>
    %12 = vector.broadcast %11 : vector<1x8xi1> to vector<8x8xi1>
    %13 = vector.extract_strided_slice %4 {offsets = [0, 0], sizes = [8, 8], strides = [1, 1]} : vector<8x96xbf16> to vector<8x8xbf16>
    %14 = vector.extract_strided_slice %6 {offsets = [0, 32], sizes = [8, 8], strides = [1, 1]} : vector<8x96xbf16> to vector<8x8xbf16>
    %15 = vector.extract_strided_slice %6 {offsets = [0, 64], sizes = [8, 8], strides = [1, 1]} : vector<8x96xbf16> to vector<8x8xbf16>
    %cst_9 = arith.constant dense<0.000000e+00> : vector<8x8xf32>
    %16 = tpu.matmul %13, %14, %cst_9 {dimension_numbers = #tpu.dot_dimension_numbers<[1], [1], [0], [0], [0, 0, 1, 0], [], []>} : vector<8x8xbf16>, vector<8x8xbf16>, vector<8x8xf32> -> vector<8x8xf32>
    %cst_10 = arith.constant -1.000000e+10 : f32
    %17 = vector.broadcast %cst_10 : f32 to vector<8x8xf32>
    %18 = arith.select %12, %16, %17 : vector<8x8xi1>, vector<8x8xf32>
    %c0_11 = arith.constant 0 : index
    %c0_12 = arith.constant 0 : index
    %c0_13 = arith.constant 0 : index
    %19 = vector.load %arg7[%c0_11, %c0_12, %c0_13] : memref<4x8x1xf32, #tpu.memory_space<vmem>>, vector<1x8x1xf32>
    %20 = vector.shape_cast %19 : vector<1x8x1xf32> to vector<8x1xf32>
    %cst_14 = arith.constant dense<0xFF800000> : vector<8xf32>
    %21 = vector.multi_reduction <maximumf>, %18, %cst_14 [1] : vector<8x8xf32> to vector<8xf32>
    %22 = vector.shape_cast %21 : vector<8xf32> to vector<8x1xf32>
    %23 = arith.maximumf %20, %22 : vector<8x1xf32>
    %24 = arith.subf %20, %23 : vector<8x1xf32>
    %25 = math.exp %24 : vector<8x1xf32>
    %26 = vector.broadcast %23 : vector<8x1xf32> to vector<8x8xf32>
    %27 = arith.subf %18, %26 : vector<8x8xf32>
    %28 = math.exp %27 : vector<8x8xf32>
    %c0_15 = arith.constant 0 : index
    %c0_16 = arith.constant 0 : index
    %c0_17 = arith.constant 0 : index
    %29 = vector.load %arg8[%c0_15, %c0_16, %c0_17] : memref<4x8x1xf32, #tpu.memory_space<vmem>>, vector<1x8x1xf32>
    %30 = vector.shape_cast %29 : vector<1x8x1xf32> to vector<8x1xf32>
    %31 = arith.mulf %25, %30 : vector<8x1xf32>
    %cst_18 = arith.constant dense<0.000000e+00> : vector<8xf32>
    %32 = vector.multi_reduction <add>, %28, %cst_18 [1] : vector<8x8xf32> to vector<8xf32>
    %33 = vector.shape_cast %32 : vector<8xf32> to vector<8x1xf32>
    %34 = arith.addf %31, %33 : vector<8x1xf32>
    %c0_19 = arith.constant 0 : index
    %c0_20 = arith.constant 0 : index
    %c0_21 = arith.constant 0 : index
    %35 = vector.load %arg8[%c0_19, %c0_20, %c0_21] : memref<4x8x1xf32, #tpu.memory_space<vmem>>, vector<1x8x1xf32>
    %36 = vector.shape_cast %35 : vector<1x8x1xf32> to vector<8x1xf32>
    %37 = vector.shape_cast %34 : vector<8x1xf32> to vector<1x8x1xf32>
    tpu.vector_store %arg8[%c0_19, %c0_20, %c0_21], %37 {strides = array<i32>} : memref<4x8x1xf32, #tpu.memory_space<vmem>>, vector<1x8x1xf32>,
    %c0_22 = arith.constant 0 : index
    %c0_23 = arith.constant 0 : index
    %c0_24 = arith.constant 0 : index
    %38 = vector.load %arg9[%c0_22, %c0_23, %c0_24] : memref<4x8x8xf32, #tpu.memory_space<vmem>>, vector<1x8x8xf32>
    %39 = vector.shape_cast %38 : vector<1x8x8xf32> to vector<8x8xf32>
    %40 = vector.broadcast %25 : vector<8x1xf32> to vector<8x8xf32>
    %41 = arith.mulf %40, %39 : vector<8x8xf32>
    %42 = arith.truncf %28 : vector<8x8xf32> to vector<8x8xbf16>
    %cst_25 = arith.constant dense<0.000000e+00> : vector<8x8xf32>
    %43 = tpu.matmul %42, %15, %cst_25 {dimension_numbers = #tpu.dot_dimension_numbers<[1], [0], [0], [1], [0, 0, 1, 1], [], []>} : vector<8x8xbf16>, vector<8x8xbf16>, vector<8x8xf32> -> vector<8x8xf32>
    %44 = arith.addf %41, %43 : vector<8x8xf32>
    %c0_26 = arith.constant 0 : index
    %c0_27 = arith.constant 0 : index
    %c0_28 = arith.constant 0 : index
    %45 = vector.load %arg9[%c0_26, %c0_27, %c0_28] : memref<4x8x8xf32, #tpu.memory_space<vmem>>, vector<1x8x8xf32>
    %46 = vector.shape_cast %45 : vector<1x8x8xf32> to vector<8x8xf32>
    %47 = vector.shape_cast %44 : vector<8x8xf32> to vector<1x8x8xf32>
    tpu.vector_store %arg9[%c0_26, %c0_27, %c0_28], %47 {strides = array<i32>} : memref<4x8x8xf32, #tpu.memory_space<vmem>>, vector<1x8x8xf32>,
    %c0_29 = arith.constant 0 : index
    %c0_30 = arith.constant 0 : index
    %c0_31 = arith.constant 0 : index
    %48 = vector.load %arg7[%c0_29, %c0_30, %c0_31] : memref<4x8x1xf32, #tpu.memory_space<vmem>>, vector<1x8x1xf32>
    %49 = vector.shape_cast %48 : vector<1x8x1xf32> to vector<8x1xf32>
    %50 = vector.shape_cast %23 : vector<8x1xf32> to vector<1x8x1xf32>
    tpu.vector_store %arg7[%c0_29, %c0_30, %c0_31], %50 {strides = array<i32>} : memref<4x8x1xf32, #tpu.memory_space<vmem>>, vector<1x8x1xf32>,
    %51 = vector.extract_strided_slice %4 {offsets = [0, 8], sizes = [8, 8], strides = [1, 1]} : vector<8x96xbf16> to vector<8x8xbf16>
    %52 = vector.extract_strided_slice %6 {offsets = [0, 40], sizes = [8, 8], strides = [1, 1]} : vector<8x96xbf16> to vector<8x8xbf16>
    %53 = vector.extract_strided_slice %6 {offsets = [0, 72], sizes = [8, 8], strides = [1, 1]} : vector<8x96xbf16> to vector<8x8xbf16>
    %cst_32 = arith.constant dense<0.000000e+00> : vector<8x8xf32>
    %54 = tpu.matmul %51, %52, %cst_32 {dimension_numbers = #tpu.dot_dimension_numbers<[1], [1], [0], [0], [0, 0, 1, 0], [], []>} : vector<8x8xbf16>, vector<8x8xbf16>, vector<8x8xf32> -> vector<8x8xf32>
    %cst_33 = arith.constant -1.000000e+10 : f32
    %55 = vector.broadcast %cst_33 : f32 to vector<8x8xf32>
    %56 = arith.select %12, %54, %55 : vector<8x8xi1>, vector<8x8xf32>
    %c1 = arith.constant 1 : index
    %c0_34 = arith.constant 0 : index
    %c0_35 = arith.constant 0 : index
    %57 = vector.load %arg7[%c1, %c0_34, %c0_35] : memref<4x8x1xf32, #tpu.memory_space<vmem>>, vector<1x8x1xf32>
    %58 = vector.shape_cast %57 : vector<1x8x1xf32> to vector<8x1xf32>
    %cst_36 = arith.constant dense<0xFF800000> : vector<8xf32>
    %59 = vector.multi_reduction <maximumf>, %56, %cst_36 [1] : vector<8x8xf32> to vector<8xf32>
    %60 = vector.shape_cast %59 : vector<8xf32> to vector<8x1xf32>
    %61 = arith.maximumf %58, %60 : vector<8x1xf32>
    %62 = arith.subf %58, %61 : vector<8x1xf32>
    %63 = math.exp %62 : vector<8x1xf32>
    %64 = vector.broadcast %61 : vector<8x1xf32> to vector<8x8xf32>
    %65 = arith.subf %56, %64 : vector<8x8xf32>
    %66 = math.exp %65 : vector<8x8xf32>
    %c1_37 = arith.constant 1 : index
    %c0_38 = arith.constant 0 : index
    %c0_39 = arith.constant 0 : index
    %67 = vector.load %arg8[%c1_37, %c0_38, %c0_39] : memref<4x8x1xf32, #tpu.memory_space<vmem>>, vector<1x8x1xf32>
    %68 = vector.shape_cast %67 : vector<1x8x1xf32> to vector<8x1xf32>
    %69 = arith.mulf %63, %68 : vector<8x1xf32>
    %cst_40 = arith.constant dense<0.000000e+00> : vector<8xf32>
    %70 = vector.multi_reduction <add>, %66, %cst_40 [1] : vector<8x8xf32> to vector<8xf32>
    %71 = vector.shape_cast %70 : vector<8xf32> to vector<8x1xf32>
    %72 = arith.addf %69, %71 : vector<8x1xf32>
    %c1_41 = arith.constant 1 : index
    %c0_42 = arith.constant 0 : index
    %c0_43 = arith.constant 0 : index
    %73 = vector.load %arg8[%c1_41, %c0_42, %c0_43] : memref<4x8x1xf32, #tpu.memory_space<vmem>>, vector<1x8x1xf32>
    %74 = vector.shape_cast %73 : vector<1x8x1xf32> to vector<8x1xf32>
    %75 = vector.shape_cast %72 : vector<8x1xf32> to vector<1x8x1xf32>
    tpu.vector_store %arg8[%c1_41, %c0_42, %c0_43], %75 {strides = array<i32>} : memref<4x8x1xf32, #tpu.memory_space<vmem>>, vector<1x8x1xf32>,
    %c1_44 = arith.constant 1 : index
    %c0_45 = arith.constant 0 : index
    %c0_46 = arith.constant 0 : index
    %76 = vector.load %arg9[%c1_44, %c0_45, %c0_46] : memref<4x8x8xf32, #tpu.memory_space<vmem>>, vector<1x8x8xf32>
    %77 = vector.shape_cast %76 : vector<1x8x8xf32> to vector<8x8xf32>
    %78 = vector.broadcast %63 : vector<8x1xf32> to vector<8x8xf32>
    %79 = arith.mulf %78, %77 : vector<8x8xf32>
    %80 = arith.truncf %66 : vector<8x8xf32> to vector<8x8xbf16>
    %cst_47 = arith.constant dense<0.000000e+00> : vector<8x8xf32>
    %81 = tpu.matmul %80, %53, %cst_47 {dimension_numbers = #tpu.dot_dimension_numbers<[1], [0], [0], [1], [0, 0, 1, 1], [], []>} : vector<8x8xbf16>, vector<8x8xbf16>, vector<8x8xf32> -> vector<8x8xf32>
    %82 = arith.addf %79, %81 : vector<8x8xf32>
    %c1_48 = arith.constant 1 : index
    %c0_49 = arith.constant 0 : index
    %c0_50 = arith.constant 0 : index
    %83 = vector.load %arg9[%c1_48, %c0_49, %c0_50] : memref<4x8x8xf32, #tpu.memory_space<vmem>>, vector<1x8x8xf32>
    %84 = vector.shape_cast %83 : vector<1x8x8xf32> to vector<8x8xf32>
    %85 = vector.shape_cast %82 : vector<8x8xf32> to vector<1x8x8xf32>
    tpu.vector_store %arg9[%c1_48, %c0_49, %c0_50], %85 {strides = array<i32>} : memref<4x8x8xf32, #tpu.memory_space<vmem>>, vector<1x8x8xf32>,
    %c1_51 = arith.constant 1 : index
    %c0_52 = arith.constant 0 : index
    %c0_53 = arith.constant 0 : index
    %86 = vector.load %arg7[%c1_51, %c0_52, %c0_53] : memref<4x8x1xf32, #tpu.memory_space<vmem>>, vector<1x8x1xf32>
    %87 = vector.shape_cast %86 : vector<1x8x1xf32> to vector<8x1xf32>
    %88 = vector.shape_cast %61 : vector<8x1xf32> to vector<1x8x1xf32>
    tpu.vector_store %arg7[%c1_51, %c0_52, %c0_53], %88 {strides = array<i32>} : memref<4x8x1xf32, #tpu.memory_space<vmem>>, vector<1x8x1xf32>,
    %89 = vector.extract_strided_slice %4 {offsets = [0, 16], sizes = [8, 8], strides = [1, 1]} : vector<8x96xbf16> to vector<8x8xbf16>
    %90 = vector.extract_strided_slice %6 {offsets = [0, 48], sizes = [8, 8], strides = [1, 1]} : vector<8x96xbf16> to vector<8x8xbf16>
    %91 = vector.extract_strided_slice %6 {offsets = [0, 80], sizes = [8, 8], strides = [1, 1]} : vector<8x96xbf16> to vector<8x8xbf16>
    %cst_54 = arith.constant dense<0.000000e+00> : vector<8x8xf32>
    %92 = tpu.matmul %89, %90, %cst_54 {dimension_numbers = #tpu.dot_dimension_numbers<[1], [1], [0], [0], [0, 0, 1, 0], [], []>} : vector<8x8xbf16>, vector<8x8xbf16>, vector<8x8xf32> -> vector<8x8xf32>
    %cst_55 = arith.constant -1.000000e+10 : f32
    %93 = vector.broadcast %cst_55 : f32 to vector<8x8xf32>
    %94 = arith.select %12, %92, %93 : vector<8x8xi1>, vector<8x8xf32>
    %c2 = arith.constant 2 : index
    %c0_56 = arith.constant 0 : index
    %c0_57 = arith.constant 0 : index
    %95 = vector.load %arg7[%c2, %c0_56, %c0_57] : memref<4x8x1xf32, #tpu.memory_space<vmem>>, vector<1x8x1xf32>
    %96 = vector.shape_cast %95 : vector<1x8x1xf32> to vector<8x1xf32>
    %cst_58 = arith.constant dense<0xFF800000> : vector<8xf32>
    %97 = vector.multi_reduction <maximumf>, %94, %cst_58 [1] : vector<8x8xf32> to vector<8xf32>
    %98 = vector.shape_cast %97 : vector<8xf32> to vector<8x1xf32>
    %99 = arith.maximumf %96, %98 : vector<8x1xf32>
    %100 = arith.subf %96, %99 : vector<8x1xf32>
    %101 = math.exp %100 : vector<8x1xf32>
    %102 = vector.broadcast %99 : vector<8x1xf32> to vector<8x8xf32>
    %103 = arith.subf %94, %102 : vector<8x8xf32>
    %104 = math.exp %103 : vector<8x8xf32>
    %c2_59 = arith.constant 2 : index
    %c0_60 = arith.constant 0 : index
    %c0_61 = arith.constant 0 : index
    %105 = vector.load %arg8[%c2_59, %c0_60, %c0_61] : memref<4x8x1xf32, #tpu.memory_space<vmem>>, vector<1x8x1xf32>
    %106 = vector.shape_cast %105 : vector<1x8x1xf32> to vector<8x1xf32>
    %107 = arith.mulf %101, %106 : vector<8x1xf32>
    %cst_62 = arith.constant dense<0.000000e+00> : vector<8xf32>
    %108 = vector.multi_reduction <add>, %104, %cst_62 [1] : vector<8x8xf32> to vector<8xf32>
    %109 = vector.shape_cast %108 : vector<8xf32> to vector<8x1xf32>
    %110 = arith.addf %107, %109 : vector<8x1xf32>
    %c2_63 = arith.constant 2 : index
    %c0_64 = arith.constant 0 : index
    %c0_65 = arith.constant 0 : index
    %111 = vector.load %arg8[%c2_63, %c0_64, %c0_65] : memref<4x8x1xf32, #tpu.memory_space<vmem>>, vector<1x8x1xf32>
    %112 = vector.shape_cast %111 : vector<1x8x1xf32> to vector<8x1xf32>
    %113 = vector.shape_cast %110 : vector<8x1xf32> to vector<1x8x1xf32>
    tpu.vector_store %arg8[%c2_63, %c0_64, %c0_65], %113 {strides = array<i32>} : memref<4x8x1xf32, #tpu.memory_space<vmem>>, vector<1x8x1xf32>,
    %c2_66 = arith.constant 2 : index
    %c0_67 = arith.constant 0 : index
    %c0_68 = arith.constant 0 : index
    %114 = vector.load %arg9[%c2_66, %c0_67, %c0_68] : memref<4x8x8xf32, #tpu.memory_space<vmem>>, vector<1x8x8xf32>
    %115 = vector.shape_cast %114 : vector<1x8x8xf32> to vector<8x8xf32>
    %116 = vector.broadcast %101 : vector<8x1xf32> to vector<8x8xf32>
    %117 = arith.mulf %116, %115 : vector<8x8xf32>
    %118 = arith.truncf %104 : vector<8x8xf32> to vector<8x8xbf16>
    %cst_69 = arith.constant dense<0.000000e+00> : vector<8x8xf32>
    %119 = tpu.matmul %118, %91, %cst_69 {dimension_numbers = #tpu.dot_dimension_numbers<[1], [0], [0], [1], [0, 0, 1, 1], [], []>} : vector<8x8xbf16>, vector<8x8xbf16>, vector<8x8xf32> -> vector<8x8xf32>
    %120 = arith.addf %117, %119 : vector<8x8xf32>
    %c2_70 = arith.constant 2 : index
    %c0_71 = arith.constant 0 : index
    %c0_72 = arith.constant 0 : index
    %121 = vector.load %arg9[%c2_70, %c0_71, %c0_72] : memref<4x8x8xf32, #tpu.memory_space<vmem>>, vector<1x8x8xf32>
    %122 = vector.shape_cast %121 : vector<1x8x8xf32> to vector<8x8xf32>
    %123 = vector.shape_cast %120 : vector<8x8xf32> to vector<1x8x8xf32>
    tpu.vector_store %arg9[%c2_70, %c0_71, %c0_72], %123 {strides = array<i32>} : memref<4x8x8xf32, #tpu.memory_space<vmem>>, vector<1x8x8xf32>,
    %c2_73 = arith.constant 2 : index
    %c0_74 = arith.constant 0 : index
    %c0_75 = arith.constant 0 : index
    %124 = vector.load %arg7[%c2_73, %c0_74, %c0_75] : memref<4x8x1xf32, #tpu.memory_space<vmem>>, vector<1x8x1xf32>
    %125 = vector.shape_cast %124 : vector<1x8x1xf32> to vector<8x1xf32>
    %126 = vector.shape_cast %99 : vector<8x1xf32> to vector<1x8x1xf32>
    tpu.vector_store %arg7[%c2_73, %c0_74, %c0_75], %126 {strides = array<i32>} : memref<4x8x1xf32, #tpu.memory_space<vmem>>, vector<1x8x1xf32>,
    %127 = vector.extract_strided_slice %4 {offsets = [0, 24], sizes = [8, 8], strides = [1, 1]} : vector<8x96xbf16> to vector<8x8xbf16>
    %128 = vector.extract_strided_slice %6 {offsets = [0, 56], sizes = [8, 8], strides = [1, 1]} : vector<8x96xbf16> to vector<8x8xbf16>
    %129 = vector.extract_strided_slice %6 {offsets = [0, 88], sizes = [8, 8], strides = [1, 1]} : vector<8x96xbf16> to vector<8x8xbf16>
    %cst_76 = arith.constant dense<0.000000e+00> : vector<8x8xf32>
    %130 = tpu.matmul %127, %128, %cst_76 {dimension_numbers = #tpu.dot_dimension_numbers<[1], [1], [0], [0], [0, 0, 1, 0], [], []>} : vector<8x8xbf16>, vector<8x8xbf16>, vector<8x8xf32> -> vector<8x8xf32>
    %cst_77 = arith.constant -1.000000e+10 : f32
    %131 = vector.broadcast %cst_77 : f32 to vector<8x8xf32>
    %132 = arith.select %12, %130, %131 : vector<8x8xi1>, vector<8x8xf32>
    %c3 = arith.constant 3 : index
    %c0_78 = arith.constant 0 : index
    %c0_79 = arith.constant 0 : index
    %133 = vector.load %arg7[%c3, %c0_78, %c0_79] : memref<4x8x1xf32, #tpu.memory_space<vmem>>, vector<1x8x1xf32>
    %134 = vector.shape_cast %133 : vector<1x8x1xf32> to vector<8x1xf32>
    %cst_80 = arith.constant dense<0xFF800000> : vector<8xf32>
    %135 = vector.multi_reduction <maximumf>, %132, %cst_80 [1] : vector<8x8xf32> to vector<8xf32>
    %136 = vector.shape_cast %135 : vector<8xf32> to vector<8x1xf32>
    %137 = arith.maximumf %134, %136 : vector<8x1xf32>
    %138 = arith.subf %134, %137 : vector<8x1xf32>
    %139 = math.exp %138 : vector<8x1xf32>
    %140 = vector.broadcast %137 : vector<8x1xf32> to vector<8x8xf32>
    %141 = arith.subf %132, %140 : vector<8x8xf32>
    %142 = math.exp %141 : vector<8x8xf32>
    %c3_81 = arith.constant 3 : index
    %c0_82 = arith.constant 0 : index
    %c0_83 = arith.constant 0 : index
    %143 = vector.load %arg8[%c3_81, %c0_82, %c0_83] : memref<4x8x1xf32, #tpu.memory_space<vmem>>, vector<1x8x1xf32>
    %144 = vector.shape_cast %143 : vector<1x8x1xf32> to vector<8x1xf32>
    %145 = arith.mulf %139, %144 : vector<8x1xf32>
    %cst_84 = arith.constant dense<0.000000e+00> : vector<8xf32>
    %146 = vector.multi_reduction <add>, %142, %cst_84 [1] : vector<8x8xf32> to vector<8xf32>
    %147 = vector.shape_cast %146 : vector<8xf32> to vector<8x1xf32>
    %148 = arith.addf %145, %147 : vector<8x1xf32>
    %c3_85 = arith.constant 3 : index
    %c0_86 = arith.constant 0 : index
    %c0_87 = arith.constant 0 : index
    %149 = vector.load %arg8[%c3_85, %c0_86, %c0_87] : memref<4x8x1xf32, #tpu.memory_space<vmem>>, vector<1x8x1xf32>
    %150 = vector.shape_cast %149 : vector<1x8x1xf32> to vector<8x1xf32>
    %151 = vector.shape_cast %148 : vector<8x1xf32> to vector<1x8x1xf32>
    tpu.vector_store %arg8[%c3_85, %c0_86, %c0_87], %151 {strides = array<i32>} : memref<4x8x1xf32, #tpu.memory_space<vmem>>, vector<1x8x1xf32>,
    %c3_88 = arith.constant 3 : index
    %c0_89 = arith.constant 0 : index
    %c0_90 = arith.constant 0 : index
    %152 = vector.load %arg9[%c3_88, %c0_89, %c0_90] : memref<4x8x8xf32, #tpu.memory_space<vmem>>, vector<1x8x8xf32>
    %153 = vector.shape_cast %152 : vector<1x8x8xf32> to vector<8x8xf32>
    %154 = vector.broadcast %139 : vector<8x1xf32> to vector<8x8xf32>
    %155 = arith.mulf %154, %153 : vector<8x8xf32>
    %156 = arith.truncf %142 : vector<8x8xf32> to vector<8x8xbf16>
    %cst_91 = arith.constant dense<0.000000e+00> : vector<8x8xf32>
    %157 = tpu.matmul %156, %129, %cst_91 {dimension_numbers = #tpu.dot_dimension_numbers<[1], [0], [0], [1], [0, 0, 1, 1], [], []>} : vector<8x8xbf16>, vector<8x8xbf16>, vector<8x8xf32> -> vector<8x8xf32>
    %158 = arith.addf %155, %157 : vector<8x8xf32>
    %c3_92 = arith.constant 3 : index
    %c0_93 = arith.constant 0 : index
    %c0_94 = arith.constant 0 : index
    %159 = vector.load %arg9[%c3_92, %c0_93, %c0_94] : memref<4x8x8xf32, #tpu.memory_space<vmem>>, vector<1x8x8xf32>
    %160 = vector.shape_cast %159 : vector<1x8x8xf32> to vector<8x8xf32>
    %161 = vector.shape_cast %158 : vector<8x8xf32> to vector<1x8x8xf32>
    tpu.vector_store %arg9[%c3_92, %c0_93, %c0_94], %161 {strides = array<i32>} : memref<4x8x8xf32, #tpu.memory_space<vmem>>, vector<1x8x8xf32>,
    %c3_95 = arith.constant 3 : index
    %c0_96 = arith.constant 0 : index
    %c0_97 = arith.constant 0 : index
    %162 = vector.load %arg7[%c3_95, %c0_96, %c0_97] : memref<4x8x1xf32, #tpu.memory_space<vmem>>, vector<1x8x1xf32>
    %163 = vector.shape_cast %162 : vector<1x8x1xf32> to vector<8x1xf32>
    %164 = vector.shape_cast %137 : vector<8x1xf32> to vector<1x8x1xf32>
    tpu.vector_store %arg7[%c3_95, %c0_96, %c0_97], %164 {strides = array<i32>} : memref<4x8x1xf32, #tpu.memory_space<vmem>>, vector<1x8x1xf32>,
    %c0_i32_98 = arith.constant 0 : i32
    %165 = arith.cmpi eq, %arg2, %c0_i32_98 : i32
    %166 = arith.extui %165 : i1 to i32
    %c0_i32_99 = arith.constant 0 : i32
    %167 = arith.cmpi ne, %166, %c0_i32_99 : i32
    scf.if %167 {
      %c0_100 = arith.constant 0 : index
      %c0_101 = arith.constant 0 : index
      %c0_102 = arith.constant 0 : index
      %168 = vector.load %arg8[%c0_100, %c0_101, %c0_102] : memref<4x8x1xf32, #tpu.memory_space<vmem>>, vector<1x8x1xf32>
      %169 = vector.shape_cast %168 : vector<1x8x1xf32> to vector<8x1xf32>
      %170 = tpu.reciprocal %169 {approx = true} : vector<8x1xf32> -> vector<8x1xf32>
      %c0_103 = arith.constant 0 : index
      %c0_104 = arith.constant 0 : index
      %c0_105 = arith.constant 0 : index
      %171 = vector.load %arg9[%c0_103, %c0_104, %c0_105] : memref<4x8x8xf32, #tpu.memory_space<vmem>>, vector<1x8x8xf32>
      %172 = vector.shape_cast %171 : vector<1x8x8xf32> to vector<8x8xf32>
      %173 = vector.broadcast %170 : vector<8x1xf32> to vector<8x8xf32>
      %174 = arith.mulf %172, %173 : vector<8x8xf32>
      %c1_106 = arith.constant 1 : index
      %c0_107 = arith.constant 0 : index
      %c0_108 = arith.constant 0 : index
      %175 = vector.load %arg8[%c1_106, %c0_107, %c0_108] : memref<4x8x1xf32, #tpu.memory_space<vmem>>, vector<1x8x1xf32>
      %176 = vector.shape_cast %175 : vector<1x8x1xf32> to vector<8x1xf32>
      %177 = tpu.reciprocal %176 {approx = true} : vector<8x1xf32> -> vector<8x1xf32>
      %c1_109 = arith.constant 1 : index
      %c0_110 = arith.constant 0 : index
      %c0_111 = arith.constant 0 : index
      %178 = vector.load %arg9[%c1_109, %c0_110, %c0_111] : memref<4x8x8xf32, #tpu.memory_space<vmem>>, vector<1x8x8xf32>
      %179 = vector.shape_cast %178 : vector<1x8x8xf32> to vector<8x8xf32>
      %180 = vector.broadcast %177 : vector<8x1xf32> to vector<8x8xf32>
      %181 = arith.mulf %179, %180 : vector<8x8xf32>
      %c2_112 = arith.constant 2 : index
      %c0_113 = arith.constant 0 : index
      %c0_114 = arith.constant 0 : index
      %182 = vector.load %arg8[%c2_112, %c0_113, %c0_114] : memref<4x8x1xf32, #tpu.memory_space<vmem>>, vector<1x8x1xf32>
      %183 = vector.shape_cast %182 : vector<1x8x1xf32> to vector<8x1xf32>
      %184 = tpu.reciprocal %183 {approx = true} : vector<8x1xf32> -> vector<8x1xf32>
      %c2_115 = arith.constant 2 : index
      %c0_116 = arith.constant 0 : index
      %c0_117 = arith.constant 0 : index
      %185 = vector.load %arg9[%c2_115, %c0_116, %c0_117] : memref<4x8x8xf32, #tpu.memory_space<vmem>>, vector<1x8x8xf32>
      %186 = vector.shape_cast %185 : vector<1x8x8xf32> to vector<8x8xf32>
      %187 = vector.broadcast %184 : vector<8x1xf32> to vector<8x8xf32>
      %188 = arith.mulf %186, %187 : vector<8x8xf32>
      %c3_118 = arith.constant 3 : index
      %c0_119 = arith.constant 0 : index
      %c0_120 = arith.constant 0 : index
      %189 = vector.load %arg8[%c3_118, %c0_119, %c0_120] : memref<4x8x1xf32, #tpu.memory_space<vmem>>, vector<1x8x1xf32>
      %190 = vector.shape_cast %189 : vector<1x8x1xf32> to vector<8x1xf32>
      %191 = tpu.reciprocal %190 {approx = true} : vector<8x1xf32> -> vector<8x1xf32>
      %c3_121 = arith.constant 3 : index
      %c0_122 = arith.constant 0 : index
      %c0_123 = arith.constant 0 : index
      %192 = vector.load %arg9[%c3_121, %c0_122, %c0_123] : memref<4x8x8xf32, #tpu.memory_space<vmem>>, vector<1x8x8xf32>
      %193 = vector.shape_cast %192 : vector<1x8x8xf32> to vector<8x8xf32>
      %194 = vector.broadcast %191 : vector<8x1xf32> to vector<8x8xf32>
      %195 = arith.mulf %193, %194 : vector<8x8xf32>
      %196 = tpu.concatenate %174, %181, %188, %195 in 1 : vector<8x8xf32>, vector<8x8xf32>, vector<8x8xf32>, vector<8x8xf32> -> vector<8x32xf32>
      %197 = arith.truncf %196 : vector<8x32xf32> to vector<8x32xbf16>
      %c0_124 = arith.constant 0 : index
      %c0_125 = arith.constant 0 : index
      %c0_126 = arith.constant 0 : index
      %198 = vector.load %arg6[%c0_124, %c0_125, %c0_126] : memref<1x8x32xbf16, #tpu.memory_space<vmem>>, vector<1x8x32xbf16>
      %199 = vector.shape_cast %198 : vector<1x8x32xbf16> to vector<8x32xbf16>
      %200 = vector.shape_cast %197 : vector<8x32xbf16> to vector<1x8x32xbf16>
      tpu.vector_store %arg6[%c0_124, %c0_125, %c0_126], %200 {strides = array<i32>} : memref<1x8x32xbf16, #tpu.memory_space<vmem>>, vector<1x8x32xbf16>,
    } else {
    }
    return
  }
  func.func @transform_0(%arg0: i32, %arg1: i32, %arg2: i32) -> (i32, i32, i32) {
    %c0_i32 = arith.constant 0 : i32
    %c0_i32_0 = arith.constant 0 : i32
    return %arg0, %arg1, %c0_i32 : i32, i32, i32
  }
  func.func @transform_1(%arg0: i32, %arg1: i32, %arg2: i32) -> (i32, i32, i32) {
    %c0_i32 = arith.constant 0 : i32
    %c0_i32_0 = arith.constant 0 : i32
    return %arg0, %arg2, %c0_i32 : i32, i32, i32
  }
  func.func @transform_2(%arg0: i32, %arg1: i32, %arg2: i32) -> (i32, i32, i32) {
    %c0_i32 = arith.constant 0 : i32
    %c0_i32_0 = arith.constant 0 : i32
    return %arg0, %c0_i32, %arg2 : i32, i32, i32
  }
  func.func @transform_3(%arg0: i32, %arg1: i32, %arg2: i32) -> (i32, i32, i32) {
    %c0_i32 = arith.constant 0 : i32
    %c0_i32_0 = arith.constant 0 : i32
    return %arg0, %arg1, %c0_i32 : i32, i32, i32
  }
}

module attributes {stable_mosaic.version = 11 : i64} {
  func.func @_linear_kernel(%arg0: i32, %arg1: i32, %arg2: i32, %arg3: memref<16x32xbf16, #tpu.memory_space<vmem>>, %arg4: memref<32x64xbf16, #tpu.memory_space<vmem>>, %arg5: memref<1x64xf32, #tpu.memory_space<vmem>>, %arg6: memref<16x64xbf16, #tpu.memory_space<vmem>>, %arg7: memref<16x64xf32, #tpu.memory_space<vmem>>) attributes {dimension_semantics = [#tpu.dimension_semantics<parallel>, #tpu.dimension_semantics<parallel>, #tpu.dimension_semantics<arbitrary>], iteration_bounds = array<i64: 1, 1, 1>, scalar_prefetch = 0 : i64, scratch_operands = 1 : i64, tpu.core_type = #tpu.core_type<tc>, window_params = [{transform_indices = @transform_0, window_bounds = array<i64: 16, 32>}, {transform_indices = @transform_1, window_bounds = array<i64: 32, 64>}, {transform_indices = @transform_2, window_bounds = array<i64: 1, 64>}, {transform_indices = @transform_3, window_bounds = array<i64: 16, 64>}]} {
    %c0_i32 = arith.constant 0 : i32
    %0 = arith.cmpi eq, %arg2, %c0_i32 : i32
    %1 = arith.extui %0 : i1 to i32
    %c0_i32_0 = arith.constant 0 : i32
    %2 = arith.cmpi ne, %1, %c0_i32_0 : i32
    scf.if %2 {
      %cst_10 = arith.constant 0.000000e+00 : f32
      %12 = vector.broadcast %cst_10 : f32 to vector<16x64xf32>
      %c0_11 = arith.constant 0 : index
      %c0_12 = arith.constant 0 : index
      %13 = vector.load %arg7[%c0_11, %c0_12] : memref<16x64xf32, #tpu.memory_space<vmem>>, vector<16x64xf32>
      tpu.vector_store %arg7[%c0_11, %c0_12], %12 {strides = array<i32>} : memref<16x64xf32, #tpu.memory_space<vmem>>, vector<16x64xf32>,
    } else {
    }
    %c0 = arith.constant 0 : index
    %c0_1 = arith.constant 0 : index
    %3 = vector.load %arg7[%c0, %c0_1] : memref<16x64xf32, #tpu.memory_space<vmem>>, vector<16x64xf32>
    %c0_2 = arith.constant 0 : index
    %c0_3 = arith.constant 0 : index
    %4 = vector.load %arg3[%c0_2, %c0_3] : memref<16x32xbf16, #tpu.memory_space<vmem>>, vector<16x32xbf16>
    %c0_4 = arith.constant 0 : index
    %c0_5 = arith.constant 0 : index
    %5 = vector.load %arg4[%c0_4, %c0_5] : memref<32x64xbf16, #tpu.memory_space<vmem>>, vector<32x64xbf16>
    %cst = arith.constant dense<0.000000e+00> : vector<16x64xf32>
    %6 = tpu.matmul %4, %5, %cst {dimension_numbers = #tpu.dot_dimension_numbers<[1], [0], [0], [1], [0, 0, 1, 1], [], []>} : vector<16x32xbf16>, vector<32x64xbf16>, vector<16x64xf32> -> vector<16x64xf32>
    %7 = arith.addf %3, %6 : vector<16x64xf32>
    %c0_6 = arith.constant 0 : index
    %c0_7 = arith.constant 0 : index
    %8 = vector.load %arg7[%c0_6, %c0_7] : memref<16x64xf32, #tpu.memory_space<vmem>>, vector<16x64xf32>
    tpu.vector_store %arg7[%c0_6, %c0_7], %7 {strides = array<i32>} : memref<16x64xf32, #tpu.memory_space<vmem>>, vector<16x64xf32>,
    %c0_i32_8 = arith.constant 0 : i32
    %9 = arith.cmpi eq, %arg2, %c0_i32_8 : i32
    %10 = arith.extui %9 : i1 to i32
    %c0_i32_9 = arith.constant 0 : i32
    %11 = arith.cmpi ne, %10, %c0_i32_9 : i32
    scf.if %11 {
      %c0_10 = arith.constant 0 : index
      %c0_11 = arith.constant 0 : index
      %12 = vector.load %arg7[%c0_10, %c0_11] : memref<16x64xf32, #tpu.memory_space<vmem>>, vector<16x64xf32>
      %c0_12 = arith.constant 0 : index
      %c0_13 = arith.constant 0 : index
      %13 = vector.load %arg5[%c0_12, %c0_13] : memref<1x64xf32, #tpu.memory_space<vmem>>, vector<1x64xf32>
      %14 = vector.broadcast %13 : vector<1x64xf32> to vector<16x64xf32>
      %15 = arith.addf %12, %14 : vector<16x64xf32>
      %cst_14 = arith.constant 0.000000e+00 : f32
      %16 = vector.broadcast %cst_14 : f32 to vector<16x64xf32>
      %17 = arith.maximumf %15, %16 : vector<16x64xf32>
      %18 = arith.truncf %17 : vector<16x64xf32> to vector<16x64xbf16>
      %c0_15 = arith.constant 0 : index
      %c0_16 = arith.constant 0 : index
      %19 = vector.load %arg6[%c0_15, %c0_16] : memref<16x64xbf16, #tpu.memory_space<vmem>>, vector<16x64xbf16>
      tpu.vector_store %arg6[%c0_15, %c0_16], %18 {strides = array<i32>} : memref<16x64xbf16, #tpu.memory_space<vmem>>, vector<16x64xbf16>,
    } else {
    }
    return
  }
  func.func @transform_0(%arg0: i32, %arg1: i32, %arg2: i32) -> (i32, i32) {
    %c0_i32 = arith.constant 0 : i32
    return %arg0, %arg2 : i32, i32
  }
  func.func @transform_1(%arg0: i32, %arg1: i32, %arg2: i32) -> (i32, i32) {
    %c0_i32 = arith.constant 0 : i32
    return %arg2, %arg1 : i32, i32
  }
  func.func @transform_2(%arg0: i32, %arg1: i32, %arg2: i32) -> (i32, i32) {
    %c0_i32 = arith.constant 0 : i32
    %c0_i32_0 = arith.constant 0 : i32
    return %c0_i32, %arg1 : i32, i32
  }
  func.func @transform_3(%arg0: i32, %arg1: i32, %arg2: i32) -> (i32, i32) {
    %c0_i32 = arith.constant 0 : i32
    return %arg0, %arg1 : i32, i32
  }
}

module attributes {stable_mosaic.version = 11 : i64} {
  func.func @_linear_kernel(%arg0: i32, %arg1: i32, %arg2: i32, %arg3: memref<16x32xbf16, #tpu.memory_space<vmem>>, %arg4: memref<32x64xbf16, #tpu.memory_space<vmem>>, %arg5: memref<1x64xf32, #tpu.memory_space<vmem>>, %arg6: memref<16x64xbf16, #tpu.memory_space<vmem>>, %arg7: memref<16x64xf32, #tpu.memory_space<vmem>>) attributes {dimension_semantics = [#tpu.dimension_semantics<parallel>, #tpu.dimension_semantics<parallel>, #tpu.dimension_semantics<arbitrary>], iteration_bounds = array<i64: 1, 1, 1>, scalar_prefetch = 0 : i64, scratch_operands = 1 : i64, tpu.core_type = #tpu.core_type<tc>, window_params = [{transform_indices = @transform_0, window_bounds = array<i64: 16, 32>}, {transform_indices = @transform_1, window_bounds = array<i64: 32, 64>}, {transform_indices = @transform_2, window_bounds = array<i64: 1, 64>}, {transform_indices = @transform_3, window_bounds = array<i64: 16, 64>}]} {
    %c0_i32 = arith.constant 0 : i32
    %0 = arith.cmpi eq, %arg2, %c0_i32 : i32
    %1 = arith.extui %0 : i1 to i32
    %c0_i32_0 = arith.constant 0 : i32
    %2 = arith.cmpi ne, %1, %c0_i32_0 : i32
    scf.if %2 {
      %cst_10 = arith.constant 0.000000e+00 : f32
      %12 = vector.broadcast %cst_10 : f32 to vector<16x64xf32>
      %c0_11 = arith.constant 0 : index
      %c0_12 = arith.constant 0 : index
      %13 = vector.load %arg7[%c0_11, %c0_12] : memref<16x64xf32, #tpu.memory_space<vmem>>, vector<16x64xf32>
      tpu.vector_store %arg7[%c0_11, %c0_12], %12 {strides = array<i32>} : memref<16x64xf32, #tpu.memory_space<vmem>>, vector<16x64xf32>,
    } else {
    }
    %c0 = arith.constant 0 : index
    %c0_1 = arith.constant 0 : index
    %3 = vector.load %arg7[%c0, %c0_1] : memref<16x64xf32, #tpu.memory_space<vmem>>, vector<16x64xf32>
    %c0_2 = arith.constant 0 : index
    %c0_3 = arith.constant 0 : index
    %4 = vector.load %arg3[%c0_2, %c0_3] : memref<16x32xbf16, #tpu.memory_space<vmem>>, vector<16x32xbf16>
    %c0_4 = arith.constant 0 : index
    %c0_5 = arith.constant 0 : index
    %5 = vector.load %arg4[%c0_4, %c0_5] : memref<32x64xbf16, #tpu.memory_space<vmem>>, vector<32x64xbf16>
    %cst = arith.constant dense<0.000000e+00> : vector<16x64xf32>
    %6 = tpu.matmul %4, %5, %cst {dimension_numbers = #tpu.dot_dimension_numbers<[1], [0], [0], [1], [0, 0, 1, 1], [], []>} : vector<16x32xbf16>, vector<32x64xbf16>, vector<16x64xf32> -> vector<16x64xf32>
    %7 = arith.addf %3, %6 : vector<16x64xf32>
    %c0_6 = arith.constant 0 : index
    %c0_7 = arith.constant 0 : index
    %8 = vector.load %arg7[%c0_6, %c0_7] : memref<16x64xf32, #tpu.memory_space<vmem>>, vector<16x64xf32>
    tpu.vector_store %arg7[%c0_6, %c0_7], %7 {strides = array<i32>} : memref<16x64xf32, #tpu.memory_space<vmem>>, vector<16x64xf32>,
    %c0_i32_8 = arith.constant 0 : i32
    %9 = arith.cmpi eq, %arg2, %c0_i32_8 : i32
    %10 = arith.extui %9 : i1 to i32
    %c0_i32_9 = arith.constant 0 : i32
    %11 = arith.cmpi ne, %10, %c0_i32_9 : i32
    scf.if %11 {
      %c0_10 = arith.constant 0 : index
      %c0_11 = arith.constant 0 : index
      %12 = vector.load %arg7[%c0_10, %c0_11] : memref<16x64xf32, #tpu.memory_space<vmem>>, vector<16x64xf32>
      %c0_12 = arith.constant 0 : index
      %c0_13 = arith.constant 0 : index
      %13 = vector.load %arg5[%c0_12, %c0_13] : memref<1x64xf32, #tpu.memory_space<vmem>>, vector<1x64xf32>
      %14 = vector.broadcast %13 : vector<1x64xf32> to vector<16x64xf32>
      %15 = arith.addf %12, %14 : vector<16x64xf32>
      %16 = arith.truncf %15 : vector<16x64xf32> to vector<16x64xbf16>
      %c0_14 = arith.constant 0 : index
      %c0_15 = arith.constant 0 : index
      %17 = vector.load %arg6[%c0_14, %c0_15] : memref<16x64xbf16, #tpu.memory_space<vmem>>, vector<16x64xbf16>
      tpu.vector_store %arg6[%c0_14, %c0_15], %16 {strides = array<i32>} : memref<16x64xbf16, #tpu.memory_space<vmem>>, vector<16x64xbf16>,
    } else {
    }
    return
  }
  func.func @transform_0(%arg0: i32, %arg1: i32, %arg2: i32) -> (i32, i32) {
    %c0_i32 = arith.constant 0 : i32
    return %arg0, %arg2 : i32, i32
  }
  func.func @transform_1(%arg0: i32, %arg1: i32, %arg2: i32) -> (i32, i32) {
    %c0_i32 = arith.constant 0 : i32
    return %arg2, %arg1 : i32, i32
  }
  func.func @transform_2(%arg0: i32, %arg1: i32, %arg2: i32) -> (i32, i32) {
    %c0_i32 = arith.constant 0 : i32
    %c0_i32_0 = arith.constant 0 : i32
    return %c0_i32, %arg1 : i32, i32
  }
  func.func @transform_3(%arg0: i32, %arg1: i32, %arg2: i32) -> (i32, i32) {
    %c0_i32 = arith.constant 0 : i32
    return %arg0, %arg1 : i32, i32
  }
}

module attributes {stable_mosaic.version = 11 : i64} {
  func.func @_linear_ln_kernel(%arg0: i32, %arg1: i32, %arg2: memref<16x64xbf16, #tpu.memory_space<vmem>>, %arg3: memref<64x32xbf16, #tpu.memory_space<vmem>>, %arg4: memref<1x32xf32, #tpu.memory_space<vmem>>, %arg5: memref<16x32xbf16, #tpu.memory_space<vmem>>, %arg6: memref<1x32xf32, #tpu.memory_space<vmem>>, %arg7: memref<1x32xf32, #tpu.memory_space<vmem>>, %arg8: memref<16x32xbf16, #tpu.memory_space<vmem>>, %arg9: memref<16x32xf32, #tpu.memory_space<vmem>>) attributes {dimension_semantics = [#tpu.dimension_semantics<parallel>, #tpu.dimension_semantics<arbitrary>], iteration_bounds = array<i64: 1, 1>, scalar_prefetch = 0 : i64, scratch_operands = 1 : i64, tpu.core_type = #tpu.core_type<tc>, window_params = [{transform_indices = @transform_0, window_bounds = array<i64: 16, 64>}, {transform_indices = @transform_1, window_bounds = array<i64: 64, 32>}, {pipeline_mode = #tpu.pipeline_mode<synchronous>, transform_indices = @transform_2, window_bounds = array<i64: 1, 32>}, {transform_indices = @transform_3, window_bounds = array<i64: 16, 32>}, {pipeline_mode = #tpu.pipeline_mode<synchronous>, transform_indices = @transform_4, window_bounds = array<i64: 1, 32>}, {pipeline_mode = #tpu.pipeline_mode<synchronous>, transform_indices = @transform_5, window_bounds = array<i64: 1, 32>}, {transform_indices = @transform_6, window_bounds = array<i64: 16, 32>}]} {
    %c0_i32 = arith.constant 0 : i32
    %0 = arith.cmpi eq, %arg1, %c0_i32 : i32
    %1 = arith.extui %0 : i1 to i32
    %c0_i32_0 = arith.constant 0 : i32
    %2 = arith.cmpi ne, %1, %c0_i32_0 : i32
    scf.if %2 {
      %cst_10 = arith.constant 0.000000e+00 : f32
      %12 = vector.broadcast %cst_10 : f32 to vector<16x32xf32>
      %c0_11 = arith.constant 0 : index
      %c0_12 = arith.constant 0 : index
      %13 = vector.load %arg9[%c0_11, %c0_12] : memref<16x32xf32, #tpu.memory_space<vmem>>, vector<16x32xf32>
      tpu.vector_store %arg9[%c0_11, %c0_12], %12 {strides = array<i32>} : memref<16x32xf32, #tpu.memory_space<vmem>>, vector<16x32xf32>,
    } else {
    }
    %c0 = arith.constant 0 : index
    %c0_1 = arith.constant 0 : index
    %3 = vector.load %arg9[%c0, %c0_1] : memref<16x32xf32, #tpu.memory_space<vmem>>, vector<16x32xf32>
    %c0_2 = arith.constant 0 : index
    %c0_3 = arith.constant 0 : index
    %4 = vector.load %arg2[%c0_2, %c0_3] : memref<16x64xbf16, #tpu.memory_space<vmem>>, vector<16x64xbf16>
    %c0_4 = arith.constant 0 : index
    %c0_5 = arith.constant 0 : index
    %5 = vector.load %arg3[%c0_4, %c0_5] : memref<64x32xbf16, #tpu.memory_space<vmem>>, vector<64x32xbf16>
    %cst = arith.constant dense<0.000000e+00> : vector<16x32xf32>
    %6 = tpu.matmul %4, %5, %cst {dimension_numbers = #tpu.dot_dimension_numbers<[1], [0], [0], [1], [0, 0, 1, 1], [], []>} : vector<16x64xbf16>, vector<64x32xbf16>, vector<16x32xf32> -> vector<16x32xf32>
    %7 = arith.addf %3, %6 : vector<16x32xf32>
    %c0_6 = arith.constant 0 : index
    %c0_7 = arith.constant 0 : index
    %8 = vector.load %arg9[%c0_6, %c0_7] : memref<16x32xf32, #tpu.memory_space<vmem>>, vector<16x32xf32>
    tpu.vector_store %arg9[%c0_6, %c0_7], %7 {strides = array<i32>} : memref<16x32xf32, #tpu.memory_space<vmem>>, vector<16x32xf32>,
    %c0_i32_8 = arith.constant 0 : i32
    %9 = arith.cmpi eq, %arg1, %c0_i32_8 : i32
    %10 = arith.extui %9 : i1 to i32
    %c0_i32_9 = arith.constant 0 : i32
    %11 = arith.cmpi ne, %10, %c0_i32_9 : i32
    scf.if %11 {
      %c0_10 = arith.constant 0 : index
      %c0_11 = arith.constant 0 : index
      %12 = vector.load %arg9[%c0_10, %c0_11] : memref<16x32xf32, #tpu.memory_space<vmem>>, vector<16x32xf32>
      %c0_12 = arith.constant 0 : index
      %c0_13 = arith.constant 0 : index
      %13 = vector.load %arg4[%c0_12, %c0_13] : memref<1x32xf32, #tpu.memory_space<vmem>>, vector<1x32xf32>
      %14 = vector.broadcast %13 : vector<1x32xf32> to vector<16x32xf32>
      %15 = arith.addf %12, %14 : vector<16x32xf32>
      %c0_14 = arith.constant 0 : index
      %c0_15 = arith.constant 0 : index
      %16 = vector.load %arg5[%c0_14, %c0_15] : memref<16x32xbf16, #tpu.memory_space<vmem>>, vector<16x32xbf16>
      %17 = arith.extf %16 : vector<16x32xbf16> to vector<16x32xf32>
      %18 = arith.addf %15, %17 : vector<16x32xf32>
      %cst_16 = arith.constant dense<0.000000e+00> : vector<16xf32>
      %19 = vector.multi_reduction <add>, %18, %cst_16 [1] : vector<16x32xf32> to vector<16xf32>
      %20 = vector.shape_cast %19 : vector<16xf32> to vector<16x1xf32>
      %cst_17 = arith.constant 3.200000e+01 : f32
      %21 = vector.broadcast %cst_17 : f32 to vector<16x1xf32>
      %22 = arith.divf %20, %21 : vector<16x1xf32>
      %23 = vector.broadcast %22 : vector<16x1xf32> to vector<16x32xf32>
      %24 = arith.subf %18, %23 : vector<16x32xf32>
      %25 = arith.mulf %24, %24 : vector<16x32xf32>
      %cst_18 = arith.constant dense<0.000000e+00> : vector<16xf32>
      %26 = vector.multi_reduction <add>, %25, %cst_18 [1] : vector<16x32xf32> to vector<16xf32>
      %27 = vector.shape_cast %26 : vector<16xf32> to vector<16x1xf32>
      %cst_19 = arith.constant 3.200000e+01 : f32
      %28 = vector.broadcast %cst_19 : f32 to vector<16x1xf32>
      %29 = arith.divf %27, %28 : vector<16x1xf32>
      %cst_20 = arith.constant 9.99999974E-6 : f32
      %30 = vector.broadcast %cst_20 : f32 to vector<16x1xf32>
      %31 = arith.addf %29, %30 : vector<16x1xf32>
      %32 = math.rsqrt %31 : vector<16x1xf32>
      %33 = vector.broadcast %32 : vector<16x1xf32> to vector<16x32xf32>
      %34 = arith.mulf %24, %33 : vector<16x32xf32>
      %c0_21 = arith.constant 0 : index
      %c0_22 = arith.constant 0 : index
      %35 = vector.load %arg6[%c0_21, %c0_22] : memref<1x32xf32, #tpu.memory_space<vmem>>, vector<1x32xf32>
      %36 = vector.broadcast %35 : vector<1x32xf32> to vector<16x32xf32>
      %37 = arith.mulf %34, %36 : vector<16x32xf32>
      %c0_23 = arith.constant 0 : index
      %c0_24 = arith.constant 0 : index
      %38 = vector.load %arg7[%c0_23, %c0_24] : memref<1x32xf32, #tpu.memory_space<vmem>>, vector<1x32xf32>
      %39 = vector.broadcast %38 : vector<1x32xf32> to vector<16x32xf32>
      %40 = arith.addf %37, %39 : vector<16x32xf32>
      %41 = arith.truncf %40 : vector<16x32xf32> to vector<16x32xbf16>
      %c0_25 = arith.constant 0 : index
      %c0_26 = arith.constant 0 : index
      %42 = vector.load %arg8[%c0_25, %c0_26] : memref<16x32xbf16, #tpu.memory_space<vmem>>, vector<16x32xbf16>
      tpu.vector_store %arg8[%c0_25, %c0_26], %41 {strides = array<i32>} : memref<16x32xbf16, #tpu.memory_space<vmem>>, vector<16x32xbf16>,
    } else {
    }
    return
  }
  func.func @transform_0(%arg0: i32, %arg1: i32) -> (i32, i32) {
    %c0_i32 = arith.constant 0 : i32
    return %arg0, %arg1 : i32, i32
  }
  func.func @transform_1(%arg0: i32, %arg1: i32) -> (i32, i32) {
    %c0_i32 = arith.constant 0 : i32
    %c0_i32_0 = arith.constant 0 : i32
    return %arg1, %c0_i32 : i32, i32
  }
  func.func @transform_2(%arg0: i32, %arg1: i32) -> (i32, i32) {
    %c0_i32 = arith.constant 0 : i32
    %c0_i32_0 = arith.constant 0 : i32
    %c0_i32_1 = arith.constant 0 : i32
    return %c0_i32, %c0_i32_0 : i32, i32
  }
  func.func @transform_3(%arg0: i32, %arg1: i32) -> (i32, i32) {
    %c0_i32 = arith.constant 0 : i32
    %c0_i32_0 = arith.constant 0 : i32
    return %arg0, %c0_i32 : i32, i32
  }
  func.func @transform_4(%arg0: i32, %arg1: i32) -> (i32, i32) {
    %c0_i32 = arith.constant 0 : i32
    %c0_i32_0 = arith.constant 0 : i32
    %c0_i32_1 = arith.constant 0 : i32
    return %c0_i32, %c0_i32_0 : i32, i32
  }
  func.func @transform_5(%arg0: i32, %arg1: i32) -> (i32, i32) {
    %c0_i32 = arith.constant 0 : i32
    %c0_i32_0 = arith.constant 0 : i32
    %c0_i32_1 = arith.constant 0 : i32
    return %c0_i32, %c0_i32_0 : i32, i32
  }
  func.func @transform_6(%arg0: i32, %arg1: i32) -> (i32, i32) {
    %c0_i32 = arith.constant 0 : i32
    %c0_i32_0 = arith.constant 0 : i32
    return %arg0, %c0_i32 : i32, i32
  }
}

module attributes {stable_mosaic.version = 11 : i64} {
  func.func @_linear_kernel(%arg0: i32, %arg1: i32, %arg2: i32, %arg3: memref<16x32xbf16, #tpu.memory_space<vmem>>, %arg4: memref<32x32xbf16, #tpu.memory_space<vmem>>, %arg5: memref<1x32xf32, #tpu.memory_space<vmem>>, %arg6: memref<16x32xbf16, #tpu.memory_space<vmem>>, %arg7: memref<16x32xf32, #tpu.memory_space<vmem>>) attributes {dimension_semantics = [#tpu.dimension_semantics<parallel>, #tpu.dimension_semantics<parallel>, #tpu.dimension_semantics<arbitrary>], iteration_bounds = array<i64: 1, 1, 1>, scalar_prefetch = 0 : i64, scratch_operands = 1 : i64, tpu.core_type = #tpu.core_type<tc>, window_params = [{transform_indices = @transform_0, window_bounds = array<i64: 16, 32>}, {transform_indices = @transform_1, window_bounds = array<i64: 32, 32>}, {transform_indices = @transform_2, window_bounds = array<i64: 1, 32>}, {transform_indices = @transform_3, window_bounds = array<i64: 16, 32>}]} {
    %c0_i32 = arith.constant 0 : i32
    %0 = arith.cmpi eq, %arg2, %c0_i32 : i32
    %1 = arith.extui %0 : i1 to i32
    %c0_i32_0 = arith.constant 0 : i32
    %2 = arith.cmpi ne, %1, %c0_i32_0 : i32
    scf.if %2 {
      %cst_10 = arith.constant 0.000000e+00 : f32
      %12 = vector.broadcast %cst_10 : f32 to vector<16x32xf32>
      %c0_11 = arith.constant 0 : index
      %c0_12 = arith.constant 0 : index
      %13 = vector.load %arg7[%c0_11, %c0_12] : memref<16x32xf32, #tpu.memory_space<vmem>>, vector<16x32xf32>
      tpu.vector_store %arg7[%c0_11, %c0_12], %12 {strides = array<i32>} : memref<16x32xf32, #tpu.memory_space<vmem>>, vector<16x32xf32>,
    } else {
    }
    %c0 = arith.constant 0 : index
    %c0_1 = arith.constant 0 : index
    %3 = vector.load %arg7[%c0, %c0_1] : memref<16x32xf32, #tpu.memory_space<vmem>>, vector<16x32xf32>
    %c0_2 = arith.constant 0 : index
    %c0_3 = arith.constant 0 : index
    %4 = vector.load %arg3[%c0_2, %c0_3] : memref<16x32xbf16, #tpu.memory_space<vmem>>, vector<16x32xbf16>
    %c0_4 = arith.constant 0 : index
    %c0_5 = arith.constant 0 : index
    %5 = vector.load %arg4[%c0_4, %c0_5] : memref<32x32xbf16, #tpu.memory_space<vmem>>, vector<32x32xbf16>
    %cst = arith.constant dense<0.000000e+00> : vector<16x32xf32>
    %6 = tpu.matmul %4, %5, %cst {dimension_numbers = #tpu.dot_dimension_numbers<[1], [0], [0], [1], [0, 0, 1, 1], [], []>} : vector<16x32xbf16>, vector<32x32xbf16>, vector<16x32xf32> -> vector<16x32xf32>
    %7 = arith.addf %3, %6 : vector<16x32xf32>
    %c0_6 = arith.constant 0 : index
    %c0_7 = arith.constant 0 : index
    %8 = vector.load %arg7[%c0_6, %c0_7] : memref<16x32xf32, #tpu.memory_space<vmem>>, vector<16x32xf32>
    tpu.vector_store %arg7[%c0_6, %c0_7], %7 {strides = array<i32>} : memref<16x32xf32, #tpu.memory_space<vmem>>, vector<16x32xf32>,
    %c0_i32_8 = arith.constant 0 : i32
    %9 = arith.cmpi eq, %arg2, %c0_i32_8 : i32
    %10 = arith.extui %9 : i1 to i32
    %c0_i32_9 = arith.constant 0 : i32
    %11 = arith.cmpi ne, %10, %c0_i32_9 : i32
    scf.if %11 {
      %c0_10 = arith.constant 0 : index
      %c0_11 = arith.constant 0 : index
      %12 = vector.load %arg7[%c0_10, %c0_11] : memref<16x32xf32, #tpu.memory_space<vmem>>, vector<16x32xf32>
      %c0_12 = arith.constant 0 : index
      %c0_13 = arith.constant 0 : index
      %13 = vector.load %arg5[%c0_12, %c0_13] : memref<1x32xf32, #tpu.memory_space<vmem>>, vector<1x32xf32>
      %14 = vector.broadcast %13 : vector<1x32xf32> to vector<16x32xf32>
      %15 = arith.addf %12, %14 : vector<16x32xf32>
      %16 = arith.truncf %15 : vector<16x32xf32> to vector<16x32xbf16>
      %c0_14 = arith.constant 0 : index
      %c0_15 = arith.constant 0 : index
      %17 = vector.load %arg6[%c0_14, %c0_15] : memref<16x32xbf16, #tpu.memory_space<vmem>>, vector<16x32xbf16>
      tpu.vector_store %arg6[%c0_14, %c0_15], %16 {strides = array<i32>} : memref<16x32xbf16, #tpu.memory_space<vmem>>, vector<16x32xbf16>,
    } else {
    }
    return
  }
  func.func @transform_0(%arg0: i32, %arg1: i32, %arg2: i32) -> (i32, i32) {
    %c0_i32 = arith.constant 0 : i32
    return %arg0, %arg2 : i32, i32
  }
  func.func @transform_1(%arg0: i32, %arg1: i32, %arg2: i32) -> (i32, i32) {
    %c0_i32 = arith.constant 0 : i32
    return %arg2, %arg1 : i32, i32
  }
  func.func @transform_2(%arg0: i32, %arg1: i32, %arg2: i32) -> (i32, i32) {
    %c0_i32 = arith.constant 0 : i32
    %c0_i32_0 = arith.constant 0 : i32
    return %c0_i32, %arg1 : i32, i32
  }
  func.func @transform_3(%arg0: i32, %arg1: i32, %arg2: i32) -> (i32, i32) {
    %c0_i32 = arith.constant 0 : i32
    return %arg0, %arg1 : i32, i32
  }
}

module attributes {stable_mosaic.version = 11 : i64} {
  func.func @_flash_attn_kernel(%arg0: i32, %arg1: i32, %arg2: i32, %arg3: memref<1x8x96xbf16, #tpu.memory_space<vmem>>, %arg4: memref<1x8x96xbf16, #tpu.memory_space<vmem>>, %arg5: memref<1x1x8xf32, #tpu.memory_space<vmem>>, %arg6: memref<1x8x32xbf16, #tpu.memory_space<vmem>>, %arg7: memref<4x8x1xf32, #tpu.memory_space<vmem>>, %arg8: memref<4x8x1xf32, #tpu.memory_space<vmem>>, %arg9: memref<4x8x8xf32, #tpu.memory_space<vmem>>) attributes {dimension_semantics = [#tpu.dimension_semantics<parallel>, #tpu.dimension_semantics<parallel>, #tpu.dimension_semantics<arbitrary>], iteration_bounds = array<i64: 2, 1, 1>, scalar_prefetch = 0 : i64, scratch_operands = 3 : i64, tpu.core_type = #tpu.core_type<tc>, window_params = [{transform_indices = @transform_0, window_bounds = array<i64: 1, 8, 96>}, {transform_indices = @transform_1, window_bounds = array<i64: 1, 8, 96>}, {transform_indices = @transform_2, window_bounds = array<i64: 1, 1, 8>}, {transform_indices = @transform_3, window_bounds = array<i64: 1, 8, 32>}]} {
    %c0_i32 = arith.constant 0 : i32
    %0 = arith.cmpi eq, %arg2, %c0_i32 : i32
    %1 = arith.extui %0 : i1 to i32
    %c0_i32_0 = arith.constant 0 : i32
    %2 = arith.cmpi ne, %1, %c0_i32_0 : i32
    scf.if %2 {
      %cst_101 = arith.constant 0xFF800000 : f32
      %178 = vector.broadcast %cst_101 : f32 to vector<4x8x1xf32>
      %c0_102 = arith.constant 0 : index
      %c0_103 = arith.constant 0 : index
      %c0_104 = arith.constant 0 : index
      %179 = vector.load %arg7[%c0_102, %c0_103, %c0_104] : memref<4x8x1xf32, #tpu.memory_space<vmem>>, vector<4x8x1xf32>
      tpu.vector_store %arg7[%c0_102, %c0_103, %c0_104], %178 {strides = array<i32>} : memref<4x8x1xf32, #tpu.memory_space<vmem>>, vector<4x8x1xf32>,
      %cst_105 = arith.constant 0.000000e+00 : f32
      %180 = vector.broadcast %cst_105 : f32 to vector<4x8x1xf32>
      %c0_106 = arith.constant 0 : index
      %c0_107 = arith.constant 0 : index
      %c0_108 = arith.constant 0 : index
      %181 = vector.load %arg8[%c0_106, %c0_107, %c0_108] : memref<4x8x1xf32, #tpu.memory_space<vmem>>, vector<4x8x1xf32>
      tpu.vector_store %arg8[%c0_106, %c0_107, %c0_108], %180 {strides = array<i32>} : memref<4x8x1xf32, #tpu.memory_space<vmem>>, vector<4x8x1xf32>,
      %cst_109 = arith.constant 0.000000e+00 : f32
      %182 = vector.broadcast %cst_109 : f32 to vector<4x8x8xf32>
      %c0_110 = arith.constant 0 : index
      %c0_111 = arith.constant 0 : index
      %c0_112 = arith.constant 0 : index
      %183 = vector.load %arg9[%c0_110, %c0_111, %c0_112] : memref<4x8x8xf32, #tpu.memory_space<vmem>>, vector<4x8x8xf32>
      tpu.vector_store %arg9[%c0_110, %c0_111, %c0_112], %182 {strides = array<i32>} : memref<4x8x8xf32, #tpu.memory_space<vmem>>, vector<4x8x8xf32>,
    } else {
    }
    %c0 = arith.constant 0 : index
    %c0_1 = arith.constant 0 : index
    %c0_2 = arith.constant 0 : index
    %3 = vector.load %arg3[%c0, %c0_1, %c0_2] : memref<1x8x96xbf16, #tpu.memory_space<vmem>>, vector<1x8x96xbf16>
    %4 = vector.shape_cast %3 : vector<1x8x96xbf16> to vector<8x96xbf16>
    %c0_3 = arith.constant 0 : index
    %c0_4 = arith.constant 0 : index
    %c0_5 = arith.constant 0 : index
    %5 = vector.load %arg4[%c0_3, %c0_4, %c0_5] : memref<1x8x96xbf16, #tpu.memory_space<vmem>>, vector<1x8x96xbf16>
    %6 = vector.shape_cast %5 : vector<1x8x96xbf16> to vector<8x96xbf16>
    %c0_6 = arith.constant 0 : index
    %c0_7 = arith.constant 0 : index
    %c0_8 = arith.constant 0 : index
    %7 = vector.load %arg5[%c0_6, %c0_7, %c0_8] : memref<1x1x8xf32, #tpu.memory_space<vmem>>, vector<1x1x8xf32>
    %8 = vector.shape_cast %7 : vector<1x1x8xf32> to vector<1x8xf32>
    %cst = arith.constant 0.000000e+00 : f32
    %9 = vector.broadcast %cst : f32 to vector<1x8xf32>
    %10 = arith.cmpf ogt, %8, %9 : vector<1x8xf32>
    %c8_i32 = arith.constant 8 : i32
    %11 = arith.muli %arg1, %c8_i32 : i32
    %12 = tpu.iota {dimensions = array<i32: 0>} : vector<8x8xi32>
    %13 = vector.broadcast %11 : i32 to vector<8x8xi32>
    %14 = arith.addi %13, %12 : vector<8x8xi32>
    %c8_i32_9 = arith.constant 8 : i32
    %15 = arith.muli %arg2, %c8_i32_9 : i32
    %16 = tpu.iota {dimensions = array<i32: 1>} : vector<8x8xi32>
    %17 = vector.broadcast %15 : i32 to vector<8x8xi32>
    %18 = arith.addi %17, %16 : vector<8x8xi32>
    %19 = vector.shape_cast %10 : vector<1x8xi1> to vector<1x8xi1>
    %20 = vector.broadcast %19 : vector<1x8xi1> to vector<8x8xi1>
    %21 = arith.cmpi sge, %14, %18 : vector<8x8xi32>
    %22 = arith.andi %20, %21 : vector<8x8xi1>
    %23 = vector.extract_strided_slice %4 {offsets = [0, 0], sizes = [8, 8], strides = [1, 1]} : vector<8x96xbf16> to vector<8x8xbf16>
    %24 = vector.extract_strided_slice %6 {offsets = [0, 32], sizes = [8, 8], strides = [1, 1]} : vector<8x96xbf16> to vector<8x8xbf16>
    %25 = vector.extract_strided_slice %6 {offsets = [0, 64], sizes = [8, 8], strides = [1, 1]} : vector<8x96xbf16> to vector<8x8xbf16>
    %cst_10 = arith.constant dense<0.000000e+00> : vector<8x8xf32>
    %26 = tpu.matmul %23, %24, %cst_10 {dimension_numbers = #tpu.dot_dimension_numbers<[1], [1], [0], [0], [0, 0, 1, 0], [], []>} : vector<8x8xbf16>, vector<8x8xbf16>, vector<8x8xf32> -> vector<8x8xf32>
    %cst_11 = arith.constant -1.000000e+10 : f32
    %27 = vector.broadcast %cst_11 : f32 to vector<8x8xf32>
    %28 = arith.select %22, %26, %27 : vector<8x8xi1>, vector<8x8xf32>
    %c0_12 = arith.constant 0 : index
    %c0_13 = arith.constant 0 : index
    %c0_14 = arith.constant 0 : index
    %29 = vector.load %arg7[%c0_12, %c0_13, %c0_14] : memref<4x8x1xf32, #tpu.memory_space<vmem>>, vector<1x8x1xf32>
    %30 = vector.shape_cast %29 : vector<1x8x1xf32> to vector<8x1xf32>
    %cst_15 = arith.constant dense<0xFF800000> : vector<8xf32>
    %31 = vector.multi_reduction <maximumf>, %28, %cst_15 [1] : vector<8x8xf32> to vector<8xf32>
    %32 = vector.shape_cast %31 : vector<8xf32> to vector<8x1xf32>
    %33 = arith.maximumf %30, %32 : vector<8x1xf32>
    %34 = arith.subf %30, %33 : vector<8x1xf32>
    %35 = math.exp %34 : vector<8x1xf32>
    %36 = vector.broadcast %33 : vector<8x1xf32> to vector<8x8xf32>
    %37 = arith.subf %28, %36 : vector<8x8xf32>
    %38 = math.exp %37 : vector<8x8xf32>
    %c0_16 = arith.constant 0 : index
    %c0_17 = arith.constant 0 : index
    %c0_18 = arith.constant 0 : index
    %39 = vector.load %arg8[%c0_16, %c0_17, %c0_18] : memref<4x8x1xf32, #tpu.memory_space<vmem>>, vector<1x8x1xf32>
    %40 = vector.shape_cast %39 : vector<1x8x1xf32> to vector<8x1xf32>
    %41 = arith.mulf %35, %40 : vector<8x1xf32>
    %cst_19 = arith.constant dense<0.000000e+00> : vector<8xf32>
    %42 = vector.multi_reduction <add>, %38, %cst_19 [1] : vector<8x8xf32> to vector<8xf32>
    %43 = vector.shape_cast %42 : vector<8xf32> to vector<8x1xf32>
    %44 = arith.addf %41, %43 : vector<8x1xf32>
    %c0_20 = arith.constant 0 : index
    %c0_21 = arith.constant 0 : index
    %c0_22 = arith.constant 0 : index
    %45 = vector.load %arg8[%c0_20, %c0_21, %c0_22] : memref<4x8x1xf32, #tpu.memory_space<vmem>>, vector<1x8x1xf32>
    %46 = vector.shape_cast %45 : vector<1x8x1xf32> to vector<8x1xf32>
    %47 = vector.shape_cast %44 : vector<8x1xf32> to vector<1x8x1xf32>
    tpu.vector_store %arg8[%c0_20, %c0_21, %c0_22], %47 {strides = array<i32>} : memref<4x8x1xf32, #tpu.memory_space<vmem>>, vector<1x8x1xf32>,
    %c0_23 = arith.constant 0 : index
    %c0_24 = arith.constant 0 : index
    %c0_25 = arith.constant 0 : index
    %48 = vector.load %arg9[%c0_23, %c0_24, %c0_25] : memref<4x8x8xf32, #tpu.memory_space<vmem>>, vector<1x8x8xf32>
    %49 = vector.shape_cast %48 : vector<1x8x8xf32> to vector<8x8xf32>
    %50 = vector.broadcast %35 : vector<8x1xf32> to vector<8x8xf32>
    %51 = arith.mulf %50, %49 : vector<8x8xf32>
    %52 = arith.truncf %38 : vector<8x8xf32> to vector<8x8xbf16>
    %cst_26 = arith.constant dense<0.000000e+00> : vector<8x8xf32>
    %53 = tpu.matmul %52, %25, %cst_26 {dimension_numbers = #tpu.dot_dimension_numbers<[1], [0], [0], [1], [0, 0, 1, 1], [], []>} : vector<8x8xbf16>, vector<8x8xbf16>, vector<8x8xf32> -> vector<8x8xf32>
    %54 = arith.addf %51, %53 : vector<8x8xf32>
    %c0_27 = arith.constant 0 : index
    %c0_28 = arith.constant 0 : index
    %c0_29 = arith.constant 0 : index
    %55 = vector.load %arg9[%c0_27, %c0_28, %c0_29] : memref<4x8x8xf32, #tpu.memory_space<vmem>>, vector<1x8x8xf32>
    %56 = vector.shape_cast %55 : vector<1x8x8xf32> to vector<8x8xf32>
    %57 = vector.shape_cast %54 : vector<8x8xf32> to vector<1x8x8xf32>
    tpu.vector_store %arg9[%c0_27, %c0_28, %c0_29], %57 {strides = array<i32>} : memref<4x8x8xf32, #tpu.memory_space<vmem>>, vector<1x8x8xf32>,
    %c0_30 = arith.constant 0 : index
    %c0_31 = arith.constant 0 : index
    %c0_32 = arith.constant 0 : index
    %58 = vector.load %arg7[%c0_30, %c0_31, %c0_32] : memref<4x8x1xf32, #tpu.memory_space<vmem>>, vector<1x8x1xf32>
    %59 = vector.shape_cast %58 : vector<1x8x1xf32> to vector<8x1xf32>
    %60 = vector.shape_cast %33 : vector<8x1xf32> to vector<1x8x1xf32>
    tpu.vector_store %arg7[%c0_30, %c0_31, %c0_32], %60 {strides = array<i32>} : memref<4x8x1xf32, #tpu.memory_space<vmem>>, vector<1x8x1xf32>,
    %61 = vector.extract_strided_slice %4 {offsets = [0, 8], sizes = [8, 8], strides = [1, 1]} : vector<8x96xbf16> to vector<8x8xbf16>
    %62 = vector.extract_strided_slice %6 {offsets = [0, 40], sizes = [8, 8], strides = [1, 1]} : vector<8x96xbf16> to vector<8x8xbf16>
    %63 = vector.extract_strided_slice %6 {offsets = [0, 72], sizes = [8, 8], strides = [1, 1]} : vector<8x96xbf16> to vector<8x8xbf16>
    %cst_33 = arith.constant dense<0.000000e+00> : vector<8x8xf32>
    %64 = tpu.matmul %61, %62, %cst_33 {dimension_numbers = #tpu.dot_dimension_numbers<[1], [1], [0], [0], [0, 0, 1, 0], [], []>} : vector<8x8xbf16>, vector<8x8xbf16>, vector<8x8xf32> -> vector<8x8xf32>
    %cst_34 = arith.constant -1.000000e+10 : f32
    %65 = vector.broadcast %cst_34 : f32 to vector<8x8xf32>
    %66 = arith.select %22, %64, %65 : vector<8x8xi1>, vector<8x8xf32>
    %c1 = arith.constant 1 : index
    %c0_35 = arith.constant 0 : index
    %c0_36 = arith.constant 0 : index
    %67 = vector.load %arg7[%c1, %c0_35, %c0_36] : memref<4x8x1xf32, #tpu.memory_space<vmem>>, vector<1x8x1xf32>
    %68 = vector.shape_cast %67 : vector<1x8x1xf32> to vector<8x1xf32>
    %cst_37 = arith.constant dense<0xFF800000> : vector<8xf32>
    %69 = vector.multi_reduction <maximumf>, %66, %cst_37 [1] : vector<8x8xf32> to vector<8xf32>
    %70 = vector.shape_cast %69 : vector<8xf32> to vector<8x1xf32>
    %71 = arith.maximumf %68, %70 : vector<8x1xf32>
    %72 = arith.subf %68, %71 : vector<8x1xf32>
    %73 = math.exp %72 : vector<8x1xf32>
    %74 = vector.broadcast %71 : vector<8x1xf32> to vector<8x8xf32>
    %75 = arith.subf %66, %74 : vector<8x8xf32>
    %76 = math.exp %75 : vector<8x8xf32>
    %c1_38 = arith.constant 1 : index
    %c0_39 = arith.constant 0 : index
    %c0_40 = arith.constant 0 : index
    %77 = vector.load %arg8[%c1_38, %c0_39, %c0_40] : memref<4x8x1xf32, #tpu.memory_space<vmem>>, vector<1x8x1xf32>
    %78 = vector.shape_cast %77 : vector<1x8x1xf32> to vector<8x1xf32>
    %79 = arith.mulf %73, %78 : vector<8x1xf32>
    %cst_41 = arith.constant dense<0.000000e+00> : vector<8xf32>
    %80 = vector.multi_reduction <add>, %76, %cst_41 [1] : vector<8x8xf32> to vector<8xf32>
    %81 = vector.shape_cast %80 : vector<8xf32> to vector<8x1xf32>
    %82 = arith.addf %79, %81 : vector<8x1xf32>
    %c1_42 = arith.constant 1 : index
    %c0_43 = arith.constant 0 : index
    %c0_44 = arith.constant 0 : index
    %83 = vector.load %arg8[%c1_42, %c0_43, %c0_44] : memref<4x8x1xf32, #tpu.memory_space<vmem>>, vector<1x8x1xf32>
    %84 = vector.shape_cast %83 : vector<1x8x1xf32> to vector<8x1xf32>
    %85 = vector.shape_cast %82 : vector<8x1xf32> to vector<1x8x1xf32>
    tpu.vector_store %arg8[%c1_42, %c0_43, %c0_44], %85 {strides = array<i32>} : memref<4x8x1xf32, #tpu.memory_space<vmem>>, vector<1x8x1xf32>,
    %c1_45 = arith.constant 1 : index
    %c0_46 = arith.constant 0 : index
    %c0_47 = arith.constant 0 : index
    %86 = vector.load %arg9[%c1_45, %c0_46, %c0_47] : memref<4x8x8xf32, #tpu.memory_space<vmem>>, vector<1x8x8xf32>
    %87 = vector.shape_cast %86 : vector<1x8x8xf32> to vector<8x8xf32>
    %88 = vector.broadcast %73 : vector<8x1xf32> to vector<8x8xf32>
    %89 = arith.mulf %88, %87 : vector<8x8xf32>
    %90 = arith.truncf %76 : vector<8x8xf32> to vector<8x8xbf16>
    %cst_48 = arith.constant dense<0.000000e+00> : vector<8x8xf32>
    %91 = tpu.matmul %90, %63, %cst_48 {dimension_numbers = #tpu.dot_dimension_numbers<[1], [0], [0], [1], [0, 0, 1, 1], [], []>} : vector<8x8xbf16>, vector<8x8xbf16>, vector<8x8xf32> -> vector<8x8xf32>
    %92 = arith.addf %89, %91 : vector<8x8xf32>
    %c1_49 = arith.constant 1 : index
    %c0_50 = arith.constant 0 : index
    %c0_51 = arith.constant 0 : index
    %93 = vector.load %arg9[%c1_49, %c0_50, %c0_51] : memref<4x8x8xf32, #tpu.memory_space<vmem>>, vector<1x8x8xf32>
    %94 = vector.shape_cast %93 : vector<1x8x8xf32> to vector<8x8xf32>
    %95 = vector.shape_cast %92 : vector<8x8xf32> to vector<1x8x8xf32>
    tpu.vector_store %arg9[%c1_49, %c0_50, %c0_51], %95 {strides = array<i32>} : memref<4x8x8xf32, #tpu.memory_space<vmem>>, vector<1x8x8xf32>,
    %c1_52 = arith.constant 1 : index
    %c0_53 = arith.constant 0 : index
    %c0_54 = arith.constant 0 : index
    %96 = vector.load %arg7[%c1_52, %c0_53, %c0_54] : memref<4x8x1xf32, #tpu.memory_space<vmem>>, vector<1x8x1xf32>
    %97 = vector.shape_cast %96 : vector<1x8x1xf32> to vector<8x1xf32>
    %98 = vector.shape_cast %71 : vector<8x1xf32> to vector<1x8x1xf32>
    tpu.vector_store %arg7[%c1_52, %c0_53, %c0_54], %98 {strides = array<i32>} : memref<4x8x1xf32, #tpu.memory_space<vmem>>, vector<1x8x1xf32>,
    %99 = vector.extract_strided_slice %4 {offsets = [0, 16], sizes = [8, 8], strides = [1, 1]} : vector<8x96xbf16> to vector<8x8xbf16>
    %100 = vector.extract_strided_slice %6 {offsets = [0, 48], sizes = [8, 8], strides = [1, 1]} : vector<8x96xbf16> to vector<8x8xbf16>
    %101 = vector.extract_strided_slice %6 {offsets = [0, 80], sizes = [8, 8], strides = [1, 1]} : vector<8x96xbf16> to vector<8x8xbf16>
    %cst_55 = arith.constant dense<0.000000e+00> : vector<8x8xf32>
    %102 = tpu.matmul %99, %100, %cst_55 {dimension_numbers = #tpu.dot_dimension_numbers<[1], [1], [0], [0], [0, 0, 1, 0], [], []>} : vector<8x8xbf16>, vector<8x8xbf16>, vector<8x8xf32> -> vector<8x8xf32>
    %cst_56 = arith.constant -1.000000e+10 : f32
    %103 = vector.broadcast %cst_56 : f32 to vector<8x8xf32>
    %104 = arith.select %22, %102, %103 : vector<8x8xi1>, vector<8x8xf32>
    %c2 = arith.constant 2 : index
    %c0_57 = arith.constant 0 : index
    %c0_58 = arith.constant 0 : index
    %105 = vector.load %arg7[%c2, %c0_57, %c0_58] : memref<4x8x1xf32, #tpu.memory_space<vmem>>, vector<1x8x1xf32>
    %106 = vector.shape_cast %105 : vector<1x8x1xf32> to vector<8x1xf32>
    %cst_59 = arith.constant dense<0xFF800000> : vector<8xf32>
    %107 = vector.multi_reduction <maximumf>, %104, %cst_59 [1] : vector<8x8xf32> to vector<8xf32>
    %108 = vector.shape_cast %107 : vector<8xf32> to vector<8x1xf32>
    %109 = arith.maximumf %106, %108 : vector<8x1xf32>
    %110 = arith.subf %106, %109 : vector<8x1xf32>
    %111 = math.exp %110 : vector<8x1xf32>
    %112 = vector.broadcast %109 : vector<8x1xf32> to vector<8x8xf32>
    %113 = arith.subf %104, %112 : vector<8x8xf32>
    %114 = math.exp %113 : vector<8x8xf32>
    %c2_60 = arith.constant 2 : index
    %c0_61 = arith.constant 0 : index
    %c0_62 = arith.constant 0 : index
    %115 = vector.load %arg8[%c2_60, %c0_61, %c0_62] : memref<4x8x1xf32, #tpu.memory_space<vmem>>, vector<1x8x1xf32>
    %116 = vector.shape_cast %115 : vector<1x8x1xf32> to vector<8x1xf32>
    %117 = arith.mulf %111, %116 : vector<8x1xf32>
    %cst_63 = arith.constant dense<0.000000e+00> : vector<8xf32>
    %118 = vector.multi_reduction <add>, %114, %cst_63 [1] : vector<8x8xf32> to vector<8xf32>
    %119 = vector.shape_cast %118 : vector<8xf32> to vector<8x1xf32>
    %120 = arith.addf %117, %119 : vector<8x1xf32>
    %c2_64 = arith.constant 2 : index
    %c0_65 = arith.constant 0 : index
    %c0_66 = arith.constant 0 : index
    %121 = vector.load %arg8[%c2_64, %c0_65, %c0_66] : memref<4x8x1xf32, #tpu.memory_space<vmem>>, vector<1x8x1xf32>
    %122 = vector.shape_cast %121 : vector<1x8x1xf32> to vector<8x1xf32>
    %123 = vector.shape_cast %120 : vector<8x1xf32> to vector<1x8x1xf32>
    tpu.vector_store %arg8[%c2_64, %c0_65, %c0_66], %123 {strides = array<i32>} : memref<4x8x1xf32, #tpu.memory_space<vmem>>, vector<1x8x1xf32>,
    %c2_67 = arith.constant 2 : index
    %c0_68 = arith.constant 0 : index
    %c0_69 = arith.constant 0 : index
    %124 = vector.load %arg9[%c2_67, %c0_68, %c0_69] : memref<4x8x8xf32, #tpu.memory_space<vmem>>, vector<1x8x8xf32>
    %125 = vector.shape_cast %124 : vector<1x8x8xf32> to vector<8x8xf32>
    %126 = vector.broadcast %111 : vector<8x1xf32> to vector<8x8xf32>
    %127 = arith.mulf %126, %125 : vector<8x8xf32>
    %128 = arith.truncf %114 : vector<8x8xf32> to vector<8x8xbf16>
    %cst_70 = arith.constant dense<0.000000e+00> : vector<8x8xf32>
    %129 = tpu.matmul %128, %101, %cst_70 {dimension_numbers = #tpu.dot_dimension_numbers<[1], [0], [0], [1], [0, 0, 1, 1], [], []>} : vector<8x8xbf16>, vector<8x8xbf16>, vector<8x8xf32> -> vector<8x8xf32>
    %130 = arith.addf %127, %129 : vector<8x8xf32>
    %c2_71 = arith.constant 2 : index
    %c0_72 = arith.constant 0 : index
    %c0_73 = arith.constant 0 : index
    %131 = vector.load %arg9[%c2_71, %c0_72, %c0_73] : memref<4x8x8xf32, #tpu.memory_space<vmem>>, vector<1x8x8xf32>
    %132 = vector.shape_cast %131 : vector<1x8x8xf32> to vector<8x8xf32>
    %133 = vector.shape_cast %130 : vector<8x8xf32> to vector<1x8x8xf32>
    tpu.vector_store %arg9[%c2_71, %c0_72, %c0_73], %133 {strides = array<i32>} : memref<4x8x8xf32, #tpu.memory_space<vmem>>, vector<1x8x8xf32>,
    %c2_74 = arith.constant 2 : index
    %c0_75 = arith.constant 0 : index
    %c0_76 = arith.constant 0 : index
    %134 = vector.load %arg7[%c2_74, %c0_75, %c0_76] : memref<4x8x1xf32, #tpu.memory_space<vmem>>, vector<1x8x1xf32>
    %135 = vector.shape_cast %134 : vector<1x8x1xf32> to vector<8x1xf32>
    %136 = vector.shape_cast %109 : vector<8x1xf32> to vector<1x8x1xf32>
    tpu.vector_store %arg7[%c2_74, %c0_75, %c0_76], %136 {strides = array<i32>} : memref<4x8x1xf32, #tpu.memory_space<vmem>>, vector<1x8x1xf32>,
    %137 = vector.extract_strided_slice %4 {offsets = [0, 24], sizes = [8, 8], strides = [1, 1]} : vector<8x96xbf16> to vector<8x8xbf16>
    %138 = vector.extract_strided_slice %6 {offsets = [0, 56], sizes = [8, 8], strides = [1, 1]} : vector<8x96xbf16> to vector<8x8xbf16>
    %139 = vector.extract_strided_slice %6 {offsets = [0, 88], sizes = [8, 8], strides = [1, 1]} : vector<8x96xbf16> to vector<8x8xbf16>
    %cst_77 = arith.constant dense<0.000000e+00> : vector<8x8xf32>
    %140 = tpu.matmul %137, %138, %cst_77 {dimension_numbers = #tpu.dot_dimension_numbers<[1], [1], [0], [0], [0, 0, 1, 0], [], []>} : vector<8x8xbf16>, vector<8x8xbf16>, vector<8x8xf32> -> vector<8x8xf32>
    %cst_78 = arith.constant -1.000000e+10 : f32
    %141 = vector.broadcast %cst_78 : f32 to vector<8x8xf32>
    %142 = arith.select %22, %140, %141 : vector<8x8xi1>, vector<8x8xf32>
    %c3 = arith.constant 3 : index
    %c0_79 = arith.constant 0 : index
    %c0_80 = arith.constant 0 : index
    %143 = vector.load %arg7[%c3, %c0_79, %c0_80] : memref<4x8x1xf32, #tpu.memory_space<vmem>>, vector<1x8x1xf32>
    %144 = vector.shape_cast %143 : vector<1x8x1xf32> to vector<8x1xf32>
    %cst_81 = arith.constant dense<0xFF800000> : vector<8xf32>
    %145 = vector.multi_reduction <maximumf>, %142, %cst_81 [1] : vector<8x8xf32> to vector<8xf32>
    %146 = vector.shape_cast %145 : vector<8xf32> to vector<8x1xf32>
    %147 = arith.maximumf %144, %146 : vector<8x1xf32>
    %148 = arith.subf %144, %147 : vector<8x1xf32>
    %149 = math.exp %148 : vector<8x1xf32>
    %150 = vector.broadcast %147 : vector<8x1xf32> to vector<8x8xf32>
    %151 = arith.subf %142, %150 : vector<8x8xf32>
    %152 = math.exp %151 : vector<8x8xf32>
    %c3_82 = arith.constant 3 : index
    %c0_83 = arith.constant 0 : index
    %c0_84 = arith.constant 0 : index
    %153 = vector.load %arg8[%c3_82, %c0_83, %c0_84] : memref<4x8x1xf32, #tpu.memory_space<vmem>>, vector<1x8x1xf32>
    %154 = vector.shape_cast %153 : vector<1x8x1xf32> to vector<8x1xf32>
    %155 = arith.mulf %149, %154 : vector<8x1xf32>
    %cst_85 = arith.constant dense<0.000000e+00> : vector<8xf32>
    %156 = vector.multi_reduction <add>, %152, %cst_85 [1] : vector<8x8xf32> to vector<8xf32>
    %157 = vector.shape_cast %156 : vector<8xf32> to vector<8x1xf32>
    %158 = arith.addf %155, %157 : vector<8x1xf32>
    %c3_86 = arith.constant 3 : index
    %c0_87 = arith.constant 0 : index
    %c0_88 = arith.constant 0 : index
    %159 = vector.load %arg8[%c3_86, %c0_87, %c0_88] : memref<4x8x1xf32, #tpu.memory_space<vmem>>, vector<1x8x1xf32>
    %160 = vector.shape_cast %159 : vector<1x8x1xf32> to vector<8x1xf32>
    %161 = vector.shape_cast %158 : vector<8x1xf32> to vector<1x8x1xf32>
    tpu.vector_store %arg8[%c3_86, %c0_87, %c0_88], %161 {strides = array<i32>} : memref<4x8x1xf32, #tpu.memory_space<vmem>>, vector<1x8x1xf32>,
    %c3_89 = arith.constant 3 : index
    %c0_90 = arith.constant 0 : index
    %c0_91 = arith.constant 0 : index
    %162 = vector.load %arg9[%c3_89, %c0_90, %c0_91] : memref<4x8x8xf32, #tpu.memory_space<vmem>>, vector<1x8x8xf32>
    %163 = vector.shape_cast %162 : vector<1x8x8xf32> to vector<8x8xf32>
    %164 = vector.broadcast %149 : vector<8x1xf32> to vector<8x8xf32>
    %165 = arith.mulf %164, %163 : vector<8x8xf32>
    %166 = arith.truncf %152 : vector<8x8xf32> to vector<8x8xbf16>
    %cst_92 = arith.constant dense<0.000000e+00> : vector<8x8xf32>
    %167 = tpu.matmul %166, %139, %cst_92 {dimension_numbers = #tpu.dot_dimension_numbers<[1], [0], [0], [1], [0, 0, 1, 1], [], []>} : vector<8x8xbf16>, vector<8x8xbf16>, vector<8x8xf32> -> vector<8x8xf32>
    %168 = arith.addf %165, %167 : vector<8x8xf32>
    %c3_93 = arith.constant 3 : index
    %c0_94 = arith.constant 0 : index
    %c0_95 = arith.constant 0 : index
    %169 = vector.load %arg9[%c3_93, %c0_94, %c0_95] : memref<4x8x8xf32, #tpu.memory_space<vmem>>, vector<1x8x8xf32>
    %170 = vector.shape_cast %169 : vector<1x8x8xf32> to vector<8x8xf32>
    %171 = vector.shape_cast %168 : vector<8x8xf32> to vector<1x8x8xf32>
    tpu.vector_store %arg9[%c3_93, %c0_94, %c0_95], %171 {strides = array<i32>} : memref<4x8x8xf32, #tpu.memory_space<vmem>>, vector<1x8x8xf32>,
    %c3_96 = arith.constant 3 : index
    %c0_97 = arith.constant 0 : index
    %c0_98 = arith.constant 0 : index
    %172 = vector.load %arg7[%c3_96, %c0_97, %c0_98] : memref<4x8x1xf32, #tpu.memory_space<vmem>>, vector<1x8x1xf32>
    %173 = vector.shape_cast %172 : vector<1x8x1xf32> to vector<8x1xf32>
    %174 = vector.shape_cast %147 : vector<8x1xf32> to vector<1x8x1xf32>
    tpu.vector_store %arg7[%c3_96, %c0_97, %c0_98], %174 {strides = array<i32>} : memref<4x8x1xf32, #tpu.memory_space<vmem>>, vector<1x8x1xf32>,
    %c0_i32_99 = arith.constant 0 : i32
    %175 = arith.cmpi eq, %arg2, %c0_i32_99 : i32
    %176 = arith.extui %175 : i1 to i32
    %c0_i32_100 = arith.constant 0 : i32
    %177 = arith.cmpi ne, %176, %c0_i32_100 : i32
    scf.if %177 {
      %c0_101 = arith.constant 0 : index
      %c0_102 = arith.constant 0 : index
      %c0_103 = arith.constant 0 : index
      %178 = vector.load %arg8[%c0_101, %c0_102, %c0_103] : memref<4x8x1xf32, #tpu.memory_space<vmem>>, vector<1x8x1xf32>
      %179 = vector.shape_cast %178 : vector<1x8x1xf32> to vector<8x1xf32>
      %180 = tpu.reciprocal %179 {approx = true} : vector<8x1xf32> -> vector<8x1xf32>
      %c0_104 = arith.constant 0 : index
      %c0_105 = arith.constant 0 : index
      %c0_106 = arith.constant 0 : index
      %181 = vector.load %arg9[%c0_104, %c0_105, %c0_106] : memref<4x8x8xf32, #tpu.memory_space<vmem>>, vector<1x8x8xf32>
      %182 = vector.shape_cast %181 : vector<1x8x8xf32> to vector<8x8xf32>
      %183 = vector.broadcast %180 : vector<8x1xf32> to vector<8x8xf32>
      %184 = arith.mulf %182, %183 : vector<8x8xf32>
      %c1_107 = arith.constant 1 : index
      %c0_108 = arith.constant 0 : index
      %c0_109 = arith.constant 0 : index
      %185 = vector.load %arg8[%c1_107, %c0_108, %c0_109] : memref<4x8x1xf32, #tpu.memory_space<vmem>>, vector<1x8x1xf32>
      %186 = vector.shape_cast %185 : vector<1x8x1xf32> to vector<8x1xf32>
      %187 = tpu.reciprocal %186 {approx = true} : vector<8x1xf32> -> vector<8x1xf32>
      %c1_110 = arith.constant 1 : index
      %c0_111 = arith.constant 0 : index
      %c0_112 = arith.constant 0 : index
      %188 = vector.load %arg9[%c1_110, %c0_111, %c0_112] : memref<4x8x8xf32, #tpu.memory_space<vmem>>, vector<1x8x8xf32>
      %189 = vector.shape_cast %188 : vector<1x8x8xf32> to vector<8x8xf32>
      %190 = vector.broadcast %187 : vector<8x1xf32> to vector<8x8xf32>
      %191 = arith.mulf %189, %190 : vector<8x8xf32>
      %c2_113 = arith.constant 2 : index
      %c0_114 = arith.constant 0 : index
      %c0_115 = arith.constant 0 : index
      %192 = vector.load %arg8[%c2_113, %c0_114, %c0_115] : memref<4x8x1xf32, #tpu.memory_space<vmem>>, vector<1x8x1xf32>
      %193 = vector.shape_cast %192 : vector<1x8x1xf32> to vector<8x1xf32>
      %194 = tpu.reciprocal %193 {approx = true} : vector<8x1xf32> -> vector<8x1xf32>
      %c2_116 = arith.constant 2 : index
      %c0_117 = arith.constant 0 : index
      %c0_118 = arith.constant 0 : index
      %195 = vector.load %arg9[%c2_116, %c0_117, %c0_118] : memref<4x8x8xf32, #tpu.memory_space<vmem>>, vector<1x8x8xf32>
      %196 = vector.shape_cast %195 : vector<1x8x8xf32> to vector<8x8xf32>
      %197 = vector.broadcast %194 : vector<8x1xf32> to vector<8x8xf32>
      %198 = arith.mulf %196, %197 : vector<8x8xf32>
      %c3_119 = arith.constant 3 : index
      %c0_120 = arith.constant 0 : index
      %c0_121 = arith.constant 0 : index
      %199 = vector.load %arg8[%c3_119, %c0_120, %c0_121] : memref<4x8x1xf32, #tpu.memory_space<vmem>>, vector<1x8x1xf32>
      %200 = vector.shape_cast %199 : vector<1x8x1xf32> to vector<8x1xf32>
      %201 = tpu.reciprocal %200 {approx = true} : vector<8x1xf32> -> vector<8x1xf32>
      %c3_122 = arith.constant 3 : index
      %c0_123 = arith.constant 0 : index
      %c0_124 = arith.constant 0 : index
      %202 = vector.load %arg9[%c3_122, %c0_123, %c0_124] : memref<4x8x8xf32, #tpu.memory_space<vmem>>, vector<1x8x8xf32>
      %203 = vector.shape_cast %202 : vector<1x8x8xf32> to vector<8x8xf32>
      %204 = vector.broadcast %201 : vector<8x1xf32> to vector<8x8xf32>
      %205 = arith.mulf %203, %204 : vector<8x8xf32>
      %206 = tpu.concatenate %184, %191, %198, %205 in 1 : vector<8x8xf32>, vector<8x8xf32>, vector<8x8xf32>, vector<8x8xf32> -> vector<8x32xf32>
      %207 = arith.truncf %206 : vector<8x32xf32> to vector<8x32xbf16>
      %c0_125 = arith.constant 0 : index
      %c0_126 = arith.constant 0 : index
      %c0_127 = arith.constant 0 : index
      %208 = vector.load %arg6[%c0_125, %c0_126, %c0_127] : memref<1x8x32xbf16, #tpu.memory_space<vmem>>, vector<1x8x32xbf16>
      %209 = vector.shape_cast %208 : vector<1x8x32xbf16> to vector<8x32xbf16>
      %210 = vector.shape_cast %207 : vector<8x32xbf16> to vector<1x8x32xbf16>
      tpu.vector_store %arg6[%c0_125, %c0_126, %c0_127], %210 {strides = array<i32>} : memref<1x8x32xbf16, #tpu.memory_space<vmem>>, vector<1x8x32xbf16>,
    } else {
    }
    return
  }
  func.func @transform_0(%arg0: i32, %arg1: i32, %arg2: i32) -> (i32, i32, i32) {
    %c0_i32 = arith.constant 0 : i32
    %c0_i32_0 = arith.constant 0 : i32
    return %arg0, %arg1, %c0_i32 : i32, i32, i32
  }
  func.func @transform_1(%arg0: i32, %arg1: i32, %arg2: i32) -> (i32, i32, i32) {
    %c0_i32 = arith.constant 0 : i32
    %c0_i32_0 = arith.constant 0 : i32
    return %arg0, %arg2, %c0_i32 : i32, i32, i32
  }
  func.func @transform_2(%arg0: i32, %arg1: i32, %arg2: i32) -> (i32, i32, i32) {
    %c0_i32 = arith.constant 0 : i32
    %c0_i32_0 = arith.constant 0 : i32
    return %arg0, %c0_i32, %arg2 : i32, i32, i32
  }
  func.func @transform_3(%arg0: i32, %arg1: i32, %arg2: i32) -> (i32, i32, i32) {
    %c0_i32 = arith.constant 0 : i32
    %c0_i32_0 = arith.constant 0 : i32
    return %arg0, %arg1, %c0_i32 : i32, i32, i32
  }
}

module attributes {stable_mosaic.version = 11 : i64} {
  func.func @_flash_attn_kernel(%arg0: i32, %arg1: i32, %arg2: i32, %arg3: memref<1x8x32xbf16, #tpu.memory_space<vmem>>, %arg4: memref<1x8x64xbf16, #tpu.memory_space<vmem>>, %arg5: memref<1x1x8xf32, #tpu.memory_space<vmem>>, %arg6: memref<1x8x32xbf16, #tpu.memory_space<vmem>>, %arg7: memref<4x8x1xf32, #tpu.memory_space<vmem>>, %arg8: memref<4x8x1xf32, #tpu.memory_space<vmem>>, %arg9: memref<4x8x8xf32, #tpu.memory_space<vmem>>) attributes {dimension_semantics = [#tpu.dimension_semantics<parallel>, #tpu.dimension_semantics<parallel>, #tpu.dimension_semantics<arbitrary>], iteration_bounds = array<i64: 2, 1, 1>, scalar_prefetch = 0 : i64, scratch_operands = 3 : i64, tpu.core_type = #tpu.core_type<tc>, window_params = [{transform_indices = @transform_0, window_bounds = array<i64: 1, 8, 32>}, {transform_indices = @transform_1, window_bounds = array<i64: 1, 8, 64>}, {transform_indices = @transform_2, window_bounds = array<i64: 1, 1, 8>}, {transform_indices = @transform_3, window_bounds = array<i64: 1, 8, 32>}]} {
    %c0_i32 = arith.constant 0 : i32
    %0 = arith.cmpi eq, %arg2, %c0_i32 : i32
    %1 = arith.extui %0 : i1 to i32
    %c0_i32_0 = arith.constant 0 : i32
    %2 = arith.cmpi ne, %1, %c0_i32_0 : i32
    scf.if %2 {
      %cst_100 = arith.constant 0xFF800000 : f32
      %168 = vector.broadcast %cst_100 : f32 to vector<4x8x1xf32>
      %c0_101 = arith.constant 0 : index
      %c0_102 = arith.constant 0 : index
      %c0_103 = arith.constant 0 : index
      %169 = vector.load %arg7[%c0_101, %c0_102, %c0_103] : memref<4x8x1xf32, #tpu.memory_space<vmem>>, vector<4x8x1xf32>
      tpu.vector_store %arg7[%c0_101, %c0_102, %c0_103], %168 {strides = array<i32>} : memref<4x8x1xf32, #tpu.memory_space<vmem>>, vector<4x8x1xf32>,
      %cst_104 = arith.constant 0.000000e+00 : f32
      %170 = vector.broadcast %cst_104 : f32 to vector<4x8x1xf32>
      %c0_105 = arith.constant 0 : index
      %c0_106 = arith.constant 0 : index
      %c0_107 = arith.constant 0 : index
      %171 = vector.load %arg8[%c0_105, %c0_106, %c0_107] : memref<4x8x1xf32, #tpu.memory_space<vmem>>, vector<4x8x1xf32>
      tpu.vector_store %arg8[%c0_105, %c0_106, %c0_107], %170 {strides = array<i32>} : memref<4x8x1xf32, #tpu.memory_space<vmem>>, vector<4x8x1xf32>,
      %cst_108 = arith.constant 0.000000e+00 : f32
      %172 = vector.broadcast %cst_108 : f32 to vector<4x8x8xf32>
      %c0_109 = arith.constant 0 : index
      %c0_110 = arith.constant 0 : index
      %c0_111 = arith.constant 0 : index
      %173 = vector.load %arg9[%c0_109, %c0_110, %c0_111] : memref<4x8x8xf32, #tpu.memory_space<vmem>>, vector<4x8x8xf32>
      tpu.vector_store %arg9[%c0_109, %c0_110, %c0_111], %172 {strides = array<i32>} : memref<4x8x8xf32, #tpu.memory_space<vmem>>, vector<4x8x8xf32>,
    } else {
    }
    %c0 = arith.constant 0 : index
    %c0_1 = arith.constant 0 : index
    %c0_2 = arith.constant 0 : index
    %3 = vector.load %arg3[%c0, %c0_1, %c0_2] : memref<1x8x32xbf16, #tpu.memory_space<vmem>>, vector<1x8x32xbf16>
    %4 = vector.shape_cast %3 : vector<1x8x32xbf16> to vector<8x32xbf16>
    %c0_3 = arith.constant 0 : index
    %c0_4 = arith.constant 0 : index
    %c0_5 = arith.constant 0 : index
    %5 = vector.load %arg4[%c0_3, %c0_4, %c0_5] : memref<1x8x64xbf16, #tpu.memory_space<vmem>>, vector<1x8x64xbf16>
    %6 = vector.shape_cast %5 : vector<1x8x64xbf16> to vector<8x64xbf16>
    %c0_6 = arith.constant 0 : index
    %c0_7 = arith.constant 0 : index
    %c0_8 = arith.constant 0 : index
    %7 = vector.load %arg5[%c0_6, %c0_7, %c0_8] : memref<1x1x8xf32, #tpu.memory_space<vmem>>, vector<1x1x8xf32>
    %8 = vector.shape_cast %7 : vector<1x1x8xf32> to vector<1x8xf32>
    %cst = arith.constant 0.000000e+00 : f32
    %9 = vector.broadcast %cst : f32 to vector<1x8xf32>
    %10 = arith.cmpf ogt, %8, %9 : vector<1x8xf32>
    %11 = vector.shape_cast %10 : vector<1x8xi1> to vector<1x8xi1>
    %12 = vector.broadcast %11 : vector<1x8xi1> to vector<8x8xi1>
    %13 = vector.extract_strided_slice %4 {offsets = [0, 0], sizes = [8, 8], strides = [1, 1]} : vector<8x32xbf16> to vector<8x8xbf16>
    %14 = vector.extract_strided_slice %6 {offsets = [0, 0], sizes = [8, 8], strides = [1, 1]} : vector<8x64xbf16> to vector<8x8xbf16>
    %15 = vector.extract_strided_slice %6 {offsets = [0, 32], sizes = [8, 8], strides = [1, 1]} : vector<8x64xbf16> to vector<8x8xbf16>
    %cst_9 = arith.constant dense<0.000000e+00> : vector<8x8xf32>
    %16 = tpu.matmul %13, %14, %cst_9 {dimension_numbers = #tpu.dot_dimension_numbers<[1], [1], [0], [0], [0, 0, 1, 0], [], []>} : vector<8x8xbf16>, vector<8x8xbf16>, vector<8x8xf32> -> vector<8x8xf32>
    %cst_10 = arith.constant -1.000000e+10 : f32
    %17 = vector.broadcast %cst_10 : f32 to vector<8x8xf32>
    %18 = arith.select %12, %16, %17 : vector<8x8xi1>, vector<8x8xf32>
    %c0_11 = arith.constant 0 : index
    %c0_12 = arith.constant 0 : index
    %c0_13 = arith.constant 0 : index
    %19 = vector.load %arg7[%c0_11, %c0_12, %c0_13] : memref<4x8x1xf32, #tpu.memory_space<vmem>>, vector<1x8x1xf32>
    %20 = vector.shape_cast %19 : vector<1x8x1xf32> to vector<8x1xf32>
    %cst_14 = arith.constant dense<0xFF800000> : vector<8xf32>
    %21 = vector.multi_reduction <maximumf>, %18, %cst_14 [1] : vector<8x8xf32> to vector<8xf32>
    %22 = vector.shape_cast %21 : vector<8xf32> to vector<8x1xf32>
    %23 = arith.maximumf %20, %22 : vector<8x1xf32>
    %24 = arith.subf %20, %23 : vector<8x1xf32>
    %25 = math.exp %24 : vector<8x1xf32>
    %26 = vector.broadcast %23 : vector<8x1xf32> to vector<8x8xf32>
    %27 = arith.subf %18, %26 : vector<8x8xf32>
    %28 = math.exp %27 : vector<8x8xf32>
    %c0_15 = arith.constant 0 : index
    %c0_16 = arith.constant 0 : index
    %c0_17 = arith.constant 0 : index
    %29 = vector.load %arg8[%c0_15, %c0_16, %c0_17] : memref<4x8x1xf32, #tpu.memory_space<vmem>>, vector<1x8x1xf32>
    %30 = vector.shape_cast %29 : vector<1x8x1xf32> to vector<8x1xf32>
    %31 = arith.mulf %25, %30 : vector<8x1xf32>
    %cst_18 = arith.constant dense<0.000000e+00> : vector<8xf32>
    %32 = vector.multi_reduction <add>, %28, %cst_18 [1] : vector<8x8xf32> to vector<8xf32>
    %33 = vector.shape_cast %32 : vector<8xf32> to vector<8x1xf32>
    %34 = arith.addf %31, %33 : vector<8x1xf32>
    %c0_19 = arith.constant 0 : index
    %c0_20 = arith.constant 0 : index
    %c0_21 = arith.constant 0 : index
    %35 = vector.load %arg8[%c0_19, %c0_20, %c0_21] : memref<4x8x1xf32, #tpu.memory_space<vmem>>, vector<1x8x1xf32>
    %36 = vector.shape_cast %35 : vector<1x8x1xf32> to vector<8x1xf32>
    %37 = vector.shape_cast %34 : vector<8x1xf32> to vector<1x8x1xf32>
    tpu.vector_store %arg8[%c0_19, %c0_20, %c0_21], %37 {strides = array<i32>} : memref<4x8x1xf32, #tpu.memory_space<vmem>>, vector<1x8x1xf32>,
    %c0_22 = arith.constant 0 : index
    %c0_23 = arith.constant 0 : index
    %c0_24 = arith.constant 0 : index
    %38 = vector.load %arg9[%c0_22, %c0_23, %c0_24] : memref<4x8x8xf32, #tpu.memory_space<vmem>>, vector<1x8x8xf32>
    %39 = vector.shape_cast %38 : vector<1x8x8xf32> to vector<8x8xf32>
    %40 = vector.broadcast %25 : vector<8x1xf32> to vector<8x8xf32>
    %41 = arith.mulf %40, %39 : vector<8x8xf32>
    %42 = arith.truncf %28 : vector<8x8xf32> to vector<8x8xbf16>
    %cst_25 = arith.constant dense<0.000000e+00> : vector<8x8xf32>
    %43 = tpu.matmul %42, %15, %cst_25 {dimension_numbers = #tpu.dot_dimension_numbers<[1], [0], [0], [1], [0, 0, 1, 1], [], []>} : vector<8x8xbf16>, vector<8x8xbf16>, vector<8x8xf32> -> vector<8x8xf32>
    %44 = arith.addf %41, %43 : vector<8x8xf32>
    %c0_26 = arith.constant 0 : index
    %c0_27 = arith.constant 0 : index
    %c0_28 = arith.constant 0 : index
    %45 = vector.load %arg9[%c0_26, %c0_27, %c0_28] : memref<4x8x8xf32, #tpu.memory_space<vmem>>, vector<1x8x8xf32>
    %46 = vector.shape_cast %45 : vector<1x8x8xf32> to vector<8x8xf32>
    %47 = vector.shape_cast %44 : vector<8x8xf32> to vector<1x8x8xf32>
    tpu.vector_store %arg9[%c0_26, %c0_27, %c0_28], %47 {strides = array<i32>} : memref<4x8x8xf32, #tpu.memory_space<vmem>>, vector<1x8x8xf32>,
    %c0_29 = arith.constant 0 : index
    %c0_30 = arith.constant 0 : index
    %c0_31 = arith.constant 0 : index
    %48 = vector.load %arg7[%c0_29, %c0_30, %c0_31] : memref<4x8x1xf32, #tpu.memory_space<vmem>>, vector<1x8x1xf32>
    %49 = vector.shape_cast %48 : vector<1x8x1xf32> to vector<8x1xf32>
    %50 = vector.shape_cast %23 : vector<8x1xf32> to vector<1x8x1xf32>
    tpu.vector_store %arg7[%c0_29, %c0_30, %c0_31], %50 {strides = array<i32>} : memref<4x8x1xf32, #tpu.memory_space<vmem>>, vector<1x8x1xf32>,
    %51 = vector.extract_strided_slice %4 {offsets = [0, 8], sizes = [8, 8], strides = [1, 1]} : vector<8x32xbf16> to vector<8x8xbf16>
    %52 = vector.extract_strided_slice %6 {offsets = [0, 8], sizes = [8, 8], strides = [1, 1]} : vector<8x64xbf16> to vector<8x8xbf16>
    %53 = vector.extract_strided_slice %6 {offsets = [0, 40], sizes = [8, 8], strides = [1, 1]} : vector<8x64xbf16> to vector<8x8xbf16>
    %cst_32 = arith.constant dense<0.000000e+00> : vector<8x8xf32>
    %54 = tpu.matmul %51, %52, %cst_32 {dimension_numbers = #tpu.dot_dimension_numbers<[1], [1], [0], [0], [0, 0, 1, 0], [], []>} : vector<8x8xbf16>, vector<8x8xbf16>, vector<8x8xf32> -> vector<8x8xf32>
    %cst_33 = arith.constant -1.000000e+10 : f32
    %55 = vector.broadcast %cst_33 : f32 to vector<8x8xf32>
    %56 = arith.select %12, %54, %55 : vector<8x8xi1>, vector<8x8xf32>
    %c1 = arith.constant 1 : index
    %c0_34 = arith.constant 0 : index
    %c0_35 = arith.constant 0 : index
    %57 = vector.load %arg7[%c1, %c0_34, %c0_35] : memref<4x8x1xf32, #tpu.memory_space<vmem>>, vector<1x8x1xf32>
    %58 = vector.shape_cast %57 : vector<1x8x1xf32> to vector<8x1xf32>
    %cst_36 = arith.constant dense<0xFF800000> : vector<8xf32>
    %59 = vector.multi_reduction <maximumf>, %56, %cst_36 [1] : vector<8x8xf32> to vector<8xf32>
    %60 = vector.shape_cast %59 : vector<8xf32> to vector<8x1xf32>
    %61 = arith.maximumf %58, %60 : vector<8x1xf32>
    %62 = arith.subf %58, %61 : vector<8x1xf32>
    %63 = math.exp %62 : vector<8x1xf32>
    %64 = vector.broadcast %61 : vector<8x1xf32> to vector<8x8xf32>
    %65 = arith.subf %56, %64 : vector<8x8xf32>
    %66 = math.exp %65 : vector<8x8xf32>
    %c1_37 = arith.constant 1 : index
    %c0_38 = arith.constant 0 : index
    %c0_39 = arith.constant 0 : index
    %67 = vector.load %arg8[%c1_37, %c0_38, %c0_39] : memref<4x8x1xf32, #tpu.memory_space<vmem>>, vector<1x8x1xf32>
    %68 = vector.shape_cast %67 : vector<1x8x1xf32> to vector<8x1xf32>
    %69 = arith.mulf %63, %68 : vector<8x1xf32>
    %cst_40 = arith.constant dense<0.000000e+00> : vector<8xf32>
    %70 = vector.multi_reduction <add>, %66, %cst_40 [1] : vector<8x8xf32> to vector<8xf32>
    %71 = vector.shape_cast %70 : vector<8xf32> to vector<8x1xf32>
    %72 = arith.addf %69, %71 : vector<8x1xf32>
    %c1_41 = arith.constant 1 : index
    %c0_42 = arith.constant 0 : index
    %c0_43 = arith.constant 0 : index
    %73 = vector.load %arg8[%c1_41, %c0_42, %c0_43] : memref<4x8x1xf32, #tpu.memory_space<vmem>>, vector<1x8x1xf32>
    %74 = vector.shape_cast %73 : vector<1x8x1xf32> to vector<8x1xf32>
    %75 = vector.shape_cast %72 : vector<8x1xf32> to vector<1x8x1xf32>
    tpu.vector_store %arg8[%c1_41, %c0_42, %c0_43], %75 {strides = array<i32>} : memref<4x8x1xf32, #tpu.memory_space<vmem>>, vector<1x8x1xf32>,
    %c1_44 = arith.constant 1 : index
    %c0_45 = arith.constant 0 : index
    %c0_46 = arith.constant 0 : index
    %76 = vector.load %arg9[%c1_44, %c0_45, %c0_46] : memref<4x8x8xf32, #tpu.memory_space<vmem>>, vector<1x8x8xf32>
    %77 = vector.shape_cast %76 : vector<1x8x8xf32> to vector<8x8xf32>
    %78 = vector.broadcast %63 : vector<8x1xf32> to vector<8x8xf32>
    %79 = arith.mulf %78, %77 : vector<8x8xf32>
    %80 = arith.truncf %66 : vector<8x8xf32> to vector<8x8xbf16>
    %cst_47 = arith.constant dense<0.000000e+00> : vector<8x8xf32>
    %81 = tpu.matmul %80, %53, %cst_47 {dimension_numbers = #tpu.dot_dimension_numbers<[1], [0], [0], [1], [0, 0, 1, 1], [], []>} : vector<8x8xbf16>, vector<8x8xbf16>, vector<8x8xf32> -> vector<8x8xf32>
    %82 = arith.addf %79, %81 : vector<8x8xf32>
    %c1_48 = arith.constant 1 : index
    %c0_49 = arith.constant 0 : index
    %c0_50 = arith.constant 0 : index
    %83 = vector.load %arg9[%c1_48, %c0_49, %c0_50] : memref<4x8x8xf32, #tpu.memory_space<vmem>>, vector<1x8x8xf32>
    %84 = vector.shape_cast %83 : vector<1x8x8xf32> to vector<8x8xf32>
    %85 = vector.shape_cast %82 : vector<8x8xf32> to vector<1x8x8xf32>
    tpu.vector_store %arg9[%c1_48, %c0_49, %c0_50], %85 {strides = array<i32>} : memref<4x8x8xf32, #tpu.memory_space<vmem>>, vector<1x8x8xf32>,
    %c1_51 = arith.constant 1 : index
    %c0_52 = arith.constant 0 : index
    %c0_53 = arith.constant 0 : index
    %86 = vector.load %arg7[%c1_51, %c0_52, %c0_53] : memref<4x8x1xf32, #tpu.memory_space<vmem>>, vector<1x8x1xf32>
    %87 = vector.shape_cast %86 : vector<1x8x1xf32> to vector<8x1xf32>
    %88 = vector.shape_cast %61 : vector<8x1xf32> to vector<1x8x1xf32>
    tpu.vector_store %arg7[%c1_51, %c0_52, %c0_53], %88 {strides = array<i32>} : memref<4x8x1xf32, #tpu.memory_space<vmem>>, vector<1x8x1xf32>,
    %89 = vector.extract_strided_slice %4 {offsets = [0, 16], sizes = [8, 8], strides = [1, 1]} : vector<8x32xbf16> to vector<8x8xbf16>
    %90 = vector.extract_strided_slice %6 {offsets = [0, 16], sizes = [8, 8], strides = [1, 1]} : vector<8x64xbf16> to vector<8x8xbf16>
    %91 = vector.extract_strided_slice %6 {offsets = [0, 48], sizes = [8, 8], strides = [1, 1]} : vector<8x64xbf16> to vector<8x8xbf16>
    %cst_54 = arith.constant dense<0.000000e+00> : vector<8x8xf32>
    %92 = tpu.matmul %89, %90, %cst_54 {dimension_numbers = #tpu.dot_dimension_numbers<[1], [1], [0], [0], [0, 0, 1, 0], [], []>} : vector<8x8xbf16>, vector<8x8xbf16>, vector<8x8xf32> -> vector<8x8xf32>
    %cst_55 = arith.constant -1.000000e+10 : f32
    %93 = vector.broadcast %cst_55 : f32 to vector<8x8xf32>
    %94 = arith.select %12, %92, %93 : vector<8x8xi1>, vector<8x8xf32>
    %c2 = arith.constant 2 : index
    %c0_56 = arith.constant 0 : index
    %c0_57 = arith.constant 0 : index
    %95 = vector.load %arg7[%c2, %c0_56, %c0_57] : memref<4x8x1xf32, #tpu.memory_space<vmem>>, vector<1x8x1xf32>
    %96 = vector.shape_cast %95 : vector<1x8x1xf32> to vector<8x1xf32>
    %cst_58 = arith.constant dense<0xFF800000> : vector<8xf32>
    %97 = vector.multi_reduction <maximumf>, %94, %cst_58 [1] : vector<8x8xf32> to vector<8xf32>
    %98 = vector.shape_cast %97 : vector<8xf32> to vector<8x1xf32>
    %99 = arith.maximumf %96, %98 : vector<8x1xf32>
    %100 = arith.subf %96, %99 : vector<8x1xf32>
    %101 = math.exp %100 : vector<8x1xf32>
    %102 = vector.broadcast %99 : vector<8x1xf32> to vector<8x8xf32>
    %103 = arith.subf %94, %102 : vector<8x8xf32>
    %104 = math.exp %103 : vector<8x8xf32>
    %c2_59 = arith.constant 2 : index
    %c0_60 = arith.constant 0 : index
    %c0_61 = arith.constant 0 : index
    %105 = vector.load %arg8[%c2_59, %c0_60, %c0_61] : memref<4x8x1xf32, #tpu.memory_space<vmem>>, vector<1x8x1xf32>
    %106 = vector.shape_cast %105 : vector<1x8x1xf32> to vector<8x1xf32>
    %107 = arith.mulf %101, %106 : vector<8x1xf32>
    %cst_62 = arith.constant dense<0.000000e+00> : vector<8xf32>
    %108 = vector.multi_reduction <add>, %104, %cst_62 [1] : vector<8x8xf32> to vector<8xf32>
    %109 = vector.shape_cast %108 : vector<8xf32> to vector<8x1xf32>
    %110 = arith.addf %107, %109 : vector<8x1xf32>
    %c2_63 = arith.constant 2 : index
    %c0_64 = arith.constant 0 : index
    %c0_65 = arith.constant 0 : index
    %111 = vector.load %arg8[%c2_63, %c0_64, %c0_65] : memref<4x8x1xf32, #tpu.memory_space<vmem>>, vector<1x8x1xf32>
    %112 = vector.shape_cast %111 : vector<1x8x1xf32> to vector<8x1xf32>
    %113 = vector.shape_cast %110 : vector<8x1xf32> to vector<1x8x1xf32>
    tpu.vector_store %arg8[%c2_63, %c0_64, %c0_65], %113 {strides = array<i32>} : memref<4x8x1xf32, #tpu.memory_space<vmem>>, vector<1x8x1xf32>,
    %c2_66 = arith.constant 2 : index
    %c0_67 = arith.constant 0 : index
    %c0_68 = arith.constant 0 : index
    %114 = vector.load %arg9[%c2_66, %c0_67, %c0_68] : memref<4x8x8xf32, #tpu.memory_space<vmem>>, vector<1x8x8xf32>
    %115 = vector.shape_cast %114 : vector<1x8x8xf32> to vector<8x8xf32>
    %116 = vector.broadcast %101 : vector<8x1xf32> to vector<8x8xf32>
    %117 = arith.mulf %116, %115 : vector<8x8xf32>
    %118 = arith.truncf %104 : vector<8x8xf32> to vector<8x8xbf16>
    %cst_69 = arith.constant dense<0.000000e+00> : vector<8x8xf32>
    %119 = tpu.matmul %118, %91, %cst_69 {dimension_numbers = #tpu.dot_dimension_numbers<[1], [0], [0], [1], [0, 0, 1, 1], [], []>} : vector<8x8xbf16>, vector<8x8xbf16>, vector<8x8xf32> -> vector<8x8xf32>
    %120 = arith.addf %117, %119 : vector<8x8xf32>
    %c2_70 = arith.constant 2 : index
    %c0_71 = arith.constant 0 : index
    %c0_72 = arith.constant 0 : index
    %121 = vector.load %arg9[%c2_70, %c0_71, %c0_72] : memref<4x8x8xf32, #tpu.memory_space<vmem>>, vector<1x8x8xf32>
    %122 = vector.shape_cast %121 : vector<1x8x8xf32> to vector<8x8xf32>
    %123 = vector.shape_cast %120 : vector<8x8xf32> to vector<1x8x8xf32>
    tpu.vector_store %arg9[%c2_70, %c0_71, %c0_72], %123 {strides = array<i32>} : memref<4x8x8xf32, #tpu.memory_space<vmem>>, vector<1x8x8xf32>,
    %c2_73 = arith.constant 2 : index
    %c0_74 = arith.constant 0 : index
    %c0_75 = arith.constant 0 : index
    %124 = vector.load %arg7[%c2_73, %c0_74, %c0_75] : memref<4x8x1xf32, #tpu.memory_space<vmem>>, vector<1x8x1xf32>
    %125 = vector.shape_cast %124 : vector<1x8x1xf32> to vector<8x1xf32>
    %126 = vector.shape_cast %99 : vector<8x1xf32> to vector<1x8x1xf32>
    tpu.vector_store %arg7[%c2_73, %c0_74, %c0_75], %126 {strides = array<i32>} : memref<4x8x1xf32, #tpu.memory_space<vmem>>, vector<1x8x1xf32>,
    %127 = vector.extract_strided_slice %4 {offsets = [0, 24], sizes = [8, 8], strides = [1, 1]} : vector<8x32xbf16> to vector<8x8xbf16>
    %128 = vector.extract_strided_slice %6 {offsets = [0, 24], sizes = [8, 8], strides = [1, 1]} : vector<8x64xbf16> to vector<8x8xbf16>
    %129 = vector.extract_strided_slice %6 {offsets = [0, 56], sizes = [8, 8], strides = [1, 1]} : vector<8x64xbf16> to vector<8x8xbf16>
    %cst_76 = arith.constant dense<0.000000e+00> : vector<8x8xf32>
    %130 = tpu.matmul %127, %128, %cst_76 {dimension_numbers = #tpu.dot_dimension_numbers<[1], [1], [0], [0], [0, 0, 1, 0], [], []>} : vector<8x8xbf16>, vector<8x8xbf16>, vector<8x8xf32> -> vector<8x8xf32>
    %cst_77 = arith.constant -1.000000e+10 : f32
    %131 = vector.broadcast %cst_77 : f32 to vector<8x8xf32>
    %132 = arith.select %12, %130, %131 : vector<8x8xi1>, vector<8x8xf32>
    %c3 = arith.constant 3 : index
    %c0_78 = arith.constant 0 : index
    %c0_79 = arith.constant 0 : index
    %133 = vector.load %arg7[%c3, %c0_78, %c0_79] : memref<4x8x1xf32, #tpu.memory_space<vmem>>, vector<1x8x1xf32>
    %134 = vector.shape_cast %133 : vector<1x8x1xf32> to vector<8x1xf32>
    %cst_80 = arith.constant dense<0xFF800000> : vector<8xf32>
    %135 = vector.multi_reduction <maximumf>, %132, %cst_80 [1] : vector<8x8xf32> to vector<8xf32>
    %136 = vector.shape_cast %135 : vector<8xf32> to vector<8x1xf32>
    %137 = arith.maximumf %134, %136 : vector<8x1xf32>
    %138 = arith.subf %134, %137 : vector<8x1xf32>
    %139 = math.exp %138 : vector<8x1xf32>
    %140 = vector.broadcast %137 : vector<8x1xf32> to vector<8x8xf32>
    %141 = arith.subf %132, %140 : vector<8x8xf32>
    %142 = math.exp %141 : vector<8x8xf32>
    %c3_81 = arith.constant 3 : index
    %c0_82 = arith.constant 0 : index
    %c0_83 = arith.constant 0 : index
    %143 = vector.load %arg8[%c3_81, %c0_82, %c0_83] : memref<4x8x1xf32, #tpu.memory_space<vmem>>, vector<1x8x1xf32>
    %144 = vector.shape_cast %143 : vector<1x8x1xf32> to vector<8x1xf32>
    %145 = arith.mulf %139, %144 : vector<8x1xf32>
    %cst_84 = arith.constant dense<0.000000e+00> : vector<8xf32>
    %146 = vector.multi_reduction <add>, %142, %cst_84 [1] : vector<8x8xf32> to vector<8xf32>
    %147 = vector.shape_cast %146 : vector<8xf32> to vector<8x1xf32>
    %148 = arith.addf %145, %147 : vector<8x1xf32>
    %c3_85 = arith.constant 3 : index
    %c0_86 = arith.constant 0 : index
    %c0_87 = arith.constant 0 : index
    %149 = vector.load %arg8[%c3_85, %c0_86, %c0_87] : memref<4x8x1xf32, #tpu.memory_space<vmem>>, vector<1x8x1xf32>
    %150 = vector.shape_cast %149 : vector<1x8x1xf32> to vector<8x1xf32>
    %151 = vector.shape_cast %148 : vector<8x1xf32> to vector<1x8x1xf32>
    tpu.vector_store %arg8[%c3_85, %c0_86, %c0_87], %151 {strides = array<i32>} : memref<4x8x1xf32, #tpu.memory_space<vmem>>, vector<1x8x1xf32>,
    %c3_88 = arith.constant 3 : index
    %c0_89 = arith.constant 0 : index
    %c0_90 = arith.constant 0 : index
    %152 = vector.load %arg9[%c3_88, %c0_89, %c0_90] : memref<4x8x8xf32, #tpu.memory_space<vmem>>, vector<1x8x8xf32>
    %153 = vector.shape_cast %152 : vector<1x8x8xf32> to vector<8x8xf32>
    %154 = vector.broadcast %139 : vector<8x1xf32> to vector<8x8xf32>
    %155 = arith.mulf %154, %153 : vector<8x8xf32>
    %156 = arith.truncf %142 : vector<8x8xf32> to vector<8x8xbf16>
    %cst_91 = arith.constant dense<0.000000e+00> : vector<8x8xf32>
    %157 = tpu.matmul %156, %129, %cst_91 {dimension_numbers = #tpu.dot_dimension_numbers<[1], [0], [0], [1], [0, 0, 1, 1], [], []>} : vector<8x8xbf16>, vector<8x8xbf16>, vector<8x8xf32> -> vector<8x8xf32>
    %158 = arith.addf %155, %157 : vector<8x8xf32>
    %c3_92 = arith.constant 3 : index
    %c0_93 = arith.constant 0 : index
    %c0_94 = arith.constant 0 : index
    %159 = vector.load %arg9[%c3_92, %c0_93, %c0_94] : memref<4x8x8xf32, #tpu.memory_space<vmem>>, vector<1x8x8xf32>
    %160 = vector.shape_cast %159 : vector<1x8x8xf32> to vector<8x8xf32>
    %161 = vector.shape_cast %158 : vector<8x8xf32> to vector<1x8x8xf32>
    tpu.vector_store %arg9[%c3_92, %c0_93, %c0_94], %161 {strides = array<i32>} : memref<4x8x8xf32, #tpu.memory_space<vmem>>, vector<1x8x8xf32>,
    %c3_95 = arith.constant 3 : index
    %c0_96 = arith.constant 0 : index
    %c0_97 = arith.constant 0 : index
    %162 = vector.load %arg7[%c3_95, %c0_96, %c0_97] : memref<4x8x1xf32, #tpu.memory_space<vmem>>, vector<1x8x1xf32>
    %163 = vector.shape_cast %162 : vector<1x8x1xf32> to vector<8x1xf32>
    %164 = vector.shape_cast %137 : vector<8x1xf32> to vector<1x8x1xf32>
    tpu.vector_store %arg7[%c3_95, %c0_96, %c0_97], %164 {strides = array<i32>} : memref<4x8x1xf32, #tpu.memory_space<vmem>>, vector<1x8x1xf32>,
    %c0_i32_98 = arith.constant 0 : i32
    %165 = arith.cmpi eq, %arg2, %c0_i32_98 : i32
    %166 = arith.extui %165 : i1 to i32
    %c0_i32_99 = arith.constant 0 : i32
    %167 = arith.cmpi ne, %166, %c0_i32_99 : i32
    scf.if %167 {
      %c0_100 = arith.constant 0 : index
      %c0_101 = arith.constant 0 : index
      %c0_102 = arith.constant 0 : index
      %168 = vector.load %arg8[%c0_100, %c0_101, %c0_102] : memref<4x8x1xf32, #tpu.memory_space<vmem>>, vector<1x8x1xf32>
      %169 = vector.shape_cast %168 : vector<1x8x1xf32> to vector<8x1xf32>
      %170 = tpu.reciprocal %169 {approx = true} : vector<8x1xf32> -> vector<8x1xf32>
      %c0_103 = arith.constant 0 : index
      %c0_104 = arith.constant 0 : index
      %c0_105 = arith.constant 0 : index
      %171 = vector.load %arg9[%c0_103, %c0_104, %c0_105] : memref<4x8x8xf32, #tpu.memory_space<vmem>>, vector<1x8x8xf32>
      %172 = vector.shape_cast %171 : vector<1x8x8xf32> to vector<8x8xf32>
      %173 = vector.broadcast %170 : vector<8x1xf32> to vector<8x8xf32>
      %174 = arith.mulf %172, %173 : vector<8x8xf32>
      %c1_106 = arith.constant 1 : index
      %c0_107 = arith.constant 0 : index
      %c0_108 = arith.constant 0 : index
      %175 = vector.load %arg8[%c1_106, %c0_107, %c0_108] : memref<4x8x1xf32, #tpu.memory_space<vmem>>, vector<1x8x1xf32>
      %176 = vector.shape_cast %175 : vector<1x8x1xf32> to vector<8x1xf32>
      %177 = tpu.reciprocal %176 {approx = true} : vector<8x1xf32> -> vector<8x1xf32>
      %c1_109 = arith.constant 1 : index
      %c0_110 = arith.constant 0 : index
      %c0_111 = arith.constant 0 : index
      %178 = vector.load %arg9[%c1_109, %c0_110, %c0_111] : memref<4x8x8xf32, #tpu.memory_space<vmem>>, vector<1x8x8xf32>
      %179 = vector.shape_cast %178 : vector<1x8x8xf32> to vector<8x8xf32>
      %180 = vector.broadcast %177 : vector<8x1xf32> to vector<8x8xf32>
      %181 = arith.mulf %179, %180 : vector<8x8xf32>
      %c2_112 = arith.constant 2 : index
      %c0_113 = arith.constant 0 : index
      %c0_114 = arith.constant 0 : index
      %182 = vector.load %arg8[%c2_112, %c0_113, %c0_114] : memref<4x8x1xf32, #tpu.memory_space<vmem>>, vector<1x8x1xf32>
      %183 = vector.shape_cast %182 : vector<1x8x1xf32> to vector<8x1xf32>
      %184 = tpu.reciprocal %183 {approx = true} : vector<8x1xf32> -> vector<8x1xf32>
      %c2_115 = arith.constant 2 : index
      %c0_116 = arith.constant 0 : index
      %c0_117 = arith.constant 0 : index
      %185 = vector.load %arg9[%c2_115, %c0_116, %c0_117] : memref<4x8x8xf32, #tpu.memory_space<vmem>>, vector<1x8x8xf32>
      %186 = vector.shape_cast %185 : vector<1x8x8xf32> to vector<8x8xf32>
      %187 = vector.broadcast %184 : vector<8x1xf32> to vector<8x8xf32>
      %188 = arith.mulf %186, %187 : vector<8x8xf32>
      %c3_118 = arith.constant 3 : index
      %c0_119 = arith.constant 0 : index
      %c0_120 = arith.constant 0 : index
      %189 = vector.load %arg8[%c3_118, %c0_119, %c0_120] : memref<4x8x1xf32, #tpu.memory_space<vmem>>, vector<1x8x1xf32>
      %190 = vector.shape_cast %189 : vector<1x8x1xf32> to vector<8x1xf32>
      %191 = tpu.reciprocal %190 {approx = true} : vector<8x1xf32> -> vector<8x1xf32>
      %c3_121 = arith.constant 3 : index
      %c0_122 = arith.constant 0 : index
      %c0_123 = arith.constant 0 : index
      %192 = vector.load %arg9[%c3_121, %c0_122, %c0_123] : memref<4x8x8xf32, #tpu.memory_space<vmem>>, vector<1x8x8xf32>
      %193 = vector.shape_cast %192 : vector<1x8x8xf32> to vector<8x8xf32>
      %194 = vector.broadcast %191 : vector<8x1xf32> to vector<8x8xf32>
      %195 = arith.mulf %193, %194 : vector<8x8xf32>
      %196 = tpu.concatenate %174, %181, %188, %195 in 1 : vector<8x8xf32>, vector<8x8xf32>, vector<8x8xf32>, vector<8x8xf32> -> vector<8x32xf32>
      %197 = arith.truncf %196 : vector<8x32xf32> to vector<8x32xbf16>
      %c0_124 = arith.constant 0 : index
      %c0_125 = arith.constant 0 : index
      %c0_126 = arith.constant 0 : index
      %198 = vector.load %arg6[%c0_124, %c0_125, %c0_126] : memref<1x8x32xbf16, #tpu.memory_space<vmem>>, vector<1x8x32xbf16>
      %199 = vector.shape_cast %198 : vector<1x8x32xbf16> to vector<8x32xbf16>
      %200 = vector.shape_cast %197 : vector<8x32xbf16> to vector<1x8x32xbf16>
      tpu.vector_store %arg6[%c0_124, %c0_125, %c0_126], %200 {strides = array<i32>} : memref<1x8x32xbf16, #tpu.memory_space<vmem>>, vector<1x8x32xbf16>,
    } else {
    }
    return
  }
  func.func @transform_0(%arg0: i32, %arg1: i32, %arg2: i32) -> (i32, i32, i32) {
    %c0_i32 = arith.constant 0 : i32
    %c0_i32_0 = arith.constant 0 : i32
    return %arg0, %arg1, %c0_i32 : i32, i32, i32
  }
  func.func @transform_1(%arg0: i32, %arg1: i32, %arg2: i32) -> (i32, i32, i32) {
    %c0_i32 = arith.constant 0 : i32
    %c0_i32_0 = arith.constant 0 : i32
    return %arg0, %arg2, %c0_i32 : i32, i32, i32
  }
  func.func @transform_2(%arg0: i32, %arg1: i32, %arg2: i32) -> (i32, i32, i32) {
    %c0_i32 = arith.constant 0 : i32
    %c0_i32_0 = arith.constant 0 : i32
    return %arg0, %c0_i32, %arg2 : i32, i32, i32
  }
  func.func @transform_3(%arg0: i32, %arg1: i32, %arg2: i32) -> (i32, i32, i32) {
    %c0_i32 = arith.constant 0 : i32
    %c0_i32_0 = arith.constant 0 : i32
    return %arg0, %arg1, %c0_i32 : i32, i32, i32
  }
}

module attributes {stable_mosaic.version = 11 : i64} {
  func.func @_linear_kernel(%arg0: i32, %arg1: i32, %arg2: i32, %arg3: memref<16x32xbf16, #tpu.memory_space<vmem>>, %arg4: memref<32x64xbf16, #tpu.memory_space<vmem>>, %arg5: memref<1x64xf32, #tpu.memory_space<vmem>>, %arg6: memref<16x64xbf16, #tpu.memory_space<vmem>>, %arg7: memref<16x64xf32, #tpu.memory_space<vmem>>) attributes {dimension_semantics = [#tpu.dimension_semantics<parallel>, #tpu.dimension_semantics<parallel>, #tpu.dimension_semantics<arbitrary>], iteration_bounds = array<i64: 1, 1, 1>, scalar_prefetch = 0 : i64, scratch_operands = 1 : i64, tpu.core_type = #tpu.core_type<tc>, window_params = [{transform_indices = @transform_0, window_bounds = array<i64: 16, 32>}, {transform_indices = @transform_1, window_bounds = array<i64: 32, 64>}, {transform_indices = @transform_2, window_bounds = array<i64: 1, 64>}, {transform_indices = @transform_3, window_bounds = array<i64: 16, 64>}]} {
    %c0_i32 = arith.constant 0 : i32
    %0 = arith.cmpi eq, %arg2, %c0_i32 : i32
    %1 = arith.extui %0 : i1 to i32
    %c0_i32_0 = arith.constant 0 : i32
    %2 = arith.cmpi ne, %1, %c0_i32_0 : i32
    scf.if %2 {
      %cst_10 = arith.constant 0.000000e+00 : f32
      %12 = vector.broadcast %cst_10 : f32 to vector<16x64xf32>
      %c0_11 = arith.constant 0 : index
      %c0_12 = arith.constant 0 : index
      %13 = vector.load %arg7[%c0_11, %c0_12] : memref<16x64xf32, #tpu.memory_space<vmem>>, vector<16x64xf32>
      tpu.vector_store %arg7[%c0_11, %c0_12], %12 {strides = array<i32>} : memref<16x64xf32, #tpu.memory_space<vmem>>, vector<16x64xf32>,
    } else {
    }
    %c0 = arith.constant 0 : index
    %c0_1 = arith.constant 0 : index
    %3 = vector.load %arg7[%c0, %c0_1] : memref<16x64xf32, #tpu.memory_space<vmem>>, vector<16x64xf32>
    %c0_2 = arith.constant 0 : index
    %c0_3 = arith.constant 0 : index
    %4 = vector.load %arg3[%c0_2, %c0_3] : memref<16x32xbf16, #tpu.memory_space<vmem>>, vector<16x32xbf16>
    %c0_4 = arith.constant 0 : index
    %c0_5 = arith.constant 0 : index
    %5 = vector.load %arg4[%c0_4, %c0_5] : memref<32x64xbf16, #tpu.memory_space<vmem>>, vector<32x64xbf16>
    %cst = arith.constant dense<0.000000e+00> : vector<16x64xf32>
    %6 = tpu.matmul %4, %5, %cst {dimension_numbers = #tpu.dot_dimension_numbers<[1], [0], [0], [1], [0, 0, 1, 1], [], []>} : vector<16x32xbf16>, vector<32x64xbf16>, vector<16x64xf32> -> vector<16x64xf32>
    %7 = arith.addf %3, %6 : vector<16x64xf32>
    %c0_6 = arith.constant 0 : index
    %c0_7 = arith.constant 0 : index
    %8 = vector.load %arg7[%c0_6, %c0_7] : memref<16x64xf32, #tpu.memory_space<vmem>>, vector<16x64xf32>
    tpu.vector_store %arg7[%c0_6, %c0_7], %7 {strides = array<i32>} : memref<16x64xf32, #tpu.memory_space<vmem>>, vector<16x64xf32>,
    %c0_i32_8 = arith.constant 0 : i32
    %9 = arith.cmpi eq, %arg2, %c0_i32_8 : i32
    %10 = arith.extui %9 : i1 to i32
    %c0_i32_9 = arith.constant 0 : i32
    %11 = arith.cmpi ne, %10, %c0_i32_9 : i32
    scf.if %11 {
      %c0_10 = arith.constant 0 : index
      %c0_11 = arith.constant 0 : index
      %12 = vector.load %arg7[%c0_10, %c0_11] : memref<16x64xf32, #tpu.memory_space<vmem>>, vector<16x64xf32>
      %c0_12 = arith.constant 0 : index
      %c0_13 = arith.constant 0 : index
      %13 = vector.load %arg5[%c0_12, %c0_13] : memref<1x64xf32, #tpu.memory_space<vmem>>, vector<1x64xf32>
      %14 = vector.broadcast %13 : vector<1x64xf32> to vector<16x64xf32>
      %15 = arith.addf %12, %14 : vector<16x64xf32>
      %cst_14 = arith.constant 0.000000e+00 : f32
      %16 = vector.broadcast %cst_14 : f32 to vector<16x64xf32>
      %17 = arith.maximumf %15, %16 : vector<16x64xf32>
      %18 = arith.truncf %17 : vector<16x64xf32> to vector<16x64xbf16>
      %c0_15 = arith.constant 0 : index
      %c0_16 = arith.constant 0 : index
      %19 = vector.load %arg6[%c0_15, %c0_16] : memref<16x64xbf16, #tpu.memory_space<vmem>>, vector<16x64xbf16>
      tpu.vector_store %arg6[%c0_15, %c0_16], %18 {strides = array<i32>} : memref<16x64xbf16, #tpu.memory_space<vmem>>, vector<16x64xbf16>,
    } else {
    }
    return
  }
  func.func @transform_0(%arg0: i32, %arg1: i32, %arg2: i32) -> (i32, i32) {
    %c0_i32 = arith.constant 0 : i32
    return %arg0, %arg2 : i32, i32
  }
  func.func @transform_1(%arg0: i32, %arg1: i32, %arg2: i32) -> (i32, i32) {
    %c0_i32 = arith.constant 0 : i32
    return %arg2, %arg1 : i32, i32
  }
  func.func @transform_2(%arg0: i32, %arg1: i32, %arg2: i32) -> (i32, i32) {
    %c0_i32 = arith.constant 0 : i32
    %c0_i32_0 = arith.constant 0 : i32
    return %c0_i32, %arg1 : i32, i32
  }
  func.func @transform_3(%arg0: i32, %arg1: i32, %arg2: i32) -> (i32, i32) {
    %c0_i32 = arith.constant 0 : i32
    return %arg0, %arg1 : i32, i32
  }
}

module attributes {stable_mosaic.version = 11 : i64} {
  func.func @_linear_ln_kernel(%arg0: i32, %arg1: i32, %arg2: memref<16x32xbf16, #tpu.memory_space<vmem>>, %arg3: memref<32x32xbf16, #tpu.memory_space<vmem>>, %arg4: memref<1x32xf32, #tpu.memory_space<vmem>>, %arg5: memref<16x32xbf16, #tpu.memory_space<vmem>>, %arg6: memref<1x32xf32, #tpu.memory_space<vmem>>, %arg7: memref<1x32xf32, #tpu.memory_space<vmem>>, %arg8: memref<16x32xbf16, #tpu.memory_space<vmem>>, %arg9: memref<16x32xf32, #tpu.memory_space<vmem>>) attributes {dimension_semantics = [#tpu.dimension_semantics<parallel>, #tpu.dimension_semantics<arbitrary>], iteration_bounds = array<i64: 1, 1>, scalar_prefetch = 0 : i64, scratch_operands = 1 : i64, tpu.core_type = #tpu.core_type<tc>, window_params = [{transform_indices = @transform_0, window_bounds = array<i64: 16, 32>}, {transform_indices = @transform_1, window_bounds = array<i64: 32, 32>}, {pipeline_mode = #tpu.pipeline_mode<synchronous>, transform_indices = @transform_2, window_bounds = array<i64: 1, 32>}, {transform_indices = @transform_3, window_bounds = array<i64: 16, 32>}, {pipeline_mode = #tpu.pipeline_mode<synchronous>, transform_indices = @transform_4, window_bounds = array<i64: 1, 32>}, {pipeline_mode = #tpu.pipeline_mode<synchronous>, transform_indices = @transform_5, window_bounds = array<i64: 1, 32>}, {transform_indices = @transform_6, window_bounds = array<i64: 16, 32>}]} {
    %c0_i32 = arith.constant 0 : i32
    %0 = arith.cmpi eq, %arg1, %c0_i32 : i32
    %1 = arith.extui %0 : i1 to i32
    %c0_i32_0 = arith.constant 0 : i32
    %2 = arith.cmpi ne, %1, %c0_i32_0 : i32
    scf.if %2 {
      %cst_10 = arith.constant 0.000000e+00 : f32
      %12 = vector.broadcast %cst_10 : f32 to vector<16x32xf32>
      %c0_11 = arith.constant 0 : index
      %c0_12 = arith.constant 0 : index
      %13 = vector.load %arg9[%c0_11, %c0_12] : memref<16x32xf32, #tpu.memory_space<vmem>>, vector<16x32xf32>
      tpu.vector_store %arg9[%c0_11, %c0_12], %12 {strides = array<i32>} : memref<16x32xf32, #tpu.memory_space<vmem>>, vector<16x32xf32>,
    } else {
    }
    %c0 = arith.constant 0 : index
    %c0_1 = arith.constant 0 : index
    %3 = vector.load %arg9[%c0, %c0_1] : memref<16x32xf32, #tpu.memory_space<vmem>>, vector<16x32xf32>
    %c0_2 = arith.constant 0 : index
    %c0_3 = arith.constant 0 : index
    %4 = vector.load %arg2[%c0_2, %c0_3] : memref<16x32xbf16, #tpu.memory_space<vmem>>, vector<16x32xbf16>
    %c0_4 = arith.constant 0 : index
    %c0_5 = arith.constant 0 : index
    %5 = vector.load %arg3[%c0_4, %c0_5] : memref<32x32xbf16, #tpu.memory_space<vmem>>, vector<32x32xbf16>
    %cst = arith.constant dense<0.000000e+00> : vector<16x32xf32>
    %6 = tpu.matmul %4, %5, %cst {dimension_numbers = #tpu.dot_dimension_numbers<[1], [0], [0], [1], [0, 0, 1, 1], [], []>} : vector<16x32xbf16>, vector<32x32xbf16>, vector<16x32xf32> -> vector<16x32xf32>
    %7 = arith.addf %3, %6 : vector<16x32xf32>
    %c0_6 = arith.constant 0 : index
    %c0_7 = arith.constant 0 : index
    %8 = vector.load %arg9[%c0_6, %c0_7] : memref<16x32xf32, #tpu.memory_space<vmem>>, vector<16x32xf32>
    tpu.vector_store %arg9[%c0_6, %c0_7], %7 {strides = array<i32>} : memref<16x32xf32, #tpu.memory_space<vmem>>, vector<16x32xf32>,
    %c0_i32_8 = arith.constant 0 : i32
    %9 = arith.cmpi eq, %arg1, %c0_i32_8 : i32
    %10 = arith.extui %9 : i1 to i32
    %c0_i32_9 = arith.constant 0 : i32
    %11 = arith.cmpi ne, %10, %c0_i32_9 : i32
    scf.if %11 {
      %c0_10 = arith.constant 0 : index
      %c0_11 = arith.constant 0 : index
      %12 = vector.load %arg9[%c0_10, %c0_11] : memref<16x32xf32, #tpu.memory_space<vmem>>, vector<16x32xf32>
      %c0_12 = arith.constant 0 : index
      %c0_13 = arith.constant 0 : index
      %13 = vector.load %arg4[%c0_12, %c0_13] : memref<1x32xf32, #tpu.memory_space<vmem>>, vector<1x32xf32>
      %14 = vector.broadcast %13 : vector<1x32xf32> to vector<16x32xf32>
      %15 = arith.addf %12, %14 : vector<16x32xf32>
      %c0_14 = arith.constant 0 : index
      %c0_15 = arith.constant 0 : index
      %16 = vector.load %arg5[%c0_14, %c0_15] : memref<16x32xbf16, #tpu.memory_space<vmem>>, vector<16x32xbf16>
      %17 = arith.extf %16 : vector<16x32xbf16> to vector<16x32xf32>
      %18 = arith.addf %15, %17 : vector<16x32xf32>
      %cst_16 = arith.constant dense<0.000000e+00> : vector<16xf32>
      %19 = vector.multi_reduction <add>, %18, %cst_16 [1] : vector<16x32xf32> to vector<16xf32>
      %20 = vector.shape_cast %19 : vector<16xf32> to vector<16x1xf32>
      %cst_17 = arith.constant 3.200000e+01 : f32
      %21 = vector.broadcast %cst_17 : f32 to vector<16x1xf32>
      %22 = arith.divf %20, %21 : vector<16x1xf32>
      %23 = vector.broadcast %22 : vector<16x1xf32> to vector<16x32xf32>
      %24 = arith.subf %18, %23 : vector<16x32xf32>
      %25 = arith.mulf %24, %24 : vector<16x32xf32>
      %cst_18 = arith.constant dense<0.000000e+00> : vector<16xf32>
      %26 = vector.multi_reduction <add>, %25, %cst_18 [1] : vector<16x32xf32> to vector<16xf32>
      %27 = vector.shape_cast %26 : vector<16xf32> to vector<16x1xf32>
      %cst_19 = arith.constant 3.200000e+01 : f32
      %28 = vector.broadcast %cst_19 : f32 to vector<16x1xf32>
      %29 = arith.divf %27, %28 : vector<16x1xf32>
      %cst_20 = arith.constant 9.99999974E-6 : f32
      %30 = vector.broadcast %cst_20 : f32 to vector<16x1xf32>
      %31 = arith.addf %29, %30 : vector<16x1xf32>
      %32 = math.rsqrt %31 : vector<16x1xf32>
      %33 = vector.broadcast %32 : vector<16x1xf32> to vector<16x32xf32>
      %34 = arith.mulf %24, %33 : vector<16x32xf32>
      %c0_21 = arith.constant 0 : index
      %c0_22 = arith.constant 0 : index
      %35 = vector.load %arg6[%c0_21, %c0_22] : memref<1x32xf32, #tpu.memory_space<vmem>>, vector<1x32xf32>
      %36 = vector.broadcast %35 : vector<1x32xf32> to vector<16x32xf32>
      %37 = arith.mulf %34, %36 : vector<16x32xf32>
      %c0_23 = arith.constant 0 : index
      %c0_24 = arith.constant 0 : index
      %38 = vector.load %arg7[%c0_23, %c0_24] : memref<1x32xf32, #tpu.memory_space<vmem>>, vector<1x32xf32>
      %39 = vector.broadcast %38 : vector<1x32xf32> to vector<16x32xf32>
      %40 = arith.addf %37, %39 : vector<16x32xf32>
      %41 = arith.truncf %40 : vector<16x32xf32> to vector<16x32xbf16>
      %c0_25 = arith.constant 0 : index
      %c0_26 = arith.constant 0 : index
      %42 = vector.load %arg8[%c0_25, %c0_26] : memref<16x32xbf16, #tpu.memory_space<vmem>>, vector<16x32xbf16>
      tpu.vector_store %arg8[%c0_25, %c0_26], %41 {strides = array<i32>} : memref<16x32xbf16, #tpu.memory_space<vmem>>, vector<16x32xbf16>,
    } else {
    }
    return
  }
  func.func @transform_0(%arg0: i32, %arg1: i32) -> (i32, i32) {
    %c0_i32 = arith.constant 0 : i32
    return %arg0, %arg1 : i32, i32
  }
  func.func @transform_1(%arg0: i32, %arg1: i32) -> (i32, i32) {
    %c0_i32 = arith.constant 0 : i32
    %c0_i32_0 = arith.constant 0 : i32
    return %arg1, %c0_i32 : i32, i32
  }
  func.func @transform_2(%arg0: i32, %arg1: i32) -> (i32, i32) {
    %c0_i32 = arith.constant 0 : i32
    %c0_i32_0 = arith.constant 0 : i32
    %c0_i32_1 = arith.constant 0 : i32
    return %c0_i32, %c0_i32_0 : i32, i32
  }
  func.func @transform_3(%arg0: i32, %arg1: i32) -> (i32, i32) {
    %c0_i32 = arith.constant 0 : i32
    %c0_i32_0 = arith.constant 0 : i32
    return %arg0, %c0_i32 : i32, i32
  }
  func.func @transform_4(%arg0: i32, %arg1: i32) -> (i32, i32) {
    %c0_i32 = arith.constant 0 : i32
    %c0_i32_0 = arith.constant 0 : i32
    %c0_i32_1 = arith.constant 0 : i32
    return %c0_i32, %c0_i32_0 : i32, i32
  }
  func.func @transform_5(%arg0: i32, %arg1: i32) -> (i32, i32) {
    %c0_i32 = arith.constant 0 : i32
    %c0_i32_0 = arith.constant 0 : i32
    %c0_i32_1 = arith.constant 0 : i32
    return %c0_i32, %c0_i32_0 : i32, i32
  }
  func.func @transform_6(%arg0: i32, %arg1: i32) -> (i32, i32) {
    %c0_i32 = arith.constant 0 : i32
    %c0_i32_0 = arith.constant 0 : i32
    return %arg0, %c0_i32 : i32, i32
  }
}

module attributes {stable_mosaic.version = 11 : i64} {
  func.func @_linear_kernel(%arg0: i32, %arg1: i32, %arg2: i32, %arg3: memref<16x32xbf16, #tpu.memory_space<vmem>>, %arg4: memref<32x32xbf16, #tpu.memory_space<vmem>>, %arg5: memref<1x32xf32, #tpu.memory_space<vmem>>, %arg6: memref<16x32xbf16, #tpu.memory_space<vmem>>, %arg7: memref<16x32xf32, #tpu.memory_space<vmem>>) attributes {dimension_semantics = [#tpu.dimension_semantics<parallel>, #tpu.dimension_semantics<parallel>, #tpu.dimension_semantics<arbitrary>], iteration_bounds = array<i64: 1, 1, 1>, scalar_prefetch = 0 : i64, scratch_operands = 1 : i64, tpu.core_type = #tpu.core_type<tc>, window_params = [{transform_indices = @transform_0, window_bounds = array<i64: 16, 32>}, {transform_indices = @transform_1, window_bounds = array<i64: 32, 32>}, {transform_indices = @transform_2, window_bounds = array<i64: 1, 32>}, {transform_indices = @transform_3, window_bounds = array<i64: 16, 32>}]} {
    %c0_i32 = arith.constant 0 : i32
    %0 = arith.cmpi eq, %arg2, %c0_i32 : i32
    %1 = arith.extui %0 : i1 to i32
    %c0_i32_0 = arith.constant 0 : i32
    %2 = arith.cmpi ne, %1, %c0_i32_0 : i32
    scf.if %2 {
      %cst_10 = arith.constant 0.000000e+00 : f32
      %12 = vector.broadcast %cst_10 : f32 to vector<16x32xf32>
      %c0_11 = arith.constant 0 : index
      %c0_12 = arith.constant 0 : index
      %13 = vector.load %arg7[%c0_11, %c0_12] : memref<16x32xf32, #tpu.memory_space<vmem>>, vector<16x32xf32>
      tpu.vector_store %arg7[%c0_11, %c0_12], %12 {strides = array<i32>} : memref<16x32xf32, #tpu.memory_space<vmem>>, vector<16x32xf32>,
    } else {
    }
    %c0 = arith.constant 0 : index
    %c0_1 = arith.constant 0 : index
    %3 = vector.load %arg7[%c0, %c0_1] : memref<16x32xf32, #tpu.memory_space<vmem>>, vector<16x32xf32>
    %c0_2 = arith.constant 0 : index
    %c0_3 = arith.constant 0 : index
    %4 = vector.load %arg3[%c0_2, %c0_3] : memref<16x32xbf16, #tpu.memory_space<vmem>>, vector<16x32xbf16>
    %c0_4 = arith.constant 0 : index
    %c0_5 = arith.constant 0 : index
    %5 = vector.load %arg4[%c0_4, %c0_5] : memref<32x32xbf16, #tpu.memory_space<vmem>>, vector<32x32xbf16>
    %cst = arith.constant dense<0.000000e+00> : vector<16x32xf32>
    %6 = tpu.matmul %4, %5, %cst {dimension_numbers = #tpu.dot_dimension_numbers<[1], [0], [0], [1], [0, 0, 1, 1], [], []>} : vector<16x32xbf16>, vector<32x32xbf16>, vector<16x32xf32> -> vector<16x32xf32>
    %7 = arith.addf %3, %6 : vector<16x32xf32>
    %c0_6 = arith.constant 0 : index
    %c0_7 = arith.constant 0 : index
    %8 = vector.load %arg7[%c0_6, %c0_7] : memref<16x32xf32, #tpu.memory_space<vmem>>, vector<16x32xf32>
    tpu.vector_store %arg7[%c0_6, %c0_7], %7 {strides = array<i32>} : memref<16x32xf32, #tpu.memory_space<vmem>>, vector<16x32xf32>,
    %c0_i32_8 = arith.constant 0 : i32
    %9 = arith.cmpi eq, %arg2, %c0_i32_8 : i32
    %10 = arith.extui %9 : i1 to i32
    %c0_i32_9 = arith.constant 0 : i32
    %11 = arith.cmpi ne, %10, %c0_i32_9 : i32
    scf.if %11 {
      %c0_10 = arith.constant 0 : index
      %c0_11 = arith.constant 0 : index
      %12 = vector.load %arg7[%c0_10, %c0_11] : memref<16x32xf32, #tpu.memory_space<vmem>>, vector<16x32xf32>
      %c0_12 = arith.constant 0 : index
      %c0_13 = arith.constant 0 : index
      %13 = vector.load %arg5[%c0_12, %c0_13] : memref<1x32xf32, #tpu.memory_space<vmem>>, vector<1x32xf32>
      %14 = vector.broadcast %13 : vector<1x32xf32> to vector<16x32xf32>
      %15 = arith.addf %12, %14 : vector<16x32xf32>
      %16 = arith.truncf %15 : vector<16x32xf32> to vector<16x32xbf16>
      %c0_14 = arith.constant 0 : index
      %c0_15 = arith.constant 0 : index
      %17 = vector.load %arg6[%c0_14, %c0_15] : memref<16x32xbf16, #tpu.memory_space<vmem>>, vector<16x32xbf16>
      tpu.vector_store %arg6[%c0_14, %c0_15], %16 {strides = array<i32>} : memref<16x32xbf16, #tpu.memory_space<vmem>>, vector<16x32xbf16>,
    } else {
    }
    return
  }
  func.func @transform_0(%arg0: i32, %arg1: i32, %arg2: i32) -> (i32, i32) {
    %c0_i32 = arith.constant 0 : i32
    return %arg0, %arg2 : i32, i32
  }
  func.func @transform_1(%arg0: i32, %arg1: i32, %arg2: i32) -> (i32, i32) {
    %c0_i32 = arith.constant 0 : i32
    return %arg2, %arg1 : i32, i32
  }
  func.func @transform_2(%arg0: i32, %arg1: i32, %arg2: i32) -> (i32, i32) {
    %c0_i32 = arith.constant 0 : i32
    %c0_i32_0 = arith.constant 0 : i32
    return %c0_i32, %arg1 : i32, i32
  }
  func.func @transform_3(%arg0: i32, %arg1: i32, %arg2: i32) -> (i32, i32) {
    %c0_i32 = arith.constant 0 : i32
    return %arg0, %arg1 : i32, i32
  }
}

module attributes {stable_mosaic.version = 11 : i64} {
  func.func @_attn_probs_kernel(%arg0: i32, %arg1: i32, %arg2: memref<1x8x32xbf16, #tpu.memory_space<vmem>>, %arg3: memref<1x8x64xbf16, #tpu.memory_space<vmem>>, %arg4: memref<1x1x8xf32, #tpu.memory_space<vmem>>, %arg5: memref<1x8x32xbf16, #tpu.memory_space<vmem>>, %arg6: memref<1x4x8x8xbf16, #tpu.memory_space<vmem>>) attributes {dimension_semantics = [#tpu.dimension_semantics<parallel>, #tpu.dimension_semantics<parallel>], iteration_bounds = array<i64: 2, 1>, scalar_prefetch = 0 : i64, scratch_operands = 0 : i64, tpu.core_type = #tpu.core_type<tc>, window_params = [{transform_indices = @transform_0, window_bounds = array<i64: 1, 8, 32>}, {transform_indices = @transform_1, window_bounds = array<i64: 1, 8, 64>}, {transform_indices = @transform_2, window_bounds = array<i64: 1, 1, 8>}, {transform_indices = @transform_3, window_bounds = array<i64: 1, 8, 32>}, {transform_indices = @transform_4, window_bounds = array<i64: 1, 4, 8, 8>}]} {
    %c0 = arith.constant 0 : index
    %c0_0 = arith.constant 0 : index
    %c0_1 = arith.constant 0 : index
    %0 = vector.load %arg2[%c0, %c0_0, %c0_1] : memref<1x8x32xbf16, #tpu.memory_space<vmem>>, vector<1x8x32xbf16>
    %1 = vector.shape_cast %0 : vector<1x8x32xbf16> to vector<8x32xbf16>
    %c0_2 = arith.constant 0 : index
    %c0_3 = arith.constant 0 : index
    %c0_4 = arith.constant 0 : index
    %2 = vector.load %arg3[%c0_2, %c0_3, %c0_4] : memref<1x8x64xbf16, #tpu.memory_space<vmem>>, vector<1x8x64xbf16>
    %3 = vector.shape_cast %2 : vector<1x8x64xbf16> to vector<8x64xbf16>
    %c0_5 = arith.constant 0 : index
    %c0_6 = arith.constant 0 : index
    %c0_7 = arith.constant 0 : index
    %4 = vector.load %arg4[%c0_5, %c0_6, %c0_7] : memref<1x1x8xf32, #tpu.memory_space<vmem>>, vector<1x1x8xf32>
    %5 = vector.shape_cast %4 : vector<1x1x8xf32> to vector<1x8xf32>
    %cst = arith.constant 0.000000e+00 : f32
    %6 = vector.broadcast %cst : f32 to vector<1x8xf32>
    %7 = arith.cmpf ogt, %5, %6 : vector<1x8xf32>
    %8 = vector.shape_cast %7 : vector<1x8xi1> to vector<1x8xi1>
    %9 = vector.broadcast %8 : vector<1x8xi1> to vector<8x8xi1>
    %10 = vector.extract_strided_slice %1 {offsets = [0, 0], sizes = [8, 8], strides = [1, 1]} : vector<8x32xbf16> to vector<8x8xbf16>
    %11 = vector.extract_strided_slice %3 {offsets = [0, 0], sizes = [8, 8], strides = [1, 1]} : vector<8x64xbf16> to vector<8x8xbf16>
    %12 = vector.extract_strided_slice %3 {offsets = [0, 32], sizes = [8, 8], strides = [1, 1]} : vector<8x64xbf16> to vector<8x8xbf16>
    %cst_8 = arith.constant dense<0.000000e+00> : vector<8x8xf32>
    %13 = tpu.matmul %10, %11, %cst_8 {dimension_numbers = #tpu.dot_dimension_numbers<[1], [1], [0], [0], [0, 0, 1, 0], [], []>} : vector<8x8xbf16>, vector<8x8xbf16>, vector<8x8xf32> -> vector<8x8xf32>
    %cst_9 = arith.constant -1.000000e+10 : f32
    %14 = vector.broadcast %cst_9 : f32 to vector<8x8xf32>
    %15 = arith.select %9, %13, %14 : vector<8x8xi1>, vector<8x8xf32>
    %cst_10 = arith.constant dense<0xFF800000> : vector<8xf32>
    %16 = vector.multi_reduction <maximumf>, %15, %cst_10 [1] : vector<8x8xf32> to vector<8xf32>
    %17 = vector.shape_cast %16 : vector<8xf32> to vector<8x1xf32>
    %18 = vector.broadcast %17 : vector<8x1xf32> to vector<8x8xf32>
    %19 = arith.subf %15, %18 : vector<8x8xf32>
    %20 = math.exp %19 : vector<8x8xf32>
    %cst_11 = arith.constant dense<0.000000e+00> : vector<8xf32>
    %21 = vector.multi_reduction <add>, %20, %cst_11 [1] : vector<8x8xf32> to vector<8xf32>
    %22 = vector.shape_cast %21 : vector<8xf32> to vector<8x1xf32>
    %23 = vector.broadcast %22 : vector<8x1xf32> to vector<8x8xf32>
    %24 = arith.divf %20, %23 : vector<8x8xf32>
    %25 = arith.truncf %24 : vector<8x8xf32> to vector<8x8xbf16>
    %c0_12 = arith.constant 0 : index
    %c0_13 = arith.constant 0 : index
    %c0_14 = arith.constant 0 : index
    %c0_15 = arith.constant 0 : index
    %26 = vector.load %arg6[%c0_12, %c0_13, %c0_14, %c0_15] : memref<1x4x8x8xbf16, #tpu.memory_space<vmem>>, vector<1x1x8x8xbf16>
    %27 = vector.shape_cast %26 : vector<1x1x8x8xbf16> to vector<8x8xbf16>
    %28 = vector.shape_cast %25 : vector<8x8xbf16> to vector<1x1x8x8xbf16>
    tpu.vector_store %arg6[%c0_12, %c0_13, %c0_14, %c0_15], %28 {strides = array<i32>} : memref<1x4x8x8xbf16, #tpu.memory_space<vmem>>, vector<1x1x8x8xbf16>,
    %29 = arith.truncf %24 : vector<8x8xf32> to vector<8x8xbf16>
    %cst_16 = arith.constant dense<0.000000e+00> : vector<8x8xf32>
    %30 = tpu.matmul %29, %12, %cst_16 {dimension_numbers = #tpu.dot_dimension_numbers<[1], [0], [0], [1], [0, 0, 1, 1], [], []>} : vector<8x8xbf16>, vector<8x8xbf16>, vector<8x8xf32> -> vector<8x8xf32>
    %31 = vector.extract_strided_slice %1 {offsets = [0, 8], sizes = [8, 8], strides = [1, 1]} : vector<8x32xbf16> to vector<8x8xbf16>
    %32 = vector.extract_strided_slice %3 {offsets = [0, 8], sizes = [8, 8], strides = [1, 1]} : vector<8x64xbf16> to vector<8x8xbf16>
    %33 = vector.extract_strided_slice %3 {offsets = [0, 40], sizes = [8, 8], strides = [1, 1]} : vector<8x64xbf16> to vector<8x8xbf16>
    %cst_17 = arith.constant dense<0.000000e+00> : vector<8x8xf32>
    %34 = tpu.matmul %31, %32, %cst_17 {dimension_numbers = #tpu.dot_dimension_numbers<[1], [1], [0], [0], [0, 0, 1, 0], [], []>} : vector<8x8xbf16>, vector<8x8xbf16>, vector<8x8xf32> -> vector<8x8xf32>
    %cst_18 = arith.constant -1.000000e+10 : f32
    %35 = vector.broadcast %cst_18 : f32 to vector<8x8xf32>
    %36 = arith.select %9, %34, %35 : vector<8x8xi1>, vector<8x8xf32>
    %cst_19 = arith.constant dense<0xFF800000> : vector<8xf32>
    %37 = vector.multi_reduction <maximumf>, %36, %cst_19 [1] : vector<8x8xf32> to vector<8xf32>
    %38 = vector.shape_cast %37 : vector<8xf32> to vector<8x1xf32>
    %39 = vector.broadcast %38 : vector<8x1xf32> to vector<8x8xf32>
    %40 = arith.subf %36, %39 : vector<8x8xf32>
    %41 = math.exp %40 : vector<8x8xf32>
    %cst_20 = arith.constant dense<0.000000e+00> : vector<8xf32>
    %42 = vector.multi_reduction <add>, %41, %cst_20 [1] : vector<8x8xf32> to vector<8xf32>
    %43 = vector.shape_cast %42 : vector<8xf32> to vector<8x1xf32>
    %44 = vector.broadcast %43 : vector<8x1xf32> to vector<8x8xf32>
    %45 = arith.divf %41, %44 : vector<8x8xf32>
    %46 = arith.truncf %45 : vector<8x8xf32> to vector<8x8xbf16>
    %c0_21 = arith.constant 0 : index
    %c1 = arith.constant 1 : index
    %c0_22 = arith.constant 0 : index
    %c0_23 = arith.constant 0 : index
    %47 = vector.load %arg6[%c0_21, %c1, %c0_22, %c0_23] : memref<1x4x8x8xbf16, #tpu.memory_space<vmem>>, vector<1x1x8x8xbf16>
    %48 = vector.shape_cast %47 : vector<1x1x8x8xbf16> to vector<8x8xbf16>
    %49 = vector.shape_cast %46 : vector<8x8xbf16> to vector<1x1x8x8xbf16>
    tpu.vector_store %arg6[%c0_21, %c1, %c0_22, %c0_23], %49 {strides = array<i32>} : memref<1x4x8x8xbf16, #tpu.memory_space<vmem>>, vector<1x1x8x8xbf16>,
    %50 = arith.truncf %45 : vector<8x8xf32> to vector<8x8xbf16>
    %cst_24 = arith.constant dense<0.000000e+00> : vector<8x8xf32>
    %51 = tpu.matmul %50, %33, %cst_24 {dimension_numbers = #tpu.dot_dimension_numbers<[1], [0], [0], [1], [0, 0, 1, 1], [], []>} : vector<8x8xbf16>, vector<8x8xbf16>, vector<8x8xf32> -> vector<8x8xf32>
    %52 = vector.extract_strided_slice %1 {offsets = [0, 16], sizes = [8, 8], strides = [1, 1]} : vector<8x32xbf16> to vector<8x8xbf16>
    %53 = vector.extract_strided_slice %3 {offsets = [0, 16], sizes = [8, 8], strides = [1, 1]} : vector<8x64xbf16> to vector<8x8xbf16>
    %54 = vector.extract_strided_slice %3 {offsets = [0, 48], sizes = [8, 8], strides = [1, 1]} : vector<8x64xbf16> to vector<8x8xbf16>
    %cst_25 = arith.constant dense<0.000000e+00> : vector<8x8xf32>
    %55 = tpu.matmul %52, %53, %cst_25 {dimension_numbers = #tpu.dot_dimension_numbers<[1], [1], [0], [0], [0, 0, 1, 0], [], []>} : vector<8x8xbf16>, vector<8x8xbf16>, vector<8x8xf32> -> vector<8x8xf32>
    %cst_26 = arith.constant -1.000000e+10 : f32
    %56 = vector.broadcast %cst_26 : f32 to vector<8x8xf32>
    %57 = arith.select %9, %55, %56 : vector<8x8xi1>, vector<8x8xf32>
    %cst_27 = arith.constant dense<0xFF800000> : vector<8xf32>
    %58 = vector.multi_reduction <maximumf>, %57, %cst_27 [1] : vector<8x8xf32> to vector<8xf32>
    %59 = vector.shape_cast %58 : vector<8xf32> to vector<8x1xf32>
    %60 = vector.broadcast %59 : vector<8x1xf32> to vector<8x8xf32>
    %61 = arith.subf %57, %60 : vector<8x8xf32>
    %62 = math.exp %61 : vector<8x8xf32>
    %cst_28 = arith.constant dense<0.000000e+00> : vector<8xf32>
    %63 = vector.multi_reduction <add>, %62, %cst_28 [1] : vector<8x8xf32> to vector<8xf32>
    %64 = vector.shape_cast %63 : vector<8xf32> to vector<8x1xf32>
    %65 = vector.broadcast %64 : vector<8x1xf32> to vector<8x8xf32>
    %66 = arith.divf %62, %65 : vector<8x8xf32>
    %67 = arith.truncf %66 : vector<8x8xf32> to vector<8x8xbf16>
    %c0_29 = arith.constant 0 : index
    %c2 = arith.constant 2 : index
    %c0_30 = arith.constant 0 : index
    %c0_31 = arith.constant 0 : index
    %68 = vector.load %arg6[%c0_29, %c2, %c0_30, %c0_31] : memref<1x4x8x8xbf16, #tpu.memory_space<vmem>>, vector<1x1x8x8xbf16>
    %69 = vector.shape_cast %68 : vector<1x1x8x8xbf16> to vector<8x8xbf16>
    %70 = vector.shape_cast %67 : vector<8x8xbf16> to vector<1x1x8x8xbf16>
    tpu.vector_store %arg6[%c0_29, %c2, %c0_30, %c0_31], %70 {strides = array<i32>} : memref<1x4x8x8xbf16, #tpu.memory_space<vmem>>, vector<1x1x8x8xbf16>,
    %71 = arith.truncf %66 : vector<8x8xf32> to vector<8x8xbf16>
    %cst_32 = arith.constant dense<0.000000e+00> : vector<8x8xf32>
    %72 = tpu.matmul %71, %54, %cst_32 {dimension_numbers = #tpu.dot_dimension_numbers<[1], [0], [0], [1], [0, 0, 1, 1], [], []>} : vector<8x8xbf16>, vector<8x8xbf16>, vector<8x8xf32> -> vector<8x8xf32>
    %73 = vector.extract_strided_slice %1 {offsets = [0, 24], sizes = [8, 8], strides = [1, 1]} : vector<8x32xbf16> to vector<8x8xbf16>
    %74 = vector.extract_strided_slice %3 {offsets = [0, 24], sizes = [8, 8], strides = [1, 1]} : vector<8x64xbf16> to vector<8x8xbf16>
    %75 = vector.extract_strided_slice %3 {offsets = [0, 56], sizes = [8, 8], strides = [1, 1]} : vector<8x64xbf16> to vector<8x8xbf16>
    %cst_33 = arith.constant dense<0.000000e+00> : vector<8x8xf32>
    %76 = tpu.matmul %73, %74, %cst_33 {dimension_numbers = #tpu.dot_dimension_numbers<[1], [1], [0], [0], [0, 0, 1, 0], [], []>} : vector<8x8xbf16>, vector<8x8xbf16>, vector<8x8xf32> -> vector<8x8xf32>
    %cst_34 = arith.constant -1.000000e+10 : f32
    %77 = vector.broadcast %cst_34 : f32 to vector<8x8xf32>
    %78 = arith.select %9, %76, %77 : vector<8x8xi1>, vector<8x8xf32>
    %cst_35 = arith.constant dense<0xFF800000> : vector<8xf32>
    %79 = vector.multi_reduction <maximumf>, %78, %cst_35 [1] : vector<8x8xf32> to vector<8xf32>
    %80 = vector.shape_cast %79 : vector<8xf32> to vector<8x1xf32>
    %81 = vector.broadcast %80 : vector<8x1xf32> to vector<8x8xf32>
    %82 = arith.subf %78, %81 : vector<8x8xf32>
    %83 = math.exp %82 : vector<8x8xf32>
    %cst_36 = arith.constant dense<0.000000e+00> : vector<8xf32>
    %84 = vector.multi_reduction <add>, %83, %cst_36 [1] : vector<8x8xf32> to vector<8xf32>
    %85 = vector.shape_cast %84 : vector<8xf32> to vector<8x1xf32>
    %86 = vector.broadcast %85 : vector<8x1xf32> to vector<8x8xf32>
    %87 = arith.divf %83, %86 : vector<8x8xf32>
    %88 = arith.truncf %87 : vector<8x8xf32> to vector<8x8xbf16>
    %c0_37 = arith.constant 0 : index
    %c3 = arith.constant 3 : index
    %c0_38 = arith.constant 0 : index
    %c0_39 = arith.constant 0 : index
    %89 = vector.load %arg6[%c0_37, %c3, %c0_38, %c0_39] : memref<1x4x8x8xbf16, #tpu.memory_space<vmem>>, vector<1x1x8x8xbf16>
    %90 = vector.shape_cast %89 : vector<1x1x8x8xbf16> to vector<8x8xbf16>
    %91 = vector.shape_cast %88 : vector<8x8xbf16> to vector<1x1x8x8xbf16>
    tpu.vector_store %arg6[%c0_37, %c3, %c0_38, %c0_39], %91 {strides = array<i32>} : memref<1x4x8x8xbf16, #tpu.memory_space<vmem>>, vector<1x1x8x8xbf16>,
    %92 = arith.truncf %87 : vector<8x8xf32> to vector<8x8xbf16>
    %cst_40 = arith.constant dense<0.000000e+00> : vector<8x8xf32>
    %93 = tpu.matmul %92, %75, %cst_40 {dimension_numbers = #tpu.dot_dimension_numbers<[1], [0], [0], [1], [0, 0, 1, 1], [], []>} : vector<8x8xbf16>, vector<8x8xbf16>, vector<8x8xf32> -> vector<8x8xf32>
    %94 = tpu.concatenate %30, %51, %72, %93 in 1 : vector<8x8xf32>, vector<8x8xf32>, vector<8x8xf32>, vector<8x8xf32> -> vector<8x32xf32>
    %95 = arith.truncf %94 : vector<8x32xf32> to vector<8x32xbf16>
    %c0_41 = arith.constant 0 : index
    %c0_42 = arith.constant 0 : index
    %c0_43 = arith.constant 0 : index
    %96 = vector.load %arg5[%c0_41, %c0_42, %c0_43] : memref<1x8x32xbf16, #tpu.memory_space<vmem>>, vector<1x8x32xbf16>
    %97 = vector.shape_cast %96 : vector<1x8x32xbf16> to vector<8x32xbf16>
    %98 = vector.shape_cast %95 : vector<8x32xbf16> to vector<1x8x32xbf16>
    tpu.vector_store %arg5[%c0_41, %c0_42, %c0_43], %98 {strides = array<i32>} : memref<1x8x32xbf16, #tpu.memory_space<vmem>>, vector<1x8x32xbf16>,
    return
  }
  func.func @transform_0(%arg0: i32, %arg1: i32) -> (i32, i32, i32) {
    %c0_i32 = arith.constant 0 : i32
    %c0_i32_0 = arith.constant 0 : i32
    return %arg0, %arg1, %c0_i32 : i32, i32, i32
  }
  func.func @transform_1(%arg0: i32, %arg1: i32) -> (i32, i32, i32) {
    %c0_i32 = arith.constant 0 : i32
    %c0_i32_0 = arith.constant 0 : i32
    %c0_i32_1 = arith.constant 0 : i32
    return %arg0, %c0_i32, %c0_i32_0 : i32, i32, i32
  }
  func.func @transform_2(%arg0: i32, %arg1: i32) -> (i32, i32, i32) {
    %c0_i32 = arith.constant 0 : i32
    %c0_i32_0 = arith.constant 0 : i32
    %c0_i32_1 = arith.constant 0 : i32
    return %arg0, %c0_i32, %c0_i32_0 : i32, i32, i32
  }
  func.func @transform_3(%arg0: i32, %arg1: i32) -> (i32, i32, i32) {
    %c0_i32 = arith.constant 0 : i32
    %c0_i32_0 = arith.constant 0 : i32
    return %arg0, %arg1, %c0_i32 : i32, i32, i32
  }
  func.func @transform_4(%arg0: i32, %arg1: i32) -> (i32, i32, i32, i32) {
    %c0_i32 = arith.constant 0 : i32
    %c0_i32_0 = arith.constant 0 : i32
    %c0_i32_1 = arith.constant 0 : i32
    return %arg0, %c0_i32, %arg1, %c0_i32_0 : i32, i32, i32, i32
  }
}

module attributes {stable_mosaic.version = 11 : i64} {
  func.func @_linear_ln_kernel(%arg0: i32, %arg1: i32, %arg2: memref<16x32xbf16, #tpu.memory_space<vmem>>, %arg3: memref<32x32xbf16, #tpu.memory_space<vmem>>, %arg4: memref<1x32xf32, #tpu.memory_space<vmem>>, %arg5: memref<16x32xbf16, #tpu.memory_space<vmem>>, %arg6: memref<1x32xf32, #tpu.memory_space<vmem>>, %arg7: memref<1x32xf32, #tpu.memory_space<vmem>>, %arg8: memref<16x32xbf16, #tpu.memory_space<vmem>>, %arg9: memref<16x32xf32, #tpu.memory_space<vmem>>) attributes {dimension_semantics = [#tpu.dimension_semantics<parallel>, #tpu.dimension_semantics<arbitrary>], iteration_bounds = array<i64: 1, 1>, scalar_prefetch = 0 : i64, scratch_operands = 1 : i64, tpu.core_type = #tpu.core_type<tc>, window_params = [{transform_indices = @transform_0, window_bounds = array<i64: 16, 32>}, {transform_indices = @transform_1, window_bounds = array<i64: 32, 32>}, {pipeline_mode = #tpu.pipeline_mode<synchronous>, transform_indices = @transform_2, window_bounds = array<i64: 1, 32>}, {transform_indices = @transform_3, window_bounds = array<i64: 16, 32>}, {pipeline_mode = #tpu.pipeline_mode<synchronous>, transform_indices = @transform_4, window_bounds = array<i64: 1, 32>}, {pipeline_mode = #tpu.pipeline_mode<synchronous>, transform_indices = @transform_5, window_bounds = array<i64: 1, 32>}, {transform_indices = @transform_6, window_bounds = array<i64: 16, 32>}]} {
    %c0_i32 = arith.constant 0 : i32
    %0 = arith.cmpi eq, %arg1, %c0_i32 : i32
    %1 = arith.extui %0 : i1 to i32
    %c0_i32_0 = arith.constant 0 : i32
    %2 = arith.cmpi ne, %1, %c0_i32_0 : i32
    scf.if %2 {
      %cst_10 = arith.constant 0.000000e+00 : f32
      %12 = vector.broadcast %cst_10 : f32 to vector<16x32xf32>
      %c0_11 = arith.constant 0 : index
      %c0_12 = arith.constant 0 : index
      %13 = vector.load %arg9[%c0_11, %c0_12] : memref<16x32xf32, #tpu.memory_space<vmem>>, vector<16x32xf32>
      tpu.vector_store %arg9[%c0_11, %c0_12], %12 {strides = array<i32>} : memref<16x32xf32, #tpu.memory_space<vmem>>, vector<16x32xf32>,
    } else {
    }
    %c0 = arith.constant 0 : index
    %c0_1 = arith.constant 0 : index
    %3 = vector.load %arg9[%c0, %c0_1] : memref<16x32xf32, #tpu.memory_space<vmem>>, vector<16x32xf32>
    %c0_2 = arith.constant 0 : index
    %c0_3 = arith.constant 0 : index
    %4 = vector.load %arg2[%c0_2, %c0_3] : memref<16x32xbf16, #tpu.memory_space<vmem>>, vector<16x32xbf16>
    %c0_4 = arith.constant 0 : index
    %c0_5 = arith.constant 0 : index
    %5 = vector.load %arg3[%c0_4, %c0_5] : memref<32x32xbf16, #tpu.memory_space<vmem>>, vector<32x32xbf16>
    %cst = arith.constant dense<0.000000e+00> : vector<16x32xf32>
    %6 = tpu.matmul %4, %5, %cst {dimension_numbers = #tpu.dot_dimension_numbers<[1], [0], [0], [1], [0, 0, 1, 1], [], []>} : vector<16x32xbf16>, vector<32x32xbf16>, vector<16x32xf32> -> vector<16x32xf32>
    %7 = arith.addf %3, %6 : vector<16x32xf32>
    %c0_6 = arith.constant 0 : index
    %c0_7 = arith.constant 0 : index
    %8 = vector.load %arg9[%c0_6, %c0_7] : memref<16x32xf32, #tpu.memory_space<vmem>>, vector<16x32xf32>
    tpu.vector_store %arg9[%c0_6, %c0_7], %7 {strides = array<i32>} : memref<16x32xf32, #tpu.memory_space<vmem>>, vector<16x32xf32>,
    %c0_i32_8 = arith.constant 0 : i32
    %9 = arith.cmpi eq, %arg1, %c0_i32_8 : i32
    %10 = arith.extui %9 : i1 to i32
    %c0_i32_9 = arith.constant 0 : i32
    %11 = arith.cmpi ne, %10, %c0_i32_9 : i32
    scf.if %11 {
      %c0_10 = arith.constant 0 : index
      %c0_11 = arith.constant 0 : index
      %12 = vector.load %arg9[%c0_10, %c0_11] : memref<16x32xf32, #tpu.memory_space<vmem>>, vector<16x32xf32>
      %c0_12 = arith.constant 0 : index
      %c0_13 = arith.constant 0 : index
      %13 = vector.load %arg4[%c0_12, %c0_13] : memref<1x32xf32, #tpu.memory_space<vmem>>, vector<1x32xf32>
      %14 = vector.broadcast %13 : vector<1x32xf32> to vector<16x32xf32>
      %15 = arith.addf %12, %14 : vector<16x32xf32>
      %c0_14 = arith.constant 0 : index
      %c0_15 = arith.constant 0 : index
      %16 = vector.load %arg5[%c0_14, %c0_15] : memref<16x32xbf16, #tpu.memory_space<vmem>>, vector<16x32xbf16>
      %17 = arith.extf %16 : vector<16x32xbf16> to vector<16x32xf32>
      %18 = arith.addf %15, %17 : vector<16x32xf32>
      %cst_16 = arith.constant dense<0.000000e+00> : vector<16xf32>
      %19 = vector.multi_reduction <add>, %18, %cst_16 [1] : vector<16x32xf32> to vector<16xf32>
      %20 = vector.shape_cast %19 : vector<16xf32> to vector<16x1xf32>
      %cst_17 = arith.constant 3.200000e+01 : f32
      %21 = vector.broadcast %cst_17 : f32 to vector<16x1xf32>
      %22 = arith.divf %20, %21 : vector<16x1xf32>
      %23 = vector.broadcast %22 : vector<16x1xf32> to vector<16x32xf32>
      %24 = arith.subf %18, %23 : vector<16x32xf32>
      %25 = arith.mulf %24, %24 : vector<16x32xf32>
      %cst_18 = arith.constant dense<0.000000e+00> : vector<16xf32>
      %26 = vector.multi_reduction <add>, %25, %cst_18 [1] : vector<16x32xf32> to vector<16xf32>
      %27 = vector.shape_cast %26 : vector<16xf32> to vector<16x1xf32>
      %cst_19 = arith.constant 3.200000e+01 : f32
      %28 = vector.broadcast %cst_19 : f32 to vector<16x1xf32>
      %29 = arith.divf %27, %28 : vector<16x1xf32>
      %cst_20 = arith.constant 9.99999974E-6 : f32
      %30 = vector.broadcast %cst_20 : f32 to vector<16x1xf32>
      %31 = arith.addf %29, %30 : vector<16x1xf32>
      %32 = math.rsqrt %31 : vector<16x1xf32>
      %33 = vector.broadcast %32 : vector<16x1xf32> to vector<16x32xf32>
      %34 = arith.mulf %24, %33 : vector<16x32xf32>
      %c0_21 = arith.constant 0 : index
      %c0_22 = arith.constant 0 : index
      %35 = vector.load %arg6[%c0_21, %c0_22] : memref<1x32xf32, #tpu.memory_space<vmem>>, vector<1x32xf32>
      %36 = vector.broadcast %35 : vector<1x32xf32> to vector<16x32xf32>
      %37 = arith.mulf %34, %36 : vector<16x32xf32>
      %c0_23 = arith.constant 0 : index
      %c0_24 = arith.constant 0 : index
      %38 = vector.load %arg7[%c0_23, %c0_24] : memref<1x32xf32, #tpu.memory_space<vmem>>, vector<1x32xf32>
      %39 = vector.broadcast %38 : vector<1x32xf32> to vector<16x32xf32>
      %40 = arith.addf %37, %39 : vector<16x32xf32>
      %41 = arith.truncf %40 : vector<16x32xf32> to vector<16x32xbf16>
      %c0_25 = arith.constant 0 : index
      %c0_26 = arith.constant 0 : index
      %42 = vector.load %arg8[%c0_25, %c0_26] : memref<16x32xbf16, #tpu.memory_space<vmem>>, vector<16x32xbf16>
      tpu.vector_store %arg8[%c0_25, %c0_26], %41 {strides = array<i32>} : memref<16x32xbf16, #tpu.memory_space<vmem>>, vector<16x32xbf16>,
    } else {
    }
    return
  }
  func.func @transform_0(%arg0: i32, %arg1: i32) -> (i32, i32) {
    %c0_i32 = arith.constant 0 : i32
    return %arg0, %arg1 : i32, i32
  }
  func.func @transform_1(%arg0: i32, %arg1: i32) -> (i32, i32) {
    %c0_i32 = arith.constant 0 : i32
    %c0_i32_0 = arith.constant 0 : i32
    return %arg1, %c0_i32 : i32, i32
  }
  func.func @transform_2(%arg0: i32, %arg1: i32) -> (i32, i32) {
    %c0_i32 = arith.constant 0 : i32
    %c0_i32_0 = arith.constant 0 : i32
    %c0_i32_1 = arith.constant 0 : i32
    return %c0_i32, %c0_i32_0 : i32, i32
  }
  func.func @transform_3(%arg0: i32, %arg1: i32) -> (i32, i32) {
    %c0_i32 = arith.constant 0 : i32
    %c0_i32_0 = arith.constant 0 : i32
    return %arg0, %c0_i32 : i32, i32
  }
  func.func @transform_4(%arg0: i32, %arg1: i32) -> (i32, i32) {
    %c0_i32 = arith.constant 0 : i32
    %c0_i32_0 = arith.constant 0 : i32
    %c0_i32_1 = arith.constant 0 : i32
    return %c0_i32, %c0_i32_0 : i32, i32
  }
  func.func @transform_5(%arg0: i32, %arg1: i32) -> (i32, i32) {
    %c0_i32 = arith.constant 0 : i32
    %c0_i32_0 = arith.constant 0 : i32
    %c0_i32_1 = arith.constant 0 : i32
    return %c0_i32, %c0_i32_0 : i32, i32
  }
  func.func @transform_6(%arg0: i32, %arg1: i32) -> (i32, i32) {
    %c0_i32 = arith.constant 0 : i32
    %c0_i32_0 = arith.constant 0 : i32
    return %arg0, %c0_i32 : i32, i32
  }
}

module attributes {stable_mosaic.version = 11 : i64} {
  func.func @_linear_kernel(%arg0: i32, %arg1: i32, %arg2: i32, %arg3: memref<16x32xbf16, #tpu.memory_space<vmem>>, %arg4: memref<32x16xbf16, #tpu.memory_space<vmem>>, %arg5: memref<1x16xf32, #tpu.memory_space<vmem>>, %arg6: memref<16x16xf32, #tpu.memory_space<vmem>>, %arg7: memref<16x16xf32, #tpu.memory_space<vmem>>) attributes {dimension_semantics = [#tpu.dimension_semantics<parallel>, #tpu.dimension_semantics<parallel>, #tpu.dimension_semantics<arbitrary>], iteration_bounds = array<i64: 1, 1, 1>, scalar_prefetch = 0 : i64, scratch_operands = 1 : i64, tpu.core_type = #tpu.core_type<tc>, window_params = [{transform_indices = @transform_0, window_bounds = array<i64: 16, 32>}, {transform_indices = @transform_1, window_bounds = array<i64: 32, 16>}, {transform_indices = @transform_2, window_bounds = array<i64: 1, 16>}, {transform_indices = @transform_3, window_bounds = array<i64: 16, 16>}]} {
    %c0_i32 = arith.constant 0 : i32
    %0 = arith.cmpi eq, %arg2, %c0_i32 : i32
    %1 = arith.extui %0 : i1 to i32
    %c0_i32_0 = arith.constant 0 : i32
    %2 = arith.cmpi ne, %1, %c0_i32_0 : i32
    scf.if %2 {
      %cst_10 = arith.constant 0.000000e+00 : f32
      %12 = vector.broadcast %cst_10 : f32 to vector<16x16xf32>
      %c0_11 = arith.constant 0 : index
      %c0_12 = arith.constant 0 : index
      %13 = vector.load %arg7[%c0_11, %c0_12] : memref<16x16xf32, #tpu.memory_space<vmem>>, vector<16x16xf32>
      tpu.vector_store %arg7[%c0_11, %c0_12], %12 {strides = array<i32>} : memref<16x16xf32, #tpu.memory_space<vmem>>, vector<16x16xf32>,
    } else {
    }
    %c0 = arith.constant 0 : index
    %c0_1 = arith.constant 0 : index
    %3 = vector.load %arg7[%c0, %c0_1] : memref<16x16xf32, #tpu.memory_space<vmem>>, vector<16x16xf32>
    %c0_2 = arith.constant 0 : index
    %c0_3 = arith.constant 0 : index
    %4 = vector.load %arg3[%c0_2, %c0_3] : memref<16x32xbf16, #tpu.memory_space<vmem>>, vector<16x32xbf16>
    %c0_4 = arith.constant 0 : index
    %c0_5 = arith.constant 0 : index
    %5 = vector.load %arg4[%c0_4, %c0_5] : memref<32x16xbf16, #tpu.memory_space<vmem>>, vector<32x16xbf16>
    %cst = arith.constant dense<0.000000e+00> : vector<16x16xf32>
    %6 = tpu.matmul %4, %5, %cst {dimension_numbers = #tpu.dot_dimension_numbers<[1], [0], [0], [1], [0, 0, 1, 1], [], []>} : vector<16x32xbf16>, vector<32x16xbf16>, vector<16x16xf32> -> vector<16x16xf32>
    %7 = arith.addf %3, %6 : vector<16x16xf32>
    %c0_6 = arith.constant 0 : index
    %c0_7 = arith.constant 0 : index
    %8 = vector.load %arg7[%c0_6, %c0_7] : memref<16x16xf32, #tpu.memory_space<vmem>>, vector<16x16xf32>
    tpu.vector_store %arg7[%c0_6, %c0_7], %7 {strides = array<i32>} : memref<16x16xf32, #tpu.memory_space<vmem>>, vector<16x16xf32>,
    %c0_i32_8 = arith.constant 0 : i32
    %9 = arith.cmpi eq, %arg2, %c0_i32_8 : i32
    %10 = arith.extui %9 : i1 to i32
    %c0_i32_9 = arith.constant 0 : i32
    %11 = arith.cmpi ne, %10, %c0_i32_9 : i32
    scf.if %11 {
      %c0_10 = arith.constant 0 : index
      %c0_11 = arith.constant 0 : index
      %12 = vector.load %arg7[%c0_10, %c0_11] : memref<16x16xf32, #tpu.memory_space<vmem>>, vector<16x16xf32>
      %c0_12 = arith.constant 0 : index
      %c0_13 = arith.constant 0 : index
      %13 = vector.load %arg5[%c0_12, %c0_13] : memref<1x16xf32, #tpu.memory_space<vmem>>, vector<1x16xf32>
      %14 = vector.broadcast %13 : vector<1x16xf32> to vector<16x16xf32>
      %15 = arith.addf %12, %14 : vector<16x16xf32>
      %c0_14 = arith.constant 0 : index
      %c0_15 = arith.constant 0 : index
      %16 = vector.load %arg6[%c0_14, %c0_15] : memref<16x16xf32, #tpu.memory_space<vmem>>, vector<16x16xf32>
      tpu.vector_store %arg6[%c0_14, %c0_15], %15 {strides = array<i32>} : memref<16x16xf32, #tpu.memory_space<vmem>>, vector<16x16xf32>,
    } else {
    }
    return
  }
  func.func @transform_0(%arg0: i32, %arg1: i32, %arg2: i32) -> (i32, i32) {
    %c0_i32 = arith.constant 0 : i32
    return %arg0, %arg2 : i32, i32
  }
  func.func @transform_1(%arg0: i32, %arg1: i32, %arg2: i32) -> (i32, i32) {
    %c0_i32 = arith.constant 0 : i32
    return %arg2, %arg1 : i32, i32
  }
  func.func @transform_2(%arg0: i32, %arg1: i32, %arg2: i32) -> (i32, i32) {
    %c0_i32 = arith.constant 0 : i32
    %c0_i32_0 = arith.constant 0 : i32
    return %c0_i32, %arg1 : i32, i32
  }
  func.func @transform_3(%arg0: i32, %arg1: i32, %arg2: i32) -> (i32, i32) {
    %c0_i32 = arith.constant 0 : i32
    return %arg0, %arg1 : i32, i32
  }
}

</mosaic_0001>

<bundles_post_ra>
// kernel: transformer_forward.31
= control target key start
LH: loop header
LB: loop body
LE: loop exit
PB: predicated region body
PF: predicated region fallthrough
CT: control target
= control target key end

     0   :  { %vm28_vm0 = vcmask 261120   ;;  %v198_v1 = vmov 0.0   ;;  %v199_v22 = vmov 32.0   ;;  %vm160_vm6 = vcmask 257024   ;;  %s271_s1 = inlined_call_operand.vmem [shape: bf16[32,32], index: 1, kind: input, shape index: {}]   ;;  %s272_s0 = inlined_call_operand.vmem [shape: bf16[16,32], index: 0, kind: input, shape index: {}]   ;;  %s273_s2 = inlined_call_operand.vmem [shape: f32[1,32], index: 2, kind: input, shape index: {}]   ;;  %s274_s3 = inlined_call_operand.vmem [shape: bf16[16,32], index: 3, kind: input, shape index: {}]   ;;  %s275_s4 = inlined_call_operand.vmem [shape: f32[1,32], index: 4, kind: input, shape index: {}]   ;;  %s276_s5 = inlined_call_operand.vmem [shape: f32[1,32], index: 5, kind: input, shape index: {}]   ;;  %s277_s6 = inlined_call_operand.vmem [shape: bf16[16,32], index: 6, kind: output, shape index: {}]  }
   0x1   :  { %v182_v0 = vld [vmem:[%s271_s1 + $0x8] sm:$0xff]  ;;  %29 = vst.msk [vmem:[#allocation2] sm:$0xff] %vm28_vm0, %v198_v1  ;;  %v181_v2 = vld [vmem:[%s271_s1] sm:$0xff]  ;;  %192 = vrcp.f32 %v199_v22 }
   0x2   :  { %30 = vst.msk [vmem:[#allocation2 + $0x8] sm:$0xff] %vm28_vm0, %v198_v1  ;;  %66 = vmatpush.bf16.msra.mxu0 %v182_v0  ;;  %v180_v3 = vld [vmem:[%s272_s0] sm:$0xff] }
   0x3   :  { %v184_v8 = vld [vmem:[%s274_s3] sm:$0xff]  }
   0x4   :  { %v189_v9 = vld [vmem:[%s273_s2] ss:$0 sm:$0xff]  ;;  %v185_v12 = vunpack.c.l.bf16 %v184_v8  ;;  %v186_v17 = vunpack.c.h.bf16 %v184_v8 }
   0x5   :  { %v190_v53 = vld [vmem:[%s275_s4] ss:$0 sm:$0xff] }
   0x6   :  { %67 = vmatpush.bf16.msra.mxu0 %v181_v2  ;;  %v191_v56 = vld [vmem:[%s276_s5] ss:$0 sm:$0xff] }
   0x7   :  { %v193_v23 = vpop.eup %192 }
   0x8   :  { %v31_v4 = vld [vmem:[#allocation2] sm:$0xff]  ;;  %v102_v24 = vmul.f32 32.0, %v193_v23  ;;  %vm106_vm1 = vweird.f32 %v193_v23 }
   0x9   :  { %179 = vmatmul.msk.bf16.vlgmr.msra.gmra.mxu0 %vm28_vm0, %v180_v3  ;;  %v32_v7 = vld [vmem:[#allocation2 + $0x8] sm:$0xff] }
   0xa   :  { %v103_v25 = vsub.f32 1.0, %v102_v24 }
   0xc   :  { %v104_v26 = vmul.f32 %v193_v23, %v103_v25 }
   0xe   :  { %v105_v27 = vadd.f32 %v193_v23, %v104_v26 }
  0x10   :  { %v107_v28 = vsel %vm106_vm1, %v193_v23, %v105_v27 }
  0x86   :  { %v69_v5 = vpop.f32.mrf.mxu0 }
  0x87   :  { %v74_v6 = vadd.f32 %v69_v5, %v31_v4 }
  0x89   :  { %76 = vst.msk [vmem:[#allocation2] sm:$0xff] %vm28_vm0, %v74_v6 }
  0x8e   :  { %v71_v10 = vpop.f32.mrf.mxu0 }
  0x8f   :  { %v75_v11 = vadd.f32 %v71_v10, %v32_v7 }
  0x90   :  { %v81_v13 = vld [vmem:[#allocation2] sm:$0xff] }
  0x91   :  { %77 = vst.msk [vmem:[#allocation2 + $0x8] sm:$0xff] %vm28_vm0, %v75_v11  ;;  %v87_v14 = vadd.f32 %v189_v9, %v81_v13 }
  0x93   :  { %v93_v15 = vadd.f32 %v185_v12, %v87_v14 }
  0x95   :  { %v95_v16 = vsel %vm28_vm0, %v93_v15, 0.0 }
  0x96   :  { %96 = vadd.xlane.f32.xlu0 %v95_v16 }
  0x98   :  { %v82_v18 = vld [vmem:[#allocation2 + $0x8] sm:$0xff] }
  0x99   :  { %v88_v19 = vadd.f32 %v189_v9, %v82_v18 }
  0x9b   :  { %v94_v20 = vadd.f32 %v186_v17, %v88_v19 }
  0x9d   :  { %v98_v21 = vsel %vm28_vm0, %v94_v20, 0.0 }
  0x9e   :  { %99 = vadd.xlane.f32.xlu0 %v98_v21 }
 0x109   :  { %v97_v29 = vpop.xlane.xlu0 %96 }
 0x10a   :  { %v108_v30 = vmul.f32 %v107_v28, %v97_v29 }
 0x10c   :  { %v110_v31 = vsub.f32 %v93_v15, %v108_v30 }
 0x10e   :  { %v112_v32 = vmul.f32 %v110_v31, %v110_v31 }
 0x110   :  { %v114_v33 = vsel %vm28_vm0, %v112_v32, 0.0 }
 0x111   :  { %115 = vadd.xlane.f32.xlu1 %v114_v33  ;;  %v100_v34 = vpop.xlane.xlu0 %99 }
 0x112   :  { %v109_v35 = vmul.f32 %v107_v28, %v100_v34 }
 0x114   :  { %v111_v36 = vsub.f32 %v94_v20, %v109_v35 }
 0x116   :  { %v113_v37 = vmul.f32 %v111_v36, %v111_v36 }
 0x118   :  { %v117_v38 = vsel %vm28_vm0, %v113_v37, 0.0 }
 0x119   :  { %118 = vadd.xlane.f32.xlu1 %v117_v38 }
 0x184   :  { %v116_v39 = vpop.xlane.xlu1 %115 }
 0x185   :  { %v120_v40 = vmul.f32 %v116_v39, %v107_v28 }
 0x187   :  { %v122_v41 = vadd.f32 1e-05, %v120_v40 }
 0x189   :  { %194 = vrsqrt.f32 %v122_v41  ;;  %vm130_vm3 = vweird.f32 %v122_v41 }
 0x18c   :  { %v119_v42 = vpop.xlane.xlu1 %118 }
 0x18d   :  { %v121_v43 = vmul.f32 %v119_v42, %v107_v28 }
 0x18f   :  { %v195_v44 = vpop.eup %194  ;;  %v123_v45 = vadd.f32 1e-05, %v121_v43 }
 0x190   :  { %v125_v46 = vmul.f32 %v195_v44, %v122_v41  ;;  %vm131_vm2 = vweird.f32 %v195_v44 }
 0x191   :  { %196 = vrsqrt.f32 %v123_v45  ;;  %vm132_vm4 = vmor %vm130_vm3, %vm131_vm2  ;;  %vm140_vm7 = vweird.f32 %v123_v45 }
 0x192   :  { %v126_v47 = vmul.f32 %v195_v44, %v125_v46 }
 0x194   :  { %v127_v48 = vmul.f32 0.5, %v126_v47 }
 0x196   :  { %v128_v49 = vsub.f32 1.5, %v127_v48 }
 0x197   :  { %v197_v50 = vpop.eup %196 }
 0x198   :  { %v129_v51 = vmul.f32 %v195_v44, %v128_v49  ;;  %v135_v52 = vmul.f32 %v197_v50, %v123_v45  ;;  %vm141_vm5 = vweird.f32 %v197_v50 }
 0x199   :  { %vm142_vm8 = vmor %vm140_vm7, %vm141_vm5 }
 0x19a   :  { %v133_v54 = vsel %vm132_vm4, %v195_v44, %v129_v51  ;;  %v136_v55 = vmul.f32 %v197_v50, %v135_v52 }
 0x19b   :  { %v144_v57 = vmul.f32 %v133_v54, %v110_v31 }
 0x19c   :  { %v137_v58 = vmul.f32 0.5, %v136_v55 }
 0x19d   :  { %v150_v59 = vmul.f32 %v190_v53, %v144_v57 }
 0x19e   :  { %v138_v60 = vsub.f32 1.5, %v137_v58 }
 0x19f   :  { %v156_v61 = vadd.f32 %v191_v56, %v150_v59 }
 0x1a0   :  { %v139_v62 = vmul.f32 %v197_v50, %v138_v60 }
 0x1a1   :  { %v158_v63 = vpack.c.bf16 %v156_v61, %v156_v61 }
 0x1a2   :  { %v143_v0 = vsel %vm142_vm8, %v197_v50, %v139_v62 }
 0x1a3   :  { %161 = vst.msk [vmem:[%s277_s6] sm:$0xf] %vm160_vm6, %v158_v63  ;;  %v145_v1 = vmul.f32 %v143_v0, %v111_v36 }
 0x1a5   :  { %v151_v2 = vmul.f32 %v190_v53, %v145_v1 }
 0x1a7   :  { %v157_v3 = vadd.f32 %v191_v56, %v151_v2 }
 0x1a9   :  { %v159_v4 = vpack.c.bf16 %v157_v3, %v157_v3 }
 0x1ab   :  { %162 = vst.msk [vmem:[%s277_s6 + $0x4] sm:$0xf] %vm160_vm6, %v159_v4 }

// kernel: transformer_forward.29
= control target key start
LH: loop header
LB: loop body
LE: loop exit
PB: predicated region body
PF: predicated region fallthrough
CT: control target
= control target key end

     0   :  { %vm19_vm0 = vcmask 785408   ;;  %v108_v1 = vmov 0.0   ;;  %vm47_vm1 = vcmask 261120   ;;  %vm83_vm2 = vcmask 781312   ;;  %s151_s1 = inlined_call_operand.vmem [shape: bf16[32,96], index: 1, kind: input, shape index: {}]   ;;  %s152_s2 = inlined_call_operand.vmem [shape: f32[1,96], index: 2, kind: input, shape index: {}]   ;;  %s153_s0 = inlined_call_operand.vmem [shape: bf16[16,32], index: 0, kind: input, shape index: {}]   ;;  %s154_s3 = inlined_call_operand.vmem [shape: bf16[16,96], index: 3, kind: output, shape index: {}]  }
   0x1   :  { %v105_v0 = vld [vmem:[%s151_s1 + $0x8] sm:$0xff]  ;;  %20 = vst.msk [vmem:[#allocation2] sm:$0xff] %vm19_vm0, %v108_v1  ;;  %v104_v2 = vld [vmem:[%s151_s1] sm:$0xff] }
   0x2   :  { %21 = vst.msk [vmem:[#allocation2 + $0x8] sm:$0xff] %vm19_vm0, %v108_v1  ;;  %57 = vmatpush.bf16.msra.mxu0 %v105_v0  ;;  %v103_v3 = vld [vmem:[%s153_s0] sm:$0xff] }
   0x3   :  { %v107_v8 = vld [vmem:[%s152_s2] ss:$0 sm:$0xff] }
   0x6   :  { %58 = vmatpush.bf16.msra.mxu0 %v104_v2 }
   0x8   :  { %v22_v4 = vld [vmem:[#allocation2] sm:$0xff] }
   0x9   :  { %102 = vmatmul.msk.bf16.vlgmr.msra.gmra.mxu0 %vm47_vm1, %v103_v3  ;;  %v23_v7 = vld [vmem:[#allocation2 + $0x8] sm:$0xff] }
  0x86   :  { %v60_v5 = vpop.f32.mrf.mxu0 }
  0x87   :  { %v65_v6 = vadd.f32 %v60_v5, %v22_v4 }
  0x89   :  { %68 = vst.msk [vmem:[#allocation2] sm:$0xff] %vm19_vm0, %v65_v6 }
  0x8e   :  { %v62_v9 = vpop.f32.mrf.mxu0 }
  0x8f   :  { %v66_v10 = vadd.f32 %v62_v9, %v23_v7 }
  0x90   :  { %v73_v11 = vld [vmem:[#allocation2] sm:$0xff] }
  0x91   :  { %v79_v12 = vadd.f32 %v107_v8, %v73_v11  ;;  %69 = vst.msk [vmem:[#allocation2 + $0x8] sm:$0xff] %vm19_vm0, %v66_v10 }
  0x93   :  { %v81_v13 = vpack.c.bf16 %v79_v12, %v79_v12 }
  0x95   :  { %84 = vst.msk [vmem:[%s154_s3] sm:$0xf] %vm83_vm2, %v81_v13 }
  0x98   :  { %v74_v14 = vld [vmem:[#allocation2 + $0x8] sm:$0xff] }
  0x99   :  { %v80_v15 = vadd.f32 %v107_v8, %v74_v14 }
  0x9b   :  { %v82_v16 = vpack.c.bf16 %v80_v15, %v80_v15 }
  0x9d   :  { %85 = vst.msk [vmem:[%s154_s3 + $0x4] sm:$0xf] %vm83_vm2, %v82_v16 }

// kernel: transformer_forward.32
= control target key start
LH: loop header
LB: loop body
LE: loop exit
PB: predicated region body
PF: predicated region fallthrough
CT: control target
= control target key end

     0   :  { %vm19_vm0 = vcmask 523264   ;;  %v110_v1 = vmov 0.0   ;;  %vm47_vm1 = vcmask 261120   ;;  %vm85_vm2 = vcmask 519168   ;;  %s153_s1 = inlined_call_operand.vmem [shape: bf16[32,64], index: 1, kind: input, shape index: {}]   ;;  %s154_s2 = inlined_call_operand.vmem [shape: f32[1,64], index: 2, kind: input, shape index: {}]   ;;  %s155_s0 = inlined_call_operand.vmem [shape: bf16[16,32], index: 0, kind: input, shape index: {}]   ;;  %s156_s3 = inlined_call_operand.vmem [shape: bf16[16,64], index: 3, kind: output, shape index: {}]  }
   0x1   :  { %v107_v0 = vld [vmem:[%s153_s1 + $0x8] sm:$0xff]  ;;  %20 = vst.msk [vmem:[#allocation2] sm:$0xff] %vm19_vm0, %v110_v1  ;;  %v106_v2 = vld [vmem:[%s153_s1] sm:$0xff] }
   0x2   :  { %21 = vst.msk [vmem:[#allocation2 + $0x8] sm:$0xff] %vm19_vm0, %v110_v1  ;;  %57 = vmatpush.bf16.msra.mxu0 %v107_v0  ;;  %v105_v3 = vld [vmem:[%s155_s0] sm:$0xff] }
   0x3   :  { %v109_v8 = vld [vmem:[%s154_s2] ss:$0 sm:$0xff] }
   0x6   :  { %58 = vmatpush.bf16.msra.mxu0 %v106_v2 }
   0x8   :  { %v22_v4 = vld [vmem:[#allocation2] sm:$0xff] }
   0x9   :  { %104 = vmatmul.msk.bf16.vlgmr.msra.gmra.mxu0 %vm47_vm1, %v105_v3  ;;  %v23_v7 = vld [vmem:[#allocation2 + $0x8] sm:$0xff] }
  0x86   :  { %v60_v5 = vpop.f32.mrf.mxu0 }
  0x87   :  { %v65_v6 = vadd.f32 %v60_v5, %v22_v4 }
  0x89   :  { %68 = vst.msk [vmem:[#allocation2] sm:$0xff] %vm19_vm0, %v65_v6 }
  0x8e   :  { %v62_v9 = vpop.f32.mrf.mxu0 }
  0x8f   :  { %v66_v10 = vadd.f32 %v62_v9, %v23_v7 }
  0x90   :  { %v73_v11 = vld [vmem:[#allocation2] sm:$0xff] }
  0x91   :  { %v79_v12 = vadd.f32 %v109_v8, %v73_v11  ;;  %69 = vst.msk [vmem:[#allocation2 + $0x8] sm:$0xff] %vm19_vm0, %v66_v10 }
  0x93   :  { %v81_v13 = vmax.f32 %v79_v12, 0.0 }
  0x95   :  { %v83_v14 = vpack.c.bf16 %v81_v13, %v81_v13 }
  0x97   :  { %86 = vst.msk [vmem:[%s156_s3] sm:$0xf] %vm85_vm2, %v83_v14 }
  0x98   :  { %v74_v15 = vld [vmem:[#allocation2 + $0x8] sm:$0xff] }
  0x99   :  { %v80_v16 = vadd.f32 %v109_v8, %v74_v15 }
  0x9b   :  { %v82_v17 = vmax.f32 %v80_v16, 0.0 }
  0x9d   :  { %v84_v18 = vpack.c.bf16 %v82_v17, %v82_v17 }
  0x9f   :  { %87 = vst.msk [vmem:[%s156_s3 + $0x4] sm:$0xf] %vm85_vm2, %v84_v18 }

// kernel: transformer_forward.30
= control target key start
LH: loop header
LB: loop body
LE: loop exit
PB: predicated region body
PF: predicated region fallthrough
CT: control target
= control target key end

     0   :  { %s925_s12 = smov 0   ;;  %s927_s13 = smov 0   ;;  %s1048_s0 = inlined_call_operand.vmem [shape: bf16[2,8,96], index: 0, kind: input, shape index: {}, may-alias: {0,1}]   ;;  %s1049_s1 = inlined_call_operand.vmem [shape: bf16[2,8,96], index: 1, kind: input, shape index: {}, may-alias: {0,1}]   ;;  %s1050_s2 = inlined_call_operand.vmem [shape: f32[2,1,8], index: 2, kind: input, shape index: {}]   ;;  %s1051_s3 = inlined_call_operand.vmem [shape: bf16[2,8,32], index: 3, kind: output, shape index: {}]  }
   0x1   :  { %s929_s14 = smov 0  }
   0x2 LB: > { %s32_s15 = sadd.s32 1, %s882_s13  ;;  %p782_p0 = scmp.ge.s32.totalorder %s886_s14, 1  ;;  %s886_s14 = sphi %s929_s14, %s13_s14   ;;  %s882_s13 = sphi %s927_s13, %s1055_s13   ;;  %s878_s12 = sphi %s925_s12, %s1054_s12  }
   0x3   : > { %p34_p1 = scmp.ge.s32.totalorder %s32_s15, 2  ;;  %p189_p2 = scmp.lt.s32.totalorder %s886_s14, 3 }
   0x5   : > { %s1057_s15 = smov (%p34_p1, %s32_s15), 0  ;;  %p190_p3 = pnand %p782_p0, %p189_p2 }
   0x6   : > { %p230_p4 = scmp.lt.s32.totalorder (!%p190_p3), %s878_s12, 1  ;;  %s888_s20 = smov (!%p190_p3), 96  }
   0x7   : > { %193 = sbr.rel (%p190_p3) target bundleno = 1228 (0x4cc), region = 32  ;;  %s889_s21 = smov (!%p190_p3), 88  }
   0x8   : > { %s891_s28 = smov (!%p190_p3), 120   ;;  %s892_s29 = smov (!%p190_p3), 64  }
   0x9   : > { %s893_s30 = smov (!%p190_p3), 72   ;;  %s894_s4 = smov (!%p190_p3), 104  }
   0xa   : > { %s897_s5 = smov (!%p190_p3), 80   ;;  %s898_s6 = smov (!%p190_p3), 112  }
   0xb   : > { %s899_s7 = smov (!%p190_p3), 48   ;;  %s900_s8 = smov (!%p190_p3), 56  }
   0xc   : > { %s1059_s12 = smov (!%p230_p4, %s878_s12), 1  ;;  %v890_v6 = vmov 0   ;;  %vm271_vm1 = vcmask 64512   ;;  %vm262_vm2 = vcmask 7168   ;;  %v895_v13 = vmov -inf   ;;  %s901_s9 = smov 40  }
   0xd   : > { %s943_s16 = sshll.u32 %s1059_s12, 2  ;;  %s249_s27 = scalar_lea.vmem %s1050_s2, %s1059_s12  ;;  %837 = vset.pattern.permute.xlu1 %v890_v6  ;;  %838 = vset.pattern.permute.xlu0 %v890_v6  ;;  %263 = vst.msk [vmem:[#allocation2] sm:$0xff] %vm262_vm2, %v895_v13  ;;  %v896_v21 = vmov 0.0   ;;  %vm346_vm4 = vcmask 1043456   ;;  %vm667_vm5 = vcmask 130048   ;;  %vm669_vm6 = vcmask 195584  }
   0xe   : > { %s243_s19 = scalar_lea.vmem %s1049_s1, %s943_s16  ;;  %s236_s24 = scalar_lea.vmem %s1048_s0, %s943_s16  ;;  %v278_v5 = vld [vmem:[%s249_s27] sm:$0x1]  ;;  %839 = vset.pattern.permute.xlu2 %v890_v6  ;;  %264 = vst.msk [vmem:[#allocation2 + $0x8] sm:$0xff] %vm262_vm2, %v895_v13  ;;  %vm672_vm7 = vcmask 257024  }
   0xf   : > { %v277_v0 = vld [vmem:[%s243_s19] sm:$0xf]  ;;  %vm279_vm0 = vcmp.gt.f32.partialorder %v278_v5, 0.0  ;;  %265 = vst.msk [vmem:[#allocation2 + $0x10] sm:$0xff] %vm262_vm2, %v895_v13  ;;  %s902_s10 = smov 8   ;;  %s903_s11 = smov 24  }
  0x10   : > { %v284_v1 = vunpack.c.l.b16 %v277_v0  ;;  %v276_v3 = vld [vmem:[%s236_s24] sm:$0xf]  ;;  %v280_v8 = vsel %vm279_vm0, 1, %v890_v6  ;;  %266 = vst.msk [vmem:[#allocation2 + $0x18] sm:$0xff] %vm262_vm2, %v895_v13  ;;  %s904_s12 = smov 16   ;;  %s256_s19 = scalar_lea.vmem %s1051_s3, %s943_s16 }
  0x11   : > { %v367_v4 = vunpack.c.l.b16 %v276_v3  ;;  %v281_v15 = vperm.slane %v280_v8, 0  ;;  %272 = vst.msk [vmem:[#allocation4] sm:$0xff] %vm271_vm1, %v896_v21 }
  0x12   : > { %v949_v2 = vpack.c.b16 %v284_v1, %v284_v1  ;;  %267 = vst.msk [vmem:[#allocation3] sm:$0xff] %vm262_vm2, %v896_v21 }
  0x13   : > { %v368_v7 = vpack.c.b16 %v367_v4, %v367_v4  ;;  %vm970_vm3 = vcmp.eq.s32.totalorder %v281_v15, 1  ;;  %268 = vst.msk [vmem:[#allocation3 + $0x8] sm:$0xff] %vm262_vm2, %v896_v21 }
  0x14   : > { %286 = vrot.lane.b32.xlu0 %v949_v2, %s888_s20  ;;  %371 = vrot.lane.b32.xlu1 %v949_v2, %s889_s21  ;;  %269 = vst.msk [vmem:[#allocation3 + $0x10] sm:$0xff] %vm262_vm2, %v896_v21  ;;  %v309_v26 = vld [vmem:[#allocation2] sm:$0xff] }
  0x15   : > { %369 = vrot.lane.b32.xlu2 %v368_v7, %s891_s28  ;;  %270 = vst.msk [vmem:[#allocation3 + $0x18] sm:$0xff] %vm262_vm2, %v896_v21  ;;  %v394_v47 = vld [vmem:[#allocation2 + $0x8] sm:$0xff] }
  0x16   : > { %273 = vst.msk [vmem:[#allocation4 + $0x8] sm:$0xff] %vm271_vm1, %v896_v21 }
  0x17   : > { %274 = vst.msk [vmem:[#allocation4 + $0x10] sm:$0xff] %vm271_vm1, %v896_v21  ;;  %v558_v55 = vld [vmem:[#allocation2 + $0x18] sm:$0xff] }
  0x18   : > { %275 = vst.msk [vmem:[#allocation4 + $0x18] sm:$0xff] %vm271_vm1, %v896_v21  ;;  %v333_v4 = vld [vmem:[#allocation4] sm:$0xff] }
  0x1d   : > { %341 = vrot.lane.b32.xlu2 %v949_v2, %s892_s29 }
  0x25   : > { %535 = vrot.lane.b32.xlu2 %v949_v2, %s893_s30 }
  0x2d   : > { %533 = vrot.lane.b32.xlu2 %v368_v7, %s894_s4 }
  0x6f   : > { %v370_v14 = vpop.permute.xlu2 %369 }
  0x77   : > { %v342_v22 = vpop.permute.xlu2 %341 }
  0x78   : > { %v348_v32 = vsel %vm346_vm4, %v342_v22, 0 }
  0x79   : > { %357 = vmatpush.bf16.msra.mxu1 %v348_v32 }
  0x7f   : > { %v536_v23 = vpop.permute.xlu2 %535 }
  0x80   : > { %v541_v24 = vsel %vm271_vm1, %v536_v23, 0 }
  0x86   : > { %v287_v9 = vpop.permute.xlu0 %286  ;;  %v372_v11 = vpop.permute.xlu1 %371 }
  0x87   : > { %v293_v10 = vsel %vm271_vm1, %v287_v9, 0  ;;  %v377_v12 = vsel %vm271_vm1, %v372_v11, 0  ;;  %v534_v25 = vpop.permute.xlu2 %533  ;;  %v476_v11 = vld [vmem:[#allocation2 + $0x10] sm:$0xff] }
  0x88   : > { %302 = vmatpush.bf16.xpose.msra.mxu0 %v293_v10  ;;  %386 = vmatpush.bf16.xpose.msra.mxu2 %v377_v12 }
  0x8f   : > { %786 = vmatmul.msk.bf16.vlgmr.msra.gmra.mxu0 %vm271_vm1, %v276_v3  ;;  %788 = vmatmul.msk.bf16.vlgmr.msra.gmra.mxu2 %vm271_vm1, %v370_v14 }
  0x90   : > { %550 = vmatpush.bf16.xpose.msrb.mxu0 %v541_v24 }
  0x9f   : > { %792 = vmatmul.msk.bf16.vlgmr.msrb.gmra.mxu0 %vm271_vm1, %v534_v25 }
 0x10c   : > { %v304_v17 = vpop.f32.mrf.mxu0 }
 0x10d   : > { %v308_v18 = vsel %vm970_vm3, %v304_v17, -1e+10 }
 0x10e   : > { %v310_v19 = vsel %vm271_vm1, %v308_v18, -inf }
 0x10f   : > { %311 = vmax.xlane.f32.xlu0 %v310_v19 }
 0x112   : > { %v388_v27 = vpop.f32.mrf.mxu2 }
 0x113   : > { %v392_v33 = vsel %vm970_vm3, %v388_v27, -1e+10  ;;  %v325_v27 = vld [vmem:[#allocation3] sm:$0xff] }
 0x114   : > { %v306_v20 = vpop.f32.mrf.mxu0  ;;  %v395_v34 = vsel %vm271_vm1, %v392_v33, -inf }
 0x11a   : > { %v390_v31 = vpop.f32.mrf.mxu2 }
 0x11c   : > { %v552_v38 = vpop.f32.mrf.mxu0 }
 0x11d   : > { %v995_v39 = vsel %vm970_vm3, %v552_v38, -1e+10 }
 0x11e   : > { %v559_v40 = vsel %vm271_vm1, %v995_v39, -inf }
 0x11f   : > { %560 = vmax.xlane.f32.xlu0 %v559_v40 }
 0x124   : > { %v554_v45 = vpop.f32.mrf.mxu0 }
 0x182   : > { %v312_v28 = vpop.xlane.xlu0 %311 }
 0x183   : > { %v313_v29 = vmax.f32 %v309_v26, %v312_v28 }
 0x185   : > { %v314_v30 = vsub.f32 %v309_v26, %v313_v29  ;;  %365 = vst.msk [vmem:[#allocation2] sm:$0xff] %vm262_vm2, %v313_v29  ;;  %319 = vperm.xlu1 %837, %v313_v29  }
 0x187   : > { %v315_v50 = vmul.f32 1.442695, %v314_v30 }
 0x18d   : > { %453 = vrot.lane.b32.xlu1 %v949_v2, %s897_s5 }
 0x192   : > { %v561_v56 = vpop.xlane.xlu0 %560 }
 0x193   : > { %v562_v57 = vmax.f32 %v558_v55, %v561_v56 }
 0x195   : > { %451 = vrot.lane.b32.xlu1 %v368_v7, %s898_s6  ;;  %v563_v58 = vsub.f32 %v558_v55, %v562_v57  ;;  %614 = vst.msk [vmem:[#allocation2 + $0x18] sm:$0xff] %vm262_vm2, %v562_v57  ;;  %v411_v55 = vld [vmem:[#allocation3 + $0x8] sm:$0xff] }
 0x197   : > { %v564_v24 = vmul.f32 1.442695, %v563_v58 }
 0x1bf   : > { %396 = vmax.xlane.f32.xlu1 %v395_v34 }
 0x1f7   : > { %v320_v35 = vpop.permute.xlu1 %319 }
 0x1f8   : > { %v322_v36 = vsub.f32 %v308_v18, %v320_v35 }
 0x1fa   : > { %v323_v37 = vmul.f32 1.442695, %v322_v36 }
 0x1fc   : > { %840 = vpow2.f32 %v323_v37 }
 0x1fd   : > { %842 = vpow2.f32 %v315_v50 }
 0x1ff   : > { %v454_v41 = vpop.permute.xlu1 %453 }
 0x200   : > { %v459_v42 = vsel %vm271_vm1, %v454_v41, 0 }
 0x201   : > { %468 = vmatpush.bf16.xpose.msrb.mxu1 %v459_v42  ;;  %v419_v42 = vld [vmem:[#allocation4 + $0x8] sm:$0xff] }
 0x202   : > { %v841_v43 = vpop.eup %840 }
 0x203   : > { %v340_v44 = vpack.c.bf16 %v841_v43, %v841_v43  ;;  %v843_v53 = vpop.eup %842  ;;  %v327_v8 = vsel %vm271_vm1, %v841_v43, 0.0 }
 0x204   : > { %v326_v28 = vmul.f32 %v843_v53, %v325_v27 }
 0x205   : > { %787 = vmatmul.msk.bf16.vlgmr.msra.gmra.mxu1 %vm271_vm1, %v340_v44  ;;  %v575_v44 = vld [vmem:[#allocation3 + $0x18] sm:$0xff] }
 0x207   : > { %v452_v46 = vpop.permute.xlu1 %451 }
 0x215   : > { %790 = vmatmul.msk.bf16.vlgmr.msrb.gmra.mxu1 %vm271_vm1, %v452_v46 }
 0x232   : > { %v397_v48 = vpop.xlane.xlu1 %396 }
 0x233   : > { %v398_v49 = vmax.f32 %v394_v47, %v397_v48 }
 0x235   : > { %450 = vst.msk [vmem:[#allocation2 + $0x8] sm:$0xff] %vm262_vm2, %v398_v49  ;;  %404 = vperm.xlu0 %838, %v398_v49   ;;  %v399_v51 = vsub.f32 %v394_v47, %v398_v49 }
 0x237   : > { %v400_v52 = vmul.f32 1.442695, %v399_v51 }
 0x239   : > { %844 = vpow2.f32 %v400_v52 }
 0x23d   : > { %509 = vrot.lane.b32.xlu0 %v949_v2, %s899_s7 }
 0x23f   : > { %v1004_v54 = vpop.eup %844 }
 0x240   : > { %v412_v56 = vmul.f32 %v1004_v54, %v411_v55 }
 0x245   : > { %336 = vperm.xlu0 %838, %v843_v53  }
 0x24d   : > { %422 = vperm.xlu0 %838, %v1004_v54   ;;  %v583_v54 = vld [vmem:[#allocation4 + $0x18] sm:$0xff] }
 0x282   : > { %v359_v59 = vpop.f32.mrf.mxu1 }
 0x28a   : > { %v361_v60 = vpop.f32.mrf.mxu1 }
 0x292   : > { %v470_v61 = vpop.f32.mrf.mxu1 }
 0x293   : > { %v474_v62 = vsel %vm970_vm3, %v470_v61, -1e+10 }
 0x294   : > { %v477_v63 = vsel %vm271_vm1, %v474_v62, -inf }
 0x295   : > { %478 = vmax.xlane.f32.xlu2 %v477_v63  ;;  %v493_v63 = vld [vmem:[#allocation3 + $0x10] sm:$0xff] }
 0x29a   : > { %v472_v0 = vpop.f32.mrf.mxu1 }
 0x2a7   : > { %v405_v1 = vpop.permute.xlu0 %404 }
 0x2a8   : > { %v407_v9 = vsub.f32 %v392_v33, %v405_v1 }
 0x2aa   : > { %v408_v10 = vmul.f32 1.442695, %v407_v9 }
 0x2ac   : > { %846 = vpow2.f32 %v408_v10 }
 0x2ad   : > { %427 = vrot.lane.b32.xlu2 %v949_v2, %s900_s8 }
 0x2af   : > { %v510_v3 = vpop.permute.xlu0 %509 }
 0x2b0   : > { %v515_v32 = vsel %vm346_vm4, %v510_v3, 0 }
 0x2b2   : > { %v847_v15 = vpop.eup %846 }
 0x2b3   : > { %v426_v18 = vpack.c.bf16 %v847_v15, %v847_v15  ;;  %v413_v26 = vsel %vm271_vm1, %v847_v15, 0.0 }
 0x2b5   : > { %568 = vperm.xlu2 %839, %v562_v57  }
 0x2b7   : > { %v337_v5 = vpop.permute.xlu0 %336 }
 0x2b8   : > { %v339_v6 = vmul.f32 %v337_v5, %v333_v4 }
 0x2ba   : > { %v363_v7 = vadd.f32 %v359_v59, %v339_v6  ;;  %v501_v6 = vld [vmem:[#allocation4 + $0x10] sm:$0xff] }
 0x2bc   : > { %364 = vst.msk [vmem:[#allocation4] sm:$0xff] %vm271_vm1, %v363_v7 }
 0x2bf   : > { %v423_v43 = vpop.permute.xlu0 %422 }
 0x2c0   : > { %v425_v46 = vmul.f32 %v423_v43, %v419_v42 }
 0x2de   : > { %328 = vadd.xlane.f32.xlu2 %v327_v8 }
 0x308   : > { %v479_v12 = vpop.xlane.xlu2 %478 }
 0x309   : > { %v480_v13 = vmax.f32 %v476_v11, %v479_v12 }
 0x30b   : > { %v481_v14 = vsub.f32 %v476_v11, %v480_v13  ;;  %532 = vst.msk [vmem:[#allocation2 + $0x10] sm:$0xff] %vm262_vm2, %v480_v13  ;;  %486 = vperm.xlu1 %837, %v480_v13  }
 0x310   : > { %v428_v16 = vpop.permute.xlu2 %427 }
 0x311   : > { %v433_v17 = vsel %vm346_vm4, %v428_v16, 0 }
 0x312   : > { %442 = vmatpush.bf16.msra.mxu3 %v433_v17 }
 0x313   : > { %591 = vrot.lane.b32.xlu1 %v949_v2, %s901_s9  ;;  %v482_v2 = vmul.f32 1.442695, %v481_v14 }
 0x315   : > { %789 = vmatmul.msk.bf16.vlgmr.msra.gmra.mxu3 %vm271_vm1, %v426_v18 }
 0x316   : > { %524 = vmatpush.bf16.msrb.mxu3 %v515_v32 }
 0x318   : > { %v569_v19 = vpop.permute.xlu2 %568 }
 0x319   : > { %v571_v20 = vsub.f32 %v995_v39, %v569_v19 }
 0x31b   : > { %v572_v21 = vmul.f32 1.442695, %v571_v20 }
 0x31d   : > { %848 = vpow2.f32 %v572_v21 }
 0x31e   : > { %850 = vpow2.f32 %v564_v24 }
 0x31f   : > { %852 = vpow2.f32 %v482_v2  ;;  %v620_v2 = vld [vmem:[#allocation4] sm:$0xff] }
 0x323   : > { %v849_v22 = vpop.eup %848 }
 0x324   : > { %v577_v23 = vsel %vm271_vm1, %v849_v22, 0.0  ;;  %v851_v25 = vpop.eup %850  ;;  %v590_v39 = vpack.c.bf16 %v849_v22, %v849_v22 }
 0x325   : > { %578 = vadd.xlane.f32.xlu2 %v577_v23  ;;  %v853_v31 = vpop.eup %852  ;;  %v576_v47 = vmul.f32 %v851_v25, %v575_v44 }
 0x326   : > { %v494_v0 = vmul.f32 %v853_v31, %v493_v63 }
 0x33d   : > { %586 = vperm.xlu2 %839, %v851_v25   ;;  %414 = vadd.xlane.f32.xlu1 %v413_v26 }
 0x351   : > { %v329_v29 = vpop.xlane.xlu2 %328 }
 0x352   : > { %v330_v30 = vadd.f32 %v329_v29, %v326_v28 }
 0x354   : > { %332 = vst.msk [vmem:[#allocation3] sm:$0xff] %vm262_vm2, %v330_v30 }
 0x356   : > { %504 = vperm.xlu1 %837, %v853_v31  }
 0x35b   : > { %v618_v45 = vld [vmem:[#allocation3] sm:$0xff] }
 0x37d   : > { %v487_v33 = vpop.permute.xlu1 %486 }
 0x37e   : > { %v489_v34 = vsub.f32 %v474_v62, %v487_v33 }
 0x380   : > { %v490_v35 = vmul.f32 1.442695, %v489_v34 }
 0x382   : > { %854 = vpow2.f32 %v490_v35 }
 0x383   : > { %856 = vrcp.f32 %v618_v45 }
 0x385   : > { %v592_v36 = vpop.permute.xlu1 %591 }
 0x386   : > { %v597_v37 = vsel %vm346_vm4, %v592_v36, 0 }
 0x387   : > { %606 = vmatpush.bf16.msrb.mxu2 %v597_v37 }
 0x388   : > { %v855_v38 = vpop.eup %854 }
 0x389   : > { %v495_v40 = vsel %vm271_vm1, %v855_v38, 0.0  ;;  %v508_v41 = vpack.c.bf16 %v855_v38, %v855_v38  ;;  %v857_v52 = vpop.eup %856 }
 0x38a   : > { %496 = vadd.xlane.f32.xlu0 %v495_v40  ;;  %793 = vmatmul.msk.bf16.vlgmr.msrb.gmra.mxu2 %vm271_vm1, %v590_v39 }
 0x38b   : > { %791 = vmatmul.msk.bf16.vlgmr.msrb.gmra.mxu3 %vm271_vm1, %v508_v41 }
 0x398   : > { %v579_v48 = vpop.xlane.xlu2 %578  ;;  %v444_v49 = vpop.f32.mrf.mxu3 }
 0x399   : > { %v580_v50 = vadd.f32 %v579_v48, %v576_v47  ;;  %v448_v51 = vadd.f32 %v444_v49, %v425_v46 }
 0x39b   : > { %581 = vst.msk [vmem:[#allocation3 + $0x18] sm:$0xff] %vm262_vm2, %v580_v50 }
 0x39c   : > { %449 = vst.msk [vmem:[#allocation4 + $0x8] sm:$0xff] %vm271_vm1, %v448_v51 }
 0x39e   : > { %623 = vperm.xlu0 %838, %v857_v52  }
 0x3a0   : > { %v446_v53 = vpop.f32.mrf.mxu3  ;;  %v587_v5 = vpop.permute.xlu2 %586 }
 0x3a1   : > { %v589_v8 = vmul.f32 %v587_v5, %v583_v54 }
 0x3a2   : > { %v645_v60 = vld [vmem:[#allocation3 + $0x18] sm:$0xff] }
 0x3a3   : > { %v629_v18 = vld [vmem:[#allocation4 + $0x8] sm:$0xff] }
 0x3b0   : > { %v415_v57 = vpop.xlane.xlu1 %414 }
 0x3b1   : > { %v416_v58 = vadd.f32 %v415_v57, %v412_v56 }
 0x3b3   : > { %417 = vst.msk [vmem:[#allocation3 + $0x8] sm:$0xff] %vm262_vm2, %v416_v58 }
 0x3ba   : > { %v627_v59 = vld [vmem:[#allocation3 + $0x8] sm:$0xff] }
 0x3bb   : > { %858 = vrcp.f32 %v627_v59 }
 0x3bc   : > { %860 = vrcp.f32 %v645_v60 }
 0x3c1   : > { %v859_v61 = vpop.eup %858 }
 0x3c2   : > { %632 = vperm.xlu1 %837, %v859_v61   ;;  %v861_v62 = vpop.eup %860 }
 0x3c8   : > { %v505_v7 = vpop.permute.xlu1 %504 }
 0x3c9   : > { %v507_v9 = vmul.f32 %v505_v7, %v501_v6 }
 0x3ca   : > { %650 = vperm.xlu1 %837, %v861_v62  }
 0x3fd   : > { %v497_v1 = vpop.xlane.xlu0 %496 }
 0x3fe   : > { %v498_v3 = vadd.f32 %v497_v1, %v494_v0 }
 0x400   : > { %499 = vst.msk [vmem:[#allocation3 + $0x10] sm:$0xff] %vm262_vm2, %v498_v3 }
 0x407   : > { %v636_v4 = vld [vmem:[#allocation3 + $0x10] sm:$0xff] }
 0x408   : > { %862 = vrcp.f32 %v636_v4 }
 0x40d   : > { %v608_v10 = vpop.f32.mrf.mxu2 }
 0x40e   : > { %v863_v11 = vpop.eup %862  ;;  %v612_v12 = vadd.f32 %v608_v10, %v589_v8  ;;  %v526_v13 = vpop.f32.mrf.mxu3 }
 0x40f   : > { %v530_v14 = vadd.f32 %v526_v13, %v507_v9  ;;  %641 = vperm.xlu2 %839, %v863_v11  }
 0x410   : > { %613 = vst.msk [vmem:[#allocation4 + $0x18] sm:$0xff] %vm271_vm1, %v612_v12  ;;  %v624_v26 = vpop.permute.xlu0 %623 }
 0x411   : > { %531 = vst.msk [vmem:[#allocation4 + $0x10] sm:$0xff] %vm271_vm1, %v530_v14  ;;  %v626_v28 = vmul.f32 %v624_v26, %v620_v2 }
 0x415   : > { %v610_v15 = vpop.f32.mrf.mxu2 }
 0x416   : > { %v528_v16 = vpop.f32.mrf.mxu3 }
 0x417   : > { %v647_v20 = vld [vmem:[#allocation4 + $0x18] sm:$0xff] }
 0x418   : > { %v638_v23 = vld [vmem:[#allocation4 + $0x10] sm:$0xff] }
 0x434   : > { %v633_v17 = vpop.permute.xlu1 %632 }
 0x435   : > { %v635_v19 = vmul.f32 %v633_v17, %v629_v18 }
 0x437   : > { %655 = vrot.lane.b32.xlu0 %v635_v19, %s902_s10 }
 0x43c   : > { %v651_v21 = vpop.permute.xlu1 %650 }
 0x43d   : > { %v653_v22 = vmul.f32 %v651_v21, %v647_v20 }
 0x43f   : > { %663 = vrot.lane.b32.xlu1 %v653_v22, %s903_s11 }
 0x469   : > { %v642_v24 = vpop.permute.xlu2 %641 }
 0x46a   : > { %v644_v25 = vmul.f32 %v642_v24, %v638_v23 }
 0x46c   : > { %659 = vrot.lane.b32.xlu2 %v644_v25, %s904_s12 }
 0x4a9   : > { %v656_v27 = vpop.permute.xlu0 %655 }
 0x4aa   : > { %v666_v29 = vsel %vm271_vm1, %v626_v28, %v656_v27 }
 0x4b1   : > { %v664_v31 = vpop.permute.xlu1 %663 }
 0x4c6   : > { %v660_v30 = vpop.permute.xlu2 %659 }
 0x4c7   : > { %v668_v32 = vsel %vm667_vm5, %v666_v29, %v660_v30 }
 0x4c8   : > { %v670_v33 = vsel %vm669_vm6, %v668_v32, %v664_v31 }
 0x4c9   : > { %v671_v34 = vpack.c.bf16 %v670_v33, %v670_v33 }
 0x4cb   : > { %673 = vst.msk [vmem:[%s256_s19] sm:$0xf] %vm672_vm7, %v671_v34 }
 0x4cc PF: > { %s13_s14 = sadd.s32 1, %s886_s14   ;;  %s1054_s12 = smov %s882_s13 }
 0x4cd   : > { %p10_p5 = scmp.ge.s32.totalorder %s13_s14, 4   ;;  %s1055_s13 = smov %s1057_s15 }
 0x4cf   :  { %12 = sbr.rel (!%p10_p5) target bundleno = 2 (0x2), region = 85 }

// kernel: transformer_forward.43
= control target key start
LH: loop header
LB: loop body
LE: loop exit
PB: predicated region body
PF: predicated region fallthrough
CT: control target
= control target key end

     0   :  { %vm19_vm0 = vcmask 523264   ;;  %v108_v1 = vmov 0.0   ;;  %vm47_vm1 = vcmask 261120   ;;  %vm83_vm2 = vcmask 519168   ;;  %s151_s1 = inlined_call_operand.vmem [shape: bf16[32,64], index: 1, kind: input, shape index: {}]   ;;  %s152_s2 = inlined_call_operand.vmem [shape: f32[1,64], index: 2, kind: input, shape index: {}]   ;;  %s153_s0 = inlined_call_operand.vmem [shape: bf16[16,32], index: 0, kind: input, shape index: {}]   ;;  %s154_s3 = inlined_call_operand.vmem [shape: bf16[16,64], index: 3, kind: output, shape index: {}]  }
   0x1   :  { %v105_v0 = vld [vmem:[%s151_s1 + $0x8] sm:$0xff]  ;;  %20 = vst.msk [vmem:[#allocation2] sm:$0xff] %vm19_vm0, %v108_v1  ;;  %v104_v2 = vld [vmem:[%s151_s1] sm:$0xff] }
   0x2   :  { %21 = vst.msk [vmem:[#allocation2 + $0x8] sm:$0xff] %vm19_vm0, %v108_v1  ;;  %57 = vmatpush.bf16.msra.mxu0 %v105_v0  ;;  %v103_v3 = vld [vmem:[%s153_s0] sm:$0xff] }
   0x3   :  { %v107_v8 = vld [vmem:[%s152_s2] ss:$0 sm:$0xff] }
   0x6   :  { %58 = vmatpush.bf16.msra.mxu0 %v104_v2 }
   0x8   :  { %v22_v4 = vld [vmem:[#allocation2] sm:$0xff] }
   0x9   :  { %102 = vmatmul.msk.bf16.vlgmr.msra.gmra.mxu0 %vm47_vm1, %v103_v3  ;;  %v23_v7 = vld [vmem:[#allocation2 + $0x8] sm:$0xff] }
  0x86   :  { %v60_v5 = vpop.f32.mrf.mxu0 }
  0x87   :  { %v65_v6 = vadd.f32 %v60_v5, %v22_v4 }
  0x89   :  { %68 = vst.msk [vmem:[#allocation2] sm:$0xff] %vm19_vm0, %v65_v6 }
  0x8e   :  { %v62_v9 = vpop.f32.mrf.mxu0 }
  0x8f   :  { %v66_v10 = vadd.f32 %v62_v9, %v23_v7 }
  0x90   :  { %v73_v11 = vld [vmem:[#allocation2] sm:$0xff] }
  0x91   :  { %v79_v12 = vadd.f32 %v107_v8, %v73_v11  ;;  %69 = vst.msk [vmem:[#allocation2 + $0x8] sm:$0xff] %vm19_vm0, %v66_v10 }
  0x93   :  { %v81_v13 = vpack.c.bf16 %v79_v12, %v79_v12 }
  0x95   :  { %84 = vst.msk [vmem:[%s154_s3] sm:$0xf] %vm83_vm2, %v81_v13 }
  0x98   :  { %v74_v14 = vld [vmem:[#allocation2 + $0x8] sm:$0xff] }
  0x99   :  { %v80_v15 = vadd.f32 %v107_v8, %v74_v14 }
  0x9b   :  { %v82_v16 = vpack.c.bf16 %v80_v15, %v80_v15 }
  0x9d   :  { %85 = vst.msk [vmem:[%s154_s3 + $0x4] sm:$0xf] %vm83_vm2, %v82_v16 }

// kernel: transformer_forward.33
= control target key start
LH: loop header
LB: loop body
LE: loop exit
PB: predicated region body
PF: predicated region fallthrough
CT: control target
= control target key end

     0   :  { %vm28_vm0 = vcmask 261120   ;;  %v225_v1 = vmov 0.0   ;;  %vm72_vm1 = vcmask 523264   ;;  %v226_v24 = vmov 32.0   ;;  %s303_s1 = inlined_call_operand.vmem [shape: bf16[64,32], index: 1, kind: input, shape index: {}]   ;;  %s304_s0 = inlined_call_operand.vmem [shape: bf16[16,64], index: 0, kind: input, shape index: {}]   ;;  %s305_s2 = inlined_call_operand.vmem [shape: f32[1,32], index: 2, kind: input, shape index: {}]   ;;  %s306_s3 = inlined_call_operand.vmem [shape: bf16[16,32], index: 3, kind: input, shape index: {}]   ;;  %s307_s4 = inlined_call_operand.vmem [shape: f32[1,32], index: 4, kind: input, shape index: {}]   ;;  %s308_s5 = inlined_call_operand.vmem [shape: f32[1,32], index: 5, kind: input, shape index: {}]   ;;  %s309_s6 = inlined_call_operand.vmem [shape: bf16[16,32], index: 6, kind: output, shape index: {}]  }
   0x1   :  { %v209_v0 = vld [vmem:[%s303_s1 + $0x18] sm:$0xff]  ;;  %29 = vst.msk [vmem:[#allocation2] sm:$0xff] %vm28_vm0, %v225_v1  ;;  %v208_v2 = vld [vmem:[%s303_s1 + $0x10] sm:$0xff]  ;;  %v207_v3 = vld [vmem:[%s303_s1 + $0x8] sm:$0xff]  ;;  %219 = vrcp.f32 %v226_v24  ;;  %vm177_vm7 = vcmask 257024  }
   0x2   :  { %30 = vst.msk [vmem:[#allocation2 + $0x8] sm:$0xff] %vm28_vm0, %v225_v1  ;;  %80 = vmatpush.bf16.msra.mxu0 %v209_v0  ;;  %v206_v4 = vld [vmem:[%s303_s1] sm:$0xff] }
   0x3   :  { %v205_v5 = vld [vmem:[%s304_s0] sm:$0xff] }
   0x4   :  { %v211_v10 = vld [vmem:[%s306_s3] sm:$0xff]  }
   0x5   :  { %v216_v11 = vld [vmem:[%s305_s2] ss:$0 sm:$0xff]  ;;  %v212_v14 = vunpack.c.l.bf16 %v211_v10  ;;  %v213_v19 = vunpack.c.h.bf16 %v211_v10 }
   0x6   :  { %81 = vmatpush.bf16.msra.mxu0 %v208_v2  ;;  %v217_v55 = vld [vmem:[%s307_s4] ss:$0 sm:$0xff] }
   0x7   :  { %v220_v25 = vpop.eup %219  ;;  %v218_v58 = vld [vmem:[%s308_s5] ss:$0 sm:$0xff] }
   0x8   :  { %v31_v6 = vld [vmem:[#allocation2] sm:$0xff]  ;;  %v119_v26 = vmul.f32 32.0, %v220_v25  ;;  %vm123_vm2 = vweird.f32 %v220_v25 }
   0x9   :  { %v32_v9 = vld [vmem:[#allocation2 + $0x8] sm:$0xff] }
   0xa   :  { %82 = vmatpush.bf16.msra.mxu0 %v207_v3  ;;  %v120_v27 = vsub.f32 1.0, %v119_v26 }
   0xc   :  { %v121_v28 = vmul.f32 %v220_v25, %v120_v27 }
   0xe   :  { %83 = vmatpush.bf16.msra.mxu0 %v206_v4  ;;  %v122_v29 = vadd.f32 %v220_v25, %v121_v28 }
  0x10   :  { %v124_v30 = vsel %vm123_vm2, %v220_v25, %v122_v29 }
  0x11   :  { %204 = vmatmul.msk.bf16.vlgmr.msra.gmra.mxu0 %vm72_vm1, %v205_v5 }
  0x8e   :  { %v85_v7 = vpop.f32.mrf.mxu0 }
  0x8f   :  { %v90_v8 = vadd.f32 %v85_v7, %v31_v6 }
  0x91   :  { %93 = vst.msk [vmem:[#allocation2] sm:$0xff] %vm28_vm0, %v90_v8 }
  0x96   :  { %v87_v12 = vpop.f32.mrf.mxu0 }
  0x97   :  { %v91_v13 = vadd.f32 %v87_v12, %v32_v9 }
  0x98   :  { %v98_v15 = vld [vmem:[#allocation2] sm:$0xff] }
  0x99   :  { %94 = vst.msk [vmem:[#allocation2 + $0x8] sm:$0xff] %vm28_vm0, %v91_v13  ;;  %v104_v16 = vadd.f32 %v216_v11, %v98_v15 }
  0x9b   :  { %v110_v17 = vadd.f32 %v212_v14, %v104_v16 }
  0x9d   :  { %v112_v18 = vsel %vm28_vm0, %v110_v17, 0.0 }
  0x9e   :  { %113 = vadd.xlane.f32.xlu0 %v112_v18 }
  0xa0   :  { %v99_v20 = vld [vmem:[#allocation2 + $0x8] sm:$0xff] }
  0xa1   :  { %v105_v21 = vadd.f32 %v216_v11, %v99_v20 }
  0xa3   :  { %v111_v22 = vadd.f32 %v213_v19, %v105_v21 }
  0xa5   :  { %v115_v23 = vsel %vm28_vm0, %v111_v22, 0.0 }
  0xa6   :  { %116 = vadd.xlane.f32.xlu0 %v115_v23 }
 0x111   :  { %v114_v31 = vpop.xlane.xlu0 %113 }
 0x112   :  { %v125_v32 = vmul.f32 %v124_v30, %v114_v31 }
 0x114   :  { %v127_v33 = vsub.f32 %v110_v17, %v125_v32 }
 0x116   :  { %v129_v34 = vmul.f32 %v127_v33, %v127_v33 }
 0x118   :  { %v131_v35 = vsel %vm28_vm0, %v129_v34, 0.0 }
 0x119   :  { %132 = vadd.xlane.f32.xlu1 %v131_v35  ;;  %v117_v36 = vpop.xlane.xlu0 %116 }
 0x11a   :  { %v126_v37 = vmul.f32 %v124_v30, %v117_v36 }
 0x11c   :  { %v128_v38 = vsub.f32 %v111_v22, %v126_v37 }
 0x11e   :  { %v130_v39 = vmul.f32 %v128_v38, %v128_v38 }
 0x120   :  { %v134_v40 = vsel %vm28_vm0, %v130_v39, 0.0 }
 0x121   :  { %135 = vadd.xlane.f32.xlu1 %v134_v40 }
 0x18c   :  { %v133_v41 = vpop.xlane.xlu1 %132 }
 0x18d   :  { %v137_v42 = vmul.f32 %v133_v41, %v124_v30 }
 0x18f   :  { %v139_v43 = vadd.f32 1e-05, %v137_v42 }
 0x191   :  { %221 = vrsqrt.f32 %v139_v43  ;;  %vm147_vm4 = vweird.f32 %v139_v43 }
 0x194   :  { %v136_v44 = vpop.xlane.xlu1 %135 }
 0x195   :  { %v138_v45 = vmul.f32 %v136_v44, %v124_v30 }
 0x197   :  { %v222_v46 = vpop.eup %221  ;;  %v140_v47 = vadd.f32 1e-05, %v138_v45 }
 0x198   :  { %v142_v48 = vmul.f32 %v222_v46, %v139_v43  ;;  %vm148_vm3 = vweird.f32 %v222_v46 }
 0x199   :  { %223 = vrsqrt.f32 %v140_v47  ;;  %vm149_vm5 = vmor %vm147_vm4, %vm148_vm3  ;;  %vm157_vm8 = vweird.f32 %v140_v47 }
 0x19a   :  { %v143_v49 = vmul.f32 %v222_v46, %v142_v48 }
 0x19c   :  { %v144_v50 = vmul.f32 0.5, %v143_v49 }
 0x19e   :  { %v145_v51 = vsub.f32 1.5, %v144_v50 }
 0x19f   :  { %v224_v52 = vpop.eup %223 }
 0x1a0   :  { %v146_v53 = vmul.f32 %v222_v46, %v145_v51  ;;  %v152_v54 = vmul.f32 %v224_v52, %v140_v47  ;;  %vm158_vm6 = vweird.f32 %v224_v52 }
 0x1a1   :  { %vm159_vm9 = vmor %vm157_vm8, %vm158_vm6 }
 0x1a2   :  { %v150_v56 = vsel %vm149_vm5, %v222_v46, %v146_v53  ;;  %v153_v57 = vmul.f32 %v224_v52, %v152_v54 }
 0x1a3   :  { %v161_v59 = vmul.f32 %v150_v56, %v127_v33 }
 0x1a4   :  { %v154_v60 = vmul.f32 0.5, %v153_v57 }
 0x1a5   :  { %v167_v61 = vmul.f32 %v217_v55, %v161_v59 }
 0x1a6   :  { %v155_v62 = vsub.f32 1.5, %v154_v60 }
 0x1a7   :  { %v173_v63 = vadd.f32 %v218_v58, %v167_v61 }
 0x1a8   :  { %v156_v0 = vmul.f32 %v224_v52, %v155_v62 }
 0x1a9   :  { %v175_v1 = vpack.c.bf16 %v173_v63, %v173_v63 }
 0x1aa   :  { %v160_v2 = vsel %vm159_vm9, %v224_v52, %v156_v0 }
 0x1ab   :  { %178 = vst.msk [vmem:[%s309_s6] sm:$0xf] %vm177_vm7, %v175_v1  ;;  %v162_v3 = vmul.f32 %v160_v2, %v128_v38 }
 0x1ad   :  { %v168_v4 = vmul.f32 %v217_v55, %v162_v3 }
 0x1af   :  { %v174_v5 = vadd.f32 %v218_v58, %v168_v4 }
 0x1b1   :  { %v176_v6 = vpack.c.bf16 %v174_v5, %v174_v5 }
 0x1b3   :  { %179 = vst.msk [vmem:[%s309_s6 + $0x4] sm:$0xf] %vm177_vm7, %v176_v6 }

// kernel: transformer_forward.42
= control target key start
LH: loop header
LB: loop body
LE: loop exit
PB: predicated region body
PF: predicated region fallthrough
CT: control target
= control target key end

     0   :  { %8 = vsyncpa [#allocation4], 0  ;;  %s149_s15 = smov [#allocation3]   ;;  %s194_s0 = inlined_call_operand.vmem [shape: bf16[16,32], index: 0, kind: input, shape index: {}]   ;;  %s195_s1 = inlined_call_operand.vmem [shape: bf16[32,32], index: 1, kind: input, shape index: {}]   ;;  %s196_s2 = inlined_call_operand.hbm [shape: f32[1,32], index: 2, kind: input, shape index: {}]   ;;  %s197_s3 = inlined_call_operand.vmem [shape: bf16[16,32], index: 3, kind: output, shape index: {}]  }
   0x1   :  { %s18_s14 = sshll.u32 %s196_s2, 4  ;;  %s20_s16 = sshll.u32 %s149_s15, 4  ;;  %s19_s14 = int_to_ptr.hbm [resolvable:$true] %s18_s14  ;;  %s21_s16 = int_to_ptr.vmem [resolvable:$true] %s20_s16 }
   0x2   :  { %23 = dma.hbm_to_vmem [thread:$0]  %s19_s14, 16, %s21_s16, [#allocation4]  }
   0x3   :  { %147 = dma.done.wait [#allocation4], 16  }
   0x4   :  { %148 = vsyncadd [#allocation4], 4294967280  ;;  %vm33_vm0 = vcmask 261120   ;;  %v150_v0 = vmov 0.0   ;;  %v119_v1 = vld [vmem:[%s195_s1 + $0x8] sm:$0xff]  ;;  %v118_v2 = vld [vmem:[%s195_s1] sm:$0xff] }
   0x5   :  { %34 = vst.msk [vmem:[#allocation2] sm:$0xff] %vm33_vm0, %v150_v0  ;;  %71 = vmatpush.bf16.msra.mxu0 %v119_v1  ;;  %v117_v3 = vld [vmem:[%s194_s0] sm:$0xff]  ;;  %v122_v8 = vld [vmem:[#allocation3] ss:$0 sm:$0xff]  ;;  %vm96_vm1 = vcmask 257024  }
   0x6   :  { %35 = vst.msk [vmem:[#allocation2 + $0x8] sm:$0xff] %vm33_vm0, %v150_v0 }
   0x9   :  { %72 = vmatpush.bf16.msra.mxu0 %v118_v2 }
   0xc   :  { %116 = vmatmul.msk.bf16.vlgmr.msra.gmra.mxu0 %vm33_vm0, %v117_v3  ;;  %v36_v4 = vld [vmem:[#allocation2] sm:$0xff] }
   0xd   :  { %v37_v7 = vld [vmem:[#allocation2 + $0x8] sm:$0xff] }
  0x89   :  { %v74_v5 = vpop.f32.mrf.mxu0 }
  0x8a   :  { %v79_v6 = vadd.f32 %v74_v5, %v36_v4 }
  0x8c   :  { %81 = vst.msk [vmem:[#allocation2] sm:$0xff] %vm33_vm0, %v79_v6 }
  0x91   :  { %v76_v9 = vpop.f32.mrf.mxu0 }
  0x92   :  { %v80_v10 = vadd.f32 %v76_v9, %v37_v7 }
  0x93   :  { %v86_v11 = vld [vmem:[#allocation2] sm:$0xff] }
  0x94   :  { %v92_v12 = vadd.f32 %v122_v8, %v86_v11  ;;  %82 = vst.msk [vmem:[#allocation2 + $0x8] sm:$0xff] %vm33_vm0, %v80_v10 }
  0x96   :  { %v94_v13 = vpack.c.bf16 %v92_v12, %v92_v12 }
  0x98   :  { %97 = vst.msk [vmem:[%s197_s3] sm:$0xf] %vm96_vm1, %v94_v13 }
  0x9b   :  { %v87_v14 = vld [vmem:[#allocation2 + $0x8] sm:$0xff] }
  0x9c   :  { %v93_v15 = vadd.f32 %v122_v8, %v87_v14 }
  0x9e   :  { %v95_v16 = vpack.c.bf16 %v93_v15, %v93_v15 }
  0xa0   :  { %98 = vst.msk [vmem:[%s197_s3 + $0x4] sm:$0xf] %vm96_vm1, %v95_v16 }
  0xa1   :  { %103 = vsyncpa [#allocation4], 1 }

// kernel: transformer_forward.40
= control target key start
LH: loop header
LB: loop body
LE: loop exit
PB: predicated region body
PF: predicated region fallthrough
CT: control target
= control target key end

     0   :  { %s937_s12 = smov 0   ;;  %s939_s13 = smov 0   ;;  %s1065_s0 = inlined_call_operand.vmem [shape: bf16[2,8,96], index: 0, kind: input, shape index: {}, may-alias: {0,1}]   ;;  %s1066_s1 = inlined_call_operand.vmem [shape: bf16[2,8,96], index: 1, kind: input, shape index: {}, may-alias: {0,1}]   ;;  %s1067_s2 = inlined_call_operand.vmem [shape: f32[2,1,8], index: 2, kind: input, shape index: {}]   ;;  %s1068_s3 = inlined_call_operand.vmem [shape: bf16[2,8,32], index: 3, kind: output, shape index: {}]  }
   0x1   :  { %s941_s14 = smov 0  }
   0x2 LB: > { %s32_s15 = sadd.s32 1, %s894_s13  ;;  %p794_p0 = scmp.ge.s32.totalorder %s898_s14, 1  ;;  %s898_s14 = sphi %s941_s14, %s13_s14   ;;  %s894_s13 = sphi %s939_s13, %s1072_s13   ;;  %s890_s12 = sphi %s937_s12, %s1071_s12  }
   0x3   : > { %p34_p1 = scmp.ge.s32.totalorder %s32_s15, 2  ;;  %p189_p2 = scmp.lt.s32.totalorder %s898_s14, 3 }
   0x5   : > { %s1074_s15 = smov (%p34_p1, %s32_s15), 0  ;;  %p190_p3 = pnand %p794_p0, %p189_p2 }
   0x6   : > { %p230_p4 = scmp.lt.s32.totalorder (!%p190_p3), %s890_s12, 1  ;;  %s900_s20 = smov (!%p190_p3), 96  }
   0x7   : > { %193 = sbr.rel (%p190_p3) target bundleno = 1228 (0x4cc), region = 32  ;;  %s901_s21 = smov (!%p190_p3), 88  }
   0x8   : > { %s903_s28 = smov (!%p190_p3), 120   ;;  %s904_s29 = smov (!%p190_p3), 64  }
   0x9   : > { %s905_s30 = smov (!%p190_p3), 72   ;;  %s906_s4 = smov (!%p190_p3), 104  }
   0xa   : > { %s909_s5 = smov (!%p190_p3), 80   ;;  %s910_s6 = smov (!%p190_p3), 112  }
   0xb   : > { %s911_s7 = smov (!%p190_p3), 48   ;;  %s912_s8 = smov (!%p190_p3), 56  }
   0xc   : > { %s1076_s12 = smov (!%p230_p4, %s890_s12), 1  ;;  %v902_v6 = vmov 0   ;;  %vm271_vm1 = vcmask 64512   ;;  %vm262_vm2 = vcmask 7168   ;;  %v907_v13 = vmov -inf   ;;  %s913_s9 = smov 40  }
   0xd   : > { %s955_s16 = sshll.u32 %s1076_s12, 2  ;;  %s249_s27 = scalar_lea.vmem %s1067_s2, %s1076_s12  ;;  %849 = vset.pattern.permute.xlu1 %v902_v6  ;;  %850 = vset.pattern.permute.xlu0 %v902_v6  ;;  %263 = vst.msk [vmem:[#allocation2] sm:$0xff] %vm262_vm2, %v907_v13  ;;  %v281_v15 = vlaneseq  ;;  %v908_v24 = vmov 0.0   ;;  %vm358_vm6 = vcmask 1043456   ;;  %vm679_vm7 = vcmask 130048  }
   0xe   : > { %s243_s19 = scalar_lea.vmem %s1066_s1, %s955_s16  ;;  %s236_s24 = scalar_lea.vmem %s1065_s0, %s955_s16  ;;  %v278_v5 = vld [vmem:[%s249_s27] sm:$0x1]  ;;  %851 = vset.pattern.permute.xlu2 %v902_v6  ;;  %264 = vst.msk [vmem:[#allocation2 + $0x8] sm:$0xff] %vm262_vm2, %v907_v13  ;;  %vm681_vm8 = vcmask 195584   ;;  %vm684_vm9 = vcmask 257024  }
   0xf   : > { %v277_v0 = vld [vmem:[%s243_s19] sm:$0xf]  ;;  %vm279_vm0 = vcmp.gt.f32.partialorder %v278_v5, 0.0  ;;  %265 = vst.msk [vmem:[#allocation2 + $0x10] sm:$0xff] %vm262_vm2, %v907_v13  ;;  %v282_v16 = vshrl.u32 %v281_v15, 7  ;;  %v287_v17 = vand.u32 127, %v281_v15  ;;  %s256_s19 = scalar_lea.vmem %s1068_s3, %s955_s16 }
  0x10   : > { %v296_v1 = vunpack.c.l.b16 %v277_v0  ;;  %v276_v3 = vld [vmem:[%s236_s24] sm:$0xf]  ;;  %v290_v8 = vsel %vm279_vm0, 1, %v902_v6  ;;  %266 = vst.msk [vmem:[#allocation2 + $0x18] sm:$0xff] %vm262_vm2, %v907_v13  ;;  %s914_s10 = smov 8   ;;  %s915_s11 = smov 24  }
  0x11   : > { %v379_v4 = vunpack.c.l.b16 %v276_v3  ;;  %v291_v18 = vperm.slane %v290_v8, 0  ;;  %vm293_vm4 = vcmp.ge.s32.totalorder %v282_v16, %v287_v17  ;;  %272 = vst.msk [vmem:[#allocation4] sm:$0xff] %vm271_vm1, %v908_v24  ;;  %s916_s12 = smov 16  }
  0x12   : > { %v961_v2 = vpack.c.b16 %v296_v1, %v296_v1  ;;  %267 = vst.msk [vmem:[#allocation3] sm:$0xff] %vm262_vm2, %v908_v24 }
  0x13   : > { %v972_v7 = vpack.c.b16 %v379_v4, %v379_v4  ;;  %vm292_vm3 = vcmp.eq.s32.totalorder %v291_v18, 1  ;;  %268 = vst.msk [vmem:[#allocation3 + $0x8] sm:$0xff] %vm262_vm2, %v908_v24 }
  0x14   : > { %298 = vrot.lane.b32.xlu0 %v961_v2, %s900_s20  ;;  %383 = vrot.lane.b32.xlu1 %v961_v2, %s901_s21  ;;  %vm986_vm5 = vmand %vm292_vm3, %vm293_vm4  ;;  %269 = vst.msk [vmem:[#allocation3 + $0x10] sm:$0xff] %vm262_vm2, %v908_v24  ;;  %v321_v29 = vld [vmem:[#allocation2] sm:$0xff] }
  0x15   : > { %381 = vrot.lane.b32.xlu2 %v972_v7, %s903_s28  ;;  %270 = vst.msk [vmem:[#allocation3 + $0x18] sm:$0xff] %vm262_vm2, %v908_v24  ;;  %v406_v50 = vld [vmem:[#allocation2 + $0x8] sm:$0xff] }
  0x16   : > { %273 = vst.msk [vmem:[#allocation4 + $0x8] sm:$0xff] %vm271_vm1, %v908_v24 }
  0x17   : > { %274 = vst.msk [vmem:[#allocation4 + $0x10] sm:$0xff] %vm271_vm1, %v908_v24  ;;  %v570_v58 = vld [vmem:[#allocation2 + $0x18] sm:$0xff] }
  0x18   : > { %275 = vst.msk [vmem:[#allocation4 + $0x18] sm:$0xff] %vm271_vm1, %v908_v24 }
  0x1d   : > { %353 = vrot.lane.b32.xlu2 %v961_v2, %s904_s29 }
  0x25   : > { %547 = vrot.lane.b32.xlu2 %v961_v2, %s905_s30 }
  0x2d   : > { %545 = vrot.lane.b32.xlu2 %v972_v7, %s906_s4 }
  0x6f   : > { %v382_v14 = vpop.permute.xlu2 %381 }
  0x77   : > { %v354_v25 = vpop.permute.xlu2 %353 }
  0x78   : > { %v360_v35 = vsel %vm358_vm6, %v354_v25, 0 }
  0x79   : > { %369 = vmatpush.bf16.msra.mxu1 %v360_v35 }
  0x7f   : > { %v548_v26 = vpop.permute.xlu2 %547 }
  0x80   : > { %v553_v27 = vsel %vm271_vm1, %v548_v26, 0 }
  0x86   : > { %v299_v9 = vpop.permute.xlu0 %298  ;;  %v384_v11 = vpop.permute.xlu1 %383 }
  0x87   : > { %v305_v10 = vsel %vm271_vm1, %v299_v9, 0  ;;  %v389_v12 = vsel %vm271_vm1, %v384_v11, 0  ;;  %v546_v28 = vpop.permute.xlu2 %545 }
  0x88   : > { %314 = vmatpush.bf16.xpose.msra.mxu0 %v305_v10  ;;  %398 = vmatpush.bf16.xpose.msra.mxu2 %v389_v12 }
  0x8f   : > { %798 = vmatmul.msk.bf16.vlgmr.msra.gmra.mxu0 %vm271_vm1, %v276_v3  ;;  %800 = vmatmul.msk.bf16.vlgmr.msra.gmra.mxu2 %vm271_vm1, %v382_v14  ;;  %v488_v14 = vld [vmem:[#allocation2 + $0x10] sm:$0xff] }
  0x90   : > { %562 = vmatpush.bf16.xpose.msrb.mxu0 %v553_v27 }
  0x9f   : > { %804 = vmatmul.msk.bf16.vlgmr.msrb.gmra.mxu0 %vm271_vm1, %v546_v28 }
 0x10c   : > { %v316_v20 = vpop.f32.mrf.mxu0 }
 0x10d   : > { %v320_v21 = vsel %vm986_vm5, %v316_v20, -1e+10 }
 0x10e   : > { %v322_v22 = vsel %vm271_vm1, %v320_v21, -inf }
 0x10f   : > { %323 = vmax.xlane.f32.xlu0 %v322_v22 }
 0x112   : > { %v400_v30 = vpop.f32.mrf.mxu2 }
 0x113   : > { %v404_v36 = vsel %vm986_vm5, %v400_v30, -1e+10  ;;  %v337_v30 = vld [vmem:[#allocation3] sm:$0xff] }
 0x114   : > { %v318_v23 = vpop.f32.mrf.mxu0  ;;  %v407_v37 = vsel %vm271_vm1, %v404_v36, -inf }
 0x11a   : > { %v402_v34 = vpop.f32.mrf.mxu2 }
 0x11c   : > { %v564_v41 = vpop.f32.mrf.mxu0 }
 0x11d   : > { %v1012_v42 = vsel %vm986_vm5, %v564_v41, -1e+10 }
 0x11e   : > { %v571_v43 = vsel %vm271_vm1, %v1012_v42, -inf }
 0x11f   : > { %572 = vmax.xlane.f32.xlu0 %v571_v43 }
 0x124   : > { %v566_v48 = vpop.f32.mrf.mxu0 }
 0x182   : > { %v324_v31 = vpop.xlane.xlu0 %323 }
 0x183   : > { %v325_v32 = vmax.f32 %v321_v29, %v324_v31 }
 0x185   : > { %v326_v33 = vsub.f32 %v321_v29, %v325_v32  ;;  %377 = vst.msk [vmem:[#allocation2] sm:$0xff] %vm262_vm2, %v325_v32  ;;  %331 = vperm.xlu1 %849, %v325_v32  }
 0x187   : > { %v327_v53 = vmul.f32 1.442695, %v326_v33 }
 0x18d   : > { %465 = vrot.lane.b32.xlu1 %v961_v2, %s909_s5 }
 0x192   : > { %v573_v59 = vpop.xlane.xlu0 %572 }
 0x193   : > { %v574_v60 = vmax.f32 %v570_v58, %v573_v59 }
 0x195   : > { %463 = vrot.lane.b32.xlu1 %v972_v7, %s910_s6  ;;  %v575_v61 = vsub.f32 %v570_v58, %v574_v60  ;;  %626 = vst.msk [vmem:[#allocation2 + $0x18] sm:$0xff] %vm262_vm2, %v574_v60  ;;  %v345_v7 = vld [vmem:[#allocation4] sm:$0xff]  ;;  %v423_v58 = vld [vmem:[#allocation3 + $0x8] sm:$0xff] }
 0x197   : > { %v576_v27 = vmul.f32 1.442695, %v575_v61 }
 0x1bf   : > { %408 = vmax.xlane.f32.xlu1 %v407_v37 }
 0x1f7   : > { %v332_v38 = vpop.permute.xlu1 %331 }
 0x1f8   : > { %v334_v39 = vsub.f32 %v320_v21, %v332_v38 }
 0x1fa   : > { %v335_v40 = vmul.f32 1.442695, %v334_v39 }
 0x1fc   : > { %852 = vpow2.f32 %v335_v40 }
 0x1fd   : > { %854 = vpow2.f32 %v327_v53 }
 0x1ff   : > { %v466_v44 = vpop.permute.xlu1 %465 }
 0x200   : > { %v471_v45 = vsel %vm271_vm1, %v466_v44, 0 }
 0x201   : > { %480 = vmatpush.bf16.xpose.msrb.mxu1 %v471_v45  ;;  %v431_v45 = vld [vmem:[#allocation4 + $0x8] sm:$0xff] }
 0x202   : > { %v853_v46 = vpop.eup %852 }
 0x203   : > { %v352_v47 = vpack.c.bf16 %v853_v46, %v853_v46  ;;  %v855_v56 = vpop.eup %854  ;;  %v339_v11 = vsel %vm271_vm1, %v853_v46, 0.0 }
 0x204   : > { %v338_v31 = vmul.f32 %v855_v56, %v337_v30 }
 0x205   : > { %799 = vmatmul.msk.bf16.vlgmr.msra.gmra.mxu1 %vm271_vm1, %v352_v47  ;;  %v587_v47 = vld [vmem:[#allocation3 + $0x18] sm:$0xff] }
 0x207   : > { %v464_v49 = vpop.permute.xlu1 %463 }
 0x215   : > { %802 = vmatmul.msk.bf16.vlgmr.msrb.gmra.mxu1 %vm271_vm1, %v464_v49 }
 0x232   : > { %v409_v51 = vpop.xlane.xlu1 %408 }
 0x233   : > { %v410_v52 = vmax.f32 %v406_v50, %v409_v51 }
 0x235   : > { %462 = vst.msk [vmem:[#allocation2 + $0x8] sm:$0xff] %vm262_vm2, %v410_v52  ;;  %416 = vperm.xlu0 %850, %v410_v52   ;;  %v411_v54 = vsub.f32 %v406_v50, %v410_v52 }
 0x237   : > { %v412_v55 = vmul.f32 1.442695, %v411_v54 }
 0x239   : > { %856 = vpow2.f32 %v412_v55 }
 0x23d   : > { %521 = vrot.lane.b32.xlu0 %v961_v2, %s911_s7 }
 0x23f   : > { %v1021_v57 = vpop.eup %856 }
 0x240   : > { %v424_v59 = vmul.f32 %v1021_v57, %v423_v58 }
 0x245   : > { %348 = vperm.xlu0 %850, %v855_v56  }
 0x24d   : > { %434 = vperm.xlu0 %850, %v1021_v57   ;;  %v595_v57 = vld [vmem:[#allocation4 + $0x18] sm:$0xff] }
 0x282   : > { %v371_v62 = vpop.f32.mrf.mxu1 }
 0x28a   : > { %v373_v63 = vpop.f32.mrf.mxu1 }
 0x292   : > { %v482_v0 = vpop.f32.mrf.mxu1 }
 0x293   : > { %v486_v1 = vsel %vm986_vm5, %v482_v0, -1e+10 }
 0x294   : > { %v489_v3 = vsel %vm271_vm1, %v486_v1, -inf }
 0x295   : > { %490 = vmax.xlane.f32.xlu2 %v489_v3  ;;  %v505_v3 = vld [vmem:[#allocation3 + $0x10] sm:$0xff] }
 0x29a   : > { %v484_v4 = vpop.f32.mrf.mxu1 }
 0x2a7   : > { %v417_v5 = vpop.permute.xlu0 %416 }
 0x2a8   : > { %v419_v12 = vsub.f32 %v404_v36, %v417_v5 }
 0x2aa   : > { %v420_v13 = vmul.f32 1.442695, %v419_v12 }
 0x2ac   : > { %858 = vpow2.f32 %v420_v13 }
 0x2ad   : > { %439 = vrot.lane.b32.xlu2 %v961_v2, %s912_s8 }
 0x2af   : > { %v522_v6 = vpop.permute.xlu0 %521 }
 0x2b0   : > { %v527_v35 = vsel %vm358_vm6, %v522_v6, 0 }
 0x2b2   : > { %v859_v18 = vpop.eup %858 }
 0x2b3   : > { %v438_v21 = vpack.c.bf16 %v859_v18, %v859_v18  ;;  %v425_v29 = vsel %vm271_vm1, %v859_v18, 0.0 }
 0x2b5   : > { %580 = vperm.xlu2 %851, %v574_v60  }
 0x2b7   : > { %v349_v8 = vpop.permute.xlu0 %348 }
 0x2b8   : > { %v351_v9 = vmul.f32 %v349_v8, %v345_v7 }
 0x2ba   : > { %v375_v10 = vadd.f32 %v371_v62, %v351_v9  ;;  %v513_v9 = vld [vmem:[#allocation4 + $0x10] sm:$0xff] }
 0x2bc   : > { %376 = vst.msk [vmem:[#allocation4] sm:$0xff] %vm271_vm1, %v375_v10 }
 0x2bf   : > { %v435_v46 = vpop.permute.xlu0 %434 }
 0x2c0   : > { %v437_v49 = vmul.f32 %v435_v46, %v431_v45 }
 0x2de   : > { %340 = vadd.xlane.f32.xlu2 %v339_v11 }
 0x308   : > { %v491_v15 = vpop.xlane.xlu2 %490 }
 0x309   : > { %v492_v16 = vmax.f32 %v488_v14, %v491_v15 }
 0x30b   : > { %v493_v17 = vsub.f32 %v488_v14, %v492_v16  ;;  %544 = vst.msk [vmem:[#allocation2 + $0x10] sm:$0xff] %vm262_vm2, %v492_v16  ;;  %498 = vperm.xlu1 %849, %v492_v16  }
 0x310   : > { %v440_v19 = vpop.permute.xlu2 %439 }
 0x311   : > { %v445_v20 = vsel %vm358_vm6, %v440_v19, 0 }
 0x312   : > { %454 = vmatpush.bf16.msra.mxu3 %v445_v20 }
 0x313   : > { %603 = vrot.lane.b32.xlu1 %v961_v2, %s913_s9  ;;  %v494_v2 = vmul.f32 1.442695, %v493_v17 }
 0x315   : > { %801 = vmatmul.msk.bf16.vlgmr.msra.gmra.mxu3 %vm271_vm1, %v438_v21 }
 0x316   : > { %536 = vmatpush.bf16.msrb.mxu3 %v527_v35 }
 0x318   : > { %v581_v22 = vpop.permute.xlu2 %580 }
 0x319   : > { %v583_v23 = vsub.f32 %v1012_v42, %v581_v22 }
 0x31b   : > { %v584_v24 = vmul.f32 1.442695, %v583_v23 }
 0x31d   : > { %860 = vpow2.f32 %v584_v24 }
 0x31e   : > { %862 = vpow2.f32 %v576_v27 }
 0x31f   : > { %864 = vpow2.f32 %v494_v2  ;;  %v632_v2 = vld [vmem:[#allocation4] sm:$0xff] }
 0x323   : > { %v861_v25 = vpop.eup %860 }
 0x324   : > { %v589_v26 = vsel %vm271_vm1, %v861_v25, 0.0  ;;  %v863_v28 = vpop.eup %862  ;;  %v602_v42 = vpack.c.bf16 %v861_v25, %v861_v25 }
 0x325   : > { %590 = vadd.xlane.f32.xlu2 %v589_v26  ;;  %v865_v34 = vpop.eup %864  ;;  %v588_v50 = vmul.f32 %v863_v28, %v587_v47 }
 0x326   : > { %v506_v4 = vmul.f32 %v865_v34, %v505_v3 }
 0x33d   : > { %598 = vperm.xlu2 %851, %v863_v28   ;;  %426 = vadd.xlane.f32.xlu1 %v425_v29 }
 0x351   : > { %v341_v32 = vpop.xlane.xlu2 %340 }
 0x352   : > { %v342_v33 = vadd.f32 %v341_v32, %v338_v31 }
 0x354   : > { %344 = vst.msk [vmem:[#allocation3] sm:$0xff] %vm262_vm2, %v342_v33 }
 0x356   : > { %516 = vperm.xlu1 %849, %v865_v34  }
 0x35b   : > { %v630_v48 = vld [vmem:[#allocation3] sm:$0xff] }
 0x37d   : > { %v499_v36 = vpop.permute.xlu1 %498 }
 0x37e   : > { %v501_v37 = vsub.f32 %v486_v1, %v499_v36 }
 0x380   : > { %v502_v38 = vmul.f32 1.442695, %v501_v37 }
 0x382   : > { %866 = vpow2.f32 %v502_v38 }
 0x383   : > { %868 = vrcp.f32 %v630_v48 }
 0x385   : > { %v604_v39 = vpop.permute.xlu1 %603 }
 0x386   : > { %v609_v40 = vsel %vm358_vm6, %v604_v39, 0 }
 0x387   : > { %618 = vmatpush.bf16.msrb.mxu2 %v609_v40 }
 0x388   : > { %v867_v41 = vpop.eup %866 }
 0x389   : > { %v507_v43 = vsel %vm271_vm1, %v867_v41, 0.0  ;;  %v520_v44 = vpack.c.bf16 %v867_v41, %v867_v41  ;;  %v869_v55 = vpop.eup %868 }
 0x38a   : > { %508 = vadd.xlane.f32.xlu0 %v507_v43  ;;  %805 = vmatmul.msk.bf16.vlgmr.msrb.gmra.mxu2 %vm271_vm1, %v602_v42 }
 0x38b   : > { %803 = vmatmul.msk.bf16.vlgmr.msrb.gmra.mxu3 %vm271_vm1, %v520_v44 }
 0x398   : > { %v591_v51 = vpop.xlane.xlu2 %590  ;;  %v456_v52 = vpop.f32.mrf.mxu3 }
 0x399   : > { %v592_v53 = vadd.f32 %v591_v51, %v588_v50  ;;  %v460_v54 = vadd.f32 %v456_v52, %v437_v49 }
 0x39b   : > { %593 = vst.msk [vmem:[#allocation3 + $0x18] sm:$0xff] %vm262_vm2, %v592_v53 }
 0x39c   : > { %461 = vst.msk [vmem:[#allocation4 + $0x8] sm:$0xff] %vm271_vm1, %v460_v54 }
 0x39e   : > { %635 = vperm.xlu0 %850, %v869_v55  }
 0x3a0   : > { %v458_v56 = vpop.f32.mrf.mxu3  ;;  %v599_v8 = vpop.permute.xlu2 %598 }
 0x3a1   : > { %v601_v11 = vmul.f32 %v599_v8, %v595_v57 }
 0x3a2   : > { %v657_v63 = vld [vmem:[#allocation3 + $0x18] sm:$0xff] }
 0x3a3   : > { %v641_v21 = vld [vmem:[#allocation4 + $0x8] sm:$0xff] }
 0x3b0   : > { %v427_v60 = vpop.xlane.xlu1 %426 }
 0x3b1   : > { %v428_v61 = vadd.f32 %v427_v60, %v424_v59 }
 0x3b3   : > { %429 = vst.msk [vmem:[#allocation3 + $0x8] sm:$0xff] %vm262_vm2, %v428_v61 }
 0x3ba   : > { %v639_v62 = vld [vmem:[#allocation3 + $0x8] sm:$0xff] }
 0x3bb   : > { %870 = vrcp.f32 %v639_v62 }
 0x3bc   : > { %872 = vrcp.f32 %v657_v63 }
 0x3c1   : > { %v871_v0 = vpop.eup %870 }
 0x3c2   : > { %644 = vperm.xlu1 %849, %v871_v0   ;;  %v873_v1 = vpop.eup %872 }
 0x3c8   : > { %v517_v10 = vpop.permute.xlu1 %516 }
 0x3c9   : > { %v519_v12 = vmul.f32 %v517_v10, %v513_v9 }
 0x3ca   : > { %662 = vperm.xlu1 %849, %v873_v1  }
 0x3fd   : > { %v509_v5 = vpop.xlane.xlu0 %508 }
 0x3fe   : > { %v510_v6 = vadd.f32 %v509_v5, %v506_v4 }
 0x400   : > { %511 = vst.msk [vmem:[#allocation3 + $0x10] sm:$0xff] %vm262_vm2, %v510_v6 }
 0x407   : > { %v648_v7 = vld [vmem:[#allocation3 + $0x10] sm:$0xff] }
 0x408   : > { %874 = vrcp.f32 %v648_v7 }
 0x40d   : > { %v620_v13 = vpop.f32.mrf.mxu2 }
 0x40e   : > { %v875_v14 = vpop.eup %874  ;;  %v624_v15 = vadd.f32 %v620_v13, %v601_v11  ;;  %v538_v16 = vpop.f32.mrf.mxu3 }
 0x40f   : > { %v542_v17 = vadd.f32 %v538_v16, %v519_v12  ;;  %653 = vperm.xlu2 %851, %v875_v14  }
 0x410   : > { %625 = vst.msk [vmem:[#allocation4 + $0x18] sm:$0xff] %vm271_vm1, %v624_v15  ;;  %v636_v29 = vpop.permute.xlu0 %635 }
 0x411   : > { %543 = vst.msk [vmem:[#allocation4 + $0x10] sm:$0xff] %vm271_vm1, %v542_v17  ;;  %v638_v31 = vmul.f32 %v636_v29, %v632_v2 }
 0x415   : > { %v622_v18 = vpop.f32.mrf.mxu2 }
 0x416   : > { %v540_v19 = vpop.f32.mrf.mxu3 }
 0x417   : > { %v659_v23 = vld [vmem:[#allocation4 + $0x18] sm:$0xff] }
 0x418   : > { %v650_v26 = vld [vmem:[#allocation4 + $0x10] sm:$0xff] }
 0x434   : > { %v645_v20 = vpop.permute.xlu1 %644 }
 0x435   : > { %v647_v22 = vmul.f32 %v645_v20, %v641_v21 }
 0x437   : > { %667 = vrot.lane.b32.xlu0 %v647_v22, %s914_s10 }
 0x43c   : > { %v663_v24 = vpop.permute.xlu1 %662 }
 0x43d   : > { %v665_v25 = vmul.f32 %v663_v24, %v659_v23 }
 0x43f   : > { %675 = vrot.lane.b32.xlu1 %v665_v25, %s915_s11 }
 0x469   : > { %v654_v27 = vpop.permute.xlu2 %653 }
 0x46a   : > { %v656_v28 = vmul.f32 %v654_v27, %v650_v26 }
 0x46c   : > { %671 = vrot.lane.b32.xlu2 %v656_v28, %s916_s12 }
 0x4a9   : > { %v668_v30 = vpop.permute.xlu0 %667 }
 0x4aa   : > { %v678_v32 = vsel %vm271_vm1, %v638_v31, %v668_v30 }
 0x4b1   : > { %v676_v34 = vpop.permute.xlu1 %675 }
 0x4c6   : > { %v672_v33 = vpop.permute.xlu2 %671 }
 0x4c7   : > { %v680_v35 = vsel %vm679_vm7, %v678_v32, %v672_v33 }
 0x4c8   : > { %v682_v36 = vsel %vm681_vm8, %v680_v35, %v676_v34 }
 0x4c9   : > { %v683_v37 = vpack.c.bf16 %v682_v36, %v682_v36 }
 0x4cb   : > { %685 = vst.msk [vmem:[%s256_s19] sm:$0xf] %vm684_vm9, %v683_v37 }
 0x4cc PF: > { %s13_s14 = sadd.s32 1, %s898_s14   ;;  %s1071_s12 = smov %s894_s13 }
 0x4cd   : > { %p10_p5 = scmp.ge.s32.totalorder %s13_s14, 4   ;;  %s1072_s13 = smov %s1074_s15 }
 0x4cf   :  { %12 = sbr.rel (!%p10_p5) target bundleno = 2 (0x2), region = 85 }

// kernel: transformer_forward.46
= control target key start
LH: loop header
LB: loop body
LE: loop exit
PB: predicated region body
PF: predicated region fallthrough
CT: control target
= control target key end

     0   :  { %8 = vsyncpa [#allocation4], 0  ;;  %s152_s15 = smov [#allocation3]   ;;  %s196_s0 = inlined_call_operand.vmem [shape: bf16[16,32], index: 0, kind: input, shape index: {}]   ;;  %s197_s1 = inlined_call_operand.vmem [shape: bf16[32,64], index: 1, kind: input, shape index: {}]   ;;  %s198_s2 = inlined_call_operand.hbm [shape: f32[1,64], index: 2, kind: input, shape index: {}]   ;;  %s199_s3 = inlined_call_operand.vmem [shape: bf16[16,64], index: 3, kind: output, shape index: {}]  }
   0x1   :  { %s18_s14 = sshll.u32 %s198_s2, 4  ;;  %s20_s16 = sshll.u32 %s152_s15, 4  ;;  %s19_s14 = int_to_ptr.hbm [resolvable:$true] %s18_s14  ;;  %s21_s16 = int_to_ptr.vmem [resolvable:$true] %s20_s16 }
   0x2   :  { %23 = dma.hbm_to_vmem [thread:$0]  %s19_s14, 16, %s21_s16, [#allocation4]  }
   0x3   :  { %150 = dma.done.wait [#allocation4], 16  }
   0x4   :  { %151 = vsyncadd [#allocation4], 4294967280  ;;  %vm33_vm0 = vcmask 523264   ;;  %v153_v0 = vmov 0.0   ;;  %v122_v1 = vld [vmem:[%s197_s1 + $0x8] sm:$0xff]  ;;  %v121_v2 = vld [vmem:[%s197_s1] sm:$0xff] }
   0x5   :  { %34 = vst.msk [vmem:[#allocation2] sm:$0xff] %vm33_vm0, %v153_v0  ;;  %71 = vmatpush.bf16.msra.mxu0 %v122_v1  ;;  %v120_v3 = vld [vmem:[%s196_s0] sm:$0xff]  ;;  %vm61_vm1 = vcmask 261120   ;;  %v125_v8 = vld [vmem:[#allocation3] ss:$0 sm:$0xff]  ;;  %vm99_vm2 = vcmask 519168  }
   0x6   :  { %35 = vst.msk [vmem:[#allocation2 + $0x8] sm:$0xff] %vm33_vm0, %v153_v0 }
   0x9   :  { %72 = vmatpush.bf16.msra.mxu0 %v121_v2 }
   0xc   :  { %119 = vmatmul.msk.bf16.vlgmr.msra.gmra.mxu0 %vm61_vm1, %v120_v3  ;;  %v36_v4 = vld [vmem:[#allocation2] sm:$0xff] }
   0xd   :  { %v37_v7 = vld [vmem:[#allocation2 + $0x8] sm:$0xff] }
  0x89   :  { %v74_v5 = vpop.f32.mrf.mxu0 }
  0x8a   :  { %v79_v6 = vadd.f32 %v74_v5, %v36_v4 }
  0x8c   :  { %82 = vst.msk [vmem:[#allocation2] sm:$0xff] %vm33_vm0, %v79_v6 }
  0x91   :  { %v76_v9 = vpop.f32.mrf.mxu0 }
  0x92   :  { %v80_v10 = vadd.f32 %v76_v9, %v37_v7 }
  0x93   :  { %v87_v11 = vld [vmem:[#allocation2] sm:$0xff] }
  0x94   :  { %v93_v12 = vadd.f32 %v125_v8, %v87_v11  ;;  %83 = vst.msk [vmem:[#allocation2 + $0x8] sm:$0xff] %vm33_vm0, %v80_v10 }
  0x96   :  { %v95_v13 = vmax.f32 %v93_v12, 0.0 }
  0x98   :  { %v97_v14 = vpack.c.bf16 %v95_v13, %v95_v13 }
  0x9a   :  { %100 = vst.msk [vmem:[%s199_s3] sm:$0xf] %vm99_vm2, %v97_v14 }
  0x9b   :  { %v88_v15 = vld [vmem:[#allocation2 + $0x8] sm:$0xff] }
  0x9c   :  { %v94_v16 = vadd.f32 %v125_v8, %v88_v15 }
  0x9e   :  { %v96_v17 = vmax.f32 %v94_v16, 0.0 }
  0xa0   :  { %v98_v18 = vpack.c.bf16 %v96_v17, %v96_v17 }
  0xa2   :  { %101 = vst.msk [vmem:[%s199_s3 + $0x4] sm:$0xf] %vm99_vm2, %v98_v18 }
  0xa3   :  { %106 = vsyncpa [#allocation4], 1 }

// kernel: transformer_forward.45
= control target key start
LH: loop header
LB: loop body
LE: loop exit
PB: predicated region body
PF: predicated region fallthrough
CT: control target
= control target key end

     0   :  { %11 = vsyncpa [#allocation4], 0  ;;  %s396_s0 = inlined_call_operand.vmem [shape: bf16[16,32], index: 0, kind: input, shape index: {}]   ;;  %s397_s1 = inlined_call_operand.vmem [shape: bf16[32,32], index: 1, kind: input, shape index: {}]   ;;  %s398_s2 = inlined_call_operand.hbm [shape: f32[1,32], index: 2, kind: input, shape index: {}]   ;;  %s399_s3 = inlined_call_operand.vmem [shape: bf16[16,32], index: 3, kind: input, shape index: {}]   ;;  %s400_s4 = inlined_call_operand.hbm [shape: f32[1,32], index: 4, kind: input, shape index: {}]   ;;  %s401_s5 = inlined_call_operand.hbm [shape: f32[1,32], index: 5, kind: input, shape index: {}]   ;;  %s402_s6 = inlined_call_operand.vmem [shape: bf16[16,32], index: 6, kind: output, shape index: {}]  }
   0x1   :  { %12 = vsyncpa [#allocation6], 0  ;;  %s35_s23 = sshll.u32 %s400_s4, 4  ;;  %s320_s24 = smov [#allocation5]   ;;  %s36_s23 = int_to_ptr.hbm [resolvable:$true] %s35_s23 }
   0x2   :  { %s37_s25 = sshll.u32 %s320_s24, 4  ;;  %s22_s28 = sshll.u32 %s398_s2, 4  ;;  %s38_s25 = int_to_ptr.vmem [resolvable:$true] %s37_s25  ;;  %s23_s28 = int_to_ptr.hbm [resolvable:$true] %s22_s28 }
   0x3   :  { %40 = dma.hbm_to_vmem [thread:$0]  %s36_s23, 16, %s38_s25, [#allocation6]  }
   0x4   :  { %s321_s29 = smov [#allocation3]   ;;  %s46_s9 = sshll.u32 %s401_s5, 4  ;;  %s47_s9 = int_to_ptr.hbm [resolvable:$true] %s46_s9 }
   0x5   :  { %s24_s30 = sshll.u32 %s321_s29, 4  ;;  %s322_s4 = smov [#allocation7]   ;;  %s25_s30 = int_to_ptr.vmem [resolvable:$true] %s24_s30 }
   0x6   :  { %27 = dma.hbm_to_vmem [thread:$0]  %s23_s28, 16, %s25_s30, [#allocation4]  }
   0x7   :  { %s48_s10 = sshll.u32 %s322_s4, 4  ;;  %s49_s10 = int_to_ptr.vmem [resolvable:$true] %s48_s10 }
   0x8   :  { %51 = dma.hbm_to_vmem [thread:$0]  %s47_s9, 16, %s49_s10, [#allocation6]  }
   0x9   :  { %316 = dma.done.wait [#allocation4], 16  }
   0xa   :  { %317 = vsyncadd [#allocation4], 4294967280 }
   0xb   :  { %318 = dma.done.wait [#allocation6], 32  }
   0xc   :  { %319 = vsyncadd [#allocation6], 4294967264  ;;  %vm69_vm0 = vcmask 261120   ;;  %v323_v0 = vmov 0.0   ;;  %v225_v1 = vld [vmem:[%s397_s1 + $0x8] sm:$0xff]  ;;  %v224_v2 = vld [vmem:[%s397_s1] sm:$0xff] }
   0xd   :  { %70 = vst.msk [vmem:[#allocation2] sm:$0xff] %vm69_vm0, %v323_v0  ;;  %107 = vmatpush.bf16.msra.mxu0 %v225_v1  ;;  %v223_v3 = vld [vmem:[%s396_s0] sm:$0xff]  ;;  %v235_v9 = vld [vmem:[#allocation3] ss:$0 sm:$0xff]  ;;  %v324_v22 = vmov 32.0   ;;  %vm201_vm6 = vcmask 257024  }
   0xe   :  { %71 = vst.msk [vmem:[#allocation2 + $0x8] sm:$0xff] %vm69_vm0, %v323_v0  ;;  %v227_v8 = vld [vmem:[%s399_s3] sm:$0xff]   ;;  %238 = vrcp.f32 %v324_v22  ;;  %v236_v53 = vld [vmem:[#allocation5] ss:$0 sm:$0xff]  ;;  %v237_v56 = vld [vmem:[#allocation7] ss:$0 sm:$0xff] }
   0xf   :  { %v228_v12 = vunpack.c.l.bf16 %v227_v8  ;;  %v229_v17 = vunpack.c.h.bf16 %v227_v8 }
  0x11   :  { %108 = vmatpush.bf16.msra.mxu0 %v224_v2 }
  0x14   :  { %222 = vmatmul.msk.bf16.vlgmr.msra.gmra.mxu0 %vm69_vm0, %v223_v3  ;;  %v72_v4 = vld [vmem:[#allocation2] sm:$0xff]  ;;  %v239_v23 = vpop.eup %238 }
  0x15   :  { %v73_v7 = vld [vmem:[#allocation2 + $0x8] sm:$0xff]  ;;  %v143_v24 = vmul.f32 32.0, %v239_v23  ;;  %vm147_vm1 = vweird.f32 %v239_v23 }
  0x17   :  { %v144_v25 = vsub.f32 1.0, %v143_v24 }
  0x19   :  { %v145_v26 = vmul.f32 %v239_v23, %v144_v25 }
  0x1b   :  { %v146_v27 = vadd.f32 %v239_v23, %v145_v26 }
  0x1d   :  { %v148_v28 = vsel %vm147_vm1, %v239_v23, %v146_v27 }
  0x91   :  { %v110_v5 = vpop.f32.mrf.mxu0 }
  0x92   :  { %v115_v6 = vadd.f32 %v110_v5, %v72_v4 }
  0x94   :  { %117 = vst.msk [vmem:[#allocation2] sm:$0xff] %vm69_vm0, %v115_v6 }
  0x99   :  { %v112_v10 = vpop.f32.mrf.mxu0 }
  0x9a   :  { %v116_v11 = vadd.f32 %v112_v10, %v73_v7 }
  0x9b   :  { %v122_v13 = vld [vmem:[#allocation2] sm:$0xff] }
  0x9c   :  { %118 = vst.msk [vmem:[#allocation2 + $0x8] sm:$0xff] %vm69_vm0, %v116_v11  ;;  %v128_v14 = vadd.f32 %v235_v9, %v122_v13 }
  0x9e   :  { %v134_v15 = vadd.f32 %v228_v12, %v128_v14 }
  0xa0   :  { %v136_v16 = vsel %vm69_vm0, %v134_v15, 0.0 }
  0xa1   :  { %137 = vadd.xlane.f32.xlu0 %v136_v16 }
  0xa3   :  { %v123_v18 = vld [vmem:[#allocation2 + $0x8] sm:$0xff] }
  0xa4   :  { %v129_v19 = vadd.f32 %v235_v9, %v123_v18 }
  0xa6   :  { %v135_v20 = vadd.f32 %v229_v17, %v129_v19 }
  0xa8   :  { %v139_v21 = vsel %vm69_vm0, %v135_v20, 0.0 }
  0xa9   :  { %140 = vadd.xlane.f32.xlu0 %v139_v21 }
 0x114   :  { %v138_v29 = vpop.xlane.xlu0 %137 }
 0x115   :  { %v149_v30 = vmul.f32 %v148_v28, %v138_v29 }
 0x117   :  { %v151_v31 = vsub.f32 %v134_v15, %v149_v30 }
 0x119   :  { %v153_v32 = vmul.f32 %v151_v31, %v151_v31 }
 0x11b   :  { %v155_v33 = vsel %vm69_vm0, %v153_v32, 0.0 }
 0x11c   :  { %156 = vadd.xlane.f32.xlu1 %v155_v33  ;;  %v141_v34 = vpop.xlane.xlu0 %140 }
 0x11d   :  { %v150_v35 = vmul.f32 %v148_v28, %v141_v34 }
 0x11f   :  { %v152_v36 = vsub.f32 %v135_v20, %v150_v35 }
 0x121   :  { %v154_v37 = vmul.f32 %v152_v36, %v152_v36 }
 0x123   :  { %v158_v38 = vsel %vm69_vm0, %v154_v37, 0.0 }
 0x124   :  { %159 = vadd.xlane.f32.xlu1 %v158_v38 }
 0x18f   :  { %v157_v39 = vpop.xlane.xlu1 %156 }
 0x190   :  { %v161_v40 = vmul.f32 %v157_v39, %v148_v28 }
 0x192   :  { %v163_v41 = vadd.f32 1e-05, %v161_v40 }
 0x194   :  { %240 = vrsqrt.f32 %v163_v41  ;;  %vm171_vm3 = vweird.f32 %v163_v41 }
 0x197   :  { %v160_v42 = vpop.xlane.xlu1 %159 }
 0x198   :  { %v162_v43 = vmul.f32 %v160_v42, %v148_v28 }
 0x19a   :  { %v241_v44 = vpop.eup %240  ;;  %v164_v45 = vadd.f32 1e-05, %v162_v43 }
 0x19b   :  { %v166_v46 = vmul.f32 %v241_v44, %v163_v41  ;;  %vm172_vm2 = vweird.f32 %v241_v44 }
 0x19c   :  { %242 = vrsqrt.f32 %v164_v45  ;;  %vm173_vm4 = vmor %vm171_vm3, %vm172_vm2  ;;  %vm181_vm7 = vweird.f32 %v164_v45 }
 0x19d   :  { %v167_v47 = vmul.f32 %v241_v44, %v166_v46 }
 0x19f   :  { %v168_v48 = vmul.f32 0.5, %v167_v47 }
 0x1a1   :  { %v169_v49 = vsub.f32 1.5, %v168_v48 }
 0x1a2   :  { %v243_v50 = vpop.eup %242 }
 0x1a3   :  { %v170_v51 = vmul.f32 %v241_v44, %v169_v49  ;;  %v176_v52 = vmul.f32 %v243_v50, %v164_v45  ;;  %vm182_vm5 = vweird.f32 %v243_v50 }
 0x1a4   :  { %vm183_vm8 = vmor %vm181_vm7, %vm182_vm5 }
 0x1a5   :  { %v174_v54 = vsel %vm173_vm4, %v241_v44, %v170_v51  ;;  %v177_v55 = vmul.f32 %v243_v50, %v176_v52 }
 0x1a6   :  { %v185_v57 = vmul.f32 %v174_v54, %v151_v31 }
 0x1a7   :  { %v178_v58 = vmul.f32 0.5, %v177_v55 }
 0x1a8   :  { %v191_v59 = vmul.f32 %v236_v53, %v185_v57 }
 0x1a9   :  { %v179_v60 = vsub.f32 1.5, %v178_v58 }
 0x1aa   :  { %v197_v61 = vadd.f32 %v237_v56, %v191_v59 }
 0x1ab   :  { %v180_v62 = vmul.f32 %v243_v50, %v179_v60 }
 0x1ac   :  { %v199_v63 = vpack.c.bf16 %v197_v61, %v197_v61 }
 0x1ad   :  { %v184_v0 = vsel %vm183_vm8, %v243_v50, %v180_v62 }
 0x1ae   :  { %202 = vst.msk [vmem:[%s402_s6] sm:$0xf] %vm201_vm6, %v199_v63  ;;  %v186_v1 = vmul.f32 %v184_v0, %v152_v36 }
 0x1b0   :  { %v192_v2 = vmul.f32 %v236_v53, %v186_v1 }
 0x1b2   :  { %v198_v3 = vadd.f32 %v237_v56, %v192_v2 }
 0x1b4   :  { %v200_v4 = vpack.c.bf16 %v198_v3, %v198_v3 }
 0x1b6   :  { %203 = vst.msk [vmem:[%s402_s6 + $0x4] sm:$0xf] %vm201_vm6, %v200_v4 }
 0x1b7   :  { %208 = vsyncpa [#allocation4], 1 }
 0x1b8   :  { %209 = vsyncpa [#allocation6], 1 }

// kernel: transformer_forward.44
= control target key start
LH: loop header
LB: loop body
LE: loop exit
PB: predicated region body
PF: predicated region fallthrough
CT: control target
= control target key end

     0   :  { %s915_s12 = smov 0   ;;  %s917_s13 = smov 0   ;;  %s1060_s0 = inlined_call_operand.vmem [shape: bf16[2,8,32], index: 0, kind: input, shape index: {}]   ;;  %s1061_s1 = inlined_call_operand.vmem [shape: bf16[2,8,64], index: 1, kind: input, shape index: {}]   ;;  %s1062_s2 = inlined_call_operand.vmem [shape: f32[2,1,8], index: 2, kind: input, shape index: {}]   ;;  %s1063_s3 = inlined_call_operand.vmem [shape: bf16[2,8,32], index: 3, kind: output, shape index: {}]  }
   0x1   :  { %s919_s14 = smov 0  }
   0x2 LB: > { %s32_s15 = sadd.s32 1, %s876_s13  ;;  %p780_p0 = scmp.ge.s32.totalorder %s880_s14, 1  ;;  %s880_s14 = sphi %s919_s14, %s13_s14   ;;  %s876_s13 = sphi %s917_s13, %s1067_s13   ;;  %s872_s12 = sphi %s915_s12, %s1066_s12  }
   0x3   : > { %p34_p1 = scmp.ge.s32.totalorder %s32_s15, 2  ;;  %p189_p2 = scmp.lt.s32.totalorder %s880_s14, 3 }
   0x5   : > { %s1069_s15 = smov (%p34_p1, %s32_s15), 0  ;;  %p190_p3 = pnand %p780_p0, %p189_p2 }
   0x6   : > { %p230_p4 = scmp.lt.s32.totalorder (!%p190_p3), %s872_s12, 1  ;;  %s884_s26 = smov (!%p190_p3), 96  }
   0x7   : > { %193 = sbr.rel (%p190_p3) target bundleno = 1133 (0x46d), region = 32  ;;  %s885_s27 = smov (!%p190_p3), 120  }
   0x8   : > { %s886_s28 = smov (!%p190_p3), 112   ;;  %s888_s29 = smov (!%p190_p3), 104  }
   0x9   : > { %s889_s30 = smov (!%p190_p3), 88   ;;  %s890_s4 = smov (!%p190_p3), 80  }
   0xa   : > { %s891_s5 = smov (!%p190_p3), 72   ;;  %s892_s6 = smov (!%p190_p3), 8  }
   0xb   : > { %s893_s7 = smov (!%p190_p3), 24   ;;  %s894_s8 = smov (!%p190_p3), 16  }
   0xc   : > { %v882_v0 = vmov 0   ;;  %s1071_s12 = smov (!%p230_p4, %s872_s12), 1  ;;  %vm271_vm0 = vcmask 64512   ;;  %vm262_vm2 = vcmask 7168   ;;  %v883_v6 = vmov -inf  }
   0xd   : > { %831 = vset.pattern.permute.xlu1 %v882_v0  ;;  %832 = vset.pattern.permute.xlu2 %v882_v0  ;;  %s933_s16 = sshll.u32 %s1071_s12, 2  ;;  %s249_s19 = scalar_lea.vmem %s1062_s2, %s1071_s12  ;;  %263 = vst.msk [vmem:[#allocation2] sm:$0xff] %vm262_vm2, %v883_v6  ;;  %v887_v17 = vmov 0.0   ;;  %vm344_vm4 = vcmask 1043456   ;;  %vm665_vm5 = vcmask 130048   ;;  %vm667_vm6 = vcmask 195584  }
   0xe   : > { %833 = vset.pattern.permute.xlu0 %v882_v0  ;;  %s243_s22 = scalar_lea.vmem %s1061_s1, %s933_s16  ;;  %v278_v1 = vld [vmem:[%s249_s19] sm:$0x1]  ;;  %s236_s25 = scalar_lea.vmem %s1060_s0, %s933_s16  ;;  %264 = vst.msk [vmem:[#allocation2 + $0x8] sm:$0xff] %vm262_vm2, %v883_v6  ;;  %vm670_vm7 = vcmask 257024  }
   0xf   : > { %v277_v2 = vld [vmem:[%s243_s22] sm:$0xf]  ;;  %vm279_vm1 = vcmp.gt.f32.partialorder %v278_v1, 0.0  ;;  %265 = vst.msk [vmem:[#allocation2 + $0x10] sm:$0xff] %vm262_vm2, %v883_v6  ;;  %s256_s11 = scalar_lea.vmem %s1063_s3, %s933_s16 }
  0x10   : > { %v288_v3 = vsel %vm271_vm0, %v277_v2, 0  ;;  %v280_v4 = vsel %vm279_vm1, 1, %v882_v0  ;;  %v276_v5 = vld [vmem:[%s236_s25] sm:$0xf]  ;;  %266 = vst.msk [vmem:[#allocation2 + $0x18] sm:$0xff] %vm262_vm2, %v883_v6  ;;  %v337_v13 = vunpack.c.l.b16 %v277_v2 }
  0x11   : > { %297 = vmatpush.bf16.xpose.msra.mxu0 %v288_v3  ;;  %v281_v7 = vperm.slane %v280_v4, 0  ;;  %v365_v15 = vunpack.c.l.b16 %v276_v5  ;;  %267 = vst.msk [vmem:[#allocation3] sm:$0xff] %vm262_vm2, %v887_v17 }
  0x12   : > { %v959_v14 = vpack.c.b16 %v337_v13, %v337_v13  ;;  %268 = vst.msk [vmem:[#allocation3 + $0x8] sm:$0xff] %vm262_vm2, %v887_v17 }
  0x13   : > { %vm952_vm3 = vcmp.eq.s32.totalorder %v281_v7, 1  ;;  %v366_v16 = vpack.c.b16 %v365_v15, %v365_v15  ;;  %269 = vst.msk [vmem:[#allocation3 + $0x10] sm:$0xff] %vm262_vm2, %v887_v17 }
  0x14   : > { %339 = vrot.lane.b32.xlu2 %v959_v14, %s884_s26  ;;  %270 = vst.msk [vmem:[#allocation3 + $0x18] sm:$0xff] %vm262_vm2, %v887_v17  ;;  %v972_v18 = vld [vmem:[#allocation2] sm:$0xff] }
  0x15   : > { %272 = vst.msk [vmem:[#allocation4] sm:$0xff] %vm271_vm0, %v887_v17  ;;  %v1008_v53 = vld [vmem:[#allocation2 + $0x8] sm:$0xff] }
  0x16   : > { %273 = vst.msk [vmem:[#allocation4 + $0x8] sm:$0xff] %vm271_vm0, %v887_v17  ;;  %v474_v61 = vld [vmem:[#allocation2 + $0x10] sm:$0xff] }
  0x17   : > { %274 = vst.msk [vmem:[#allocation4 + $0x10] sm:$0xff] %vm271_vm0, %v887_v17  ;;  %v556_v57 = vld [vmem:[#allocation2 + $0x18] sm:$0xff] }
  0x18   : > { %784 = vmatmul.msk.bf16.vlgmr.msra.gmra.mxu0 %vm271_vm0, %v276_v5  ;;  %275 = vst.msk [vmem:[#allocation4 + $0x18] sm:$0xff] %vm271_vm0, %v887_v17  ;;  %v320_v6 = vld [vmem:[#allocation3] sm:$0xff] }
  0x1c   : > { %451 = vrot.lane.b32.xlu2 %v959_v14, %s886_s28 }
  0x24   : > { %449 = vrot.lane.b32.xlu2 %v366_v16, %s886_s28 }
  0x6e   : > { %v340_v24 = vpop.permute.xlu2 %339 }
  0x6f   : > { %v346_v25 = vsel %vm344_vm4, %v340_v24, 0 }
  0x70   : > { %355 = vmatpush.bf16.msra.mxu1 %v346_v25 }
  0x76   : > { %v452_v26 = vpop.permute.xlu2 %451 }
  0x77   : > { %v457_v27 = vsel %vm271_vm0, %v452_v26, 0 }
  0x78   : > { %466 = vmatpush.bf16.xpose.msrb.mxu1 %v457_v27 }
  0x7e   : > { %v450_v37 = vpop.permute.xlu2 %449 }
  0x95   : > { %v299_v9 = vpop.f32.mrf.mxu0 }
  0x96   : > { %v303_v10 = vsel %vm952_vm3, %v299_v9, -1e+10 }
  0x97   : > { %v305_v11 = vsel %vm271_vm0, %v303_v10, -inf }
  0x98   : > { %306 = vmax.xlane.f32.xlu0 %v305_v11 }
  0x9d   : > { %v301_v12 = vpop.f32.mrf.mxu0 }
  0xac   : > { %369 = vrot.lane.b32.xlu0 %v959_v14, %s885_s27 }
 0x10b   : > { %v307_v19 = vpop.xlane.xlu0 %306 }
 0x10c   : > { %v975_v20 = vmax.f32 %v972_v18, %v307_v19 }
 0x10e   : > { %v309_v21 = vsub.f32 %v972_v18, %v975_v20  ;;  %363 = vst.msk [vmem:[#allocation2] sm:$0xff] %vm262_vm2, %v975_v20  ;;  %314 = vperm.xlu1 %831, %v975_v20  }
 0x110   : > { %v310_v62 = vmul.f32 1.442695, %v309_v21 }
 0x116   : > { %367 = vrot.lane.b32.xlu1 %v366_v16, %s885_s27 }
 0x11e   : > { %533 = vrot.lane.b32.xlu1 %v959_v14, %s888_s29  ;;  %v370_v22 = vpop.permute.xlu0 %369 }
 0x11f   : > { %v375_v23 = vsel %vm271_vm0, %v370_v22, 0 }
 0x120   : > { %384 = vmatpush.bf16.xpose.msra.mxu2 %v375_v23 }
 0x126   : > { %531 = vrot.lane.b32.xlu1 %v366_v16, %s888_s29 }
 0x180   : > { %v315_v28 = vpop.permute.xlu1 %314 }
 0x181   : > { %v317_v29 = vsub.f32 %v303_v10, %v315_v28 }
 0x183   : > { %v318_v30 = vmul.f32 1.442695, %v317_v29 }
 0x185   : > { %834 = vpow2.f32 %v318_v30 }
 0x186   : > { %836 = vpow2.f32 %v310_v62 }
 0x188   : > { %v368_v31 = vpop.permute.xlu1 %367 }
 0x189   : > { %786 = vmatmul.msk.bf16.vlgmr.msra.gmra.mxu2 %vm271_vm0, %v368_v31 }
 0x18b   : > { %v835_v32 = vpop.eup %834 }
 0x18c   : > { %v335_v33 = vpack.c.bf16 %v835_v32, %v835_v32  ;;  %v322_v52 = vsel %vm271_vm0, %v835_v32, 0.0  ;;  %v837_v2 = vpop.eup %836  ;;  %v328_v32 = vld [vmem:[#allocation4] sm:$0xff] }
 0x18d   : > { %v321_v7 = vmul.f32 %v837_v2, %v320_v6 }
 0x18e   : > { %785 = vmatmul.msk.bf16.vlgmr.msra.gmra.mxu1 %vm271_vm0, %v335_v33 }
 0x190   : > { %v534_v34 = vpop.permute.xlu1 %533 }
 0x191   : > { %v539_v35 = vsel %vm271_vm0, %v534_v34, 0 }
 0x192   : > { %548 = vmatpush.bf16.xpose.msrb.mxu0 %v539_v35 }
 0x198   : > { %v532_v36 = vpop.permute.xlu1 %531 }
 0x199   : > { %790 = vmatmul.msk.bf16.vlgmr.msrb.gmra.mxu0 %vm271_vm0, %v532_v36 }
 0x19e   : > { %788 = vmatmul.msk.bf16.vlgmr.msrb.gmra.mxu1 %vm271_vm0, %v450_v37 }
 0x20b   : > { %v991_v38 = vpop.f32.mrf.mxu1 }
 0x20c   : > { %v386_v39 = vpop.f32.mrf.mxu2 }
 0x20d   : > { %v390_v40 = vsel %vm952_vm3, %v386_v39, -1e+10 }
 0x20e   : > { %v393_v41 = vsel %vm271_vm0, %v390_v40, -inf }
 0x20f   : > { %394 = vmax.xlane.f32.xlu2 %v393_v41 }
 0x213   : > { %v359_v42 = vpop.f32.mrf.mxu1 }
 0x214   : > { %v388_v43 = vpop.f32.mrf.mxu2 }
 0x216   : > { %v550_v44 = vpop.f32.mrf.mxu0 }
 0x217   : > { %v554_v45 = vsel %vm952_vm3, %v550_v44, -1e+10 }
 0x218   : > { %v557_v46 = vsel %vm271_vm0, %v554_v45, -inf }
 0x219   : > { %558 = vmax.xlane.f32.xlu1 %v557_v46 }
 0x21b   : > { %v468_v47 = vpop.f32.mrf.mxu1 }
 0x21c   : > { %v1001_v48 = vsel %vm952_vm3, %v468_v47, -1e+10  ;;  %v573_v47 = vld [vmem:[#allocation3 + $0x18] sm:$0xff] }
 0x21d   : > { %v475_v49 = vsel %vm271_vm0, %v1001_v48, -inf }
 0x21e   : > { %476 = vmax.xlane.f32.xlu0 %v475_v49  ;;  %v552_v50 = vpop.f32.mrf.mxu0 }
 0x223   : > { %v470_v51 = vpop.f32.mrf.mxu1 }
 0x232   : > { %425 = vrot.lane.b32.xlu0 %v959_v14, %s889_s30 }
 0x23a   : > { %507 = vrot.lane.b32.xlu0 %v959_v14, %s890_s4 }
 0x264   : > { %323 = vadd.xlane.f32.xlu0 %v322_v52 }
 0x282   : > { %v395_v54 = vpop.xlane.xlu2 %394 }
 0x283   : > { %v1011_v55 = vmax.f32 %v1008_v53, %v395_v54 }
 0x285   : > { %v397_v56 = vsub.f32 %v1008_v53, %v1011_v55  ;;  %448 = vst.msk [vmem:[#allocation2 + $0x8] sm:$0xff] %vm262_vm2, %v1011_v55  ;;  %402 = vperm.xlu2 %832, %v1011_v55  }
 0x28c   : > { %v559_v58 = vpop.xlane.xlu1 %558 }
 0x28d   : > { %v560_v59 = vmax.f32 %v556_v57, %v559_v58  ;;  %v581_v58 = vld [vmem:[#allocation4 + $0x18] sm:$0xff] }
 0x28f   : > { %v561_v60 = vsub.f32 %v556_v57, %v560_v59  ;;  %612 = vst.msk [vmem:[#allocation2 + $0x18] sm:$0xff] %vm262_vm2, %v560_v59  ;;  %566 = vperm.xlu2 %832, %v560_v59  }
 0x291   : > { %v477_v63 = vpop.xlane.xlu0 %476  ;;  %v562_v26 = vmul.f32 1.442695, %v561_v60 }
 0x292   : > { %v478_v0 = vmax.f32 %v474_v61, %v477_v63  ;;  %v491_v63 = vld [vmem:[#allocation3 + $0x10] sm:$0xff] }
 0x294   : > { %v479_v1 = vsub.f32 %v474_v61, %v478_v0  ;;  %530 = vst.msk [vmem:[#allocation2 + $0x10] sm:$0xff] %vm262_vm2, %v478_v0  ;;  %484 = vperm.xlu1 %831, %v478_v0  }
 0x296   : > { %v480_v25 = vmul.f32 1.442695, %v479_v1 }
 0x297   : > { %589 = vrot.lane.b32.xlu2 %v959_v14, %s891_s5 }
 0x29c   : > { %331 = vperm.xlu1 %831, %v837_v2  }
 0x2a4   : > { %v426_v3 = vpop.permute.xlu0 %425 }
 0x2a5   : > { %v431_v4 = vsel %vm344_vm4, %v426_v3, 0 }
 0x2a6   : > { %440 = vmatpush.bf16.msra.mxu3 %v431_v4  ;;  %v499_v4 = vld [vmem:[#allocation4 + $0x10] sm:$0xff] }
 0x2ac   : > { %v508_v5 = vpop.permute.xlu0 %507 }
 0x2ad   : > { %v513_v19 = vsel %vm344_vm4, %v508_v5, 0 }
 0x2ae   : > { %522 = vmatpush.bf16.msrb.mxu3 %v513_v19 }
 0x2d7   : > { %v324_v8 = vpop.xlane.xlu0 %323 }
 0x2d8   : > { %v325_v9 = vadd.f32 %v324_v8, %v321_v7 }
 0x2da   : > { %327 = vst.msk [vmem:[#allocation3] sm:$0xff] %vm262_vm2, %v325_v9 }
 0x2df   : > { %v403_v10 = vpop.permute.xlu2 %402 }
 0x2e0   : > { %v405_v11 = vsub.f32 %v390_v40, %v403_v10  ;;  %v398_v40 = vmul.f32 1.442695, %v397_v56  ;;  %v417_v10 = vld [vmem:[#allocation4 + $0x8] sm:$0xff] }
 0x2e1   : > { %v616_v41 = vld [vmem:[#allocation3] sm:$0xff] }
 0x2e2   : > { %v406_v12 = vmul.f32 1.442695, %v405_v11 }
 0x2e4   : > { %838 = vpow2.f32 %v406_v12 }
 0x2e9   : > { %v567_v13 = vpop.permute.xlu2 %566 }
 0x2ea   : > { %v839_v15 = vpop.eup %838  ;;  %v569_v14 = vsub.f32 %v554_v45, %v567_v13 }
 0x2eb   : > { %v411_v16 = vsel %vm271_vm0, %v839_v15, 0.0  ;;  %v424_v17 = vpack.c.bf16 %v839_v15, %v839_v15 }
 0x2ec   : > { %v570_v18 = vmul.f32 1.442695, %v569_v14  ;;  %412 = vadd.xlane.f32.xlu2 %v411_v16 }
 0x2ed   : > { %787 = vmatmul.msk.bf16.vlgmr.msra.gmra.mxu3 %vm271_vm0, %v424_v17 }
 0x2ee   : > { %840 = vpow2.f32 %v570_v18 }
 0x2ef   : > { %842 = vpow2.f32 %v480_v25 }
 0x2f0   : > { %844 = vpow2.f32 %v562_v26 }
 0x2f1   : > { %v590_v20 = vpop.permute.xlu2 %589 }
 0x2f2   : > { %v595_v21 = vsel %vm344_vm4, %v590_v20, 0 }
 0x2f3   : > { %604 = vmatpush.bf16.msrb.mxu2 %v595_v21 }
 0x2f4   : > { %v841_v22 = vpop.eup %840 }
 0x2f5   : > { %v575_v23 = vsel %vm271_vm0, %v841_v22, 0.0  ;;  %v588_v24 = vpack.c.bf16 %v841_v22, %v841_v22  ;;  %v843_v27 = vpop.eup %842 }
 0x2f6   : > { %576 = vadd.xlane.f32.xlu0 %v575_v23  ;;  %v845_v30 = vpop.eup %844  ;;  %v492_v0 = vmul.f32 %v843_v27, %v491_v63 }
 0x2f7   : > { %791 = vmatmul.msk.bf16.vlgmr.msrb.gmra.mxu2 %vm271_vm0, %v588_v24 }
 0x304   : > { %502 = vperm.xlu2 %832, %v843_v27  }
 0x306   : > { %v485_v28 = vpop.permute.xlu1 %484 }
 0x307   : > { %v487_v29 = vsub.f32 %v1001_v48, %v485_v28  ;;  %v574_v48 = vmul.f32 %v845_v30, %v573_v47 }
 0x309   : > { %v488_v31 = vmul.f32 1.442695, %v487_v29 }
 0x30a   : > { %584 = vperm.xlu0 %833, %v845_v30  }
 0x30b   : > { %846 = vpow2.f32 %v488_v31 }
 0x30c   : > { %848 = vpow2.f32 %v398_v40 }
 0x30d   : > { %850 = vrcp.f32 %v616_v41 }
 0x30e   : > { %v332_v33 = vpop.permute.xlu1 %331 }
 0x30f   : > { %v334_v34 = vmul.f32 %v332_v33, %v328_v32 }
 0x311   : > { %v847_v35 = vpop.eup %846  ;;  %v361_v36 = vadd.f32 %v991_v38, %v334_v34  ;;  %v409_v38 = vld [vmem:[#allocation3 + $0x8] sm:$0xff] }
 0x312   : > { %v493_v37 = vsel %vm271_vm0, %v847_v35, 0.0  ;;  %v506_v39 = vpack.c.bf16 %v847_v35, %v847_v35  ;;  %v849_v42 = vpop.eup %848 }
 0x313   : > { %362 = vst.msk [vmem:[#allocation4] sm:$0xff] %vm271_vm0, %v361_v36  ;;  %494 = vadd.xlane.f32.xlu1 %v493_v37  ;;  %v851_v43 = vpop.eup %850  ;;  %v410_v44 = vmul.f32 %v849_v42, %v409_v38 }
 0x314   : > { %789 = vmatmul.msk.bf16.vlgmr.msrb.gmra.mxu3 %vm271_vm0, %v506_v39 }
 0x31a   : > { %v618_v25 = vld [vmem:[#allocation4] sm:$0xff] }
 0x32c   : > { %420 = vperm.xlu1 %831, %v849_v42  }
 0x334   : > { %621 = vperm.xlu1 %831, %v851_v43  }
 0x35f   : > { %v413_v45 = vpop.xlane.xlu2 %412 }
 0x360   : > { %v414_v46 = vadd.f32 %v413_v45, %v410_v44 }
 0x362   : > { %415 = vst.msk [vmem:[#allocation3 + $0x8] sm:$0xff] %vm262_vm2, %v414_v46 }
 0x367   : > { %v503_v5 = vpop.permute.xlu2 %502 }
 0x368   : > { %v505_v6 = vmul.f32 %v503_v5, %v499_v4 }
 0x369   : > { %v577_v49 = vpop.xlane.xlu0 %576  ;;  %v625_v50 = vld [vmem:[#allocation3 + $0x8] sm:$0xff] }
 0x36a   : > { %v578_v51 = vadd.f32 %v577_v49, %v574_v48  ;;  %852 = vrcp.f32 %v625_v50 }
 0x36c   : > { %579 = vst.msk [vmem:[#allocation3 + $0x18] sm:$0xff] %vm262_vm2, %v578_v51 }
 0x370   : > { %v853_v52 = vpop.eup %852  ;;  %v442_v53 = vpop.f32.mrf.mxu3 }
 0x371   : > { %630 = vperm.xlu2 %832, %v853_v52  }
 0x373   : > { %v643_v54 = vld [vmem:[#allocation3 + $0x18] sm:$0xff] }
 0x374   : > { %854 = vrcp.f32 %v643_v54 }
 0x378   : > { %v444_v55 = vpop.f32.mrf.mxu3 }
 0x37a   : > { %v855_v56 = vpop.eup %854  ;;  %v606_v57 = vpop.f32.mrf.mxu2 }
 0x37b   : > { %648 = vperm.xlu1 %831, %v855_v56  }
 0x37c   : > { %v585_v59 = vpop.permute.xlu0 %584 }
 0x37d   : > { %v587_v60 = vmul.f32 %v585_v59, %v581_v58 }
 0x37f   : > { %v610_v61 = vadd.f32 %v606_v57, %v587_v60 }
 0x381   : > { %611 = vst.msk [vmem:[#allocation4 + $0x18] sm:$0xff] %vm271_vm0, %v610_v61 }
 0x382   : > { %v608_v62 = vpop.f32.mrf.mxu2 }
 0x386   : > { %v495_v1 = vpop.xlane.xlu1 %494 }
 0x387   : > { %v496_v2 = vadd.f32 %v495_v1, %v492_v0 }
 0x388   : > { %v645_v19 = vld [vmem:[#allocation4 + $0x18] sm:$0xff] }
 0x389   : > { %497 = vst.msk [vmem:[#allocation3 + $0x10] sm:$0xff] %vm262_vm2, %v496_v2 }
 0x390   : > { %v634_v3 = vld [vmem:[#allocation3 + $0x10] sm:$0xff] }
 0x391   : > { %856 = vrcp.f32 %v634_v3 }
 0x397   : > { %v857_v7 = vpop.eup %856  ;;  %v524_v8 = vpop.f32.mrf.mxu3 }
 0x398   : > { %v528_v9 = vadd.f32 %v524_v8, %v505_v6  ;;  %639 = vperm.xlu2 %832, %v857_v7  }
 0x39a   : > { %529 = vst.msk [vmem:[#allocation4 + $0x10] sm:$0xff] %vm271_vm0, %v528_v9 }
 0x39e   : > { %v421_v11 = vpop.permute.xlu1 %420 }
 0x39f   : > { %v423_v12 = vmul.f32 %v421_v11, %v417_v10  ;;  %v526_v13 = vpop.f32.mrf.mxu3 }
 0x3a1   : > { %v446_v15 = vadd.f32 %v442_v53, %v423_v12  ;;  %v636_v22 = vld [vmem:[#allocation4 + $0x10] sm:$0xff] }
 0x3a3   : > { %447 = vst.msk [vmem:[#allocation4 + $0x8] sm:$0xff] %vm271_vm0, %v446_v15 }
 0x3a6   : > { %v622_v18 = vpop.permute.xlu1 %621 }
 0x3a7   : > { %v624_v27 = vmul.f32 %v622_v18, %v618_v25 }
 0x3aa   : > { %v627_v16 = vld [vmem:[#allocation4 + $0x8] sm:$0xff] }
 0x3cb   : > { %v631_v14 = vpop.permute.xlu2 %630 }
 0x3cc   : > { %v633_v17 = vmul.f32 %v631_v14, %v627_v16 }
 0x3ce   : > { %653 = vrot.lane.b32.xlu2 %v633_v17, %s892_s6 }
 0x3ed   : > { %v649_v20 = vpop.permute.xlu1 %648 }
 0x3ee   : > { %v651_v21 = vmul.f32 %v649_v20, %v645_v19 }
 0x3f0   : > { %661 = vrot.lane.b32.xlu1 %v651_v21, %s893_s7 }
 0x3f2   : > { %v640_v23 = vpop.permute.xlu2 %639 }
 0x3f3   : > { %v642_v24 = vmul.f32 %v640_v23, %v636_v22 }
 0x3f5   : > { %657 = vrot.lane.b32.xlu0 %v642_v24, %s894_s8 }
 0x428   : > { %v654_v26 = vpop.permute.xlu2 %653 }
 0x429   : > { %v664_v28 = vsel %vm271_vm0, %v624_v27, %v654_v26 }
 0x462   : > { %v662_v30 = vpop.permute.xlu1 %661 }
 0x467   : > { %v658_v29 = vpop.permute.xlu0 %657 }
 0x468   : > { %v666_v31 = vsel %vm665_vm5, %v664_v28, %v658_v29 }
 0x469   : > { %v668_v32 = vsel %vm667_vm6, %v666_v31, %v662_v30 }
 0x46a   : > { %v669_v33 = vpack.c.bf16 %v668_v32, %v668_v32 }
 0x46c   : > { %671 = vst.msk [vmem:[%s256_s11] sm:$0xf] %vm670_vm7, %v669_v33 }
 0x46d PF: > { %s13_s14 = sadd.s32 1, %s880_s14   ;;  %s1066_s12 = smov %s876_s13 }
 0x46e   : > { %p10_p5 = scmp.ge.s32.totalorder %s13_s14, 4   ;;  %s1067_s13 = smov %s1069_s15 }
 0x470   :  { %12 = sbr.rel (!%p10_p5) target bundleno = 2 (0x2), region = 85 }

// kernel: transformer_forward.51
= control target key start
LH: loop header
LB: loop body
LE: loop exit
PB: predicated region body
PF: predicated region fallthrough
CT: control target
= control target key end

     0   :  { %vm19_vm0 = vcmask 261120   ;;  %v107_v1 = vmov 0.0   ;;  %vm82_vm1 = vcmask 257024   ;;  %s151_s1 = inlined_call_operand.vmem [shape: bf16[32,32], index: 1, kind: input, shape index: {}]   ;;  %s152_s2 = inlined_call_operand.vmem [shape: f32[1,32], index: 2, kind: input, shape index: {}]   ;;  %s153_s0 = inlined_call_operand.vmem [shape: bf16[16,32], index: 0, kind: input, shape index: {}]   ;;  %s154_s3 = inlined_call_operand.vmem [shape: bf16[16,32], index: 3, kind: output, shape index: {}]  }
   0x1   :  { %v104_v0 = vld [vmem:[%s151_s1 + $0x8] sm:$0xff]  ;;  %20 = vst.msk [vmem:[#allocation2] sm:$0xff] %vm19_vm0, %v107_v1  ;;  %v103_v2 = vld [vmem:[%s151_s1] sm:$0xff] }
   0x2   :  { %21 = vst.msk [vmem:[#allocation2 + $0x8] sm:$0xff] %vm19_vm0, %v107_v1  ;;  %57 = vmatpush.bf16.msra.mxu0 %v104_v0  ;;  %v102_v3 = vld [vmem:[%s153_s0] sm:$0xff] }
   0x3   :  { %v106_v8 = vld [vmem:[%s152_s2] ss:$0 sm:$0xff] }
   0x6   :  { %58 = vmatpush.bf16.msra.mxu0 %v103_v2 }
   0x8   :  { %v22_v4 = vld [vmem:[#allocation2] sm:$0xff] }
   0x9   :  { %101 = vmatmul.msk.bf16.vlgmr.msra.gmra.mxu0 %vm19_vm0, %v102_v3  ;;  %v23_v7 = vld [vmem:[#allocation2 + $0x8] sm:$0xff] }
  0x86   :  { %v60_v5 = vpop.f32.mrf.mxu0 }
  0x87   :  { %v65_v6 = vadd.f32 %v60_v5, %v22_v4 }
  0x89   :  { %67 = vst.msk [vmem:[#allocation2] sm:$0xff] %vm19_vm0, %v65_v6 }
  0x8e   :  { %v62_v9 = vpop.f32.mrf.mxu0 }
  0x8f   :  { %v66_v10 = vadd.f32 %v62_v9, %v23_v7 }
  0x90   :  { %v72_v11 = vld [vmem:[#allocation2] sm:$0xff] }
  0x91   :  { %v78_v12 = vadd.f32 %v106_v8, %v72_v11  ;;  %68 = vst.msk [vmem:[#allocation2 + $0x8] sm:$0xff] %vm19_vm0, %v66_v10 }
  0x93   :  { %v80_v13 = vpack.c.bf16 %v78_v12, %v78_v12 }
  0x95   :  { %83 = vst.msk [vmem:[%s154_s3] sm:$0xf] %vm82_vm1, %v80_v13 }
  0x98   :  { %v73_v14 = vld [vmem:[#allocation2 + $0x8] sm:$0xff] }
  0x99   :  { %v79_v15 = vadd.f32 %v106_v8, %v73_v14 }
  0x9b   :  { %v81_v16 = vpack.c.bf16 %v79_v15, %v79_v15 }
  0x9d   :  { %84 = vst.msk [vmem:[%s154_s3 + $0x4] sm:$0xf] %vm82_vm1, %v81_v16 }

// kernel: transformer_forward.53
= control target key start
LH: loop header
LB: loop body
LE: loop exit
PB: predicated region body
PF: predicated region fallthrough
CT: control target
= control target key end

     0   :  { %10 = vsyncpa [#allocation3], 0  ;;  %s1149_s0 = inlined_call_operand.vmem [shape: bf16[2,8,32], index: 0, kind: input, shape index: {}]   ;;  %s1150_s1 = inlined_call_operand.vmem [shape: bf16[2,8,64], index: 1, kind: input, shape index: {}]   ;;  %s1151_s2 = inlined_call_operand.vmem [shape: f32[2,1,8], index: 2, kind: input, shape index: {}]   ;;  %s1152_s3 = inlined_call_operand.vmem [shape: bf16[2,8,32], index: 3, kind: output, shape index: {0}]   ;;  %s1153_s4 = inlined_call_operand.hbm [shape: bf16[2,4,8,8], index: 4, kind: output, shape index: {1}]  }
   0x1   :  { %12 = vsyncpa [#allocation3 + $0x1], 0  ;;  %s970_s15 = smov 0   ;;  %s972_s16 = smov 0  }
   0x2   :  { %s974_s17 = smov 0   ;;  %s976_s18 = smov 0  }
   0x3   :  { %s978_s19 = smov 0   ;;  %s980_s20 = smov 0  }
   0x4 LB: > { %s742_s21 = sadd.s32 4294967295, %s930_s20   ;;  %s743_s22 = sadd.s32 4294967294, %s930_s20   ;;  %s930_s20 = sphi %s980_s20, %s18_s20   ;;  %s926_s19 = sphi %s978_s19, %s1162_s19   ;;  %s922_s18 = sphi %s976_s18, %s1161_s18   ;;  %s918_s17 = sphi %s974_s17, %s1160_s17   ;;  %s914_s16 = sphi %s972_s16, %s1159_s16   ;;  %s910_s15 = sphi %s970_s15, %s1158_s15  }
   0x5   : > { %s30_s23 = sadd.s32 1, %s926_s19  ;;  %s147_s24 = sadd.s32 1, %s918_s17 }
   0x6   : > { %p32_p0 = scmp.ge.s32.totalorder %s30_s23, 2  ;;  %p157_p1 = scmp.ne.s32.totalorder %s918_s17, %s914_s16 }
   0x7   : > { %p158_p2 = scmp.eq.s32.totalorder %s742_s21, 1  ;;  %p163_p3 = scmp.ne.s32.totalorder %s914_s16, %s910_s15 }
   0x8   : > { %s1164_s23 = smov (%p32_p0, %s30_s23), 0  ;;  %p164_p5 = scmp.eq.s32.totalorder %s743_s22, 1 }
   0x9   : > { %p1010_p4 = por %p158_p2, %p157_p1  ;;  %s142_s26 = ssub.s32 %s926_s19, %s1164_s23 }
   0xa   : > { %p746_p6 = scmp.ge.s32.totalorder %s930_s20, 1  ;;  %p145_p7 = scmp.eq.s32.totalorder %s142_s26, 0 }
   0xb   : > { %p1017_p8 = por %p164_p5, %p163_p3  ;;  %p205_p9 = scmp.lt.s32.totalorder %s930_s20, 3 }
   0xc   : > { %s1023_s28 = scalar_select %p145_p7, %s918_s17, %s147_s24  }
   0xd   : > { %p206_p10 = pnand %p746_p6, %p205_p9 }
   0xe   : > { %p247_p11 = scmp.lt.s32.totalorder (!%p206_p10), %s922_s18, 1  ;;  %s932_s11 = smov (!%p206_p10), 120  }
   0xf   : > { %209 = sbr.rel (%p206_p10) target bundleno = 1110 (0x456), region = 32  ;;  %s934_s21 = smov (!%p206_p10), 96  }
  0x10   : > { %s935_s22 = smov (!%p206_p10), 112   ;;  %s936_s24 = smov (!%p206_p10), 104  }
  0x11   : > { %s244_s26 = sand.u32 (!%p206_p10), 1, %s914_s16   ;;  %s937_s6 = smov (!%p206_p10), 80  }
  0x12   : > { %s939_s8 = smov (!%p206_p10), 88   ;;  %s940_s9 = smov (!%p206_p10), 24  }
  0x14   : > { %s248_s29 = scalar_select %p247_p11, %s922_s18, 1  ;;  %vm276_vm0 = vcmask 64512   ;;  %v933_v8 = vmov 0   ;;  %vm332_vm3 = vcmask 1043456   ;;  %vm322_vm8 = vcmask 60416  }
  0x16   : > { %s1027_s30 = sshll.u32 %s248_s29, 2  ;;  %s260_s14 = scalar_lea.vmem %s1151_s2, %s248_s29 }
  0x17   : > { %s257_s7 = scalar_lea.vmem %s1150_s1, %s1027_s30  ;;  %s253_s10 = scalar_lea.vmem %s1149_s0, %s1027_s30  ;;  %v271_v7 = vld [vmem:[%s260_s14] sm:$0x1] }
  0x18   : > { %v270_v0 = vld [vmem:[%s257_s7] sm:$0xf]  ;;  %vm272_vm1 = vcmp.gt.f32.partialorder %v271_v7, 0.0  ;;  %s747_s29 = sshll.u32 %s244_s26, 4  ;;  %s938_s7 = smov 72  }
  0x19   : > { %v281_v1 = vsel %vm276_vm0, %v270_v0, 0  ;;  %v269_v2 = vld [vmem:[%s253_s10] sm:$0xf]  ;;  %v325_v3 = vunpack.c.l.b16 %v270_v0  ;;  %v273_v9 = vsel %vm272_vm1, 1, %v933_v8  ;;  %s1067_s5 = scalar_lea.vmem [#allocation2], %s747_s29  ;;  %s941_s10 = smov 8  }
  0x1a   : > { %290 = vmatpush.bf16.xpose.msra.mxu0 %v281_v1  ;;  %v350_v5 = vunpack.c.l.b16 %v269_v2  ;;  %v274_v10 = vperm.slane %v273_v9, 0 }
  0x1b   : > { %v1039_v4 = vpack.c.b16 %v325_v3, %v325_v3 }
  0x1c   : > { %v351_v6 = vpack.c.b16 %v350_v5, %v350_v5  ;;  %vm1045_vm2 = vcmp.eq.s32.totalorder %v274_v10, 1 }
  0x1d   : > { %354 = vrot.lane.b32.xlu1 %v1039_v4, %s932_s11  ;;  %327 = vrot.lane.b32.xlu2 %v1039_v4, %s934_s21  ;;  %s612_s21 = sshll.u32 %s1067_s5, 4  ;;  %s613_s21 = int_to_ptr.vmem [resolvable:$true] %s612_s21 }
  0x21   : > { %751 = vmatmul.msk.bf16.vlgmr.msra.gmra.mxu0 %vm276_vm0, %v269_v2 }
  0x25   : > { %352 = vrot.lane.b32.xlu1 %v351_v6, %s932_s11  ;;  %426 = vrot.lane.b32.xlu2 %v1039_v4, %s935_s22  ;;  %s767_s11 = sshll.u32 %s922_s18, 4 }
  0x26   : > { %s611_s14 = scalar_lea.hbm %s1153_s4, %s767_s11 }
  0x2d   : > { %424 = vrot.lane.b32.xlu1 %v351_v6, %s935_s22  ;;  %496 = vrot.lane.b32.xlu2 %v351_v6, %s936_s24  ;;  %s614_s22 = sshll.u32 %s611_s14, 4  ;;  %s615_s22 = int_to_ptr.hbm [resolvable:$true] %s614_s22 }
  0x2e   : > { %s866_s29 = sshra.s32 %s615_s22, 4  ;;  %s867_s29 = int_to_ptr.hbm [resolvable:$true] %s866_s29 }
  0x2f   : > { %p873_p1 = scmp.lt.s32.totalorder %s867_s29, %s1153_s4 }
  0x77   : > { %v328_v24 = vpop.permute.xlu2 %327 }
  0x78   : > { %v334_v25 = vsel %vm332_vm3, %v328_v24, 0 }
  0x79   : > { %343 = vmatpush.bf16.msra.mxu1 %v334_v25 }
  0x7f   : > { %v427_v26 = vpop.permute.xlu2 %426 }
  0x80   : > { %v432_v27 = vsel %vm276_vm0, %v427_v26, 0 }
  0x81   : > { %441 = vmatpush.bf16.xpose.msrb.mxu1 %v432_v27 }
  0x87   : > { %v497_v47 = vpop.permute.xlu2 %496 }
  0x8f   : > { %v355_v16 = vpop.permute.xlu1 %354 }
  0x90   : > { %v360_v17 = vsel %vm276_vm0, %v355_v16, 0 }
  0x91   : > { %369 = vmatpush.bf16.xpose.msra.mxu2 %v360_v17 }
  0x97   : > { %v353_v20 = vpop.permute.xlu1 %352 }
  0x98   : > { %753 = vmatmul.msk.bf16.vlgmr.msra.gmra.mxu2 %vm276_vm0, %v353_v20 }
  0x9e   : > { %v292_v12 = vpop.f32.mrf.mxu0 }
  0x9f   : > { %v296_v13 = vsel %vm1045_vm2, %v292_v12, -1e+10  ;;  %v425_v48 = vpop.permute.xlu1 %424 }
  0xa0   : > { %v297_v14 = vsel %vm276_vm0, %v296_v13, -inf }
  0xa1   : > { %298 = vmax.xlane.f32.xlu0 %v297_v14 }
  0xa6   : > { %v294_v15 = vpop.f32.mrf.mxu0 }
 0x114   : > { %v299_v18 = vpop.xlane.xlu0 %298 }
 0x115   : > { %v300_v19 = vsub.f32 %v296_v13, %v299_v18 }
 0x117   : > { %v301_v21 = vmul.f32 1.442695, %v300_v19 }
 0x119   : > { %836 = vpow2.f32 %v301_v21 }
 0x11b   : > { %v371_v29 = vpop.f32.mrf.mxu2 }
 0x11c   : > { %v375_v31 = vsel %vm1045_vm2, %v371_v29, -1e+10 }
 0x11d   : > { %v376_v33 = vsel %vm276_vm0, %v375_v31, -inf }
 0x11e   : > { %377 = vmax.xlane.f32.xlu1 %v376_v33 }
 0x11f   : > { %v837_v22 = vpop.eup %836 }
 0x120   : > { %v303_v23 = vsel %vm276_vm0, %v837_v22, 0.0 }
 0x121   : > { %304 = vadd.xlane.f32.xlu0 %v303_v23 }
 0x123   : > { %v373_v39 = vpop.f32.mrf.mxu2 }
 0x135   : > { %498 = vrot.lane.b32.xlu0 %v1039_v4, %s936_s24  ;;  %s596_s24 = scalar_lea.sflag [#allocation3], %s244_s26 }
 0x191   : > { %v378_v50 = vpop.xlane.xlu1 %377 }
 0x192   : > { %v379_v53 = vsub.f32 %v375_v31, %v378_v50 }
 0x194   : > { %v305_v28 = vpop.xlane.xlu0 %304  ;;  %v380_v56 = vmul.f32 1.442695, %v379_v53 }
 0x195   : > { %838 = vrcp.f32 %v305_v28  ;;  %v317_v35 = vand.u32 2147483648, %v305_v28  ;;  %v315_v37 = vand.u32 2147483647, %v305_v28  ;;  %vm311_vm5 = vweird.f32 %v305_v28 }
 0x196   : > { %840 = vpow2.f32 %v380_v56 }
 0x197   : > { %v318_v40 = vor.u32 1.1754944e-38, %v317_v35  ;;  %vm316_vm7 = vcmp.eq.f32.partialorder %v315_v37, 8.507059e+37 }
 0x19b   : > { %v839_v30 = vpop.eup %838 }
 0x19c   : > { %v307_v32 = vmul.f32 %v839_v30, %v305_v28  ;;  %vm312_vm4 = vweird.f32 %v839_v30  ;;  %v841_v61 = vpop.eup %840 }
 0x19d   : > { %vm313_vm6 = vmor %vm311_vm5, %vm312_vm4  ;;  %v382_v63 = vsel %vm276_vm0, %v841_v61, 0.0 }
 0x19e   : > { %v308_v34 = vsub.f32 1.0, %v307_v32 }
 0x1a0   : > { %v309_v36 = vmul.f32 %v839_v30, %v308_v34 }
 0x1a2   : > { %v310_v38 = vadd.f32 %v839_v30, %v309_v36 }
 0x1a4   : > { %v314_v41 = vsel %vm313_vm6, %v839_v30, %v310_v38 }
 0x1a5   : > { %v319_v42 = vsel %vm316_vm7, %v318_v40, %v314_v41 }
 0x1a6   : > { %v320_v43 = vmul.f32 %v837_v22, %v319_v42 }
 0x1a7   : > { %v499_v44 = vpop.permute.xlu0 %498 }
 0x1a8   : > { %v504_v45 = vsel %vm276_vm0, %v499_v44, 0  ;;  %v321_v46 = vpack.c.bf16 %v320_v43, %v320_v43 }
 0x1a9   : > { %513 = vmatpush.bf16.xpose.msrb.mxu0 %v504_v45 }
 0x1aa   : > { %323 = vst.msk [vmem:[%s1067_s5] sm:$0xf] %vm322_vm8, %v321_v46  ;;  %752 = vmatmul.msk.bf16.vlgmr.msra.gmra.mxu1 %vm276_vm0, %v321_v46 }
 0x1b0   : > { %759 = vmatmul.msk.bf16.vlgmr.msrb.gmra.mxu0 %vm276_vm0, %v497_v47 }
 0x1ba   : > { %756 = vmatmul.msk.bf16.vlgmr.msrb.gmra.mxu1 %vm276_vm0, %v425_v48 }
 0x227   : > { %v1074_v49 = vpop.f32.mrf.mxu1 }
 0x22d   : > { %v515_v51 = vpop.f32.mrf.mxu0 }
 0x22e   : > { %v519_v52 = vsel %vm1045_vm2, %v515_v51, -1e+10 }
 0x22f   : > { %v347_v54 = vpop.f32.mrf.mxu1  ;;  %v520_v55 = vsel %vm276_vm0, %v519_v52, -inf }
 0x230   : > { %521 = vmax.xlane.f32.xlu0 %v520_v55 }
 0x235   : > { %v517_v57 = vpop.f32.mrf.mxu0 }
 0x237   : > { %v443_v58 = vpop.f32.mrf.mxu1 }
 0x238   : > { %v447_v59 = vsel %vm1045_vm2, %v443_v58, -1e+10 }
 0x239   : > { %v448_v60 = vsel %vm276_vm0, %v447_v59, -inf }
 0x23a   : > { %449 = vmax.xlane.f32.xlu2 %v448_v60 }
 0x23f   : > { %v445_v62 = vpop.f32.mrf.mxu1 }
 0x242   : > { %383 = vadd.xlane.f32.xlu2 %v382_v63 }
 0x244   : > { %475 = vrot.lane.b32.xlu0 %v1039_v4, %s937_s6  ;;  %s868_s6 = scalar_lea.hbm %s867_s29, 16 }
 0x245   : > { %p869_p12 = scmp.ne.s32.totalorder %s867_s29, %s868_s6 }
 0x247   : > { %p870_p13 = pnand %p869_p12, %p1010_p4 }
 0x249   : > { %p871_p0 = pneg %p870_p13 }
 0x2a3   : > { %v522_v0 = vpop.xlane.xlu0 %521 }
 0x2a4   : > { %v523_v1 = vsub.f32 %v519_v52, %v522_v0 }
 0x2a6   : > { %v524_v2 = vmul.f32 1.442695, %v523_v1 }
 0x2a8   : > { %842 = vpow2.f32 %v524_v2 }
 0x2ad   : > { %v450_v3 = vpop.xlane.xlu2 %449 }
 0x2ae   : > { %v843_v5 = vpop.eup %842  ;;  %v451_v6 = vsub.f32 %v447_v59, %v450_v3 }
 0x2af   : > { %v526_v7 = vsel %vm276_vm0, %v843_v5, 0.0 }
 0x2b0   : > { %v452_v8 = vmul.f32 1.442695, %v451_v6  ;;  %527 = vadd.xlane.f32.xlu2 %v526_v7 }
 0x2b2   : > { %844 = vpow2.f32 %v452_v8 }
 0x2b5   : > { %v384_v9 = vpop.xlane.xlu2 %383 }
 0x2b6   : > { %846 = vrcp.f32 %v384_v9  ;;  %v396_v15 = vand.u32 2147483648, %v384_v9  ;;  %v394_v17 = vand.u32 2147483647, %v384_v9  ;;  %vm390_vm10 = vweird.f32 %v384_v9  ;;  %v476_v52 = vpop.permute.xlu0 %475 }
 0x2b7   : > { %v481_v54 = vsel %vm332_vm3, %v476_v52, 0 }
 0x2b8   : > { %v1085_v10 = vpop.eup %844  ;;  %v397_v19 = vor.u32 1.1754944e-38, %v396_v15  ;;  %vm395_vm12 = vcmp.eq.f32.partialorder %v394_v17, 8.507059e+37 }
 0x2b9   : > { %v454_v11 = vsel %vm276_vm0, %v1085_v10, 0.0 }
 0x2ba   : > { %455 = vadd.xlane.f32.xlu1 %v454_v11 }
 0x2bc   : > { %v847_v12 = vpop.eup %846 }
 0x2bd   : > { %v386_v13 = vmul.f32 %v847_v12, %v384_v9  ;;  %vm391_vm9 = vweird.f32 %v847_v12 }
 0x2be   : > { %vm392_vm11 = vmor %vm390_vm10, %vm391_vm9 }
 0x2bf   : > { %v387_v14 = vsub.f32 1.0, %v386_v13 }
 0x2c1   : > { %v388_v16 = vmul.f32 %v847_v12, %v387_v14 }
 0x2c3   : > { %v389_v18 = vadd.f32 %v847_v12, %v388_v16 }
 0x2c5   : > { %v393_v20 = vsel %vm392_vm11, %v847_v12, %v389_v18 }
 0x2c6   : > { %v398_v21 = vsel %vm395_vm12, %v397_v19, %v393_v20 }
 0x2c7   : > { %v399_v22 = vmul.f32 %v841_v61, %v398_v21 }
 0x2c8   : > { %547 = vrot.lane.b32.xlu2 %v1039_v4, %s938_s7 }
 0x2c9   : > { %v400_v23 = vpack.c.bf16 %v399_v22, %v399_v22 }
 0x2cb   : > { %754 = vst.msk [vmem:[%s1067_s5 + $0x4] sm:$0xf] %vm322_vm8, %v400_v23 }
 0x2d3   : > { %403 = vrot.lane.b32.xlu1 %v1039_v4, %s939_s8  ;;  %s872_s8 = scalar_lea.hbm %s1153_s4, 32 }
 0x2d4   : > { %p874_p2 = scmp.lt.s32.totalorder %s872_s8, %s868_s6 }
 0x2d6   : > { %p875_p3 = por %p874_p2, %p873_p1 }
 0x2d8   : > { %p876_p5 = pnand %p875_p3, %p871_p0 }
 0x323   : > { %v528_v24 = vpop.xlane.xlu2 %527 }
 0x324   : > { %848 = vrcp.f32 %v528_v24  ;;  %v540_v31 = vand.u32 2147483648, %v528_v24  ;;  %v538_v33 = vand.u32 2147483647, %v528_v24  ;;  %vm534_vm14 = vweird.f32 %v528_v24 }
 0x326   : > { %v541_v4 = vor.u32 1.1754944e-38, %v540_v31  ;;  %vm539_vm1 = vcmp.eq.f32.partialorder %v538_v33, 8.507059e+37 }
 0x32a   : > { %v849_v25 = vpop.eup %848 }
 0x32b   : > { %v530_v26 = vmul.f32 %v849_v25, %v528_v24  ;;  %v548_v27 = vpop.permute.xlu2 %547  ;;  %vm535_vm13 = vweird.f32 %v849_v25 }
 0x32c   : > { %v553_v28 = vsel %vm332_vm3, %v548_v27, 0  ;;  %vm536_vm15 = vmor %vm534_vm14, %vm535_vm13 }
 0x32d   : > { %v531_v29 = vsub.f32 1.0, %v530_v26  ;;  %v456_v30 = vpop.xlane.xlu1 %455  ;;  %562 = vmatpush.bf16.msrb.mxu2 %v553_v28 }
 0x32e   : > { %850 = vrcp.f32 %v456_v30  ;;  %v468_v42 = vand.u32 2147483648, %v456_v30  ;;  %v466_v44 = vand.u32 2147483647, %v456_v30  ;;  %vm462_vm4 = vweird.f32 %v456_v30 }
 0x32f   : > { %v532_v32 = vmul.f32 %v849_v25, %v531_v29 }
 0x330   : > { %v469_v46 = vor.u32 1.1754944e-38, %v468_v42  ;;  %vm467_vm6 = vcmp.eq.f32.partialorder %v466_v44, 8.507059e+37 }
 0x331   : > { %v533_v34 = vadd.f32 %v849_v25, %v532_v32 }
 0x333   : > { %v537_v35 = vsel %vm536_vm15, %v849_v25, %v533_v34 }
 0x334   : > { %v851_v36 = vpop.eup %850  ;;  %v542_v37 = vsel %vm539_vm1, %v541_v4, %v537_v35 }
 0x335   : > { %v458_v38 = vmul.f32 %v851_v36, %v456_v30  ;;  %v543_v39 = vmul.f32 %v843_v5, %v542_v37  ;;  %vm463_vm2 = vweird.f32 %v851_v36 }
 0x336   : > { %vm464_vm5 = vmor %vm462_vm4, %vm463_vm2 }
 0x337   : > { %v459_v40 = vsub.f32 1.0, %v458_v38  ;;  %v544_v41 = vpack.c.bf16 %v543_v39, %v543_v39 }
 0x339   : > { %v460_v43 = vmul.f32 %v851_v36, %v459_v40  ;;  %760 = vst.msk [vmem:[%s1067_s5 + $0xc] sm:$0xf] %vm322_vm8, %v544_v41  ;;  %761 = vmatmul.msk.bf16.vlgmr.msrb.gmra.mxu2 %vm276_vm0, %v544_v41 }
 0x33b   : > { %v461_v45 = vadd.f32 %v851_v36, %v460_v43 }
 0x33d   : > { %v465_v47 = vsel %vm464_vm5, %v851_v36, %v461_v45 }
 0x33e   : > { %v470_v48 = vsel %vm467_vm6, %v469_v46, %v465_v47 }
 0x33f   : > { %v471_v50 = vmul.f32 %v1085_v10, %v470_v48 }
 0x341   : > { %v472_v51 = vpack.c.bf16 %v471_v50, %v471_v50 }
 0x343   : > { %757 = vst.msk [vmem:[%s1067_s5 + $0x8] sm:$0xf] %vm322_vm8, %v472_v51 }
 0x345   : > { %v404_v53 = vpop.permute.xlu1 %403 }
 0x346   : > { %v409_v55 = vsel %vm332_vm3, %v404_v53, 0 }
 0x347   : > { %418 = vmatpush.bf16.msra.mxu3 %v409_v55 }
 0x34a   : > { %755 = vmatmul.msk.bf16.vlgmr.msra.gmra.mxu3 %vm276_vm0, %v400_v23 }
 0x34b   : > { %490 = vmatpush.bf16.msrb.mxu3 %v481_v54 }
 0x35a   : > { %758 = vmatmul.msk.bf16.vlgmr.msrb.gmra.mxu3 %vm276_vm0, %v472_v51 }
 0x3bc   : > { %v564_v56 = vpop.f32.mrf.mxu2 }
 0x3bd   : > { %577 = vrot.lane.b32.xlu2 %v564_v56, %s940_s9 }
 0x3c4   : > { %v566_v57 = vpop.f32.mrf.mxu2 }
 0x3cd   : > { %v420_v58 = vpop.f32.mrf.mxu3 }
 0x3ce   : > { %569 = vrot.lane.b32.xlu0 %v420_v58, %s941_s10 }
 0x3d5   : > { %v422_v59 = vpop.f32.mrf.mxu3 }
 0x3d6   : > { %879 = shalt.err (!%p876_p5)
}
 0x3d7   : > { %s942_s26 = smov 64   ;;  %s943_s5 = smov 4   ;;  %vm581_vm3 = vcmask 130048   ;;  %vm583_vm7 = vcmask 195584   ;;  %vm586_vm8 = vcmask 257024  }
 0x3d8   : > { %768 = dma.vmem_to_hbm [thread:$0]  (%p1010_p4), %s613_s21, 256, %s615_s22, %s596_s24, %s942_s26, %s942_s26, %s943_s5  }
 0x3d9   : > { %s944_s11 = smov 16   ;;  %s267_s14 = scalar_lea.vmem %s1152_s3, %s1027_s30 }
 0x3dd   : > { %v492_v60 = vpop.f32.mrf.mxu3 }
 0x3de   : > { %573 = vrot.lane.b32.xlu1 %v492_v60, %s944_s11 }
 0x3e5   : > { %v494_v61 = vpop.f32.mrf.mxu3 }
 0x417   : > { %v578_v1 = vpop.permute.xlu2 %577 }
 0x440   : > { %v570_v62 = vpop.permute.xlu0 %569 }
 0x441   : > { %v580_v63 = vsel %vm276_vm0, %v1074_v49, %v570_v62 }
 0x450   : > { %v574_v0 = vpop.permute.xlu1 %573 }
 0x451   : > { %v582_v2 = vsel %vm581_vm3, %v580_v63, %v574_v0 }
 0x452   : > { %v584_v3 = vsel %vm583_vm7, %v582_v2, %v578_v1 }
 0x453   : > { %v585_v5 = vpack.c.bf16 %v584_v3, %v584_v3 }
 0x455   : > { %587 = vst.msk [vmem:[%s267_s14] sm:$0xf] %vm586_vm8, %v585_v5 }
 0x456 PF: > { %p774_p4 = scmp.ge.s32.totalorder %s930_s20, 2  ;;  %s639_s25 = sand.u32 1, %s910_s15  }
 0x457   : > { %s640_s21 = scalar_lea.sflag [#allocation3], %s639_s25 }
 0x458   : > { %p771_p6 = pnand %p774_p4, %p1017_p8 }
 0x45a   : > { %p772_p7 = pneg %p771_p6 }
 0x45c   : > { %905 = dma.done.wait (%p772_p7), %s640_s21, 256  }
 0x45d   : > { %907 = vsyncadd (%p772_p7), %s640_s21, 4294967040  ;;  %s18_s20 = sadd.s32 1, %s930_s20   ;;  %s1158_s15 = smov %s914_s16 }
 0x45e   : > { %p15_p9 = scmp.ge.s32.totalorder %s18_s20, 4   ;;  %s1159_s16 = smov %s918_s17 }
 0x45f   : > { %s1160_s17 = smov %s1023_s28  ;;  %s1161_s18 = smov %s926_s19 }
 0x460   : > { %s1162_s19 = smov %s1164_s23  ;;  %17 = sbr.rel (!%p15_p9) target bundleno = 4 (0x4), region = 88 }
 0x465   :  { %646 = vsyncpa [#allocation3], 1 }
 0x466   :  { %648 = vsyncpa [#allocation3 + $0x1], 1 }

// kernel: transformer_forward.54
= control target key start
LH: loop header
LB: loop body
LE: loop exit
PB: predicated region body
PF: predicated region fallthrough
CT: control target
= control target key end

     0   :  { %11 = vsyncpa [#allocation4], 0  ;;  %s240_s24 = smov [#allocation3]   ;;  %s314_s0 = inlined_call_operand.vmem [shape: bf16[16,32], index: 0, kind: input, shape index: {}]   ;;  %s315_s1 = inlined_call_operand.vmem [shape: bf16[32,32], index: 1, kind: input, shape index: {}]   ;;  %s316_s2 = inlined_call_operand.vmem [shape: f32[1,32], index: 2, kind: input, shape index: {}]   ;;  %s317_s3 = inlined_call_operand.vmem [shape: bf16[16,32], index: 3, kind: input, shape index: {}]   ;;  %s318_s4 = inlined_call_operand.vmem [shape: f32[1,32], index: 4, kind: input, shape index: {}]   ;;  %s319_s5 = inlined_call_operand.hbm [shape: f32[1,32], index: 5, kind: input, shape index: {}]   ;;  %s320_s6 = inlined_call_operand.vmem [shape: bf16[16,32], index: 6, kind: output, shape index: {}]  }
   0x1   :  { %s27_s23 = sshll.u32 %s319_s5, 4  ;;  %s29_s25 = sshll.u32 %s240_s24, 4  ;;  %s28_s23 = int_to_ptr.hbm [resolvable:$true] %s27_s23  ;;  %s30_s25 = int_to_ptr.vmem [resolvable:$true] %s29_s25 }
   0x2   :  { %32 = dma.hbm_to_vmem [thread:$0]  %s28_s23, 16, %s30_s25, [#allocation4]  }
   0x3   :  { %238 = dma.done.wait [#allocation4], 16  }
   0x4   :  { %239 = vsyncadd [#allocation4], 4294967280  ;;  %vm42_vm0 = vcmask 261120   ;;  %v241_v0 = vmov 0.0   ;;  %v197_v1 = vld [vmem:[%s315_s1 + $0x8] sm:$0xff]  ;;  %v196_v2 = vld [vmem:[%s315_s1] sm:$0xff] }
   0x5   :  { %43 = vst.msk [vmem:[#allocation2] sm:$0xff] %vm42_vm0, %v241_v0  ;;  %80 = vmatpush.bf16.msra.mxu0 %v197_v1  ;;  %v195_v3 = vld [vmem:[%s314_s0] sm:$0xff]  ;;  %v242_v22 = vmov 32.0   ;;  %v207_v56 = vld [vmem:[#allocation3] ss:$0 sm:$0xff]  ;;  %vm174_vm6 = vcmask 257024  }
   0x6   :  { %44 = vst.msk [vmem:[#allocation2 + $0x8] sm:$0xff] %vm42_vm0, %v241_v0  ;;  %v199_v8 = vld [vmem:[%s317_s3] sm:$0xff]   ;;  %208 = vrcp.f32 %v242_v22 }
   0x7   :  { %v205_v9 = vld [vmem:[%s316_s2] ss:$0 sm:$0xff]  ;;  %v200_v12 = vunpack.c.l.bf16 %v199_v8  ;;  %v201_v17 = vunpack.c.h.bf16 %v199_v8 }
   0x8   :  { %v206_v53 = vld [vmem:[%s318_s4] ss:$0 sm:$0xff] }
   0x9   :  { %81 = vmatpush.bf16.msra.mxu0 %v196_v2 }
   0xc   :  { %194 = vmatmul.msk.bf16.vlgmr.msra.gmra.mxu0 %vm42_vm0, %v195_v3  ;;  %v45_v4 = vld [vmem:[#allocation2] sm:$0xff]  ;;  %v209_v23 = vpop.eup %208 }
   0xd   :  { %v46_v7 = vld [vmem:[#allocation2 + $0x8] sm:$0xff]  ;;  %v116_v24 = vmul.f32 32.0, %v209_v23  ;;  %vm120_vm1 = vweird.f32 %v209_v23 }
   0xf   :  { %v117_v25 = vsub.f32 1.0, %v116_v24 }
  0x11   :  { %v118_v26 = vmul.f32 %v209_v23, %v117_v25 }
  0x13   :  { %v119_v27 = vadd.f32 %v209_v23, %v118_v26 }
  0x15   :  { %v121_v28 = vsel %vm120_vm1, %v209_v23, %v119_v27 }
  0x89   :  { %v83_v5 = vpop.f32.mrf.mxu0 }
  0x8a   :  { %v88_v6 = vadd.f32 %v83_v5, %v45_v4 }
  0x8c   :  { %90 = vst.msk [vmem:[#allocation2] sm:$0xff] %vm42_vm0, %v88_v6 }
  0x91   :  { %v85_v10 = vpop.f32.mrf.mxu0 }
  0x92   :  { %v89_v11 = vadd.f32 %v85_v10, %v46_v7 }
  0x93   :  { %v95_v13 = vld [vmem:[#allocation2] sm:$0xff] }
  0x94   :  { %91 = vst.msk [vmem:[#allocation2 + $0x8] sm:$0xff] %vm42_vm0, %v89_v11  ;;  %v101_v14 = vadd.f32 %v205_v9, %v95_v13 }
  0x96   :  { %v107_v15 = vadd.f32 %v200_v12, %v101_v14 }
  0x98   :  { %v109_v16 = vsel %vm42_vm0, %v107_v15, 0.0 }
  0x99   :  { %110 = vadd.xlane.f32.xlu0 %v109_v16 }
  0x9b   :  { %v96_v18 = vld [vmem:[#allocation2 + $0x8] sm:$0xff] }
  0x9c   :  { %v102_v19 = vadd.f32 %v205_v9, %v96_v18 }
  0x9e   :  { %v108_v20 = vadd.f32 %v201_v17, %v102_v19 }
  0xa0   :  { %v112_v21 = vsel %vm42_vm0, %v108_v20, 0.0 }
  0xa1   :  { %113 = vadd.xlane.f32.xlu0 %v112_v21 }
 0x10c   :  { %v111_v29 = vpop.xlane.xlu0 %110 }
 0x10d   :  { %v122_v30 = vmul.f32 %v121_v28, %v111_v29 }
 0x10f   :  { %v124_v31 = vsub.f32 %v107_v15, %v122_v30 }
 0x111   :  { %v126_v32 = vmul.f32 %v124_v31, %v124_v31 }
 0x113   :  { %v128_v33 = vsel %vm42_vm0, %v126_v32, 0.0 }
 0x114   :  { %129 = vadd.xlane.f32.xlu1 %v128_v33  ;;  %v114_v34 = vpop.xlane.xlu0 %113 }
 0x115   :  { %v123_v35 = vmul.f32 %v121_v28, %v114_v34 }
 0x117   :  { %v125_v36 = vsub.f32 %v108_v20, %v123_v35 }
 0x119   :  { %v127_v37 = vmul.f32 %v125_v36, %v125_v36 }
 0x11b   :  { %v131_v38 = vsel %vm42_vm0, %v127_v37, 0.0 }
 0x11c   :  { %132 = vadd.xlane.f32.xlu1 %v131_v38 }
 0x187   :  { %v130_v39 = vpop.xlane.xlu1 %129 }
 0x188   :  { %v134_v40 = vmul.f32 %v130_v39, %v121_v28 }
 0x18a   :  { %v136_v41 = vadd.f32 1e-05, %v134_v40 }
 0x18c   :  { %210 = vrsqrt.f32 %v136_v41  ;;  %vm144_vm3 = vweird.f32 %v136_v41 }
 0x18f   :  { %v133_v42 = vpop.xlane.xlu1 %132 }
 0x190   :  { %v135_v43 = vmul.f32 %v133_v42, %v121_v28 }
 0x192   :  { %v211_v44 = vpop.eup %210  ;;  %v137_v45 = vadd.f32 1e-05, %v135_v43 }
 0x193   :  { %v139_v46 = vmul.f32 %v211_v44, %v136_v41  ;;  %vm145_vm2 = vweird.f32 %v211_v44 }
 0x194   :  { %212 = vrsqrt.f32 %v137_v45  ;;  %vm146_vm4 = vmor %vm144_vm3, %vm145_vm2  ;;  %vm154_vm7 = vweird.f32 %v137_v45 }
 0x195   :  { %v140_v47 = vmul.f32 %v211_v44, %v139_v46 }
 0x197   :  { %v141_v48 = vmul.f32 0.5, %v140_v47 }
 0x199   :  { %v142_v49 = vsub.f32 1.5, %v141_v48 }
 0x19a   :  { %v213_v50 = vpop.eup %212 }
 0x19b   :  { %v143_v51 = vmul.f32 %v211_v44, %v142_v49  ;;  %v149_v52 = vmul.f32 %v213_v50, %v137_v45  ;;  %vm155_vm5 = vweird.f32 %v213_v50 }
 0x19c   :  { %vm156_vm8 = vmor %vm154_vm7, %vm155_vm5 }
 0x19d   :  { %v147_v54 = vsel %vm146_vm4, %v211_v44, %v143_v51  ;;  %v150_v55 = vmul.f32 %v213_v50, %v149_v52 }
 0x19e   :  { %v158_v57 = vmul.f32 %v147_v54, %v124_v31 }
 0x19f   :  { %v151_v58 = vmul.f32 0.5, %v150_v55 }
 0x1a0   :  { %v164_v59 = vmul.f32 %v206_v53, %v158_v57 }
 0x1a1   :  { %v152_v60 = vsub.f32 1.5, %v151_v58 }
 0x1a2   :  { %v170_v61 = vadd.f32 %v207_v56, %v164_v59 }
 0x1a3   :  { %v153_v62 = vmul.f32 %v213_v50, %v152_v60 }
 0x1a4   :  { %v172_v63 = vpack.c.bf16 %v170_v61, %v170_v61 }
 0x1a5   :  { %v157_v0 = vsel %vm156_vm8, %v213_v50, %v153_v62 }
 0x1a6   :  { %175 = vst.msk [vmem:[%s320_s6] sm:$0xf] %vm174_vm6, %v172_v63  ;;  %v159_v1 = vmul.f32 %v157_v0, %v125_v36 }
 0x1a8   :  { %v165_v2 = vmul.f32 %v206_v53, %v159_v1 }
 0x1aa   :  { %v171_v3 = vadd.f32 %v207_v56, %v165_v2 }
 0x1ac   :  { %v173_v4 = vpack.c.bf16 %v171_v3, %v171_v3 }
 0x1ae   :  { %176 = vst.msk [vmem:[%s320_s6 + $0x4] sm:$0xf] %vm174_vm6, %v173_v4 }
 0x1af   :  { %181 = vsyncpa [#allocation4], 1 }

// kernel: transformer_forward.57
= control target key start
LH: loop header
LB: loop body
LE: loop exit
PB: predicated region body
PF: predicated region fallthrough
CT: control target
= control target key end

     0   :  { %vm20_vm0 = vcmask 130048   ;;  %v149_v1 = vmov 0.0   ;;  %s194_s0 = inlined_call_operand.vmem [shape: bf16[16,32], index: 0, kind: input, shape index: {}]   ;;  %s195_s1 = inlined_call_operand.vmem [shape: bf16[32,16], index: 1, kind: input, shape index: {}]   ;;  %s196_s2 = inlined_call_operand.vmem [shape: f32[1,16], index: 2, kind: input, shape index: {}]   ;;  %s197_s3 = inlined_call_operand.hbm [shape: f32[16,16], index: 3, kind: output, shape index: {}]  }
   0x1   :  { %v117_v0 = vld [vmem:[%s195_s1 + $0x8] sm:$0xff]  ;;  %21 = vst.msk [vmem:[#allocation2] sm:$0xff] %vm20_vm0, %v149_v1 }
   0x2   :  { %8 = vsyncpa [#allocation4], 0  ;;  %58 = vmatpush.bf16.msra.mxu0 %v117_v0  ;;  %v116_v2 = vld [vmem:[%s195_s1] sm:$0xff]  ;;  %22 = vst.msk [vmem:[#allocation2 + $0x8] sm:$0xff] %vm20_vm0, %v149_v1  ;;  %vm48_vm1 = vcmask 261120   ;;  %s90_s22 = sshll.u32 %s197_s3, 4  ;;  %s91_s22 = int_to_ptr.hbm [resolvable:$true] %s90_s22 }
   0x3   :  { %v115_v3 = vld [vmem:[%s194_s0] sm:$0xff]  ;;  %s150_s0 = smov [#allocation3]   ;;  %s152_s23 = smov 8  }
   0x4   :  { %v122_v8 = vld [vmem:[%s196_s2] ss:$0 sm:$0xff]  ;;  %s88_s1 = sshll.u32 %s150_s0, 4  ;;  %s151_s2 = smov 128   ;;  %s89_s1 = int_to_ptr.vmem [resolvable:$true] %s88_s1 }
   0x6   :  { %59 = vmatpush.bf16.msra.mxu0 %v116_v2 }
   0x8   :  { %v23_v4 = vld [vmem:[#allocation2] sm:$0xff] }
   0x9   :  { %114 = vmatmul.msk.bf16.vlgmr.msra.gmra.mxu0 %vm48_vm1, %v115_v3  ;;  %v24_v7 = vld [vmem:[#allocation2 + $0x8] sm:$0xff] }
  0x86   :  { %v61_v5 = vpop.f32.mrf.mxu0 }
  0x87   :  { %v66_v6 = vadd.f32 %v61_v5, %v23_v4 }
  0x89   :  { %69 = vst.msk [vmem:[#allocation2] sm:$0xff] %vm20_vm0, %v66_v6 }
  0x8e   :  { %v63_v9 = vpop.f32.mrf.mxu0 }
  0x8f   :  { %v67_v10 = vadd.f32 %v63_v9, %v24_v7 }
  0x90   :  { %v74_v11 = vld [vmem:[#allocation2] sm:$0xff] }
  0x91   :  { %70 = vst.msk [vmem:[#allocation2 + $0x8] sm:$0xff] %vm20_vm0, %v67_v10  ;;  %v80_v12 = vadd.f32 %v122_v8, %v74_v11 }
  0x93   :  { %82 = vst.msk [vmem:[#allocation3] sm:$0xff] %vm20_vm0, %v80_v12 }
  0x98   :  { %v75_v13 = vld [vmem:[#allocation2 + $0x8] sm:$0xff] }
  0x99   :  { %v81_v14 = vadd.f32 %v122_v8, %v75_v13 }
  0x9b   :  { %83 = vst.msk [vmem:[#allocation3 + $0x8] sm:$0xff] %vm20_vm0, %v81_v14 }
  0x9c   :  { %96 = dma.vmem_to_hbm [thread:$0]  %s89_s1, 256, %s91_s22, [#allocation4], %s151_s2, %s151_s2, %s152_s23  }
  0x9d   :  { %147 = dma.done.wait [#allocation4], 256  }
  0x9e   :  { %148 = vsyncadd [#allocation4], 4294967040 }
  0x9f   :  { %101 = vsyncpa [#allocation4], 1 }

</bundles_post_ra>
